<compile_context>
chip_gen: v5e
topology: v5e:2x2
jax: 0.10.0
libtpu: 0.0.40
codegen_flags: <defaults>
</compile_context>

<pallas_src>
import functools

import numpy as np
import jax
import jax.numpy as jnp
from jax import lax
from jax.experimental import pallas as pl
from jax.experimental.pallas import tpu as pltpu

_BN_EPS = 1e-5
_F32 = jnp.float32
_BF16 = jnp.bfloat16


def _round_up(x, m):
    return ((x + m - 1) // m) * m


# ----------------------------------------------------------------------------
# Trace-time 0/1 constants (numpy, built once): block-diagonal over batch,
# zero rows/cols for lane padding.
# ----------------------------------------------------------------------------
def _gather_const(B, H, W, K, stride, pad, n_in, n_out):
    """g[k, b*H*W+ih*W+iw, b*OH*OW+oh*OW+ow] = 1 iff ih==s*oh+kh-p, iw==s*ow+kw-p."""
    OH = (H + 2 * pad - K) // stride + 1
    OW = (W + 2 * pad - K) // stride + 1
    g = np.zeros((K * K, n_in, n_out), np.float32)
    for kh in range(K):
        for kw in range(K):
            k = kh * K + kw
            for b in range(B):
                for oh in range(OH):
                    ih = oh * stride + kh - pad
                    if not 0 <= ih < H:
                        continue
                    for ow in range(OW):
                        iw = ow * stride + kw - pad
                        if not 0 <= iw < W:
                            continue
                        g[k, b * H * W + ih * W + iw,
                          b * OH * OW + oh * OW + ow] = 1.0
    return g, OH, OW


def _scatter_const(B, H, W, K, stride, n_in, n_out):
    """ConvTranspose scatter: s[k, b*HW+ih*W+iw, b*OHOW+(s*ih+kh)*OW+(s*iw+kw)]=1."""
    OH = (H - 1) * stride + K
    OW = (W - 1) * stride + K
    s = np.zeros((K * K, n_in, n_out), np.float32)
    for kh in range(K):
        for kw in range(K):
            k = kh * K + kw
            for b in range(B):
                for ih in range(H):
                    for iw in range(W):
                        s[k, b * H * W + ih * W + iw,
                          b * OH * OW + (ih * stride + kh) * OW
                          + (iw * stride + kw)] = 1.0
    return s, OH, OW


# ----------------------------------------------------------------------------
# Kernel helpers
# ----------------------------------------------------------------------------
def _bn_relu(x, gamma, beta, n_live):
    """Training-mode BatchNorm (+ReLU) with padded-zero columns.

    Padded lane columns of `x` are exactly zero pre-BN, so plain sums with the
    true element count `n_live` and var = E[x^2]-mean^2 are exact.
    """
    s1 = jnp.sum(x, axis=1, keepdims=True)
    s2 = jnp.sum(x * x, axis=1, keepdims=True)
    mean = s1 * (1.0 / n_live)
    var = s2 * (1.0 / n_live) - mean * mean
    scale = gamma * lax.rsqrt(var + _BN_EPS)
    return jnp.maximum((x - mean) * scale + beta, 0.0)


def _tree_sum(xs):
    xs = list(xs)
    while len(xs) > 1:
        nxt = [xs[i] + xs[i + 1] for i in range(0, len(xs) - 1, 2)]
        if len(xs) % 2:
            nxt.append(xs[-1])
        xs = nxt
    return xs[0]


def _acc_sum(term, n, n_acc=4):
    """Sum term(0..n-1) with n_acc parallel accumulators (short add chains)."""
    accs = []
    for k in range(n):
        t = term(k)
        if k < n_acc:
            accs.append(t)
        else:
            accs[k % n_acc] = accs[k % n_acc] + t
    return _tree_sum(accs)


# ----------------------------------------------------------------------------
# The single fused kernel
# ----------------------------------------------------------------------------
def _encoder_kernel(
    scond_ref,   # (360, n0)          bf16  kron-expanded cond
    xpT_ref,     # (9*nc, n1)         bf16  im2col'd image (batch folded)
    w1_ref,      # (2*ncondf, 360)    bf16
    wt_ref,      # (16*ncp, 2*ncondf) bf16  out_cond weights, offsets stacked
    scat_ref,    # (16, n0, n1)       bf16
    win_ref,     # (4*ngf, 9*nc)      bf16
    w1m_ref,     # (9*2*ngf, 4*ngf)   bf16  mid_conv1 main-group, offsets stacked
    w1c_ref,     # (9*2*ngf, ncp)     bf16  mid_conv1 cond-group, offsets stacked
    gm1_ref,     # (9, n1, n2)        bf16
    w2s_ref,     # (9*ngf, 2*ngf)     bf16
    gm2_ref,     # (9, n2, n3)        bf16
    woc_ref,     # (ngf, nhd, n3)     f32   out_conv weights tiled over batch cols
    ssum_ref,    # (n3, nb)           bf16  lane-group sum selector
    mask0_ref,   # (1, n0)            f32   live-column mask (cond 6x6 stage)
    mask1_ref,   # (1, n1)            f32   live-column mask (14x14 stage)
    pvec_ref,    # (P, 1)             f32   packed biases / BN gammas / betas
    out_ref,     # (nhd, nb)          f32
    *, c_cond1, ncp, c_main, c_mid1, c_mid2, nhd,
    n36, n196, n49, n16, offs,
):
    def mm(a, b):
        return jnp.dot(a.astype(_BF16), b.astype(_BF16),
                       preferred_element_type=_F32)

    def pv(name, length):
        off = offs[name]
        return pvec_ref[off:off + length, :]              # (length, 1) f32

    mask0 = mask0_ref[...]
    mask1 = mask1_ref[...]

    # ---- in_cond (ConvTranspose 6x6 on a 1x1 map) + cond_bn1 + ReLU --------
    c1 = mm(w1_ref[...], scond_ref[...]) + pv('b1', c_cond1) * mask0
    c1 = _bn_relu(c1, pv('g1', c_cond1), pv('be1', c_cond1), n36)   # (24, n0)

    # ---- out_cond (ConvTranspose 4x4, stride 2): channel-first + scatter ---
    bc = mm(wt_ref[...], c1).astype(_BF16)                          # (16*ncp, n0)
    oc = _acc_sum(lambda k: mm(bc[k * ncp:(k + 1) * ncp, :], scat_ref[k]), 16)
    oc = oc + pv('b2', ncp) * mask1                                 # (ncp, n1)

    # ---- in_conv (3x3, stride 2, pad 1, no bias) ----------------------------
    xin = mm(win_ref[...], xpT_ref[...])                            # (4*ngf, n1)

    # ---- in_bn + ReLU on torch.cat((x, cond), 1): per channel group --------
    xin = _bn_relu(xin, pv('gin_m', c_main), pv('bin_m', c_main), n196)
    oc = _bn_relu(oc, pv('gin_c', ncp), pv('bin_c', ncp), n196)

    # ---- mid_conv1 (3x3 s2 p1) + mid_bn1 + ReLU -----------------------------
    bm1 = (mm(w1m_ref[...], xin) + mm(w1c_ref[...], oc)).astype(_BF16)  # (144, n1)
    m1 = _acc_sum(lambda k: mm(bm1[k * c_mid1:(k + 1) * c_mid1, :], gm1_ref[k]), 9)
    m1 = _bn_relu(m1, pv('g1m', c_mid1), pv('b1m', c_mid1), n49)    # (2*ngf, n2)

    # ---- mid_conv2 (3x3 s2 p1) + mid_bn2 + ReLU -----------------------------
    bm2 = mm(w2s_ref[...], m1).astype(_BF16)                        # (72, n2)
    m2 = _acc_sum(lambda k: mm(bm2[k * c_mid2:(k + 1) * c_mid2, :], gm2_ref[k]), 9)
    m2 = _bn_relu(m2, pv('g2m', c_mid2), pv('b2m', c_mid2), n16)    # (ngf, n3)

    # ---- out_conv (4x4 full reduce -> 1x1): VPU channel reduce + one matmul -
    p = _tree_sum([woc_ref[c] * m2[c:c + 1, :] for c in range(c_mid2)])  # (nhd, n3)
    out = jnp.dot(p.astype(_BF16), ssum_ref[...], preferred_element_type=_F32)
    out_ref[...] = out + pv('bo', nhd)                              # (nhd, nb)


# ----------------------------------------------------------------------------
# One-time preparation (weight re-layouts + constants) and the jitted forward
# ----------------------------------------------------------------------------
def make_encoder(params, nc, ngf, ncondf, nhd, B):
    assert ngf % 8 == 0, "ngf must be a multiple of 8 for aligned row slicing"
    c_cond1 = 2 * ncondf
    ncp = _round_up(ncondf, 8)          # cond channel group padded to 8
    c_main = 4 * ngf
    c_mid1 = 2 * ngf
    c_mid2 = ngf

    H = W = 28                          # cond path always yields 14x14
    P1, P2, P3 = 14 * 14, 7 * 7, 4 * 4
    n0 = _round_up(max(B * 36, 128), 128)
    n1 = _round_up(max(B * P1, 128), 128)
    n2 = _round_up(max(B * P2, 128), 128)
    n3 = _round_up(max(B * P3, 128), 128)
    nb = 128

    # 0/1 gather / scatter constants, block-diagonal over batch.
    scat_np, sh, sw = _scatter_const(B, 6, 6, 4, 2, n0, n1)
    assert (sh, sw) == (14, 14)
    gm1_np, oh2, ow2 = _gather_const(B, 14, 14, 3, 2, 1, n1, n2)
    gm2_np, oh3, ow3 = _gather_const(B, 7, 7, 3, 2, 1, n2, n3)
    assert (oh2, ow2, oh3, ow3) == (7, 7, 4, 4)

    # ---- weight re-layouts (done once) --------------------------------------
    w1 = jnp.transpose(params['in_cond_w'].reshape(10, c_cond1, 36),
                       (1, 0, 2)).reshape(c_cond1, 360).astype(_BF16)
    wt_ = jnp.transpose(params['out_cond_w'], (2, 3, 1, 0)).reshape(16, ncondf, c_cond1)
    wt = jnp.pad(wt_, ((0, 0), (0, ncp - ncondf), (0, 0))) \
            .reshape(16 * ncp, c_cond1).astype(_BF16)
    win = jnp.transpose(params['in_conv_w'], (0, 2, 3, 1)) \
             .reshape(c_main, 9 * nc).astype(_BF16)
    wm1 = jnp.transpose(params['mid_conv1_w'], (2, 3, 0, 1)) \
             .reshape(9 * c_mid1, c_main + ncondf)
    w1m = wm1[:, :c_main].astype(_BF16)
    w1c = jnp.pad(wm1[:, c_main:], ((0, 0), (0, ncp - ncondf))).astype(_BF16)
    w2s = jnp.transpose(params['mid_conv2_w'], (2, 3, 0, 1)) \
             .reshape(9 * c_mid2, c_mid1).astype(_BF16)
    wo = jnp.transpose(params['out_conv_w'].reshape(nhd, c_mid2, 16), (1, 0, 2))
    woc = jnp.pad(jnp.tile(wo, (1, 1, B)),
                  ((0, 0), (0, 0), (0, n3 - B * 16))).astype(_F32)

    # Lane-group sum selector: column b sums positions b*16..b*16+15.
    ssum_np = np.zeros((n3, nb), np.float32)
    for b in range(B):
        ssum_np[b * 16:(b + 1) * 16, b] = 1.0

    # Live-column masks (biases only added on live columns -> BN sums exact).
    mask0_np = np.zeros((1, n0), np.float32)
    mask0_np[:, :B * 36] = 1.0
    mask1_np = np.zeros((1, n1), np.float32)
    mask1_np[:, :B * P1] = 1.0

    # ---- packed per-channel vector params (8-aligned segments) --------------
    def seg(v, pad_to=None, pad_val=0.0):
        v = jnp.asarray(v, _F32).reshape(-1)
        if pad_to is not None and v.shape[0] < pad_to:
            v = jnp.concatenate(
                [v, jnp.full((pad_to - v.shape[0],), pad_val, _F32)])
        return v

    segs = [
        ('b1', seg(params['in_cond_b'])),
        ('g1', seg(params['cond_bn1_g'])),
        ('be1', seg(params['cond_bn1_b'])),
        ('b2', seg(params['out_cond_b'], ncp, 0.0)),
        ('gin_m', seg(params['in_bn_g'][:c_main])),
        ('bin_m', seg(params['in_bn_b'][:c_main])),
        ('gin_c', seg(params['in_bn_g'][c_main:], ncp, 1.0)),
        ('bin_c', seg(params['in_bn_b'][c_main:], ncp, 0.0)),
        ('g1m', seg(params['mid_bn1_g'])),
        ('b1m', seg(params['mid_bn1_b'])),
        ('g2m', seg(params['mid_bn2_g'])),
        ('b2m', seg(params['mid_bn2_b'])),
        ('bo', seg(params['out_conv_b'])),
    ]
    offs, pieces, cur = {}, [], 0
    for name, v in segs:
        ln = int(v.shape[0])
        aln = _round_up(ln, 8)
        offs[name] = cur
        if aln > ln:
            v = jnp.concatenate([v, jnp.zeros((aln - ln,), _F32)])
        pieces.append(v)
        cur += aln
    pvec = jnp.concatenate(pieces).reshape(cur, 1)

    consts = [
        w1, wt, jnp.asarray(scat_np, _BF16), win,
        w1m, w1c, jnp.asarray(gm1_np, _BF16), w2s, jnp.asarray(gm2_np, _BF16),
        woc, jnp.asarray(ssum_np, _BF16),
        jnp.asarray(mask0_np, _F32), jnp.asarray(mask1_np, _F32), pvec,
    ]

    kernel = functools.partial(
        _encoder_kernel,
        c_cond1=c_cond1, ncp=ncp, c_main=c_main, c_mid1=c_mid1, c_mid2=c_mid2,
        nhd=nhd, n36=B * 36, n196=B * P1, n49=B * P2, n16=B * P3, offs=offs)

    def forward(x, cond):
        assert x.shape == (B, nc, H, W), x.shape
        # im2col of the image, batch folded into lanes, zero padded to n1.
        xt = jnp.transpose(x, (0, 2, 3, 1))
        xp = jnp.pad(xt, ((0, 0), (1, 1), (1, 1), (0, 0)))
        cols = [xp[:, kh:kh + 28:2, kw:kw + 28:2, :]
                for kh in range(3) for kw in range(3)]
        patches = jnp.stack(cols, axis=3).reshape(B, P1, 9 * nc)
        xpT = jnp.transpose(patches, (2, 0, 1)).reshape(9 * nc, B * P1)
        xpT = jnp.pad(xpT, ((0, 0), (0, n1 - B * P1))).astype(_BF16)

        # Kron-expand cond so in_cond is one matmul with batch folded in lanes:
        # scond[i*36+q, b*36+p] = cond[b, i] * (q == p).
        eye = jnp.eye(36, dtype=_F32)
        scond = (cond.astype(_F32).T[:, None, :, None]
                 * eye[None, :, None, :]).reshape(360, B * 36)
        scond = jnp.pad(scond, ((0, 0), (0, n0 - B * 36))).astype(_BF16)

        inputs = [scond, xpT] + consts
        in_specs = [pl.BlockSpec(a.shape, lambda i, nd=a.ndim: (0,) * nd)
                    for a in inputs]

        out = pl.pallas_call(
            kernel,
            grid=(1,),
            in_specs=in_specs,
            out_specs=pl.BlockSpec((nhd, nb), lambda i: (0, 0)),
            out_shape=jax.ShapeDtypeStruct((nhd, nb), _F32),
            compiler_params=pltpu.CompilerParams(
                dimension_semantics=("arbitrary",)),
        )(*inputs)

        # (nhd, nb) -> (B, nhd, 1, 1); only the first B lanes are live.
        return jnp.transpose(out[:, :B])[:, :, None, None]

    return jax.jit(forward)


# ----------------------------------------------------------------------------
# Deterministic parameter init (torch layouts, synthetic values)
# ----------------------------------------------------------------------------
def init_params(key, nc, ngf, ncondf, nhd):
    ks = jax.random.split(key, 17)

    def w(k, shape, scale=0.1):
        return (scale * jax.random.normal(k, shape)).astype(jnp.float32)

    return {
        "in_cond_w": w(ks[0], (10, 2 * ncondf, 6, 6)),      # ConvTranspose (Cin,Cout,K,K)
        "in_cond_b": w(ks[1], (2 * ncondf,)),
        "cond_bn1_g": 1.0 + w(ks[2], (2 * ncondf,)),
        "cond_bn1_b": w(ks[3], (2 * ncondf,)),
        "out_cond_w": w(ks[4], (2 * ncondf, ncondf, 4, 4)),
        "out_cond_b": w(ks[5], (ncondf,)),
        "in_conv_w": w(ks[6], (4 * ngf, nc, 3, 3)),          # Conv (O,C,KH,KW), no bias
        "in_bn_g": 1.0 + w(ks[7], (4 * ngf + ncondf,)),
        "in_bn_b": w(ks[8], (4 * ngf + ncondf,)),
        "mid_conv1_w": w(ks[9], (2 * ngf, 4 * ngf + ncondf, 3, 3)),
        "mid_bn1_g": 1.0 + w(ks[10], (2 * ngf,)),
        "mid_bn1_b": w(ks[11], (2 * ngf,)),
        "mid_conv2_w": w(ks[12], (ngf, 2 * ngf, 3, 3)),
        "mid_bn2_g": 1.0 + w(ks[13], (ngf,)),
        "mid_bn2_b": w(ks[14], (ngf,)),
        "out_conv_w": w(ks[15], (nhd, ngf, 4, 4)),
        "out_conv_b": w(ks[16], (nhd,)),
    }


if __name__ == "__main__":
    # The module's cond path always produces a 14x14 map, so x must be 28x28.
    nc, ngf, ncondf, nhd = 1, 8, 12, 16
    B = 2

    key = jax.random.PRNGKey(0)
    kp, kx, kc = jax.random.split(key, 3)
    params = init_params(kp, nc, ngf, ncondf, nhd)
    x = jax.random.normal(kx, (B, nc, 28, 28), jnp.float32)   # NCHW like torch
    cond = jax.random.normal(kc, (B, 10), jnp.float32)

    fwd = make_encoder(params, nc, ngf, ncondf, nhd, B)
    out = jax.block_until_ready(fwd(x, cond))

    assert out.shape == (B, nhd, 1, 1), out.shape
    assert bool(jnp.all(jnp.isfinite(out)))
    print("KERNEL_OK")
</pallas_src>

<mosaic_0001>
module attributes {stable_mosaic.version = 11 : i64} {
  func.func @_encoder_kernel(%arg0: i32, %arg1: memref<360x128xbf16, #tpu.memory_space<vmem>>, %arg2: memref<9x512xbf16, #tpu.memory_space<vmem>>, %arg3: memref<24x360xbf16, #tpu.memory_space<vmem>>, %arg4: memref<256x24xbf16, #tpu.memory_space<vmem>>, %arg5: memref<16x128x512xbf16, #tpu.memory_space<vmem>>, %arg6: memref<32x9xbf16, #tpu.memory_space<vmem>>, %arg7: memref<144x32xbf16, #tpu.memory_space<vmem>>, %arg8: memref<144x16xbf16, #tpu.memory_space<vmem>>, %arg9: memref<9x512x128xbf16, #tpu.memory_space<vmem>>, %arg10: memref<72x16xbf16, #tpu.memory_space<vmem>>, %arg11: memref<9x128x128xbf16, #tpu.memory_space<vmem>>, %arg12: memref<8x16x128xf32, #tpu.memory_space<vmem>>, %arg13: memref<128x128xbf16, #tpu.memory_space<vmem>>, %arg14: memref<1x128xf32, #tpu.memory_space<vmem>>, %arg15: memref<1x512xf32, #tpu.memory_space<vmem>>, %arg16: memref<248x1xf32, #tpu.memory_space<vmem>>, %arg17: memref<16x128xf32, #tpu.memory_space<vmem>>) attributes {dimension_semantics = [#tpu.dimension_semantics<arbitrary>], iteration_bounds = array<i64: 1>, scalar_prefetch = 0 : i64, scratch_operands = 0 : i64, tpu.core_type = #tpu.core_type<tc>, window_params = [{pipeline_mode = #tpu.pipeline_mode<synchronous>, transform_indices = @transform_0, window_bounds = array<i64: 360, 128>}, {pipeline_mode = #tpu.pipeline_mode<synchronous>, transform_indices = @transform_1, window_bounds = array<i64: 9, 512>}, {pipeline_mode = #tpu.pipeline_mode<synchronous>, transform_indices = @transform_2, window_bounds = array<i64: 24, 360>}, {pipeline_mode = #tpu.pipeline_mode<synchronous>, transform_indices = @transform_3, window_bounds = array<i64: 256, 24>}, {pipeline_mode = #tpu.pipeline_mode<synchronous>, transform_indices = @transform_4, window_bounds = array<i64: 16, 128, 512>}, {pipeline_mode = #tpu.pipeline_mode<synchronous>, transform_indices = @transform_5, window_bounds = array<i64: 32, 9>}, {pipeline_mode = #tpu.pipeline_mode<synchronous>, transform_indices = @transform_6, window_bounds = array<i64: 144, 32>}, {pipeline_mode = #tpu.pipeline_mode<synchronous>, transform_indices = @transform_7, window_bounds = array<i64: 144, 16>}, {pipeline_mode = #tpu.pipeline_mode<synchronous>, transform_indices = @transform_8, window_bounds = array<i64: 9, 512, 128>}, {pipeline_mode = #tpu.pipeline_mode<synchronous>, transform_indices = @transform_9, window_bounds = array<i64: 72, 16>}, {pipeline_mode = #tpu.pipeline_mode<synchronous>, transform_indices = @transform_10, window_bounds = array<i64: 9, 128, 128>}, {pipeline_mode = #tpu.pipeline_mode<synchronous>, transform_indices = @transform_11, window_bounds = array<i64: 8, 16, 128>}, {pipeline_mode = #tpu.pipeline_mode<synchronous>, transform_indices = @transform_12, window_bounds = array<i64: 128, 128>}, {pipeline_mode = #tpu.pipeline_mode<synchronous>, transform_indices = @transform_13, window_bounds = array<i64: 1, 128>}, {pipeline_mode = #tpu.pipeline_mode<synchronous>, transform_indices = @transform_14, window_bounds = array<i64: 1, 512>}, {pipeline_mode = #tpu.pipeline_mode<synchronous>, transform_indices = @transform_15, window_bounds = array<i64: 248, 1>}, {pipeline_mode = #tpu.pipeline_mode<synchronous>, transform_indices = @transform_16, window_bounds = array<i64: 16, 128>}]} {
    %c0 = arith.constant 0 : index
    %c0_0 = arith.constant 0 : index
    %0 = vector.load %arg14[%c0, %c0_0] : memref<1x128xf32, #tpu.memory_space<vmem>>, vector<1x128xf32>
    %c0_1 = arith.constant 0 : index
    %c0_2 = arith.constant 0 : index
    %1 = vector.load %arg15[%c0_1, %c0_2] : memref<1x512xf32, #tpu.memory_space<vmem>>, vector<1x512xf32>
    %c0_3 = arith.constant 0 : index
    %c0_4 = arith.constant 0 : index
    %2 = vector.load %arg3[%c0_3, %c0_4] : memref<24x360xbf16, #tpu.memory_space<vmem>>, vector<24x360xbf16>
    %c0_5 = arith.constant 0 : index
    %c0_6 = arith.constant 0 : index
    %3 = vector.load %arg1[%c0_5, %c0_6] : memref<360x128xbf16, #tpu.memory_space<vmem>>, vector<360x128xbf16>
    %cst = arith.constant dense<0.000000e+00> : vector<24x128xf32>
    %4 = tpu.matmul %2, %3, %cst {dimension_numbers = #tpu.dot_dimension_numbers<[1], [0], [0], [1], [0, 0, 1, 1], [], []>} : vector<24x360xbf16>, vector<360x128xbf16>, vector<24x128xf32> -> vector<24x128xf32>
    %c0_7 = arith.constant 0 : index
    %c0_8 = arith.constant 0 : index
    %5 = vector.load %arg16[%c0_7, %c0_8] : memref<248x1xf32, #tpu.memory_space<vmem>>, vector<24x1xf32>
    %6 = vector.broadcast %5 : vector<24x1xf32> to vector<24x128xf32>
    %7 = vector.broadcast %0 : vector<1x128xf32> to vector<24x128xf32>
    %8 = arith.mulf %6, %7 : vector<24x128xf32>
    %9 = arith.addf %4, %8 : vector<24x128xf32>
    %c24 = arith.constant 24 : index
    %c0_9 = arith.constant 0 : index
    %10 = vector.load %arg16[%c24, %c0_9] : memref<248x1xf32, #tpu.memory_space<vmem>>, vector<24x1xf32>
    %c48 = arith.constant 48 : index
    %c0_10 = arith.constant 0 : index
    %11 = vector.load %arg16[%c48, %c0_10] : memref<248x1xf32, #tpu.memory_space<vmem>>, vector<24x1xf32>
    %cst_11 = arith.constant dense<0.000000e+00> : vector<24xf32>
    %12 = vector.multi_reduction <add>, %9, %cst_11 [1] : vector<24x128xf32> to vector<24xf32>
    %13 = vector.shape_cast %12 : vector<24xf32> to vector<24x1xf32>
    %14 = arith.mulf %9, %9 : vector<24x128xf32>
    %cst_12 = arith.constant dense<0.000000e+00> : vector<24xf32>
    %15 = vector.multi_reduction <add>, %14, %cst_12 [1] : vector<24x128xf32> to vector<24xf32>
    %16 = vector.shape_cast %15 : vector<24xf32> to vector<24x1xf32>
    %cst_13 = arith.constant 0.013888889 : f32
    %17 = vector.broadcast %cst_13 : f32 to vector<24x1xf32>
    %18 = arith.mulf %13, %17 : vector<24x1xf32>
    %cst_14 = arith.constant 0.013888889 : f32
    %19 = vector.broadcast %cst_14 : f32 to vector<24x1xf32>
    %20 = arith.mulf %16, %19 : vector<24x1xf32>
    %21 = arith.mulf %18, %18 : vector<24x1xf32>
    %22 = arith.subf %20, %21 : vector<24x1xf32>
    %cst_15 = arith.constant 9.99999974E-6 : f32
    %23 = vector.broadcast %cst_15 : f32 to vector<24x1xf32>
    %24 = arith.addf %22, %23 : vector<24x1xf32>
    %25 = math.rsqrt %24 : vector<24x1xf32>
    %26 = arith.mulf %10, %25 : vector<24x1xf32>
    %27 = vector.broadcast %18 : vector<24x1xf32> to vector<24x128xf32>
    %28 = arith.subf %9, %27 : vector<24x128xf32>
    %29 = vector.broadcast %26 : vector<24x1xf32> to vector<24x128xf32>
    %30 = arith.mulf %28, %29 : vector<24x128xf32>
    %31 = vector.broadcast %11 : vector<24x1xf32> to vector<24x128xf32>
    %32 = arith.addf %30, %31 : vector<24x128xf32>
    %cst_16 = arith.constant 0.000000e+00 : f32
    %33 = vector.broadcast %cst_16 : f32 to vector<24x128xf32>
    %34 = arith.maximumf %32, %33 : vector<24x128xf32>
    %c0_17 = arith.constant 0 : index
    %c0_18 = arith.constant 0 : index
    %35 = vector.load %arg4[%c0_17, %c0_18] : memref<256x24xbf16, #tpu.memory_space<vmem>>, vector<256x24xbf16>
    %36 = arith.truncf %34 : vector<24x128xf32> to vector<24x128xbf16>
    %cst_19 = arith.constant dense<0.000000e+00> : vector<256x128xf32>
    %37 = tpu.matmul %35, %36, %cst_19 {dimension_numbers = #tpu.dot_dimension_numbers<[1], [0], [0], [1], [0, 0, 1, 1], [], []>} : vector<256x24xbf16>, vector<24x128xbf16>, vector<256x128xf32> -> vector<256x128xf32>
    %38 = arith.truncf %37 : vector<256x128xf32> to vector<256x128xbf16>
    %39 = vector.extract_strided_slice %38 {offsets = [0, 0], sizes = [16, 128], strides = [1, 1]} : vector<256x128xbf16> to vector<16x128xbf16>
    %c0_20 = arith.constant 0 : index
    %c0_21 = arith.constant 0 : index
    %c0_22 = arith.constant 0 : index
    %40 = vector.load %arg5[%c0_20, %c0_21, %c0_22] : memref<16x128x512xbf16, #tpu.memory_space<vmem>>, vector<1x128x512xbf16>
    %41 = vector.shape_cast %40 : vector<1x128x512xbf16> to vector<128x512xbf16>
    %cst_23 = arith.constant dense<0.000000e+00> : vector<16x512xf32>
    %42 = tpu.matmul %39, %41, %cst_23 {dimension_numbers = #tpu.dot_dimension_numbers<[1], [0], [0], [1], [0, 0, 1, 1], [], []>} : vector<16x128xbf16>, vector<128x512xbf16>, vector<16x512xf32> -> vector<16x512xf32>
    %43 = vector.extract_strided_slice %38 {offsets = [16, 0], sizes = [16, 128], strides = [1, 1]} : vector<256x128xbf16> to vector<16x128xbf16>
    %c1 = arith.constant 1 : index
    %c0_24 = arith.constant 0 : index
    %c0_25 = arith.constant 0 : index
    %44 = vector.load %arg5[%c1, %c0_24, %c0_25] : memref<16x128x512xbf16, #tpu.memory_space<vmem>>, vector<1x128x512xbf16>
    %45 = vector.shape_cast %44 : vector<1x128x512xbf16> to vector<128x512xbf16>
    %cst_26 = arith.constant dense<0.000000e+00> : vector<16x512xf32>
    %46 = tpu.matmul %43, %45, %cst_26 {dimension_numbers = #tpu.dot_dimension_numbers<[1], [0], [0], [1], [0, 0, 1, 1], [], []>} : vector<16x128xbf16>, vector<128x512xbf16>, vector<16x512xf32> -> vector<16x512xf32>
    %47 = vector.extract_strided_slice %38 {offsets = [32, 0], sizes = [16, 128], strides = [1, 1]} : vector<256x128xbf16> to vector<16x128xbf16>
    %c2 = arith.constant 2 : index
    %c0_27 = arith.constant 0 : index
    %c0_28 = arith.constant 0 : index
    %48 = vector.load %arg5[%c2, %c0_27, %c0_28] : memref<16x128x512xbf16, #tpu.memory_space<vmem>>, vector<1x128x512xbf16>
    %49 = vector.shape_cast %48 : vector<1x128x512xbf16> to vector<128x512xbf16>
    %cst_29 = arith.constant dense<0.000000e+00> : vector<16x512xf32>
    %50 = tpu.matmul %47, %49, %cst_29 {dimension_numbers = #tpu.dot_dimension_numbers<[1], [0], [0], [1], [0, 0, 1, 1], [], []>} : vector<16x128xbf16>, vector<128x512xbf16>, vector<16x512xf32> -> vector<16x512xf32>
    %51 = vector.extract_strided_slice %38 {offsets = [48, 0], sizes = [16, 128], strides = [1, 1]} : vector<256x128xbf16> to vector<16x128xbf16>
    %c3 = arith.constant 3 : index
    %c0_30 = arith.constant 0 : index
    %c0_31 = arith.constant 0 : index
    %52 = vector.load %arg5[%c3, %c0_30, %c0_31] : memref<16x128x512xbf16, #tpu.memory_space<vmem>>, vector<1x128x512xbf16>
    %53 = vector.shape_cast %52 : vector<1x128x512xbf16> to vector<128x512xbf16>
    %cst_32 = arith.constant dense<0.000000e+00> : vector<16x512xf32>
    %54 = tpu.matmul %51, %53, %cst_32 {dimension_numbers = #tpu.dot_dimension_numbers<[1], [0], [0], [1], [0, 0, 1, 1], [], []>} : vector<16x128xbf16>, vector<128x512xbf16>, vector<16x512xf32> -> vector<16x512xf32>
    %55 = vector.extract_strided_slice %38 {offsets = [64, 0], sizes = [16, 128], strides = [1, 1]} : vector<256x128xbf16> to vector<16x128xbf16>
    %c4 = arith.constant 4 : index
    %c0_33 = arith.constant 0 : index
    %c0_34 = arith.constant 0 : index
    %56 = vector.load %arg5[%c4, %c0_33, %c0_34] : memref<16x128x512xbf16, #tpu.memory_space<vmem>>, vector<1x128x512xbf16>
    %57 = vector.shape_cast %56 : vector<1x128x512xbf16> to vector<128x512xbf16>
    %cst_35 = arith.constant dense<0.000000e+00> : vector<16x512xf32>
    %58 = tpu.matmul %55, %57, %cst_35 {dimension_numbers = #tpu.dot_dimension_numbers<[1], [0], [0], [1], [0, 0, 1, 1], [], []>} : vector<16x128xbf16>, vector<128x512xbf16>, vector<16x512xf32> -> vector<16x512xf32>
    %59 = arith.addf %42, %58 : vector<16x512xf32>
    %60 = vector.extract_strided_slice %38 {offsets = [80, 0], sizes = [16, 128], strides = [1, 1]} : vector<256x128xbf16> to vector<16x128xbf16>
    %c5 = arith.constant 5 : index
    %c0_36 = arith.constant 0 : index
    %c0_37 = arith.constant 0 : index
    %61 = vector.load %arg5[%c5, %c0_36, %c0_37] : memref<16x128x512xbf16, #tpu.memory_space<vmem>>, vector<1x128x512xbf16>
    %62 = vector.shape_cast %61 : vector<1x128x512xbf16> to vector<128x512xbf16>
    %cst_38 = arith.constant dense<0.000000e+00> : vector<16x512xf32>
    %63 = tpu.matmul %60, %62, %cst_38 {dimension_numbers = #tpu.dot_dimension_numbers<[1], [0], [0], [1], [0, 0, 1, 1], [], []>} : vector<16x128xbf16>, vector<128x512xbf16>, vector<16x512xf32> -> vector<16x512xf32>
    %64 = arith.addf %46, %63 : vector<16x512xf32>
    %65 = vector.extract_strided_slice %38 {offsets = [96, 0], sizes = [16, 128], strides = [1, 1]} : vector<256x128xbf16> to vector<16x128xbf16>
    %c6 = arith.constant 6 : index
    %c0_39 = arith.constant 0 : index
    %c0_40 = arith.constant 0 : index
    %66 = vector.load %arg5[%c6, %c0_39, %c0_40] : memref<16x128x512xbf16, #tpu.memory_space<vmem>>, vector<1x128x512xbf16>
    %67 = vector.shape_cast %66 : vector<1x128x512xbf16> to vector<128x512xbf16>
    %cst_41 = arith.constant dense<0.000000e+00> : vector<16x512xf32>
    %68 = tpu.matmul %65, %67, %cst_41 {dimension_numbers = #tpu.dot_dimension_numbers<[1], [0], [0], [1], [0, 0, 1, 1], [], []>} : vector<16x128xbf16>, vector<128x512xbf16>, vector<16x512xf32> -> vector<16x512xf32>
    %69 = arith.addf %50, %68 : vector<16x512xf32>
    %70 = vector.extract_strided_slice %38 {offsets = [112, 0], sizes = [16, 128], strides = [1, 1]} : vector<256x128xbf16> to vector<16x128xbf16>
    %c7 = arith.constant 7 : index
    %c0_42 = arith.constant 0 : index
    %c0_43 = arith.constant 0 : index
    %71 = vector.load %arg5[%c7, %c0_42, %c0_43] : memref<16x128x512xbf16, #tpu.memory_space<vmem>>, vector<1x128x512xbf16>
    %72 = vector.shape_cast %71 : vector<1x128x512xbf16> to vector<128x512xbf16>
    %cst_44 = arith.constant dense<0.000000e+00> : vector<16x512xf32>
    %73 = tpu.matmul %70, %72, %cst_44 {dimension_numbers = #tpu.dot_dimension_numbers<[1], [0], [0], [1], [0, 0, 1, 1], [], []>} : vector<16x128xbf16>, vector<128x512xbf16>, vector<16x512xf32> -> vector<16x512xf32>
    %74 = arith.addf %54, %73 : vector<16x512xf32>
    %75 = vector.extract_strided_slice %38 {offsets = [128, 0], sizes = [16, 128], strides = [1, 1]} : vector<256x128xbf16> to vector<16x128xbf16>
    %c8 = arith.constant 8 : index
    %c0_45 = arith.constant 0 : index
    %c0_46 = arith.constant 0 : index
    %76 = vector.load %arg5[%c8, %c0_45, %c0_46] : memref<16x128x512xbf16, #tpu.memory_space<vmem>>, vector<1x128x512xbf16>
    %77 = vector.shape_cast %76 : vector<1x128x512xbf16> to vector<128x512xbf16>
    %cst_47 = arith.constant dense<0.000000e+00> : vector<16x512xf32>
    %78 = tpu.matmul %75, %77, %cst_47 {dimension_numbers = #tpu.dot_dimension_numbers<[1], [0], [0], [1], [0, 0, 1, 1], [], []>} : vector<16x128xbf16>, vector<128x512xbf16>, vector<16x512xf32> -> vector<16x512xf32>
    %79 = arith.addf %59, %78 : vector<16x512xf32>
    %80 = vector.extract_strided_slice %38 {offsets = [144, 0], sizes = [16, 128], strides = [1, 1]} : vector<256x128xbf16> to vector<16x128xbf16>
    %c9 = arith.constant 9 : index
    %c0_48 = arith.constant 0 : index
    %c0_49 = arith.constant 0 : index
    %81 = vector.load %arg5[%c9, %c0_48, %c0_49] : memref<16x128x512xbf16, #tpu.memory_space<vmem>>, vector<1x128x512xbf16>
    %82 = vector.shape_cast %81 : vector<1x128x512xbf16> to vector<128x512xbf16>
    %cst_50 = arith.constant dense<0.000000e+00> : vector<16x512xf32>
    %83 = tpu.matmul %80, %82, %cst_50 {dimension_numbers = #tpu.dot_dimension_numbers<[1], [0], [0], [1], [0, 0, 1, 1], [], []>} : vector<16x128xbf16>, vector<128x512xbf16>, vector<16x512xf32> -> vector<16x512xf32>
    %84 = arith.addf %64, %83 : vector<16x512xf32>
    %85 = vector.extract_strided_slice %38 {offsets = [160, 0], sizes = [16, 128], strides = [1, 1]} : vector<256x128xbf16> to vector<16x128xbf16>
    %c10 = arith.constant 10 : index
    %c0_51 = arith.constant 0 : index
    %c0_52 = arith.constant 0 : index
    %86 = vector.load %arg5[%c10, %c0_51, %c0_52] : memref<16x128x512xbf16, #tpu.memory_space<vmem>>, vector<1x128x512xbf16>
    %87 = vector.shape_cast %86 : vector<1x128x512xbf16> to vector<128x512xbf16>
    %cst_53 = arith.constant dense<0.000000e+00> : vector<16x512xf32>
    %88 = tpu.matmul %85, %87, %cst_53 {dimension_numbers = #tpu.dot_dimension_numbers<[1], [0], [0], [1], [0, 0, 1, 1], [], []>} : vector<16x128xbf16>, vector<128x512xbf16>, vector<16x512xf32> -> vector<16x512xf32>
    %89 = arith.addf %69, %88 : vector<16x512xf32>
    %90 = vector.extract_strided_slice %38 {offsets = [176, 0], sizes = [16, 128], strides = [1, 1]} : vector<256x128xbf16> to vector<16x128xbf16>
    %c11 = arith.constant 11 : index
    %c0_54 = arith.constant 0 : index
    %c0_55 = arith.constant 0 : index
    %91 = vector.load %arg5[%c11, %c0_54, %c0_55] : memref<16x128x512xbf16, #tpu.memory_space<vmem>>, vector<1x128x512xbf16>
    %92 = vector.shape_cast %91 : vector<1x128x512xbf16> to vector<128x512xbf16>
    %cst_56 = arith.constant dense<0.000000e+00> : vector<16x512xf32>
    %93 = tpu.matmul %90, %92, %cst_56 {dimension_numbers = #tpu.dot_dimension_numbers<[1], [0], [0], [1], [0, 0, 1, 1], [], []>} : vector<16x128xbf16>, vector<128x512xbf16>, vector<16x512xf32> -> vector<16x512xf32>
    %94 = arith.addf %74, %93 : vector<16x512xf32>
    %95 = vector.extract_strided_slice %38 {offsets = [192, 0], sizes = [16, 128], strides = [1, 1]} : vector<256x128xbf16> to vector<16x128xbf16>
    %c12 = arith.constant 12 : index
    %c0_57 = arith.constant 0 : index
    %c0_58 = arith.constant 0 : index
    %96 = vector.load %arg5[%c12, %c0_57, %c0_58] : memref<16x128x512xbf16, #tpu.memory_space<vmem>>, vector<1x128x512xbf16>
    %97 = vector.shape_cast %96 : vector<1x128x512xbf16> to vector<128x512xbf16>
    %cst_59 = arith.constant dense<0.000000e+00> : vector<16x512xf32>
    %98 = tpu.matmul %95, %97, %cst_59 {dimension_numbers = #tpu.dot_dimension_numbers<[1], [0], [0], [1], [0, 0, 1, 1], [], []>} : vector<16x128xbf16>, vector<128x512xbf16>, vector<16x512xf32> -> vector<16x512xf32>
    %99 = arith.addf %79, %98 : vector<16x512xf32>
    %100 = vector.extract_strided_slice %38 {offsets = [208, 0], sizes = [16, 128], strides = [1, 1]} : vector<256x128xbf16> to vector<16x128xbf16>
    %c13 = arith.constant 13 : index
    %c0_60 = arith.constant 0 : index
    %c0_61 = arith.constant 0 : index
    %101 = vector.load %arg5[%c13, %c0_60, %c0_61] : memref<16x128x512xbf16, #tpu.memory_space<vmem>>, vector<1x128x512xbf16>
    %102 = vector.shape_cast %101 : vector<1x128x512xbf16> to vector<128x512xbf16>
    %cst_62 = arith.constant dense<0.000000e+00> : vector<16x512xf32>
    %103 = tpu.matmul %100, %102, %cst_62 {dimension_numbers = #tpu.dot_dimension_numbers<[1], [0], [0], [1], [0, 0, 1, 1], [], []>} : vector<16x128xbf16>, vector<128x512xbf16>, vector<16x512xf32> -> vector<16x512xf32>
    %104 = arith.addf %84, %103 : vector<16x512xf32>
    %105 = vector.extract_strided_slice %38 {offsets = [224, 0], sizes = [16, 128], strides = [1, 1]} : vector<256x128xbf16> to vector<16x128xbf16>
    %c14 = arith.constant 14 : index
    %c0_63 = arith.constant 0 : index
    %c0_64 = arith.constant 0 : index
    %106 = vector.load %arg5[%c14, %c0_63, %c0_64] : memref<16x128x512xbf16, #tpu.memory_space<vmem>>, vector<1x128x512xbf16>
    %107 = vector.shape_cast %106 : vector<1x128x512xbf16> to vector<128x512xbf16>
    %cst_65 = arith.constant dense<0.000000e+00> : vector<16x512xf32>
    %108 = tpu.matmul %105, %107, %cst_65 {dimension_numbers = #tpu.dot_dimension_numbers<[1], [0], [0], [1], [0, 0, 1, 1], [], []>} : vector<16x128xbf16>, vector<128x512xbf16>, vector<16x512xf32> -> vector<16x512xf32>
    %109 = arith.addf %89, %108 : vector<16x512xf32>
    %110 = vector.extract_strided_slice %38 {offsets = [240, 0], sizes = [16, 128], strides = [1, 1]} : vector<256x128xbf16> to vector<16x128xbf16>
    %c15 = arith.constant 15 : index
    %c0_66 = arith.constant 0 : index
    %c0_67 = arith.constant 0 : index
    %111 = vector.load %arg5[%c15, %c0_66, %c0_67] : memref<16x128x512xbf16, #tpu.memory_space<vmem>>, vector<1x128x512xbf16>
    %112 = vector.shape_cast %111 : vector<1x128x512xbf16> to vector<128x512xbf16>
    %cst_68 = arith.constant dense<0.000000e+00> : vector<16x512xf32>
    %113 = tpu.matmul %110, %112, %cst_68 {dimension_numbers = #tpu.dot_dimension_numbers<[1], [0], [0], [1], [0, 0, 1, 1], [], []>} : vector<16x128xbf16>, vector<128x512xbf16>, vector<16x512xf32> -> vector<16x512xf32>
    %114 = arith.addf %94, %113 : vector<16x512xf32>
    %115 = arith.addf %99, %104 : vector<16x512xf32>
    %116 = arith.addf %109, %114 : vector<16x512xf32>
    %117 = arith.addf %115, %116 : vector<16x512xf32>
    %c72 = arith.constant 72 : index
    %c0_69 = arith.constant 0 : index
    %118 = vector.load %arg16[%c72, %c0_69] : memref<248x1xf32, #tpu.memory_space<vmem>>, vector<16x1xf32>
    %119 = vector.broadcast %118 : vector<16x1xf32> to vector<16x512xf32>
    %120 = vector.broadcast %1 : vector<1x512xf32> to vector<16x512xf32>
    %121 = arith.mulf %119, %120 : vector<16x512xf32>
    %122 = arith.addf %117, %121 : vector<16x512xf32>
    %c0_70 = arith.constant 0 : index
    %c0_71 = arith.constant 0 : index
    %123 = vector.load %arg6[%c0_70, %c0_71] : memref<32x9xbf16, #tpu.memory_space<vmem>>, vector<32x9xbf16>
    %c0_72 = arith.constant 0 : index
    %c0_73 = arith.constant 0 : index
    %124 = vector.load %arg2[%c0_72, %c0_73] : memref<9x512xbf16, #tpu.memory_space<vmem>>, vector<9x512xbf16>
    %cst_74 = arith.constant dense<0.000000e+00> : vector<32x512xf32>
    %125 = tpu.matmul %123, %124, %cst_74 {dimension_numbers = #tpu.dot_dimension_numbers<[1], [0], [0], [1], [0, 0, 1, 1], [], []>} : vector<32x9xbf16>, vector<9x512xbf16>, vector<32x512xf32> -> vector<32x512xf32>
    %c88 = arith.constant 88 : index
    %c0_75 = arith.constant 0 : index
    %126 = vector.load %arg16[%c88, %c0_75] : memref<248x1xf32, #tpu.memory_space<vmem>>, vector<32x1xf32>
    %c120 = arith.constant 120 : index
    %c0_76 = arith.constant 0 : index
    %127 = vector.load %arg16[%c120, %c0_76] : memref<248x1xf32, #tpu.memory_space<vmem>>, vector<32x1xf32>
    %cst_77 = arith.constant dense<0.000000e+00> : vector<32xf32>
    %128 = vector.multi_reduction <add>, %125, %cst_77 [1] : vector<32x512xf32> to vector<32xf32>
    %129 = vector.shape_cast %128 : vector<32xf32> to vector<32x1xf32>
    %130 = arith.mulf %125, %125 : vector<32x512xf32>
    %cst_78 = arith.constant dense<0.000000e+00> : vector<32xf32>
    %131 = vector.multi_reduction <add>, %130, %cst_78 [1] : vector<32x512xf32> to vector<32xf32>
    %132 = vector.shape_cast %131 : vector<32xf32> to vector<32x1xf32>
    %cst_79 = arith.constant 0.00255102036 : f32
    %133 = vector.broadcast %cst_79 : f32 to vector<32x1xf32>
    %134 = arith.mulf %129, %133 : vector<32x1xf32>
    %cst_80 = arith.constant 0.00255102036 : f32
    %135 = vector.broadcast %cst_80 : f32 to vector<32x1xf32>
    %136 = arith.mulf %132, %135 : vector<32x1xf32>
    %137 = arith.mulf %134, %134 : vector<32x1xf32>
    %138 = arith.subf %136, %137 : vector<32x1xf32>
    %cst_81 = arith.constant 9.99999974E-6 : f32
    %139 = vector.broadcast %cst_81 : f32 to vector<32x1xf32>
    %140 = arith.addf %138, %139 : vector<32x1xf32>
    %141 = math.rsqrt %140 : vector<32x1xf32>
    %142 = arith.mulf %126, %141 : vector<32x1xf32>
    %143 = vector.broadcast %134 : vector<32x1xf32> to vector<32x512xf32>
    %144 = arith.subf %125, %143 : vector<32x512xf32>
    %145 = vector.broadcast %142 : vector<32x1xf32> to vector<32x512xf32>
    %146 = arith.mulf %144, %145 : vector<32x512xf32>
    %147 = vector.broadcast %127 : vector<32x1xf32> to vector<32x512xf32>
    %148 = arith.addf %146, %147 : vector<32x512xf32>
    %cst_82 = arith.constant 0.000000e+00 : f32
    %149 = vector.broadcast %cst_82 : f32 to vector<32x512xf32>
    %150 = arith.maximumf %148, %149 : vector<32x512xf32>
    %c152 = arith.constant 152 : index
    %c0_83 = arith.constant 0 : index
    %151 = vector.load %arg16[%c152, %c0_83] : memref<248x1xf32, #tpu.memory_space<vmem>>, vector<16x1xf32>
    %c168 = arith.constant 168 : index
    %c0_84 = arith.constant 0 : index
    %152 = vector.load %arg16[%c168, %c0_84] : memref<248x1xf32, #tpu.memory_space<vmem>>, vector<16x1xf32>
    %cst_85 = arith.constant dense<0.000000e+00> : vector<16xf32>
    %153 = vector.multi_reduction <add>, %122, %cst_85 [1] : vector<16x512xf32> to vector<16xf32>
    %154 = vector.shape_cast %153 : vector<16xf32> to vector<16x1xf32>
    %155 = arith.mulf %122, %122 : vector<16x512xf32>
    %cst_86 = arith.constant dense<0.000000e+00> : vector<16xf32>
    %156 = vector.multi_reduction <add>, %155, %cst_86 [1] : vector<16x512xf32> to vector<16xf32>
    %157 = vector.shape_cast %156 : vector<16xf32> to vector<16x1xf32>
    %cst_87 = arith.constant 0.00255102036 : f32
    %158 = vector.broadcast %cst_87 : f32 to vector<16x1xf32>
    %159 = arith.mulf %154, %158 : vector<16x1xf32>
    %cst_88 = arith.constant 0.00255102036 : f32
    %160 = vector.broadcast %cst_88 : f32 to vector<16x1xf32>
    %161 = arith.mulf %157, %160 : vector<16x1xf32>
    %162 = arith.mulf %159, %159 : vector<16x1xf32>
    %163 = arith.subf %161, %162 : vector<16x1xf32>
    %cst_89 = arith.constant 9.99999974E-6 : f32
    %164 = vector.broadcast %cst_89 : f32 to vector<16x1xf32>
    %165 = arith.addf %163, %164 : vector<16x1xf32>
    %166 = math.rsqrt %165 : vector<16x1xf32>
    %167 = arith.mulf %151, %166 : vector<16x1xf32>
    %168 = vector.broadcast %159 : vector<16x1xf32> to vector<16x512xf32>
    %169 = arith.subf %122, %168 : vector<16x512xf32>
    %170 = vector.broadcast %167 : vector<16x1xf32> to vector<16x512xf32>
    %171 = arith.mulf %169, %170 : vector<16x512xf32>
    %172 = vector.broadcast %152 : vector<16x1xf32> to vector<16x512xf32>
    %173 = arith.addf %171, %172 : vector<16x512xf32>
    %cst_90 = arith.constant 0.000000e+00 : f32
    %174 = vector.broadcast %cst_90 : f32 to vector<16x512xf32>
    %175 = arith.maximumf %173, %174 : vector<16x512xf32>
    %c0_91 = arith.constant 0 : index
    %c0_92 = arith.constant 0 : index
    %176 = vector.load %arg7[%c0_91, %c0_92] : memref<144x32xbf16, #tpu.memory_space<vmem>>, vector<144x32xbf16>
    %177 = arith.truncf %150 : vector<32x512xf32> to vector<32x512xbf16>
    %cst_93 = arith.constant dense<0.000000e+00> : vector<144x512xf32>
    %178 = tpu.matmul %176, %177, %cst_93 {dimension_numbers = #tpu.dot_dimension_numbers<[1], [0], [0], [1], [0, 0, 1, 1], [], []>} : vector<144x32xbf16>, vector<32x512xbf16>, vector<144x512xf32> -> vector<144x512xf32>
    %c0_94 = arith.constant 0 : index
    %c0_95 = arith.constant 0 : index
    %179 = vector.load %arg8[%c0_94, %c0_95] : memref<144x16xbf16, #tpu.memory_space<vmem>>, vector<144x16xbf16>
    %180 = arith.truncf %175 : vector<16x512xf32> to vector<16x512xbf16>
    %cst_96 = arith.constant dense<0.000000e+00> : vector<144x512xf32>
    %181 = tpu.matmul %179, %180, %cst_96 {dimension_numbers = #tpu.dot_dimension_numbers<[1], [0], [0], [1], [0, 0, 1, 1], [], []>} : vector<144x16xbf16>, vector<16x512xbf16>, vector<144x512xf32> -> vector<144x512xf32>
    %182 = arith.addf %178, %181 : vector<144x512xf32>
    %183 = arith.truncf %182 : vector<144x512xf32> to vector<144x512xbf16>
    %184 = vector.extract_strided_slice %183 {offsets = [0, 0], sizes = [16, 512], strides = [1, 1]} : vector<144x512xbf16> to vector<16x512xbf16>
    %c0_97 = arith.constant 0 : index
    %c0_98 = arith.constant 0 : index
    %c0_99 = arith.constant 0 : index
    %185 = vector.load %arg9[%c0_97, %c0_98, %c0_99] : memref<9x512x128xbf16, #tpu.memory_space<vmem>>, vector<1x512x128xbf16>
    %186 = vector.shape_cast %185 : vector<1x512x128xbf16> to vector<512x128xbf16>
    %cst_100 = arith.constant dense<0.000000e+00> : vector<16x128xf32>
    %187 = tpu.matmul %184, %186, %cst_100 {dimension_numbers = #tpu.dot_dimension_numbers<[1], [0], [0], [1], [0, 0, 1, 1], [], []>} : vector<16x512xbf16>, vector<512x128xbf16>, vector<16x128xf32> -> vector<16x128xf32>
    %188 = vector.extract_strided_slice %183 {offsets = [16, 0], sizes = [16, 512], strides = [1, 1]} : vector<144x512xbf16> to vector<16x512xbf16>
    %c1_101 = arith.constant 1 : index
    %c0_102 = arith.constant 0 : index
    %c0_103 = arith.constant 0 : index
    %189 = vector.load %arg9[%c1_101, %c0_102, %c0_103] : memref<9x512x128xbf16, #tpu.memory_space<vmem>>, vector<1x512x128xbf16>
    %190 = vector.shape_cast %189 : vector<1x512x128xbf16> to vector<512x128xbf16>
    %cst_104 = arith.constant dense<0.000000e+00> : vector<16x128xf32>
    %191 = tpu.matmul %188, %190, %cst_104 {dimension_numbers = #tpu.dot_dimension_numbers<[1], [0], [0], [1], [0, 0, 1, 1], [], []>} : vector<16x512xbf16>, vector<512x128xbf16>, vector<16x128xf32> -> vector<16x128xf32>
    %192 = vector.extract_strided_slice %183 {offsets = [32, 0], sizes = [16, 512], strides = [1, 1]} : vector<144x512xbf16> to vector<16x512xbf16>
    %c2_105 = arith.constant 2 : index
    %c0_106 = arith.constant 0 : index
    %c0_107 = arith.constant 0 : index
    %193 = vector.load %arg9[%c2_105, %c0_106, %c0_107] : memref<9x512x128xbf16, #tpu.memory_space<vmem>>, vector<1x512x128xbf16>
    %194 = vector.shape_cast %193 : vector<1x512x128xbf16> to vector<512x128xbf16>
    %cst_108 = arith.constant dense<0.000000e+00> : vector<16x128xf32>
    %195 = tpu.matmul %192, %194, %cst_108 {dimension_numbers = #tpu.dot_dimension_numbers<[1], [0], [0], [1], [0, 0, 1, 1], [], []>} : vector<16x512xbf16>, vector<512x128xbf16>, vector<16x128xf32> -> vector<16x128xf32>
    %196 = vector.extract_strided_slice %183 {offsets = [48, 0], sizes = [16, 512], strides = [1, 1]} : vector<144x512xbf16> to vector<16x512xbf16>
    %c3_109 = arith.constant 3 : index
    %c0_110 = arith.constant 0 : index
    %c0_111 = arith.constant 0 : index
    %197 = vector.load %arg9[%c3_109, %c0_110, %c0_111] : memref<9x512x128xbf16, #tpu.memory_space<vmem>>, vector<1x512x128xbf16>
    %198 = vector.shape_cast %197 : vector<1x512x128xbf16> to vector<512x128xbf16>
    %cst_112 = arith.constant dense<0.000000e+00> : vector<16x128xf32>
    %199 = tpu.matmul %196, %198, %cst_112 {dimension_numbers = #tpu.dot_dimension_numbers<[1], [0], [0], [1], [0, 0, 1, 1], [], []>} : vector<16x512xbf16>, vector<512x128xbf16>, vector<16x128xf32> -> vector<16x128xf32>
    %200 = vector.extract_strided_slice %183 {offsets = [64, 0], sizes = [16, 512], strides = [1, 1]} : vector<144x512xbf16> to vector<16x512xbf16>
    %c4_113 = arith.constant 4 : index
    %c0_114 = arith.constant 0 : index
    %c0_115 = arith.constant 0 : index
    %201 = vector.load %arg9[%c4_113, %c0_114, %c0_115] : memref<9x512x128xbf16, #tpu.memory_space<vmem>>, vector<1x512x128xbf16>
    %202 = vector.shape_cast %201 : vector<1x512x128xbf16> to vector<512x128xbf16>
    %cst_116 = arith.constant dense<0.000000e+00> : vector<16x128xf32>
    %203 = tpu.matmul %200, %202, %cst_116 {dimension_numbers = #tpu.dot_dimension_numbers<[1], [0], [0], [1], [0, 0, 1, 1], [], []>} : vector<16x512xbf16>, vector<512x128xbf16>, vector<16x128xf32> -> vector<16x128xf32>
    %204 = arith.addf %187, %203 : vector<16x128xf32>
    %205 = vector.extract_strided_slice %183 {offsets = [80, 0], sizes = [16, 512], strides = [1, 1]} : vector<144x512xbf16> to vector<16x512xbf16>
    %c5_117 = arith.constant 5 : index
    %c0_118 = arith.constant 0 : index
    %c0_119 = arith.constant 0 : index
    %206 = vector.load %arg9[%c5_117, %c0_118, %c0_119] : memref<9x512x128xbf16, #tpu.memory_space<vmem>>, vector<1x512x128xbf16>
    %207 = vector.shape_cast %206 : vector<1x512x128xbf16> to vector<512x128xbf16>
    %cst_120 = arith.constant dense<0.000000e+00> : vector<16x128xf32>
    %208 = tpu.matmul %205, %207, %cst_120 {dimension_numbers = #tpu.dot_dimension_numbers<[1], [0], [0], [1], [0, 0, 1, 1], [], []>} : vector<16x512xbf16>, vector<512x128xbf16>, vector<16x128xf32> -> vector<16x128xf32>
    %209 = arith.addf %191, %208 : vector<16x128xf32>
    %210 = vector.extract_strided_slice %183 {offsets = [96, 0], sizes = [16, 512], strides = [1, 1]} : vector<144x512xbf16> to vector<16x512xbf16>
    %c6_121 = arith.constant 6 : index
    %c0_122 = arith.constant 0 : index
    %c0_123 = arith.constant 0 : index
    %211 = vector.load %arg9[%c6_121, %c0_122, %c0_123] : memref<9x512x128xbf16, #tpu.memory_space<vmem>>, vector<1x512x128xbf16>
    %212 = vector.shape_cast %211 : vector<1x512x128xbf16> to vector<512x128xbf16>
    %cst_124 = arith.constant dense<0.000000e+00> : vector<16x128xf32>
    %213 = tpu.matmul %210, %212, %cst_124 {dimension_numbers = #tpu.dot_dimension_numbers<[1], [0], [0], [1], [0, 0, 1, 1], [], []>} : vector<16x512xbf16>, vector<512x128xbf16>, vector<16x128xf32> -> vector<16x128xf32>
    %214 = arith.addf %195, %213 : vector<16x128xf32>
    %215 = vector.extract_strided_slice %183 {offsets = [112, 0], sizes = [16, 512], strides = [1, 1]} : vector<144x512xbf16> to vector<16x512xbf16>
    %c7_125 = arith.constant 7 : index
    %c0_126 = arith.constant 0 : index
    %c0_127 = arith.constant 0 : index
    %216 = vector.load %arg9[%c7_125, %c0_126, %c0_127] : memref<9x512x128xbf16, #tpu.memory_space<vmem>>, vector<1x512x128xbf16>
    %217 = vector.shape_cast %216 : vector<1x512x128xbf16> to vector<512x128xbf16>
    %cst_128 = arith.constant dense<0.000000e+00> : vector<16x128xf32>
    %218 = tpu.matmul %215, %217, %cst_128 {dimension_numbers = #tpu.dot_dimension_numbers<[1], [0], [0], [1], [0, 0, 1, 1], [], []>} : vector<16x512xbf16>, vector<512x128xbf16>, vector<16x128xf32> -> vector<16x128xf32>
    %219 = arith.addf %199, %218 : vector<16x128xf32>
    %220 = vector.extract_strided_slice %183 {offsets = [128, 0], sizes = [16, 512], strides = [1, 1]} : vector<144x512xbf16> to vector<16x512xbf16>
    %c8_129 = arith.constant 8 : index
    %c0_130 = arith.constant 0 : index
    %c0_131 = arith.constant 0 : index
    %221 = vector.load %arg9[%c8_129, %c0_130, %c0_131] : memref<9x512x128xbf16, #tpu.memory_space<vmem>>, vector<1x512x128xbf16>
    %222 = vector.shape_cast %221 : vector<1x512x128xbf16> to vector<512x128xbf16>
    %cst_132 = arith.constant dense<0.000000e+00> : vector<16x128xf32>
    %223 = tpu.matmul %220, %222, %cst_132 {dimension_numbers = #tpu.dot_dimension_numbers<[1], [0], [0], [1], [0, 0, 1, 1], [], []>} : vector<16x512xbf16>, vector<512x128xbf16>, vector<16x128xf32> -> vector<16x128xf32>
    %224 = arith.addf %204, %223 : vector<16x128xf32>
    %225 = arith.addf %224, %209 : vector<16x128xf32>
    %226 = arith.addf %214, %219 : vector<16x128xf32>
    %227 = arith.addf %225, %226 : vector<16x128xf32>
    %c184 = arith.constant 184 : index
    %c0_133 = arith.constant 0 : index
    %228 = vector.load %arg16[%c184, %c0_133] : memref<248x1xf32, #tpu.memory_space<vmem>>, vector<16x1xf32>
    %c200 = arith.constant 200 : index
    %c0_134 = arith.constant 0 : index
    %229 = vector.load %arg16[%c200, %c0_134] : memref<248x1xf32, #tpu.memory_space<vmem>>, vector<16x1xf32>
    %cst_135 = arith.constant dense<0.000000e+00> : vector<16xf32>
    %230 = vector.multi_reduction <add>, %227, %cst_135 [1] : vector<16x128xf32> to vector<16xf32>
    %231 = vector.shape_cast %230 : vector<16xf32> to vector<16x1xf32>
    %232 = arith.mulf %227, %227 : vector<16x128xf32>
    %cst_136 = arith.constant dense<0.000000e+00> : vector<16xf32>
    %233 = vector.multi_reduction <add>, %232, %cst_136 [1] : vector<16x128xf32> to vector<16xf32>
    %234 = vector.shape_cast %233 : vector<16xf32> to vector<16x1xf32>
    %cst_137 = arith.constant 0.0102040814 : f32
    %235 = vector.broadcast %cst_137 : f32 to vector<16x1xf32>
    %236 = arith.mulf %231, %235 : vector<16x1xf32>
    %cst_138 = arith.constant 0.0102040814 : f32
    %237 = vector.broadcast %cst_138 : f32 to vector<16x1xf32>
    %238 = arith.mulf %234, %237 : vector<16x1xf32>
    %239 = arith.mulf %236, %236 : vector<16x1xf32>
    %240 = arith.subf %238, %239 : vector<16x1xf32>
    %cst_139 = arith.constant 9.99999974E-6 : f32
    %241 = vector.broadcast %cst_139 : f32 to vector<16x1xf32>
    %242 = arith.addf %240, %241 : vector<16x1xf32>
    %243 = math.rsqrt %242 : vector<16x1xf32>
    %244 = arith.mulf %228, %243 : vector<16x1xf32>
    %245 = vector.broadcast %236 : vector<16x1xf32> to vector<16x128xf32>
    %246 = arith.subf %227, %245 : vector<16x128xf32>
    %247 = vector.broadcast %244 : vector<16x1xf32> to vector<16x128xf32>
    %248 = arith.mulf %246, %247 : vector<16x128xf32>
    %249 = vector.broadcast %229 : vector<16x1xf32> to vector<16x128xf32>
    %250 = arith.addf %248, %249 : vector<16x128xf32>
    %cst_140 = arith.constant 0.000000e+00 : f32
    %251 = vector.broadcast %cst_140 : f32 to vector<16x128xf32>
    %252 = arith.maximumf %250, %251 : vector<16x128xf32>
    %c0_141 = arith.constant 0 : index
    %c0_142 = arith.constant 0 : index
    %253 = vector.load %arg10[%c0_141, %c0_142] : memref<72x16xbf16, #tpu.memory_space<vmem>>, vector<72x16xbf16>
    %254 = arith.truncf %252 : vector<16x128xf32> to vector<16x128xbf16>
    %cst_143 = arith.constant dense<0.000000e+00> : vector<72x128xf32>
    %255 = tpu.matmul %253, %254, %cst_143 {dimension_numbers = #tpu.dot_dimension_numbers<[1], [0], [0], [1], [0, 0, 1, 1], [], []>} : vector<72x16xbf16>, vector<16x128xbf16>, vector<72x128xf32> -> vector<72x128xf32>
    %256 = arith.truncf %255 : vector<72x128xf32> to vector<72x128xbf16>
    %257 = vector.extract_strided_slice %256 {offsets = [0, 0], sizes = [8, 128], strides = [1, 1]} : vector<72x128xbf16> to vector<8x128xbf16>
    %c0_144 = arith.constant 0 : index
    %c0_145 = arith.constant 0 : index
    %c0_146 = arith.constant 0 : index
    %258 = vector.load %arg11[%c0_144, %c0_145, %c0_146] : memref<9x128x128xbf16, #tpu.memory_space<vmem>>, vector<1x128x128xbf16>
    %259 = vector.shape_cast %258 : vector<1x128x128xbf16> to vector<128x128xbf16>
    %cst_147 = arith.constant dense<0.000000e+00> : vector<8x128xf32>
    %260 = tpu.matmul %257, %259, %cst_147 {dimension_numbers = #tpu.dot_dimension_numbers<[1], [0], [0], [1], [0, 0, 1, 1], [], []>} : vector<8x128xbf16>, vector<128x128xbf16>, vector<8x128xf32> -> vector<8x128xf32>
    %261 = vector.extract_strided_slice %256 {offsets = [8, 0], sizes = [8, 128], strides = [1, 1]} : vector<72x128xbf16> to vector<8x128xbf16>
    %c1_148 = arith.constant 1 : index
    %c0_149 = arith.constant 0 : index
    %c0_150 = arith.constant 0 : index
    %262 = vector.load %arg11[%c1_148, %c0_149, %c0_150] : memref<9x128x128xbf16, #tpu.memory_space<vmem>>, vector<1x128x128xbf16>
    %263 = vector.shape_cast %262 : vector<1x128x128xbf16> to vector<128x128xbf16>
    %cst_151 = arith.constant dense<0.000000e+00> : vector<8x128xf32>
    %264 = tpu.matmul %261, %263, %cst_151 {dimension_numbers = #tpu.dot_dimension_numbers<[1], [0], [0], [1], [0, 0, 1, 1], [], []>} : vector<8x128xbf16>, vector<128x128xbf16>, vector<8x128xf32> -> vector<8x128xf32>
    %265 = vector.extract_strided_slice %256 {offsets = [16, 0], sizes = [8, 128], strides = [1, 1]} : vector<72x128xbf16> to vector<8x128xbf16>
    %c2_152 = arith.constant 2 : index
    %c0_153 = arith.constant 0 : index
    %c0_154 = arith.constant 0 : index
    %266 = vector.load %arg11[%c2_152, %c0_153, %c0_154] : memref<9x128x128xbf16, #tpu.memory_space<vmem>>, vector<1x128x128xbf16>
    %267 = vector.shape_cast %266 : vector<1x128x128xbf16> to vector<128x128xbf16>
    %cst_155 = arith.constant dense<0.000000e+00> : vector<8x128xf32>
    %268 = tpu.matmul %265, %267, %cst_155 {dimension_numbers = #tpu.dot_dimension_numbers<[1], [0], [0], [1], [0, 0, 1, 1], [], []>} : vector<8x128xbf16>, vector<128x128xbf16>, vector<8x128xf32> -> vector<8x128xf32>
    %269 = vector.extract_strided_slice %256 {offsets = [24, 0], sizes = [8, 128], strides = [1, 1]} : vector<72x128xbf16> to vector<8x128xbf16>
    %c3_156 = arith.constant 3 : index
    %c0_157 = arith.constant 0 : index
    %c0_158 = arith.constant 0 : index
    %270 = vector.load %arg11[%c3_156, %c0_157, %c0_158] : memref<9x128x128xbf16, #tpu.memory_space<vmem>>, vector<1x128x128xbf16>
    %271 = vector.shape_cast %270 : vector<1x128x128xbf16> to vector<128x128xbf16>
    %cst_159 = arith.constant dense<0.000000e+00> : vector<8x128xf32>
    %272 = tpu.matmul %269, %271, %cst_159 {dimension_numbers = #tpu.dot_dimension_numbers<[1], [0], [0], [1], [0, 0, 1, 1], [], []>} : vector<8x128xbf16>, vector<128x128xbf16>, vector<8x128xf32> -> vector<8x128xf32>
    %273 = vector.extract_strided_slice %256 {offsets = [32, 0], sizes = [8, 128], strides = [1, 1]} : vector<72x128xbf16> to vector<8x128xbf16>
    %c4_160 = arith.constant 4 : index
    %c0_161 = arith.constant 0 : index
    %c0_162 = arith.constant 0 : index
    %274 = vector.load %arg11[%c4_160, %c0_161, %c0_162] : memref<9x128x128xbf16, #tpu.memory_space<vmem>>, vector<1x128x128xbf16>
    %275 = vector.shape_cast %274 : vector<1x128x128xbf16> to vector<128x128xbf16>
    %cst_163 = arith.constant dense<0.000000e+00> : vector<8x128xf32>
    %276 = tpu.matmul %273, %275, %cst_163 {dimension_numbers = #tpu.dot_dimension_numbers<[1], [0], [0], [1], [0, 0, 1, 1], [], []>} : vector<8x128xbf16>, vector<128x128xbf16>, vector<8x128xf32> -> vector<8x128xf32>
    %277 = arith.addf %260, %276 : vector<8x128xf32>
    %278 = vector.extract_strided_slice %256 {offsets = [40, 0], sizes = [8, 128], strides = [1, 1]} : vector<72x128xbf16> to vector<8x128xbf16>
    %c5_164 = arith.constant 5 : index
    %c0_165 = arith.constant 0 : index
    %c0_166 = arith.constant 0 : index
    %279 = vector.load %arg11[%c5_164, %c0_165, %c0_166] : memref<9x128x128xbf16, #tpu.memory_space<vmem>>, vector<1x128x128xbf16>
    %280 = vector.shape_cast %279 : vector<1x128x128xbf16> to vector<128x128xbf16>
    %cst_167 = arith.constant dense<0.000000e+00> : vector<8x128xf32>
    %281 = tpu.matmul %278, %280, %cst_167 {dimension_numbers = #tpu.dot_dimension_numbers<[1], [0], [0], [1], [0, 0, 1, 1], [], []>} : vector<8x128xbf16>, vector<128x128xbf16>, vector<8x128xf32> -> vector<8x128xf32>
    %282 = arith.addf %264, %281 : vector<8x128xf32>
    %283 = vector.extract_strided_slice %256 {offsets = [48, 0], sizes = [8, 128], strides = [1, 1]} : vector<72x128xbf16> to vector<8x128xbf16>
    %c6_168 = arith.constant 6 : index
    %c0_169 = arith.constant 0 : index
    %c0_170 = arith.constant 0 : index
    %284 = vector.load %arg11[%c6_168, %c0_169, %c0_170] : memref<9x128x128xbf16, #tpu.memory_space<vmem>>, vector<1x128x128xbf16>
    %285 = vector.shape_cast %284 : vector<1x128x128xbf16> to vector<128x128xbf16>
    %cst_171 = arith.constant dense<0.000000e+00> : vector<8x128xf32>
    %286 = tpu.matmul %283, %285, %cst_171 {dimension_numbers = #tpu.dot_dimension_numbers<[1], [0], [0], [1], [0, 0, 1, 1], [], []>} : vector<8x128xbf16>, vector<128x128xbf16>, vector<8x128xf32> -> vector<8x128xf32>
    %287 = arith.addf %268, %286 : vector<8x128xf32>
    %288 = vector.extract_strided_slice %256 {offsets = [56, 0], sizes = [8, 128], strides = [1, 1]} : vector<72x128xbf16> to vector<8x128xbf16>
    %c7_172 = arith.constant 7 : index
    %c0_173 = arith.constant 0 : index
    %c0_174 = arith.constant 0 : index
    %289 = vector.load %arg11[%c7_172, %c0_173, %c0_174] : memref<9x128x128xbf16, #tpu.memory_space<vmem>>, vector<1x128x128xbf16>
    %290 = vector.shape_cast %289 : vector<1x128x128xbf16> to vector<128x128xbf16>
    %cst_175 = arith.constant dense<0.000000e+00> : vector<8x128xf32>
    %291 = tpu.matmul %288, %290, %cst_175 {dimension_numbers = #tpu.dot_dimension_numbers<[1], [0], [0], [1], [0, 0, 1, 1], [], []>} : vector<8x128xbf16>, vector<128x128xbf16>, vector<8x128xf32> -> vector<8x128xf32>
    %292 = arith.addf %272, %291 : vector<8x128xf32>
    %293 = vector.extract_strided_slice %256 {offsets = [64, 0], sizes = [8, 128], strides = [1, 1]} : vector<72x128xbf16> to vector<8x128xbf16>
    %c8_176 = arith.constant 8 : index
    %c0_177 = arith.constant 0 : index
    %c0_178 = arith.constant 0 : index
    %294 = vector.load %arg11[%c8_176, %c0_177, %c0_178] : memref<9x128x128xbf16, #tpu.memory_space<vmem>>, vector<1x128x128xbf16>
    %295 = vector.shape_cast %294 : vector<1x128x128xbf16> to vector<128x128xbf16>
    %cst_179 = arith.constant dense<0.000000e+00> : vector<8x128xf32>
    %296 = tpu.matmul %293, %295, %cst_179 {dimension_numbers = #tpu.dot_dimension_numbers<[1], [0], [0], [1], [0, 0, 1, 1], [], []>} : vector<8x128xbf16>, vector<128x128xbf16>, vector<8x128xf32> -> vector<8x128xf32>
    %297 = arith.addf %277, %296 : vector<8x128xf32>
    %298 = arith.addf %297, %282 : vector<8x128xf32>
    %299 = arith.addf %287, %292 : vector<8x128xf32>
    %300 = arith.addf %298, %299 : vector<8x128xf32>
    %c216 = arith.constant 216 : index
    %c0_180 = arith.constant 0 : index
    %301 = vector.load %arg16[%c216, %c0_180] : memref<248x1xf32, #tpu.memory_space<vmem>>, vector<8x1xf32>
    %c224 = arith.constant 224 : index
    %c0_181 = arith.constant 0 : index
    %302 = vector.load %arg16[%c224, %c0_181] : memref<248x1xf32, #tpu.memory_space<vmem>>, vector<8x1xf32>
    %cst_182 = arith.constant dense<0.000000e+00> : vector<8xf32>
    %303 = vector.multi_reduction <add>, %300, %cst_182 [1] : vector<8x128xf32> to vector<8xf32>
    %304 = vector.shape_cast %303 : vector<8xf32> to vector<8x1xf32>
    %305 = arith.mulf %300, %300 : vector<8x128xf32>
    %cst_183 = arith.constant dense<0.000000e+00> : vector<8xf32>
    %306 = vector.multi_reduction <add>, %305, %cst_183 [1] : vector<8x128xf32> to vector<8xf32>
    %307 = vector.shape_cast %306 : vector<8xf32> to vector<8x1xf32>
    %cst_184 = arith.constant 3.125000e-02 : f32
    %308 = vector.broadcast %cst_184 : f32 to vector<8x1xf32>
    %309 = arith.mulf %304, %308 : vector<8x1xf32>
    %cst_185 = arith.constant 3.125000e-02 : f32
    %310 = vector.broadcast %cst_185 : f32 to vector<8x1xf32>
    %311 = arith.mulf %307, %310 : vector<8x1xf32>
    %312 = arith.mulf %309, %309 : vector<8x1xf32>
    %313 = arith.subf %311, %312 : vector<8x1xf32>
    %cst_186 = arith.constant 9.99999974E-6 : f32
    %314 = vector.broadcast %cst_186 : f32 to vector<8x1xf32>
    %315 = arith.addf %313, %314 : vector<8x1xf32>
    %316 = math.rsqrt %315 : vector<8x1xf32>
    %317 = arith.mulf %301, %316 : vector<8x1xf32>
    %318 = vector.broadcast %309 : vector<8x1xf32> to vector<8x128xf32>
    %319 = arith.subf %300, %318 : vector<8x128xf32>
    %320 = vector.broadcast %317 : vector<8x1xf32> to vector<8x128xf32>
    %321 = arith.mulf %319, %320 : vector<8x128xf32>
    %322 = vector.broadcast %302 : vector<8x1xf32> to vector<8x128xf32>
    %323 = arith.addf %321, %322 : vector<8x128xf32>
    %cst_187 = arith.constant 0.000000e+00 : f32
    %324 = vector.broadcast %cst_187 : f32 to vector<8x128xf32>
    %325 = arith.maximumf %323, %324 : vector<8x128xf32>
    %c0_188 = arith.constant 0 : index
    %c0_189 = arith.constant 0 : index
    %c0_190 = arith.constant 0 : index
    %326 = vector.load %arg12[%c0_188, %c0_189, %c0_190] : memref<8x16x128xf32, #tpu.memory_space<vmem>>, vector<1x16x128xf32>
    %327 = vector.shape_cast %326 : vector<1x16x128xf32> to vector<16x128xf32>
    %328 = vector.extract_strided_slice %325 {offsets = [0, 0], sizes = [1, 128], strides = [1, 1]} : vector<8x128xf32> to vector<1x128xf32>
    %329 = vector.broadcast %328 : vector<1x128xf32> to vector<16x128xf32>
    %330 = arith.mulf %327, %329 : vector<16x128xf32>
    %c1_191 = arith.constant 1 : index
    %c0_192 = arith.constant 0 : index
    %c0_193 = arith.constant 0 : index
    %331 = vector.load %arg12[%c1_191, %c0_192, %c0_193] : memref<8x16x128xf32, #tpu.memory_space<vmem>>, vector<1x16x128xf32>
    %332 = vector.shape_cast %331 : vector<1x16x128xf32> to vector<16x128xf32>
    %333 = vector.extract_strided_slice %325 {offsets = [1, 0], sizes = [1, 128], strides = [1, 1]} : vector<8x128xf32> to vector<1x128xf32>
    %334 = vector.broadcast %333 : vector<1x128xf32> to vector<16x128xf32>
    %335 = arith.mulf %332, %334 : vector<16x128xf32>
    %c2_194 = arith.constant 2 : index
    %c0_195 = arith.constant 0 : index
    %c0_196 = arith.constant 0 : index
    %336 = vector.load %arg12[%c2_194, %c0_195, %c0_196] : memref<8x16x128xf32, #tpu.memory_space<vmem>>, vector<1x16x128xf32>
    %337 = vector.shape_cast %336 : vector<1x16x128xf32> to vector<16x128xf32>
    %338 = vector.extract_strided_slice %325 {offsets = [2, 0], sizes = [1, 128], strides = [1, 1]} : vector<8x128xf32> to vector<1x128xf32>
    %339 = vector.broadcast %338 : vector<1x128xf32> to vector<16x128xf32>
    %340 = arith.mulf %337, %339 : vector<16x128xf32>
    %c3_197 = arith.constant 3 : index
    %c0_198 = arith.constant 0 : index
    %c0_199 = arith.constant 0 : index
    %341 = vector.load %arg12[%c3_197, %c0_198, %c0_199] : memref<8x16x128xf32, #tpu.memory_space<vmem>>, vector<1x16x128xf32>
    %342 = vector.shape_cast %341 : vector<1x16x128xf32> to vector<16x128xf32>
    %343 = vector.extract_strided_slice %325 {offsets = [3, 0], sizes = [1, 128], strides = [1, 1]} : vector<8x128xf32> to vector<1x128xf32>
    %344 = vector.broadcast %343 : vector<1x128xf32> to vector<16x128xf32>
    %345 = arith.mulf %342, %344 : vector<16x128xf32>
    %c4_200 = arith.constant 4 : index
    %c0_201 = arith.constant 0 : index
    %c0_202 = arith.constant 0 : index
    %346 = vector.load %arg12[%c4_200, %c0_201, %c0_202] : memref<8x16x128xf32, #tpu.memory_space<vmem>>, vector<1x16x128xf32>
    %347 = vector.shape_cast %346 : vector<1x16x128xf32> to vector<16x128xf32>
    %348 = vector.extract_strided_slice %325 {offsets = [4, 0], sizes = [1, 128], strides = [1, 1]} : vector<8x128xf32> to vector<1x128xf32>
    %349 = vector.broadcast %348 : vector<1x128xf32> to vector<16x128xf32>
    %350 = arith.mulf %347, %349 : vector<16x128xf32>
    %c5_203 = arith.constant 5 : index
    %c0_204 = arith.constant 0 : index
    %c0_205 = arith.constant 0 : index
    %351 = vector.load %arg12[%c5_203, %c0_204, %c0_205] : memref<8x16x128xf32, #tpu.memory_space<vmem>>, vector<1x16x128xf32>
    %352 = vector.shape_cast %351 : vector<1x16x128xf32> to vector<16x128xf32>
    %353 = vector.extract_strided_slice %325 {offsets = [5, 0], sizes = [1, 128], strides = [1, 1]} : vector<8x128xf32> to vector<1x128xf32>
    %354 = vector.broadcast %353 : vector<1x128xf32> to vector<16x128xf32>
    %355 = arith.mulf %352, %354 : vector<16x128xf32>
    %c6_206 = arith.constant 6 : index
    %c0_207 = arith.constant 0 : index
    %c0_208 = arith.constant 0 : index
    %356 = vector.load %arg12[%c6_206, %c0_207, %c0_208] : memref<8x16x128xf32, #tpu.memory_space<vmem>>, vector<1x16x128xf32>
    %357 = vector.shape_cast %356 : vector<1x16x128xf32> to vector<16x128xf32>
    %358 = vector.extract_strided_slice %325 {offsets = [6, 0], sizes = [1, 128], strides = [1, 1]} : vector<8x128xf32> to vector<1x128xf32>
    %359 = vector.broadcast %358 : vector<1x128xf32> to vector<16x128xf32>
    %360 = arith.mulf %357, %359 : vector<16x128xf32>
    %c7_209 = arith.constant 7 : index
    %c0_210 = arith.constant 0 : index
    %c0_211 = arith.constant 0 : index
    %361 = vector.load %arg12[%c7_209, %c0_210, %c0_211] : memref<8x16x128xf32, #tpu.memory_space<vmem>>, vector<1x16x128xf32>
    %362 = vector.shape_cast %361 : vector<1x16x128xf32> to vector<16x128xf32>
    %363 = vector.extract_strided_slice %325 {offsets = [7, 0], sizes = [1, 128], strides = [1, 1]} : vector<8x128xf32> to vector<1x128xf32>
    %364 = vector.broadcast %363 : vector<1x128xf32> to vector<16x128xf32>
    %365 = arith.mulf %362, %364 : vector<16x128xf32>
    %366 = arith.addf %330, %335 : vector<16x128xf32>
    %367 = arith.addf %340, %345 : vector<16x128xf32>
    %368 = arith.addf %350, %355 : vector<16x128xf32>
    %369 = arith.addf %360, %365 : vector<16x128xf32>
    %370 = arith.addf %366, %367 : vector<16x128xf32>
    %371 = arith.addf %368, %369 : vector<16x128xf32>
    %372 = arith.addf %370, %371 : vector<16x128xf32>
    %373 = arith.truncf %372 : vector<16x128xf32> to vector<16x128xbf16>
    %c0_212 = arith.constant 0 : index
    %c0_213 = arith.constant 0 : index
    %374 = vector.load %arg13[%c0_212, %c0_213] : memref<128x128xbf16, #tpu.memory_space<vmem>>, vector<128x128xbf16>
    %cst_214 = arith.constant dense<0.000000e+00> : vector<16x128xf32>
    %375 = tpu.matmul %373, %374, %cst_214 {dimension_numbers = #tpu.dot_dimension_numbers<[1], [0], [0], [1], [0, 0, 1, 1], [], []>} : vector<16x128xbf16>, vector<128x128xbf16>, vector<16x128xf32> -> vector<16x128xf32>
    %c232 = arith.constant 232 : index
    %c0_215 = arith.constant 0 : index
    %376 = vector.load %arg16[%c232, %c0_215] : memref<248x1xf32, #tpu.memory_space<vmem>>, vector<16x1xf32>
    %377 = vector.broadcast %376 : vector<16x1xf32> to vector<16x128xf32>
    %378 = arith.addf %375, %377 : vector<16x128xf32>
    %c0_216 = arith.constant 0 : index
    %c0_217 = arith.constant 0 : index
    %379 = vector.load %arg17[%c0_216, %c0_217] : memref<16x128xf32, #tpu.memory_space<vmem>>, vector<16x128xf32>
    tpu.vector_store %arg17[%c0_216, %c0_217], %378 {strides = array<i32>} : memref<16x128xf32, #tpu.memory_space<vmem>>, vector<16x128xf32>,
    return
  }
  func.func @transform_0(%arg0: i32) -> (i32, i32) {
    %c0_i32 = arith.constant 0 : i32
    %c0_i32_0 = arith.constant 0 : i32
    %c0_i32_1 = arith.constant 0 : i32
    return %c0_i32, %c0_i32_0 : i32, i32
  }
  func.func @transform_1(%arg0: i32) -> (i32, i32) {
    %c0_i32 = arith.constant 0 : i32
    %c0_i32_0 = arith.constant 0 : i32
    %c0_i32_1 = arith.constant 0 : i32
    return %c0_i32, %c0_i32_0 : i32, i32
  }
  func.func @transform_2(%arg0: i32) -> (i32, i32) {
    %c0_i32 = arith.constant 0 : i32
    %c0_i32_0 = arith.constant 0 : i32
    %c0_i32_1 = arith.constant 0 : i32
    return %c0_i32, %c0_i32_0 : i32, i32
  }
  func.func @transform_3(%arg0: i32) -> (i32, i32) {
    %c0_i32 = arith.constant 0 : i32
    %c0_i32_0 = arith.constant 0 : i32
    %c0_i32_1 = arith.constant 0 : i32
    return %c0_i32, %c0_i32_0 : i32, i32
  }
  func.func @transform_4(%arg0: i32) -> (i32, i32, i32) {
    %c0_i32 = arith.constant 0 : i32
    %c0_i32_0 = arith.constant 0 : i32
    %c0_i32_1 = arith.constant 0 : i32
    %c0_i32_2 = arith.constant 0 : i32
    return %c0_i32, %c0_i32_0, %c0_i32_1 : i32, i32, i32
  }
  func.func @transform_5(%arg0: i32) -> (i32, i32) {
    %c0_i32 = arith.constant 0 : i32
    %c0_i32_0 = arith.constant 0 : i32
    %c0_i32_1 = arith.constant 0 : i32
    return %c0_i32, %c0_i32_0 : i32, i32
  }
  func.func @transform_6(%arg0: i32) -> (i32, i32) {
    %c0_i32 = arith.constant 0 : i32
    %c0_i32_0 = arith.constant 0 : i32
    %c0_i32_1 = arith.constant 0 : i32
    return %c0_i32, %c0_i32_0 : i32, i32
  }
  func.func @transform_7(%arg0: i32) -> (i32, i32) {
    %c0_i32 = arith.constant 0 : i32
    %c0_i32_0 = arith.constant 0 : i32
    %c0_i32_1 = arith.constant 0 : i32
    return %c0_i32, %c0_i32_0 : i32, i32
  }
  func.func @transform_8(%arg0: i32) -> (i32, i32, i32) {
    %c0_i32 = arith.constant 0 : i32
    %c0_i32_0 = arith.constant 0 : i32
    %c0_i32_1 = arith.constant 0 : i32
    %c0_i32_2 = arith.constant 0 : i32
    return %c0_i32, %c0_i32_0, %c0_i32_1 : i32, i32, i32
  }
  func.func @transform_9(%arg0: i32) -> (i32, i32) {
    %c0_i32 = arith.constant 0 : i32
    %c0_i32_0 = arith.constant 0 : i32
    %c0_i32_1 = arith.constant 0 : i32
    return %c0_i32, %c0_i32_0 : i32, i32
  }
  func.func @transform_10(%arg0: i32) -> (i32, i32, i32) {
    %c0_i32 = arith.constant 0 : i32
    %c0_i32_0 = arith.constant 0 : i32
    %c0_i32_1 = arith.constant 0 : i32
    %c0_i32_2 = arith.constant 0 : i32
    return %c0_i32, %c0_i32_0, %c0_i32_1 : i32, i32, i32
  }
  func.func @transform_11(%arg0: i32) -> (i32, i32, i32) {
    %c0_i32 = arith.constant 0 : i32
    %c0_i32_0 = arith.constant 0 : i32
    %c0_i32_1 = arith.constant 0 : i32
    %c0_i32_2 = arith.constant 0 : i32
    return %c0_i32, %c0_i32_0, %c0_i32_1 : i32, i32, i32
  }
  func.func @transform_12(%arg0: i32) -> (i32, i32) {
    %c0_i32 = arith.constant 0 : i32
    %c0_i32_0 = arith.constant 0 : i32
    %c0_i32_1 = arith.constant 0 : i32
    return %c0_i32, %c0_i32_0 : i32, i32
  }
  func.func @transform_13(%arg0: i32) -> (i32, i32) {
    %c0_i32 = arith.constant 0 : i32
    %c0_i32_0 = arith.constant 0 : i32
    %c0_i32_1 = arith.constant 0 : i32
    return %c0_i32, %c0_i32_0 : i32, i32
  }
  func.func @transform_14(%arg0: i32) -> (i32, i32) {
    %c0_i32 = arith.constant 0 : i32
    %c0_i32_0 = arith.constant 0 : i32
    %c0_i32_1 = arith.constant 0 : i32
    return %c0_i32, %c0_i32_0 : i32, i32
  }
  func.func @transform_15(%arg0: i32) -> (i32, i32) {
    %c0_i32 = arith.constant 0 : i32
    %c0_i32_0 = arith.constant 0 : i32
    %c0_i32_1 = arith.constant 0 : i32
    return %c0_i32, %c0_i32_0 : i32, i32
  }
  func.func @transform_16(%arg0: i32) -> (i32, i32) {
    %c0_i32 = arith.constant 0 : i32
    %c0_i32_0 = arith.constant 0 : i32
    %c0_i32_1 = arith.constant 0 : i32
    return %c0_i32, %c0_i32_0 : i32, i32
  }
}

</mosaic_0001>

<bundles_post_ra>
// kernel: forward.1
= control target key start
LH: loop header
LB: loop body
LE: loop exit
PB: predicated region body
PF: predicated region fallthrough
CT: control target
= control target key end

     0   :  { %s17174_s0 = inlined_call_operand.vmem [shape: bf16[360,128], index: 0, kind: input, shape index: {}]   ;;  %s17175_s1 = inlined_call_operand.vmem [shape: bf16[9,512], index: 1, kind: input, shape index: {}]   ;;  %s17176_s2 = inlined_call_operand.hbm [shape: bf16[24,360], index: 2, kind: input, shape index: {}]   ;;  %s17177_s3 = inlined_call_operand.hbm [shape: bf16[256,24], index: 3, kind: input, shape index: {}]   ;;  %s17178_s4 = inlined_call_operand.hbm [shape: bf16[16,128,512], index: 4, kind: input, shape index: {}]   ;;  %s17179_s5 = inlined_call_operand.hbm [shape: bf16[32,9], index: 5, kind: input, shape index: {}]   ;;  %s17180_s6 = inlined_call_operand.hbm [shape: bf16[144,32], index: 6, kind: input, shape index: {}]   ;;  %s17181_s7 = inlined_call_operand.hbm [shape: bf16[144,16], index: 7, kind: input, shape index: {}]   ;;  %s17182_s8 = inlined_call_operand.hbm [shape: bf16[9,512,128], index: 8, kind: input, shape index: {}]   ;;  %s17183_s9 = inlined_call_operand.hbm [shape: bf16[72,16], index: 9, kind: input, shape index: {}]   ;;  %s17184_s10 = inlined_call_operand.hbm [shape: bf16[9,128,128], index: 10, kind: input, shape index: {}]   ;;  %s17185_s11 = inlined_call_operand.hbm [shape: f32[8,16,128], index: 11, kind: input, shape index: {}]   ;;  %s17186_s12 = inlined_call_operand.hbm [shape: bf16[128,128], index: 12, kind: input, shape index: {}]   ;;  %s17187_s13 = inlined_call_operand.hbm [shape: f32[1,128], index: 13, kind: input, shape index: {}]   ;;  %s17188_s14 = inlined_call_operand.hbm [shape: f32[1,512], index: 14, kind: input, shape index: {}]   ;;  %s17189_s15 = inlined_call_operand.hbm [shape: f32[248,1], index: 15, kind: input, shape index: {}]   ;;  %s17190_s16 = inlined_call_operand.vmem [shape: f32[16,128], index: 16, kind: output, shape index: {}]  }
   0x1   :  { %17202 = sst [smem:[#allocation67_spill]] %s17174_s0 }
   0x2   :  { %21 = vsyncpa [#allocation3], 0 }
   0x3   :  { %22 = vsyncpa [#allocation5], 0 }
   0x4   :  { %23 = vsyncpa [#allocation8], 0 }
   0x5   :  { %24 = vsyncpa [#allocation11], 0 }
   0x6   :  { %25 = vsyncpa [#allocation14], 0 }
   0x7   :  { %26 = vsyncpa [#allocation17], 0 }
   0x8   :  { %27 = vsyncpa [#allocation20], 0  ;;  %s50_s23 = sshll.u32 %s17177_s3, 4  ;;  %s51_s23 = int_to_ptr.hbm [resolvable:$true] %s50_s23 }
   0x9   :  { %28 = vsyncpa [#allocation23], 0  ;;  %s15644_s24 = smov [#allocation4]   ;;  %s76_s28 = sshll.u32 %s17179_s5, 4  ;;  %s77_s28 = int_to_ptr.hbm [resolvable:$true] %s76_s28 }
   0xa   :  { %s52_s25 = sshll.u32 %s15644_s24, 4  ;;  %s15645_s29 = smov 64   ;;  %s53_s25 = int_to_ptr.vmem [resolvable:$true] %s52_s25 }
   0xb   :  { %s15646_s30 = smov 4   ;;  %s15647_s0 = smov [#allocation7]  }
   0xc   :  { %58 = dma.hbm_to_vmem [thread:$0]  %s51_s23, 2048, %s53_s25, [#allocation5], %s15645_s29, %s15645_s29, %s15646_s30  }
   0xd   :  { %s78_s17 = sshll.u32 %s15647_s0, 4  ;;  %s102_s19 = sshll.u32 %s17181_s7, 4  ;;  %s79_s17 = int_to_ptr.vmem [resolvable:$true] %s78_s17  ;;  %s103_s19 = int_to_ptr.hbm [resolvable:$true] %s102_s19 }
   0xe   :  { %84 = dma.hbm_to_vmem [thread:$0]  %s77_s28, 256, %s79_s17, [#allocation8], %s15645_s29, %s15645_s29, %s15646_s30  }
   0xf   :  { %s128_s21 = sshll.u32 %s17183_s9, 4  ;;  %s15648_s22 = smov [#allocation10]   ;;  %s129_s21 = int_to_ptr.hbm [resolvable:$true] %s128_s21 }
  0x10   :  { %s104_s24 = sshll.u32 %s15648_s22, 4  ;;  %s15649_s23 = smov [#allocation13]   ;;  %s105_s24 = int_to_ptr.vmem [resolvable:$true] %s104_s24 }
  0x11   :  { %110 = dma.hbm_to_vmem [thread:$0]  %s103_s19, 1152, %s105_s24, [#allocation11], %s15645_s29, %s15645_s29, %s15646_s30  }
  0x12   :  { %s130_s7 = sshll.u32 %s15649_s23, 4  ;;  %s154_s27 = sshll.u32 %s17185_s11, 4  ;;  %s131_s7 = int_to_ptr.vmem [resolvable:$true] %s130_s7  ;;  %s155_s27 = int_to_ptr.hbm [resolvable:$true] %s154_s27 }
  0x13   :  { %136 = dma.hbm_to_vmem [thread:$0]  %s129_s21, 576, %s131_s7, [#allocation14], %s15645_s29, %s15645_s29, %s15646_s30  }
  0x14   :  { %s15650_s9 = smov [#allocation16]   ;;  %s181_s18 = sshll.u32 %s17187_s13, 4  ;;  %s182_s18 = int_to_ptr.hbm [resolvable:$true] %s181_s18 }
  0x15   :  { %s156_s28 = sshll.u32 %s15650_s9, 4  ;;  %s15651_s3 = smov 128   ;;  %s157_s28 = int_to_ptr.vmem [resolvable:$true] %s156_s28 }
  0x16   :  { %s15652_s19 = smov 8   ;;  %s15653_s11 = smov [#allocation19]  }
  0x17   :  { %162 = dma.hbm_to_vmem [thread:$0]  %s155_s27, 2048, %s157_s28, [#allocation17], %s15651_s3, %s15651_s3, %s15652_s19  }
  0x18   :  { %s183_s5 = sshll.u32 %s15653_s11, 4  ;;  %s37_s21 = sshll.u32 %s17176_s2, 4  ;;  %s184_s5 = int_to_ptr.vmem [resolvable:$true] %s183_s5  ;;  %s38_s21 = int_to_ptr.hbm [resolvable:$true] %s37_s21 }
  0x19   :  { %186 = dma.hbm_to_vmem [thread:$0]  %s182_s18, 16, %s184_s5, [#allocation20]  }
  0x1a   :  { %s15654_s24 = smov [#allocation2]   ;;  %s63_s25 = sshll.u32 %s17178_s4, 4  ;;  %s64_s25 = int_to_ptr.hbm [resolvable:$true] %s63_s25 }
  0x1b   :  { %s39_s23 = sshll.u32 %s15654_s24, 4  ;;  %s15655_s26 = smov 192   ;;  %s40_s23 = int_to_ptr.vmem [resolvable:$true] %s39_s23 }
  0x1c   :  { %s15656_s9 = smov 12   ;;  %s15657_s27 = smov [#allocation6]  }
  0x1d   :  { %45 = dma.hbm_to_vmem [thread:$0]  %s38_s21, 576, %s40_s23, [#allocation3], %s15655_s26, %s15655_s26, %s15656_s9  }
  0x1e   :  { %s65_s28 = sshll.u32 %s15657_s27, 4  ;;  %s15658_s0 = smov 256   ;;  %s66_s28 = int_to_ptr.vmem [resolvable:$true] %s65_s28 }
  0x1f   :  { %s15659_s17 = smov 16   ;;  %s89_s18 = sshll.u32 %s17180_s6, 4  ;;  %s90_s18 = int_to_ptr.hbm [resolvable:$true] %s89_s18 }
  0x20   :  { %71 = dma.hbm_to_vmem [thread:$0]  %s64_s25, 65536, %s66_s28, [#allocation5], %s15658_s0, %s15658_s0, %s15659_s17  }
  0x21   :  { %s15660_s5 = smov [#allocation9]   ;;  %s115_s24 = sshll.u32 %s17182_s8, 4  ;;  %s116_s24 = int_to_ptr.hbm [resolvable:$true] %s115_s24 }
  0x22   :  { %s91_s20 = sshll.u32 %s15660_s5, 4  ;;  %s15661_s21 = smov [#allocation12]   ;;  %s92_s20 = int_to_ptr.vmem [resolvable:$true] %s91_s20 }
  0x23   :  { %97 = dma.hbm_to_vmem [thread:$0]  %s90_s18, 1152, %s92_s20, [#allocation8], %s15645_s29, %s15645_s29, %s15646_s30  }
  0x24   :  { %s117_s23 = sshll.u32 %s15661_s21, 4  ;;  %s141_s25 = sshll.u32 %s17184_s10, 4  ;;  %s118_s23 = int_to_ptr.vmem [resolvable:$true] %s117_s23  ;;  %s142_s25 = int_to_ptr.hbm [resolvable:$true] %s141_s25 }
  0x25   :  { %123 = dma.hbm_to_vmem [thread:$0]  %s116_s24, 36864, %s118_s23, [#allocation11], %s15645_s29, %s15645_s29, %s15646_s30  }
  0x26   :  { %s167_s8 = sshll.u32 %s17186_s12, 4  ;;  %s15662_s9 = smov [#allocation15]   ;;  %s168_s8 = int_to_ptr.hbm [resolvable:$true] %s167_s8 }
  0x27   :  { %s143_s27 = sshll.u32 %s15662_s9, 4  ;;  %s15663_s28 = smov [#allocation18]   ;;  %s144_s27 = int_to_ptr.vmem [resolvable:$true] %s143_s27 }
  0x28   :  { %149 = dma.hbm_to_vmem [thread:$0]  %s142_s25, 9216, %s144_s27, [#allocation14], %s15645_s29, %s15645_s29, %s15646_s30  }
  0x29   :  { %s169_s10 = sshll.u32 %s15663_s28, 4  ;;  %s192_s2 = sshll.u32 %s17188_s14, 4  ;;  %s170_s10 = int_to_ptr.vmem [resolvable:$true] %s169_s10  ;;  %s193_s2 = int_to_ptr.hbm [resolvable:$true] %s192_s2 }
  0x2a   :  { %175 = dma.hbm_to_vmem [thread:$0]  %s168_s8, 1024, %s170_s10, [#allocation17], %s15645_s29, %s15645_s29, %s15646_s30  }
  0x2b   :  { %s202_s18 = sshll.u32 %s17189_s15, 4  ;;  %s15664_s5 = smov [#allocation21]   ;;  %s203_s18 = int_to_ptr.hbm [resolvable:$true] %s202_s18 }
  0x2c   :  { %s194_s20 = sshll.u32 %s15664_s5, 4  ;;  %s15665_s22 = smov [#allocation22]   ;;  %s195_s20 = int_to_ptr.vmem [resolvable:$true] %s194_s20 }
  0x2d   :  { %197 = dma.hbm_to_vmem [thread:$0]  %s193_s2, 64, %s195_s20, [#allocation20]  }
  0x2e   :  { %s204_s4 = sshll.u32 %s15665_s22, 4  ;;  %s205_s4 = int_to_ptr.vmem [resolvable:$true] %s204_s4 }
  0x2f   :  { %210 = dma.hbm_to_vmem [thread:$0]  %s203_s18, 3968, %s205_s4, [#allocation23], %s15651_s3, %s15651_s3, %s15652_s19  }
  0x30   :  { %15628 = dma.done.wait [#allocation3], 576  }
  0x31   :  { %15629 = vsyncadd [#allocation3], 4294966720 }
  0x32   :  { %15630 = dma.done.wait [#allocation5], 67584  }
  0x33   :  { %15631 = vsyncadd [#allocation5], 4294899712 }
  0x34   :  { %15632 = dma.done.wait [#allocation8], 1408  }
  0x35   :  { %15633 = vsyncadd [#allocation8], 4294965888 }
  0x36   :  { %15634 = dma.done.wait [#allocation11], 38016  }
  0x37   :  { %15635 = vsyncadd [#allocation11], 4294929280 }
  0x38   :  { %15636 = dma.done.wait [#allocation14], 9792  }
  0x39   :  { %15637 = vsyncadd [#allocation14], 4294957504 }
  0x3a   :  { %15638 = dma.done.wait [#allocation17], 3072  }
  0x3b   :  { %15639 = vsyncadd [#allocation17], 4294964224 }
  0x3c   :  { %15640 = dma.done.wait [#allocation20], 80  }
  0x3d   :  { %15641 = vsyncadd [#allocation20], 4294967216 }
  0x3e   :  { %15642 = dma.done.wait [#allocation23], 3968  }
  0x3f   :  { %15643 = vsyncadd [#allocation23], 4294963328  ;;  %v15666_v0 = vmov 0   ;;  %s17203_s29 = sld [smem:[#allocation67_spill]]  ;;  %vm512_vm0 = vcmask 1043456   ;;  %v323_v11 = vld [vmem:[#allocation22 + $0x10] sm:$0xff] }
  0x40   :  { %15264 = vset.pattern.permute.xlu0 %v15666_v0  ;;  %15265 = vset.pattern.permute.xlu1 %v15666_v0  ;;  %v321_v16 = vld [vmem:[#allocation22] sm:$0xff]  ;;  %v322_v22 = vld [vmem:[#allocation22 + $0x8] sm:$0xff]  ;;  %v10400_v29 = vld [vmem:[#allocation2 + $0x8] sm:$0xf]  ;;  %vm505_vm1 = vcmask 850944   ;;  %vm795_vm11 = vcmask 195584  }
  0x41   :  { %15266 = vset.pattern.permute.xlu2 %v15666_v0  ;;  %336 = vperm.xlu0 %15264, %v323_v11   ;;  %v14291_v30 = vld [vmem:[#allocation2 + $0x10] sm:$0xf0]  ;;  %v10392_v31 = vld [vmem:[#allocation2] sm:$0xf]  ;;  %v14290_v32 = vld [vmem:[#allocation2 + $0x8] sm:$0xf0] }
  0x42   :  { %331 = vperm.xlu1 %15265, %v322_v22   ;;  %v14289_v34 = vld [vmem:[#allocation2 + $0x4] sm:$0xf]  ;;  %v10394_v35 = vld [vmem:[#allocation2 + $0xc] sm:$0xf0]  ;;  %v10401_v36 = vor.u32 %v14291_v30, %v10400_v29  ;;  %v10393_v37 = vor.u32 %v14290_v32, %v10392_v31  ;;  %v275_v39 = vld [vmem:[#allocation2 + $0x20] sm:$0xf] }
  0x43   :  { %v10397_v38 = vor.u32 %v14289_v34, %v10394_v35  ;;  %v274_v40 = vld [vmem:[#allocation2 + $0x18] sm:$0xff]  ;;  %v359_v41 = vunpack.c.l.b16 %v275_v39  ;;  %v15267_v48 = vld [vmem:[#allocation19] ss:$0 sm:$0xff]  ;;  %vm5213_vm12 = vcmask 1044480   ;;  %vm5206_vm13 = vcmask 72704  }
  0x44   :  { %v357_v42 = vunpack.c.l.b16 %v274_v40  ;;  %v358_v43 = vunpack.c.h.b16 %v274_v40 }
  0x45   :  { %v14299_v1 = vld [vmem:[%s17203_s29 + $0x38] sm:$0xff]  ;;  %v320_v3 = vld [vmem:[%s17203_s29 + $0xb0] sm:$0xf]  ;;  %v14313_v9 = vld [vmem:[%s17203_s29 + $0xa8] sm:$0xff]  ;;  %v365_v44 = vpack.c.b16 %v359_v41, %v359_v41 }
  0x46   :  { %v14307_v2 = vld [vmem:[%s17203_s29 + $0x78] sm:$0xff]  ;;  %v459_v4 = vunpack.c.l.b16 %v320_v3  ;;  %516 = vmatpush.bf16.msra.mxu0 %v14299_v1  ;;  %v14298_v5 = vld [vmem:[%s17203_s29 + $0x30] sm:$0xff]  ;;  %v14297_v10 = vld [vmem:[%s17203_s29 + $0x28] sm:$0xff]  ;;  %v363_v45 = vpack.c.b16 %v357_v42, %v357_v42  ;;  %v364_v46 = vpack.c.b16 %v358_v43, %v358_v43 }
  0x47   :  { %534 = vmatpush.bf16.msra.mxu1 %v14307_v2  ;;  %v14306_v7 = vld [vmem:[%s17203_s29 + $0x70] sm:$0xff]  ;;  %v14305_v12 = vld [vmem:[%s17203_s29 + $0x68] sm:$0xff]  ;;  %v14312_v13 = vld [vmem:[%s17203_s29 + $0xa0] sm:$0xff] }
  0x48   :  { %v482_v6 = vpack.c.b16 %v459_v4, %v459_v4  ;;  %v14296_v14 = vld [vmem:[%s17203_s29 + $0x20] sm:$0xff]  ;;  %v14311_v17 = vld [vmem:[%s17203_s29 + $0x98] sm:$0xff]  ;;  %v14310_v20 = vld [vmem:[%s17203_s29 + $0x90] sm:$0xff] }
  0x49   :  { %v14304_v15 = vld [vmem:[%s17203_s29 + $0x60] sm:$0xff]  ;;  %v14295_v18 = vld [vmem:[%s17203_s29 + $0x18] sm:$0xff]  ;;  %326 = vperm.xlu0 %15264, %v321_v16   ;;  %v14294_v21 = vld [vmem:[%s17203_s29 + $0x10] sm:$0xff] }
  0x4a   :  { %v514_v8 = vsel %vm512_vm0, %v482_v6, 0  ;;  %517 = vmatpush.bf16.msra.mxu0 %v14298_v5  ;;  %v14303_v19 = vld [vmem:[%s17203_s29 + $0x58] sm:$0xff]  ;;  %v14302_v23 = vld [vmem:[%s17203_s29 + $0x50] sm:$0xff]  ;;  %v14309_v24 = vld [vmem:[%s17203_s29 + $0x88] sm:$0xff] }
  0x4b   :  { %553 = vmatpush.bf16.msra.mxu2 %v514_v8  ;;  %535 = vmatpush.bf16.msra.mxu1 %v14306_v7  ;;  %v14293_v25 = vld [vmem:[%s17203_s29 + $0x8] sm:$0xff]  ;;  %v14308_v27 = vld [vmem:[%s17203_s29 + $0x80] sm:$0xff] }
  0x4c   :  { %v14301_v26 = vld [vmem:[%s17203_s29 + $0x48] sm:$0xff]  ;;  %v14292_v28 = vld [vmem:[%s17203_s29] sm:$0xff] }
  0x4d   :  { %v14300_v33 = vld [vmem:[%s17203_s29 + $0x40] sm:$0xff] }
  0x4e   :  { %518 = vmatpush.bf16.msra.mxu0 %v14297_v10  ;;  %v570_v41 = vld [vmem:[#allocation22 + $0x18] sm:$0xff] }
  0x4f   :  { %554 = vmatpush.bf16.msra.mxu2 %v14313_v9  ;;  %536 = vmatpush.bf16.msra.mxu1 %v14305_v12 }
  0x52   :  { %519 = vmatpush.bf16.msra.mxu0 %v14296_v14  ;;  %v575_v14 = vld [vmem:[#allocation22 + $0x40] sm:$0xff] }
  0x53   :  { %555 = vmatpush.bf16.msra.mxu2 %v14312_v13  ;;  %537 = vmatpush.bf16.msra.mxu1 %v14304_v15  ;;  %v5135_v15 = vld [vmem:[#allocation22 + $0x48] sm:$0xff] }
  0x56   :  { %520 = vmatpush.bf16.msra.mxu0 %v14295_v18 }
  0x57   :  { %556 = vmatpush.bf16.msra.mxu2 %v14311_v17  ;;  %538 = vmatpush.bf16.msra.mxu1 %v14303_v19 }
  0x5a   :  { %521 = vmatpush.bf16.msra.mxu0 %v14294_v21 }
  0x5b   :  { %557 = vmatpush.bf16.msra.mxu2 %v14310_v20  ;;  %539 = vmatpush.bf16.msra.mxu1 %v14302_v23 }
  0x5e   :  { %522 = vmatpush.bf16.msra.mxu0 %v14293_v25 }
  0x5f   :  { %558 = vmatpush.bf16.msra.mxu2 %v14309_v24  ;;  %540 = vmatpush.bf16.msra.mxu1 %v14301_v26 }
  0x62   :  { %523 = vmatpush.bf16.msra.mxu0 %v14292_v28 }
  0x63   :  { %559 = vmatpush.bf16.msra.mxu2 %v14308_v27  ;;  %541 = vmatpush.bf16.msra.mxu1 %v14300_v33 }
  0x65   :  { %524 = vmatmul.bf16.vlgmr.msra.gmra.mxu0 %v10393_v37 }
  0x66   :  { %10490 = vmatmul.msk.bf16.vlgmr.msra.gmra.mxu2 %vm505_vm1, %v10401_v36  ;;  %542 = vmatmul.bf16.vlgmr.msra.gmra.mxu1 %v10397_v38 }
  0x75   :  { %529 = vmatmul.bf16.gmra.mxu0 %v363_v45 }
  0x76   :  { %10491 = vmatmul.msk.bf16.gmra.mxu2 %vm505_vm1, %v365_v44  ;;  %547 = vmatmul.bf16.gmra.mxu1 %v364_v46 }
  0xb3   :  { %v337_v47 = vpop.permute.xlu0 %336 }
  0xb4   :  { %v332_v54 = vpop.permute.xlu1 %331  ;;  %v344_v0 = vmul.f32 %v15267_v48, %v337_v47 }
  0xb5   :  { %v343_v56 = vmul.f32 %v15267_v48, %v332_v54 }
  0xbb   :  { %v327_v49 = vpop.permute.xlu0 %326 }
  0xbc   :  { %v342_v50 = vmul.f32 %v15267_v48, %v327_v49 }
  0xe2   :  { %v525_v51 = vpop.f32.mrf.mxu0 }
  0xe3   :  { %v526_v52 = vadd.f32 %v525_v51, %v342_v50  ;;  %v543_v53 = vpop.f32.mrf.mxu1 }
  0xe5   :  { %v544_v55 = vadd.f32 %v543_v53, %v526_v52  ;;  %v573_v53 = vld [vmem:[#allocation22 + $0x30] sm:$0xff] }
  0xe9   :  { %v561_v57 = vpop.f32.mrf.mxu2 }
  0xea   :  { %v15895_v58 = vadd.f32 %v561_v57, %v544_v55  ;;  %v527_v59 = vpop.f32.mrf.mxu0 }
  0xeb   :  { %v528_v60 = vadd.f32 %v527_v59, %v343_v56  ;;  %v545_v61 = vpop.f32.mrf.mxu1  ;;  %v572_v59 = vld [vmem:[#allocation22 + $0x28] sm:$0xff] }
  0xec   :  { %576 = vadd.xlane.f32.xlu2 %v15895_v58  ;;  %v582_v2 = vmul.f32 %v15895_v58, %v15895_v58 }
  0xed   :  { %v546_v62 = vadd.f32 %v545_v61, %v528_v60  ;;  %v571_v61 = vld [vmem:[#allocation22 + $0x20] sm:$0xff] }
  0xf1   :  { %v563_v63 = vpop.f32.mrf.mxu2 }
  0xf2   :  { %v15898_v1 = vadd.f32 %v563_v63, %v546_v62  ;;  %v530_v3 = vpop.f32.mrf.mxu0 }
  0xf3   :  { %v531_v4 = vadd.f32 %v530_v3, %v344_v0  ;;  %v548_v5 = vpop.f32.mrf.mxu1  ;;  %v574_v3 = vld [vmem:[#allocation22 + $0x38] sm:$0xff] }
  0xf4   :  { %578 = vadd.xlane.f32.xlu0 %v15898_v1  ;;  %585 = vadd.xlane.f32.xlu2 %v582_v2  ;;  %v583_v13 = vmul.f32 %v15898_v1, %v15898_v1 }
  0xf5   :  { %v549_v6 = vadd.f32 %v548_v5, %v531_v4  ;;  %v5136_v4 = vld [vmem:[#allocation22 + $0x50] sm:$0xff] }
  0xf9   :  { %v566_v7 = vpop.f32.mrf.mxu2 }
  0xfa   :  { %v15903_v8 = vadd.f32 %v566_v7, %v549_v6  ;;  %v532_v9 = vpop.f32.mrf.mxu0 }
  0xfb   :  { %v550_v10 = vpop.f32.mrf.mxu1 }
  0xfc   :  { %580 = vadd.xlane.f32.xlu1 %v15903_v8  ;;  %v584_v11 = vmul.f32 %v15903_v8, %v15903_v8 }
  0xfe   :  { %589 = vadd.xlane.f32.xlu2 %v584_v11 }
 0x101   :  { %v568_v12 = vpop.f32.mrf.mxu2 }
 0x106   :  { %587 = vadd.xlane.f32.xlu2 %v583_v13 }
 0x115   :  { %672 = vperm.xlu1 %15265, %v575_v14  }
 0x11d   :  { %5139 = vperm.xlu1 %15265, %v5135_v15  }
 0x15f   :  { %v577_v16 = vpop.xlane.xlu2 %576 }
 0x160   :  { %v15910_v17 = vmul.f32 0.013888889, %v577_v16 }
 0x162   :  { %v597_v19 = vmul.f32 %v15910_v17, %v15910_v17  ;;  %v639_v16 = vsub.f32 %v15895_v58, %v15910_v17  ;;  %v14316_v58 = vld [vmem:[#allocation4 + $0x10] sm:$0xff]  ;;  %v14318_v17 = vld [vmem:[#allocation4 + $0x20] sm:$0xff] }
 0x167   :  { %v586_v18 = vpop.xlane.xlu2 %585  ;;  %v579_v28 = vpop.xlane.xlu0 %578 }
 0x168   :  { %v594_v20 = vmul.f32 0.013888889, %v586_v18  ;;  %v15918_v32 = vmul.f32 0.013888889, %v579_v28  ;;  %v14315_v28 = vld [vmem:[#allocation4 + $0x8] sm:$0xff] }
 0x16a   :  { %v600_v21 = vsub.f32 %v594_v20, %v597_v19  ;;  %v598_v37 = vmul.f32 %v15918_v32, %v15918_v32  ;;  %v640_v19 = vsub.f32 %v15898_v1, %v15918_v32  ;;  %v14317_v1 = vld [vmem:[#allocation4 + $0x18] sm:$0xff]  ;;  %v10686_v32 = vld [vmem:[#allocation6 + $0x4e0] sm:$0xf] }
 0x16c   :  { %v603_v22 = vadd.f32 1e-05, %v600_v21 }
 0x16e   :  { %15268 = vrsqrt.f32 %v603_v22  ;;  %vm612_vm3 = vweird.f32 %v603_v22 }
 0x16f   :  { %v581_v23 = vpop.xlane.xlu1 %580 }
 0x170   :  { %v15914_v24 = vmul.f32 0.013888889, %v581_v23 }
 0x171   :  { %v590_v25 = vpop.xlane.xlu2 %589 }
 0x172   :  { %v599_v26 = vmul.f32 %v15914_v24, %v15914_v24  ;;  %v596_v27 = vmul.f32 0.013888889, %v590_v25  ;;  %v641_v7 = vsub.f32 %v15903_v8, %v15914_v24 }
 0x174   :  { %v15269_v29 = vpop.eup %15268  ;;  %v602_v30 = vsub.f32 %v596_v27, %v599_v26  ;;  %v14314_v27 = vld [vmem:[#allocation4] sm:$0xff] }
 0x175   :  { %v607_v31 = vmul.f32 %v15269_v29, %v603_v22  ;;  %vm613_vm2 = vweird.f32 %v15269_v29 }
 0x176   :  { %v605_v33 = vadd.f32 1e-05, %v602_v30  ;;  %vm614_vm4 = vmor %vm612_vm3, %vm613_vm2  ;;  %v14320_v30 = vld [vmem:[#allocation4 + $0x30] sm:$0xff] }
 0x177   :  { %v608_v34 = vmul.f32 %v15269_v29, %v607_v31  ;;  %v14321_v31 = vld [vmem:[#allocation4 + $0x38] sm:$0xff] }
 0x178   :  { %15270 = vrsqrt.f32 %v605_v33  ;;  %vm632_vm6 = vweird.f32 %v605_v33 }
 0x179   :  { %v609_v35 = vmul.f32 0.5, %v608_v34  ;;  %v588_v36 = vpop.xlane.xlu2 %587  ;;  %v14486_v34 = vld [vmem:[#allocation6 + $0x4e4] sm:$0xf] }
 0x17a   :  { %v595_v38 = vmul.f32 0.013888889, %v588_v36  ;;  %v10688_v36 = vld [vmem:[#allocation6 + $0x4f0] sm:$0xf0] }
 0x17b   :  { %v610_v39 = vsub.f32 1.5, %v609_v35 }
 0x17c   :  { %v601_v40 = vsub.f32 %v595_v38, %v598_v37  ;;  %v10694_v37 = vld [vmem:[#allocation6 + $0x4e8] sm:$0xf]  ;;  %v14489_v38 = vld [vmem:[#allocation6 + $0x4f4] sm:$0xf0] }
 0x17d   :  { %v611_v42 = vmul.f32 %v15269_v29, %v610_v39  ;;  %v10691_v39 = vor.u32 %v14486_v34, %v10688_v36  ;;  %v10592_v34 = vld [vmem:[#allocation6 + $0x430] sm:$0xf0] }
 0x17e   :  { %v15271_v43 = vpop.eup %15270  ;;  %v604_v44 = vadd.f32 1e-05, %v601_v40  ;;  %v10695_v40 = vor.u32 %v14489_v38, %v10694_v37  ;;  %v14465_v38 = vld [vmem:[#allocation6 + $0x434] sm:$0xf0] }
 0x17f   :  { %v627_v45 = vmul.f32 %v15271_v43, %v605_v33  ;;  %v615_v46 = vsel %vm614_vm4, %v15269_v29, %v611_v42  ;;  %vm633_vm5 = vweird.f32 %v15271_v43  ;;  %v14319_v29 = vld [vmem:[#allocation4 + $0x28] sm:$0xff]  ;;  %v14488_v33 = vld [vmem:[#allocation6 + $0x4ec] sm:$0xf0]  ;;  %1312 = vmatpush.bf16.msrb.mxu0 %v10691_v39  ;;  %vm5745_vm4 = vcmask 130048  }
 0x180   :  { %15272 = vrsqrt.f32 %v604_v44  ;;  %v636_v47 = vmul.f32 %v615_v46, %v570_v41  ;;  %vm634_vm7 = vmor %vm632_vm6, %vm633_vm5  ;;  %vm622_vm9 = vweird.f32 %v604_v44  ;;  %v10687_v35 = vor.u32 %v14488_v33, %v10686_v32  ;;  %1326 = vmatpush.bf16.msrb.mxu1 %v10695_v40  ;;  %v10670_v41 = vld [vmem:[#allocation6 + $0x4c0] sm:$0xf]  ;;  %v14484_v42 = vld [vmem:[#allocation6 + $0x4cc] sm:$0xf0] }
 0x181   :  { %v628_v48 = vmul.f32 %v15271_v43, %v627_v45  ;;  %v10672_v45 = vld [vmem:[#allocation6 + $0x4d0] sm:$0xf0]  ;;  %v10678_v46 = vld [vmem:[#allocation6 + $0x4c8] sm:$0xf]  ;;  %v14462_v32 = vld [vmem:[#allocation6 + $0x424] sm:$0xf] }
 0x182   :  { %644 = vperm.xlu2 %15266, %v636_v47   ;;  %1298 = vmatpush.bf16.msrb.mxu2 %v10687_v35  ;;  %v14485_v47 = vld [vmem:[#allocation6 + $0x4d4] sm:$0xf0]  ;;  %v10598_v35 = vld [vmem:[#allocation6 + $0x428] sm:$0xf]  ;;  %v10595_v37 = vor.u32 %v14462_v32, %v10592_v34  ;;  %v10574_v40 = vld [vmem:[#allocation6 + $0x400] sm:$0xf] }
 0x183   :  { %v629_v49 = vmul.f32 0.5, %v628_v48  ;;  %v14322_v48 = vld [vmem:[#allocation4 + $0x40] sm:$0xff]  ;;  %v10599_v39 = vor.u32 %v14465_v38, %v10598_v35  ;;  %v14344_v34 = vld [vmem:[#allocation6 + $0x6c] sm:$0xf0] }
 0x184   :  { %v10750_v32 = vld [vmem:[#allocation6 + $0x60] sm:$0xf]  ;;  %v14342_v35 = vld [vmem:[#allocation6 + $0x64] sm:$0xf] }
 0x185   :  { %v630_v50 = vsub.f32 1.5, %v629_v49  ;;  %v10751_v38 = vor.u32 %v14344_v34, %v10750_v32 }
 0x186   :  { %v15273_v51 = vpop.eup %15272 }
 0x187   :  { %v617_v52 = vmul.f32 %v15273_v51, %v604_v44  ;;  %v631_v55 = vmul.f32 %v15271_v43, %v630_v50  ;;  %vm623_vm8 = vweird.f32 %v15273_v51  ;;  %v673_v11 = vpop.permute.xlu1 %672  ;;  %v10671_v44 = vor.u32 %v14484_v42, %v10670_v41  ;;  %v14460_v41 = vld [vmem:[#allocation6 + $0x40c] sm:$0xf0]  ;;  %v14458_v42 = vld [vmem:[#allocation6 + $0x404] sm:$0xf] }
 0x188   :  { %vm624_vm10 = vmor %vm622_vm9, %vm623_vm8  ;;  %v10679_v50 = vor.u32 %v14485_v47, %v10678_v46  ;;  %v10582_v46 = vld [vmem:[#allocation6 + $0x408] sm:$0xf]  ;;  %v14461_v47 = vld [vmem:[#allocation6 + $0x414] sm:$0xf0] }
 0x189   :  { %v618_v54 = vmul.f32 %v15273_v51, %v617_v52  ;;  %v635_v60 = vsel %vm634_vm7, %v15271_v43, %v631_v55  ;;  %v14482_v43 = vld [vmem:[#allocation6 + $0x4c4] sm:$0xf]  ;;  %1299 = vmatpush.bf16.msrb.mxu2 %v10671_v44  ;;  %v14480_v52 = vld [vmem:[#allocation6 + $0x4ac] sm:$0xf0]  ;;  %v10656_v55 = vld [vmem:[#allocation6 + $0x4b0] sm:$0xf0]  ;;  %v10575_v44 = vor.u32 %v14460_v41, %v10574_v40 }
 0x18a   :  { %662 = vperm.xlu2 %15266, %v573_v53   ;;  %v638_v63 = vmul.f32 %v635_v60, %v572_v59  ;;  %v10675_v49 = vor.u32 %v14482_v43, %v10672_v45  ;;  %1327 = vmatpush.bf16.msrb.mxu1 %v10679_v50  ;;  %v14478_v53 = vld [vmem:[#allocation6 + $0x4a4] sm:$0xf]  ;;  %v14481_v59 = vld [vmem:[#allocation6 + $0x4b4] sm:$0xf0]  ;;  %v10576_v45 = vld [vmem:[#allocation6 + $0x410] sm:$0xf0] }
 0x18b   :  { %v619_v56 = vmul.f32 0.5, %v618_v54  ;;  %v14487_v50 = vld [vmem:[#allocation6 + $0x4ec] sm:$0xf]  ;;  %v14422_v40 = vld [vmem:[#allocation6 + $0x2e4] sm:$0xf] }
 0x18c   :  { %1313 = vmatpush.bf16.msrb.mxu0 %v10675_v49  ;;  %v10583_v49 = vor.u32 %v14461_v47, %v10582_v46  ;;  %v11328_v41 = vld [vmem:[#allocation6 + $0x2f0] sm:$0xf0]  ;;  %v14340_v47 = vld [vmem:[#allocation6 + $0x4c] sm:$0xf0] }
 0x18d   :  { %v620_v57 = vsub.f32 1.5, %v619_v56  ;;  %v10662_v56 = vld [vmem:[#allocation6 + $0x4a8] sm:$0xf] }
 0x18e   :  { %v10663_v60 = vor.u32 %v14481_v59, %v10662_v56  ;;  %v10816_v56 = vld [vmem:[#allocation6 + $0xf0] sm:$0xf0] }
 0x18f   :  { %v621_v62 = vmul.f32 %v15273_v51, %v620_v57  ;;  %v10659_v57 = vor.u32 %v14478_v53, %v10656_v55  ;;  %v14358_v55 = vld [vmem:[#allocation6 + $0xe4] sm:$0xf] }
 0x190   :  { %1328 = vmatpush.bf16.msrb.mxu1 %v10663_v60  ;;  %v10819_v59 = vor.u32 %v14358_v55, %v10816_v56  ;;  %v14483_v60 = vld [vmem:[#allocation6 + $0x4cc] sm:$0xf]  ;;  %v14325_v56 = vld [vmem:[#allocation4 + $0x58] sm:$0xff] }
 0x191   :  { %v625_v0 = vsel %vm624_vm10, %v15273_v51, %v621_v62  ;;  %v10654_v51 = vld [vmem:[#allocation6 + $0x4a0] sm:$0xf]  ;;  %1314 = vmatpush.bf16.msrb.mxu0 %v10659_v57  ;;  %v14476_v62 = vld [vmem:[#allocation6 + $0x48c] sm:$0xf0] }
 0x192   :  { %654 = vperm.xlu2 %15266, %v638_v63   ;;  %v637_v2 = vmul.f32 %v625_v0, %v571_v61  ;;  %v10655_v54 = vor.u32 %v14480_v52, %v10654_v51  ;;  %v10638_v61 = vld [vmem:[#allocation6 + $0x480] sm:$0xf]  ;;  %v14474_v63 = vld [vmem:[#allocation6 + $0x484] sm:$0xf]  ;;  %v10696_v51 = vld [vmem:[#allocation6 + $0x4f8] sm:$0xf0] }
 0x193   :  { %v10814_v52 = vld [vmem:[#allocation6 + $0xe0] sm:$0xf]  ;;  %v10699_v53 = vor.u32 %v14487_v50, %v10696_v51  ;;  %v14418_v51 = vld [vmem:[#allocation6 + $0x2c4] sm:$0xf] }
 0x194   :  { %649 = vperm.xlu0 %15264, %v637_v2   ;;  %1300 = vmatpush.bf16.msrb.mxu2 %v10655_v54  ;;  %v10639_v2 = vor.u32 %v14476_v62, %v10638_v61  ;;  %v14360_v54 = vld [vmem:[#allocation6 + $0xec] sm:$0xf0]  ;;  %v10680_v61 = vld [vmem:[#allocation6 + $0x4d8] sm:$0xf0]  ;;  %v10798_v62 = vld [vmem:[#allocation6 + $0xc0] sm:$0xf] }
 0x195   :  { %v10815_v57 = vor.u32 %v14360_v54, %v10814_v52  ;;  %v11312_v52 = vld [vmem:[#allocation6 + $0x2d0] sm:$0xf0] }
 0x196   :  { %v11315_v54 = vor.u32 %v14418_v51, %v11312_v52  ;;  %v14574_v52 = vld [vmem:[#allocation6 + $0x7a4] sm:$0xf] }
 0x198   :  { %1301 = vmatpush.bf16.msrb.mxu2 %v10639_v2  ;;  %v14354_v2 = vld [vmem:[#allocation6 + $0xc4] sm:$0xf] }
 0x19a   :  { %667 = vperm.xlu2 %15266, %v574_v3   ;;  %v10640_v3 = vld [vmem:[#allocation6 + $0x490] sm:$0xf0] }
 0x19c   :  { %5144 = vperm.xlu0 %15264, %v5136_v4   ;;  %v10646_v4 = vld [vmem:[#allocation6 + $0x488] sm:$0xf] }
 0x1dc   :  { %v645_v5 = vpop.permute.xlu2 %644 }
 0x1dd   :  { %v657_v18 = vmul.f32 %v645_v5, %v639_v16  ;;  %v14477_v5 = vld [vmem:[#allocation6 + $0x494] sm:$0xf0] }
 0x1e4   :  { %v663_v6 = vpop.permute.xlu2 %662 }
 0x1e5   :  { %v675_v21 = vadd.f32 %v663_v6, %v657_v18  ;;  %v10643_v6 = vor.u32 %v14474_v63, %v10640_v3  ;;  %v10683_v63 = vor.u32 %v14483_v60, %v10680_v61  ;;  %v10800_v3 = vld [vmem:[#allocation6 + $0xd0] sm:$0xf0]  ;;  %v10600_v60 = vld [vmem:[#allocation6 + $0x438] sm:$0xf0]  ;;  %v10718_v61 = vld [vmem:[#allocation6 + $0x20] sm:$0xf] }
 0x1e7   :  { %v678_v24 = vmax.f32 %v675_v21, 0.0  ;;  %1315 = vmatpush.bf16.msrb.mxu0 %v10643_v6  ;;  %v14468_v21 = vld [vmem:[#allocation6 + $0x44c] sm:$0xf0] }
 0x1ec   :  { %v655_v9 = vpop.permute.xlu2 %654 }
 0x1ed   :  { %v659_v10 = vmul.f32 %v655_v9, %v641_v7  ;;  %v10647_v7 = vor.u32 %v14477_v5, %v10646_v4  ;;  %v10622_v9 = vld [vmem:[#allocation6 + $0x460] sm:$0xf]  ;;  %v10803_v5 = vor.u32 %v14354_v2, %v10800_v3  ;;  %v14334_v2 = vld [vmem:[#allocation6 + $0x24] sm:$0xf]  ;;  %v10720_v3 = vld [vmem:[#allocation6 + $0x30] sm:$0xf0] }
 0x1ef   :  { %v677_v12 = vadd.f32 %v673_v11, %v659_v10  ;;  %v14472_v10 = vld [vmem:[#allocation6 + $0x46c] sm:$0xf0]  ;;  %v14470_v11 = vld [vmem:[#allocation6 + $0x464] sm:$0xf]  ;;  %1329 = vmatpush.bf16.msrb.mxu1 %v10647_v7 }
 0x1f0   :  { %v14324_v7 = vld [vmem:[#allocation4 + $0x50] sm:$0xff] }
 0x1f1   :  { %v680_v13 = vmax.f32 %v677_v12, 0.0  ;;  %v10623_v12 = vor.u32 %v14472_v10, %v10622_v9  ;;  %v14479_v10 = vld [vmem:[#allocation6 + $0x4ac] sm:$0xf] }
 0x1f3   :  { %v714_v14 = vpack.c.bf16 %v680_v13, %v680_v13  ;;  %v10624_v13 = vld [vmem:[#allocation6 + $0x470] sm:$0xf0]  ;;  %1302 = vmatpush.bf16.msrb.mxu2 %v10623_v12  ;;  %v10782_v12 = vld [vmem:[#allocation6 + $0xa0] sm:$0xf] }
 0x1f4   :  { %v668_v8 = vpop.permute.xlu2 %667  ;;  %v10627_v16 = vor.u32 %v14470_v11, %v10624_v13  ;;  %v10664_v11 = vld [vmem:[#allocation6 + $0x4b8] sm:$0xf0] }
 0x1f5   :  { %v845_v15 = vsel %vm512_vm0, %v714_v14, 0  ;;  %v10630_v14 = vld [vmem:[#allocation6 + $0x468] sm:$0xf] }
 0x1f6   :  { %853 = vmatpush.bf16.msra.mxu3 %v845_v15  ;;  %v14473_v15 = vld [vmem:[#allocation6 + $0x474] sm:$0xf0]  ;;  %1316 = vmatpush.bf16.msrb.mxu0 %v10627_v16  ;;  %v14350_v16 = vld [vmem:[#allocation6 + $0xa4] sm:$0xf] }
 0x1f7   :  { %v10631_v18 = vor.u32 %v14473_v15, %v10630_v14  ;;  %v10667_v14 = vor.u32 %v14479_v10, %v10664_v11  ;;  %v14352_v15 = vld [vmem:[#allocation6 + $0xac] sm:$0xf0] }
 0x1f9   :  { %1330 = vmatpush.bf16.msrb.mxu1 %v10631_v18  ;;  %v10784_v18 = vld [vmem:[#allocation6 + $0xb0] sm:$0xf0] }
 0x206   :  { %v650_v20 = vpop.permute.xlu0 %649 }
 0x207   :  { %v658_v22 = vmul.f32 %v650_v20, %v640_v19  ;;  %v10606_v20 = vld [vmem:[#allocation6 + $0x440] sm:$0xf] }
 0x209   :  { %v676_v23 = vadd.f32 %v668_v8, %v658_v22  ;;  %v14466_v22 = vld [vmem:[#allocation6 + $0x444] sm:$0xf] }
 0x20b   :  { %v679_v25 = vmax.f32 %v676_v23, 0.0  ;;  %v10607_v23 = vor.u32 %v14468_v21, %v10606_v20  ;;  %v10787_v20 = vor.u32 %v14350_v16, %v10784_v18  ;;  %v10702_v16 = vld [vmem:[#allocation6] sm:$0xf]  ;;  %v14332_v18 = vld [vmem:[#allocation6 + $0xc] sm:$0xf0] }
 0x20d   :  { %v713_v26 = vpack.c.bf16 %v679_v25, %v678_v24  ;;  %v10608_v24 = vld [vmem:[#allocation6 + $0x450] sm:$0xf0]  ;;  %v10614_v25 = vld [vmem:[#allocation6 + $0x448] sm:$0xf]  ;;  %1303 = vmatpush.bf16.msrb.mxu2 %v10607_v23  ;;  %v10648_v23 = vld [vmem:[#allocation6 + $0x498] sm:$0xf0] }
 0x20f   :  { %854 = vmatpush.bf16.msra.mxu3 %v713_v26  ;;  %v14469_v26 = vld [vmem:[#allocation6 + $0x454] sm:$0xf0] }
 0x212   :  { %10556 = vmatmul.msk.bf16.vlgmr.msra.gmra.mxu3 %vm795_vm11, %v14314_v27 }
 0x222   :  { %10557 = vmatmul.msk.bf16.gmra.mxu3 %vm795_vm11, %v14315_v28  ;;  %v14323_v28 = vld [vmem:[#allocation4 + $0x48] sm:$0xff] }
 0x232   :  { %10558 = vmatmul.msk.bf16.gmra.mxu3 %vm795_vm11, %v14316_v58  ;;  %v10611_v58 = vor.u32 %v14466_v22, %v10608_v24 }
 0x234   :  { %1317 = vmatpush.bf16.msrb.mxu0 %v10611_v58 }
 0x238   :  { %1318 = vmatpush.bf16.msrb.mxu0 %v10595_v37  ;;  %v10752_v37 = vld [vmem:[#allocation6 + $0x70] sm:$0xf0] }
 0x242   :  { %10559 = vmatmul.msk.bf16.gmra.mxu3 %vm795_vm11, %v14317_v1  ;;  %v10615_v1 = vor.u32 %v14469_v26, %v10614_v25  ;;  %v10766_v26 = vld [vmem:[#allocation6 + $0x80] sm:$0xf] }
 0x244   :  { %1331 = vmatpush.bf16.msrb.mxu1 %v10615_v1  ;;  %v10768_v1 = vld [vmem:[#allocation6 + $0x90] sm:$0xf0] }
 0x248   :  { %1332 = vmatpush.bf16.msrb.mxu1 %v10599_v39  ;;  %v10755_v39 = vor.u32 %v14342_v35, %v10752_v37  ;;  %v14398_v37 = vld [vmem:[#allocation6 + $0x224] sm:$0xf] }
 0x24c   :  { %1333 = vmatpush.bf16.msrb.mxu1 %v10583_v49  ;;  %v10736_v49 = vld [vmem:[#allocation6 + $0x50] sm:$0xf0] }
 0x250   :  { %1534 = vmatpush.bf16.msra.mxu1 %v10819_v59  ;;  %v14463_v59 = vld [vmem:[#allocation6 + $0x42c] sm:$0xf] }
 0x252   :  { %10560 = vmatmul.msk.bf16.gmra.mxu3 %vm795_vm11, %v14318_v17 }
 0x254   :  { %1535 = vmatpush.bf16.msra.mxu1 %v10803_v5  ;;  %v10723_v5 = vor.u32 %v14334_v2, %v10720_v3 }
 0x258   :  { %1536 = vmatpush.bf16.msra.mxu1 %v10787_v20  ;;  %v10703_v20 = vor.u32 %v14332_v18, %v10702_v16  ;;  %v14570_v16 = vld [vmem:[#allocation6 + $0x784] sm:$0xf]  ;;  %v11408_v18 = vld [vmem:[#allocation6 + $0x790] sm:$0xf0] }
 0x262   :  { %10561 = vmatmul.msk.bf16.gmra.mxu3 %vm795_vm11, %v14319_v29 }
 0x272   :  { %10562 = vmatmul.msk.bf16.gmra.mxu3 %vm795_vm11, %v14320_v30  ;;  %v10590_v30 = vld [vmem:[#allocation6 + $0x420] sm:$0xf] }
 0x282   :  { %10563 = vmatmul.msk.bf16.gmra.mxu3 %vm795_vm11, %v14321_v31  ;;  %v14464_v31 = vld [vmem:[#allocation6 + $0x42c] sm:$0xf0] }
 0x283   :  { %v10591_v33 = vor.u32 %v14464_v31, %v10590_v30  ;;  %v14471_v30 = vld [vmem:[#allocation6 + $0x46c] sm:$0xf]  ;;  %v10632_v31 = vld [vmem:[#allocation6 + $0x478] sm:$0xf0] }
 0x285   :  { %1304 = vmatpush.bf16.msrb.mxu2 %v10591_v33  ;;  %v10635_v33 = vor.u32 %v14471_v30, %v10632_v31 }
 0x289   :  { %1305 = vmatpush.bf16.msrb.mxu2 %v10575_v44  ;;  %v10616_v44 = vld [vmem:[#allocation6 + $0x458] sm:$0xf0] }
 0x28d   :  { %1340 = vmatpush.bf16.msra.mxu2 %v10699_v53 }
 0x291   :  { %1341 = vmatpush.bf16.msra.mxu2 %v10683_v63  ;;  %v10603_v63 = vor.u32 %v14463_v59, %v10600_v60  ;;  %v10822_v59 = vld [vmem:[#allocation6 + $0xe8] sm:$0xf]  ;;  %v14361_v60 = vld [vmem:[#allocation6 + $0xf4] sm:$0xf0] }
 0x292   :  { %10564 = vmatmul.msk.bf16.gmra.mxu3 %vm795_vm11, %v14322_v48  ;;  %v10579_v48 = vor.u32 %v14458_v42, %v10576_v45  ;;  %v11331_v42 = vor.u32 %v14422_v40, %v11328_v41  ;;  %v10734_v45 = vld [vmem:[#allocation6 + $0x40] sm:$0xf] }
 0x293   :  { %v10735_v50 = vor.u32 %v14340_v47, %v10734_v45 }
 0x294   :  { %1319 = vmatpush.bf16.msrb.mxu0 %v10579_v48  ;;  %v14338_v48 = vld [vmem:[#allocation6 + $0x44] sm:$0xf]  ;;  %2488 = vmatpush.bf16.msrb.mxu3 %v11331_v42 }
 0x295   :  { %v856_v0 = vpop.f32.mrf.mxu3  ;;  %1342 = vmatpush.bf16.msra.mxu2 %v10667_v14  ;;  %v10739_v53 = vor.u32 %v14338_v48, %v10736_v49  ;;  %v14394_v42 = vld [vmem:[#allocation6 + $0x204] sm:$0xf]  ;;  %v11440_v49 = vld [vmem:[#allocation6 + $0x7d0] sm:$0xf0] }
 0x296   :  { %v936_v19 = vpack.c.bf16 %v856_v0, %v856_v0  ;;  %v14356_v0 = vld [vmem:[#allocation6 + $0xcc] sm:$0xf0]  ;;  %v14578_v48 = vld [vmem:[#allocation6 + $0x7c4] sm:$0xf] }
 0x297   :  { %v10799_v4 = vor.u32 %v14356_v0, %v10798_v62  ;;  %v14336_v0 = vld [vmem:[#allocation6 + $0x2c] sm:$0xf0] }
 0x298   :  { %v1356_v17 = vunpack.c.l.b16 %v936_v19  ;;  %1520 = vmatpush.bf16.msra.mxu0 %v10815_v57  ;;  %v10783_v19 = vor.u32 %v14352_v15, %v10782_v12  ;;  %2489 = vmatpush.bf16.msrb.mxu3 %v11315_v54  ;;  %v14459_v12 = vld [vmem:[#allocation6 + $0x40c] sm:$0xf] }
 0x29c   :  { %1521 = vmatpush.bf16.msra.mxu0 %v10799_v4  ;;  %v10719_v4 = vor.u32 %v14336_v0, %v10718_v61  ;;  %v14359_v61 = vld [vmem:[#allocation6 + $0xec] sm:$0xf]  ;;  %v14520_v0 = vld [vmem:[#allocation6 + $0x5ec] sm:$0xf0] }
 0x29d   :  { %v858_v8 = vpop.f32.mrf.mxu3 }
 0x29e   :  { %v937_v27 = vpack.c.bf16 %v858_v8, %v858_v8  ;;  %v14475_v8 = vld [vmem:[#allocation6 + $0x48c] sm:$0xf] }
 0x29f   :  { %v10651_v25 = vor.u32 %v14475_v8, %v10648_v23  ;;  %v14410_v23 = vld [vmem:[#allocation6 + $0x284] sm:$0xf] }
 0x2a0   :  { %v1357_v29 = vunpack.c.l.b16 %v937_v27  ;;  %1522 = vmatpush.bf16.msra.mxu0 %v10783_v19  ;;  %v14348_v27 = vld [vmem:[#allocation6 + $0x8c] sm:$0xf0]  ;;  %v14330_v19 = vld [vmem:[#allocation6 + $0x4] sm:$0xf] }
 0x2a1   :  { %v10767_v58 = vor.u32 %v14348_v27, %v10766_v26  ;;  %1343 = vmatpush.bf16.msra.mxu2 %v10651_v25  ;;  %v11280_v25 = vld [vmem:[#allocation6 + $0x290] sm:$0xf0]  ;;  %v14406_v27 = vld [vmem:[#allocation6 + $0x264] sm:$0xf] }
 0x2a2   :  { %v15938_v36 = vpack.c.b16 %v1357_v29, %v1356_v17  ;;  %10565 = vmatmul.msk.bf16.gmra.mxu3 %vm795_vm11, %v14323_v28  ;;  %v14346_v28 = vld [vmem:[#allocation6 + $0x84] sm:$0xf]  ;;  %v11283_v26 = vor.u32 %v14410_v23, %v11280_v25 }
 0x2a3   :  { %v10771_v17 = vor.u32 %v14346_v28, %v10768_v1  ;;  %v11264_v28 = vld [vmem:[#allocation6 + $0x270] sm:$0xf0] }
 0x2a4   :  { %1523 = vmatpush.bf16.msra.mxu0 %v10767_v58  ;;  %v11267_v58 = vor.u32 %v14406_v27, %v11264_v28  ;;  %v10792_v27 = vld [vmem:[#allocation6 + $0xb8] sm:$0xf0]  ;;  %v10910_v28 = vld [vmem:[#allocation6 + $0x5a0] sm:$0xf] }
 0x2a5   :  { %v861_v43 = vpop.f32.mrf.mxu3  ;;  %1537 = vmatpush.bf16.msra.mxu1 %v10771_v17  ;;  %1344 = vmatpush.bf16.msra.mxu2 %v10635_v33  ;;  %v14402_v17 = vld [vmem:[#allocation6 + $0x244] sm:$0xf] }
 0x2a6   :  { %v938_v6 = vpack.c.bf16 %v861_v43, %v861_v43  ;;  %v14467_v43 = vld [vmem:[#allocation6 + $0x44c] sm:$0xf]  ;;  %v14326_v33 = vld [vmem:[#allocation4 + $0x60] sm:$0xff] }
 0x2a7   :  { %v10619_v46 = vor.u32 %v14467_v43, %v10616_v44  ;;  %v11216_v43 = vld [vmem:[#allocation6 + $0x210] sm:$0xf0]  ;;  %v14582_v44 = vld [vmem:[#allocation6 + $0x7e4] sm:$0xf] }
 0x2a8   :  { %v1833_v21 = vunpack.c.l.b16 %v938_v6  ;;  %1524 = vmatpush.bf16.msra.mxu0 %v10751_v38  ;;  %v14414_v6 = vld [vmem:[#allocation6 + $0x2a4] sm:$0xf]  ;;  %v11232_v38 = vld [vmem:[#allocation6 + $0x230] sm:$0xf0]  ;;  %v11219_v45 = vor.u32 %v14394_v42, %v11216_v43  ;;  %v14508_v42 = vld [vmem:[#allocation6 + $0x58c] sm:$0xf0] }
 0x2a9   :  { %1538 = vmatpush.bf16.msra.mxu1 %v10755_v39  ;;  %1345 = vmatpush.bf16.msra.mxu2 %v10619_v46  ;;  %v11235_v40 = vor.u32 %v14398_v37, %v11232_v38  ;;  %v11456_v46 = vld [vmem:[#allocation6 + $0x7f0] sm:$0xf0]  ;;  %v14562_v37 = vld [vmem:[#allocation6 + $0x744] sm:$0xf] }
 0x2aa   :  { %v11459_v47 = vor.u32 %v14582_v44, %v11456_v46  ;;  %v11376_v38 = vld [vmem:[#allocation6 + $0x750] sm:$0xf0] }
 0x2ab   :  { %v11379_v43 = vor.u32 %v14562_v37, %v11376_v38  ;;  %v14328_v46 = vld [vmem:[#allocation4 + $0x70] sm:$0xff] }
 0x2ac   :  { %1525 = vmatpush.bf16.msra.mxu0 %v10735_v50  ;;  %v11443_v50 = vor.u32 %v14578_v48, %v11440_v49  ;;  %v10758_v49 = vld [vmem:[#allocation6 + $0x68] sm:$0xf] }
 0x2ad   :  { %v863_v9 = vpop.f32.mrf.mxu3  ;;  %1539 = vmatpush.bf16.msra.mxu1 %v10739_v53  ;;  %1346 = vmatpush.bf16.msra.mxu2 %v10603_v63  ;;  %v11424_v53 = vld [vmem:[#allocation6 + $0x7b0] sm:$0xf0]  ;;  %v10942_v63 = vld [vmem:[#allocation6 + $0x5e0] sm:$0xf] }
 0x2ae   :  { %v939_v13 = vpack.c.bf16 %v863_v9, %v863_v9 }
 0x2b0   :  { %v1834_v22 = vunpack.c.l.b16 %v939_v13  ;;  %v10584_v13 = vld [vmem:[#allocation6 + $0x418] sm:$0xf0]  ;;  %1526 = vmatpush.bf16.msra.mxu0 %v10719_v4  ;;  %v10823_v4 = vor.u32 %v14361_v60, %v10822_v59 }
 0x2b1   :  { %v10587_v15 = vor.u32 %v14459_v12, %v10584_v13  ;;  %1540 = vmatpush.bf16.msra.mxu1 %v10723_v5  ;;  %v10806_v5 = vld [vmem:[#allocation6 + $0xc8] sm:$0xf]  ;;  %v10808_v12 = vld [vmem:[#allocation6 + $0xd8] sm:$0xf0]  ;;  %v10926_v13 = vld [vmem:[#allocation6 + $0x5c0] sm:$0xf] }
 0x2b2   :  { %v15941_v24 = vpack.c.b16 %v1834_v22, %v1833_v21  ;;  %10566 = vmatmul.msk.bf16.gmra.mxu3 %vm795_vm11, %v14324_v7  ;;  %v11296_v7 = vld [vmem:[#allocation6 + $0x2b0] sm:$0xf0] }
 0x2b3   :  { %v11299_v11 = vor.u32 %v14414_v6, %v11296_v7  ;;  %v10704_v21 = vld [vmem:[#allocation6 + $0x10] sm:$0xf0]  ;;  %1347 = vmatpush.bf16.msra.mxu2 %v10587_v15  ;;  %v14357_v6 = vld [vmem:[#allocation6 + $0xd4] sm:$0xf0]  ;;  %v14516_v15 = vld [vmem:[#allocation6 + $0x5cc] sm:$0xf0] }
 0x2b4   :  { %v10707_v22 = vor.u32 %v14330_v19, %v10704_v21  ;;  %1527 = vmatpush.bf16.msra.mxu0 %v10703_v20  ;;  %v11411_v19 = vor.u32 %v14570_v16, %v11408_v18  ;;  %v10807_v21 = vor.u32 %v14357_v6, %v10806_v5  ;;  %v10927_v25 = vor.u32 %v14516_v15, %v10926_v13  ;;  %v14554_v5 = vld [vmem:[#allocation6 + $0x704] sm:$0xf]  ;;  %v11344_v6 = vld [vmem:[#allocation6 + $0x710] sm:$0xf0]  ;;  %v14335_v13 = vld [vmem:[#allocation6 + $0x2c] sm:$0xf] }
 0x2b5   :  { %v866_v29 = vpop.f32.mrf.mxu3  ;;  %2490 = vmatpush.bf16.msrb.mxu3 %v11299_v11  ;;  %v14355_v11 = vld [vmem:[#allocation6 + $0xcc] sm:$0xf]  ;;  %v10728_v18 = vld [vmem:[#allocation6 + $0x38] sm:$0xf0] }
 0x2b6   :  { %v940_v55 = vpack.c.bf16 %v866_v29, %v866_v29  ;;  %1541 = vmatpush.bf16.msra.mxu1 %v10707_v22  ;;  %v11248_v29 = vld [vmem:[#allocation6 + $0x250] sm:$0xf0]  ;;  %v10790_v22 = vld [vmem:[#allocation6 + $0xa8] sm:$0xf]  ;;  %v10811_v23 = vor.u32 %v14355_v11, %v10808_v12  ;;  %v14337_v12 = vld [vmem:[#allocation6 + $0x34] sm:$0xf0] }
 0x2b7   :  { %v11251_v31 = vor.u32 %v14402_v17, %v11248_v29  ;;  %v11392_v17 = vld [vmem:[#allocation6 + $0x770] sm:$0xf0]  ;;  %v10726_v11 = vld [vmem:[#allocation6 + $0x28] sm:$0xf] }
 0x2b8   :  { %v2310_v9 = vunpack.c.l.b16 %v940_v55  ;;  %v14327_v55 = vld [vmem:[#allocation4 + $0x68] sm:$0xff] }
 0x2b9   :  { %2491 = vmatpush.bf16.msrb.mxu3 %v11283_v26  ;;  %v14351_v26 = vld [vmem:[#allocation6 + $0xac] sm:$0xf] }
 0x2bd   :  { %v868_v57 = vpop.f32.mrf.mxu3  ;;  %2492 = vmatpush.bf16.msrb.mxu3 %v11267_v58  ;;  %v14512_v58 = vld [vmem:[#allocation6 + $0x5ac] sm:$0xf0] }
 0x2be   :  { %v941_v62 = vpack.c.bf16 %v868_v57, %v868_v57 }
 0x2c0   :  { %v2311_v10 = vunpack.c.l.b16 %v941_v62  ;;  %v10824_v62 = vld [vmem:[#allocation6 + $0xf8] sm:$0xf0] }
 0x2c1   :  { %2493 = vmatpush.bf16.msrb.mxu3 %v11251_v31  ;;  %v10774_v31 = vld [vmem:[#allocation6 + $0x88] sm:$0xf] }
 0x2c2   :  { %v15944_v14 = vpack.c.b16 %v2311_v10, %v2310_v9  ;;  %10567 = vmatmul.msk.bf16.gmra.mxu3 %vm795_vm11, %v14325_v56  ;;  %v11427_v56 = vor.u32 %v14574_v52, %v11424_v53  ;;  %v10827_v9 = vor.u32 %v14359_v61, %v10824_v62  ;;  %v10943_v10 = vor.u32 %v14520_v0, %v10942_v63  ;;  %v10760_v52 = vld [vmem:[#allocation6 + $0x78] sm:$0xf0]  ;;  %v10878_v53 = vld [vmem:[#allocation6 + $0x560] sm:$0xf]  ;;  %v10742_v61 = vld [vmem:[#allocation6 + $0x48] sm:$0xf] }
 0x2c3   :  { %v14341_v62 = vld [vmem:[#allocation6 + $0x54] sm:$0xf0]  ;;  %v14339_v63 = vld [vmem:[#allocation6 + $0x4c] sm:$0xf]  ;;  %v10744_v0 = vld [vmem:[#allocation6 + $0x58] sm:$0xf0] }
 0x2c4   :  { %v10747_v15 = vor.u32 %v14339_v63, %v10744_v0  ;;  %v10912_v0 = vld [vmem:[#allocation6 + $0x5b0] sm:$0xf0] }
 0x2c5   :  { %v871_v8 = vpop.f32.mrf.mxu3  ;;  %2494 = vmatpush.bf16.msrb.mxu3 %v11235_v40  ;;  %v10776_v40 = vld [vmem:[#allocation6 + $0x98] sm:$0xf0] }
 0x2c6   :  { %v942_v1 = vpack.c.bf16 %v871_v8, %v871_v8  ;;  %v14353_v8 = vld [vmem:[#allocation6 + $0xb4] sm:$0xf0] }
 0x2c8   :  { %v2787_v34 = vunpack.c.l.b16 %v942_v1  ;;  %v14566_v1 = vld [vmem:[#allocation6 + $0x764] sm:$0xf] }
 0x2c9   :  { %2495 = vmatpush.bf16.msrb.mxu3 %v11219_v45  ;;  %v11395_v29 = vor.u32 %v14566_v1, %v11392_v17  ;;  %v10712_v17 = vld [vmem:[#allocation6 + $0x18] sm:$0xf0] }
 0x2cd   :  { %v873_v30 = vpop.f32.mrf.mxu3  ;;  %2743 = vmatpush.bf16.msra.mxu3 %v11459_v47 }
 0x2ce   :  { %v943_v32 = vpack.c.bf16 %v873_v30, %v873_v30  ;;  %v10791_v30 = vor.u32 %v14353_v8, %v10790_v22  ;;  %v10727_v22 = vor.u32 %v14337_v12, %v10726_v11  ;;  %v10731_v8 = vor.u32 %v14335_v13, %v10728_v18  ;;  %v14506_v11 = vld [vmem:[#allocation6 + $0x584] sm:$0xf]  ;;  %v10896_v13 = vld [vmem:[#allocation6 + $0x590] sm:$0xf0]  ;;  %v14507_v18 = vld [vmem:[#allocation6 + $0x58c] sm:$0xf] }
 0x2d0   :  { %v2788_v35 = vunpack.c.l.b16 %v943_v32  ;;  %v14349_v32 = vld [vmem:[#allocation6 + $0x94] sm:$0xf0] }
 0x2d1   :  { %2744 = vmatpush.bf16.msra.mxu3 %v11443_v50  ;;  %v10775_v45 = vor.u32 %v14349_v32, %v10774_v31  ;;  %v14345_v50 = vld [vmem:[#allocation6 + $0x74] sm:$0xf0]  ;;  %v14518_v31 = vld [vmem:[#allocation6 + $0x5e4] sm:$0xf]  ;;  %v10944_v32 = vld [vmem:[#allocation6 + $0x5f0] sm:$0xf0] }
 0x2d2   :  { %v15947_v39 = vpack.c.b16 %v2788_v35, %v2787_v34  ;;  %10568 = vmatmul.msk.bf16.gmra.mxu3 %vm795_vm11, %v14326_v33  ;;  %v10795_v33 = vor.u32 %v14351_v26, %v10792_v27  ;;  %v10911_v34 = vor.u32 %v14512_v58, %v10910_v28  ;;  %v14347_v35 = vld [vmem:[#allocation6 + $0x8c] sm:$0xf]  ;;  %v14333_v26 = vld [vmem:[#allocation6 + $0x14] sm:$0xf0] }
 0x2d3   :  { %v10779_v47 = vor.u32 %v14347_v35, %v10776_v40  ;;  %v14331_v27 = vld [vmem:[#allocation6 + $0xc] sm:$0xf] }
 0x2d4   :  { %v10715_v38 = vor.u32 %v14331_v27, %v10712_v17  ;;  %v14503_v27 = vld [vmem:[#allocation6 + $0x56c] sm:$0xf] }
 0x2d5   :  { %v876_v41 = vpop.f32.mrf.mxu3  ;;  %2745 = vmatpush.bf16.msra.mxu3 %v11427_v56  ;;  %v11360_v56 = vld [vmem:[#allocation6 + $0x730] sm:$0xf0] }
 0x2d6   :  { %v944_v51 = vpack.c.bf16 %v876_v41, %v876_v41  ;;  %v10894_v41 = vld [vmem:[#allocation6 + $0x580] sm:$0xf] }
 0x2d7   :  { %v10895_v48 = vor.u32 %v14508_v42, %v10894_v41  ;;  %v10952_v41 = vld [vmem:[#allocation6 + $0x5f8] sm:$0xf0] }
 0x2d8   :  { %v1134_v2 = vunpack.c.l.b16 %v944_v51  ;;  %v14343_v51 = vld [vmem:[#allocation6 + $0x6c] sm:$0xf] }
 0x2d9   :  { %2746 = vmatpush.bf16.msra.mxu3 %v11411_v19  ;;  %v10763_v59 = vor.u32 %v14343_v51, %v10760_v52  ;;  %v10846_v19 = vld [vmem:[#allocation6 + $0x520] sm:$0xf]  ;;  %v10928_v52 = vld [vmem:[#allocation6 + $0x5d0] sm:$0xf0] }
 0x2dd   :  { %v878_v54 = vpop.f32.mrf.mxu3  ;;  %2747 = vmatpush.bf16.msra.mxu3 %v11395_v29  ;;  %v10830_v29 = vld [vmem:[#allocation6 + $0x500] sm:$0xf] }
 0x2de   :  { %v945_v57 = vpack.c.bf16 %v878_v54, %v878_v54  ;;  %v14504_v54 = vld [vmem:[#allocation6 + $0x56c] sm:$0xf0] }
 0x2df   :  { %v10879_v60 = vor.u32 %v14504_v54, %v10878_v53  ;;  %v10934_v53 = vld [vmem:[#allocation6 + $0x5c8] sm:$0xf]  ;;  %v14517_v54 = vld [vmem:[#allocation6 + $0x5d4] sm:$0xf0] }
 0x2e0   :  { %v1135_v3 = vunpack.c.l.b16 %v945_v57  ;;  %v10759_v57 = vor.u32 %v14345_v50, %v10758_v49  ;;  %v14514_v49 = vld [vmem:[#allocation6 + $0x5c4] sm:$0xf] }
 0x2e1   :  { %2748 = vmatpush.bf16.msra.mxu3 %v11379_v43 }
 0x2e2   :  { %v15950_v7 = vpack.c.b16 %v1135_v3, %v1134_v2  ;;  %10569 = vmatmul.msk.bf16.gmra.mxu3 %vm795_vm11, %v14327_v55  ;;  %v14558_v55 = vld [vmem:[#allocation6 + $0x724] sm:$0xf]  ;;  %v10862_v2 = vld [vmem:[#allocation6 + $0x540] sm:$0xf]  ;;  %v14500_v3 = vld [vmem:[#allocation6 + $0x54c] sm:$0xf0] }
 0x2e3   :  { %v10863_v16 = vor.u32 %v14500_v3, %v10862_v2  ;;  %v10918_v2 = vld [vmem:[#allocation6 + $0x5a8] sm:$0xf]  ;;  %v14513_v3 = vld [vmem:[#allocation6 + $0x5b4] sm:$0xf0] }
 0x2e4   :  { %1306 = vmatmul.bf16.vlgmr.msrb.gmra.mxu2 %v15950_v7  ;;  %1320 = vmatmul.bf16.vlgmr.msrb.gmra.mxu0 %v15950_v7 }
 0x2e5   :  { %1334 = vmatmul.bf16.vlgmr.msrb.gmra.mxu1 %v15950_v7  ;;  %1548 = vmatpush.bf16.msrb.mxu2 %v10823_v4  ;;  %v15956_v20 = vpop.f32.mrf.mxu3  ;;  %v11363_v4 = vor.u32 %v14558_v55, %v11360_v56  ;;  %v14515_v55 = vld [vmem:[#allocation6 + $0x5cc] sm:$0xf]  ;;  %v10936_v56 = vld [vmem:[#allocation6 + $0x5d8] sm:$0xf0] }
 0x2e6   :  { %1562 = vmatpush.bf16.msrb.mxu0 %v10827_v9  ;;  %1775 = vmatpush.bf16.msrb.mxu1 %v10943_v10  ;;  %v10743_v10 = vor.u32 %v14341_v62, %v10742_v61  ;;  %v946_v28 = vpack.c.bf16 %v15956_v20, %v15956_v20  ;;  %v14519_v20 = vld [vmem:[#allocation6 + $0x5ec] sm:$0xf]  ;;  %v10935_v61 = vor.u32 %v14517_v54, %v10934_v53  ;;  %v14510_v62 = vld [vmem:[#allocation6 + $0x5a4] sm:$0xf]  ;;  %v11552_v53 = vld [vmem:[#allocation6 + $0x3b0] sm:$0xf0] }
 0x2e7   :  { %2749 = vmatpush.bf16.msra.mxu3 %v11363_v4  ;;  %v10955_v51 = vor.u32 %v14519_v20, %v10952_v41  ;;  %v10939_v63 = vor.u32 %v14515_v55, %v10936_v56  ;;  %v11568_v20 = vld [vmem:[#allocation6 + $0x3d0] sm:$0xf0]  ;;  %v14490_v56 = vld [vmem:[#allocation6 + $0x504] sm:$0xf] }
 0x2e8   :  { %v1611_v42 = vunpack.c.l.b16 %v946_v28  ;;  %v10888_v28 = vld [vmem:[#allocation6 + $0x578] sm:$0xf0] }
 0x2e9   :  { %1549 = vmatpush.bf16.msrb.mxu2 %v10807_v21  ;;  %v14496_v21 = vld [vmem:[#allocation6 + $0x52c] sm:$0xf0] }
 0x2ea   :  { %1563 = vmatpush.bf16.msrb.mxu0 %v10811_v23  ;;  %1776 = vmatpush.bf16.msrb.mxu1 %v10927_v25  ;;  %v10847_v23 = vor.u32 %v14496_v21, %v10846_v19  ;;  %v10710_v25 = vld [vmem:[#allocation6 + $0x8] sm:$0xf]  ;;  %v10904_v19 = vld [vmem:[#allocation6 + $0x598] sm:$0xf0] }
 0x2eb   :  { %v10711_v37 = vor.u32 %v14333_v26, %v10710_v25  ;;  %v14505_v25 = vld [vmem:[#allocation6 + $0x574] sm:$0xf0] }
 0x2ed   :  { %1550 = vmatpush.bf16.msrb.mxu2 %v10791_v30  ;;  %v15958_v44 = vpop.f32.mrf.mxu3  ;;  %v14492_v30 = vld [vmem:[#allocation6 + $0x50c] sm:$0xf0] }
 0x2ee   :  { %1564 = vmatpush.bf16.msrb.mxu0 %v10795_v33  ;;  %1777 = vmatpush.bf16.msrb.mxu1 %v10911_v34  ;;  %v947_v58 = vpack.c.bf16 %v15958_v44, %v15958_v44  ;;  %v10950_v33 = vld [vmem:[#allocation6 + $0x5e8] sm:$0xf]  ;;  %v14521_v34 = vld [vmem:[#allocation6 + $0x5f4] sm:$0xf0]  ;;  %v10831_v40 = vor.u32 %v14492_v30, %v10830_v29  ;;  %v14498_v30 = vld [vmem:[#allocation6 + $0x544] sm:$0xf] }
 0x2f0   :  { %v1612_v43 = vunpack.c.l.b16 %v947_v58  ;;  %v14454_v58 = vld [vmem:[#allocation6 + $0x3e4] sm:$0xf] }
 0x2f1   :  { %1551 = vmatpush.bf16.msrb.mxu2 %v10775_v45 }
 0x2f2   :  { %1565 = vmatpush.bf16.msrb.mxu0 %v10779_v47  ;;  %1778 = vmatpush.bf16.msrb.mxu1 %v10895_v48  ;;  %v10951_v47 = vor.u32 %v14521_v34, %v10950_v33  ;;  %v14329_v48 = vld [vmem:[#allocation4 + $0x78] sm:$0xff]  ;;  %v10870_v33 = vld [vmem:[#allocation6 + $0x548] sm:$0xf] }
 0x2f3   :  { %10570 = vmatmul.msk.bf16.gmra.mxu3 %vm795_vm11, %v14328_v46  ;;  %v10947_v46 = vor.u32 %v14518_v31, %v10944_v32  ;;  %v10891_v31 = vor.u32 %v14503_v27, %v10888_v28  ;;  %v10864_v32 = vld [vmem:[#allocation6 + $0x550] sm:$0xf0]  ;;  %v14501_v34 = vld [vmem:[#allocation6 + $0x554] sm:$0xf0]  ;;  %v14388_v27 = vld [vmem:[#allocation6 + $0x1cc] sm:$0xf0] }
 0x2f4   :  { %1348 = vmatmul.bf16.vlgmr.msra.gmra.mxu2 %v15950_v7  ;;  %1528 = vmatmul.bf16.vlgmr.msra.gmra.mxu0 %v15938_v36  ;;  %v11347_v7 = vor.u32 %v14554_v5, %v11344_v6  ;;  %v14511_v5 = vld [vmem:[#allocation6 + $0x5ac] sm:$0xf]  ;;  %v10920_v6 = vld [vmem:[#allocation6 + $0x5b8] sm:$0xf0]  ;;  %v10867_v41 = vor.u32 %v14498_v30, %v10864_v32  ;;  %v14386_v28 = vld [vmem:[#allocation6 + $0x1c4] sm:$0xf] }
 0x2f5   :  { %1542 = vmatmul.bf16.vlgmr.msra.gmra.mxu1 %v15938_v36  ;;  %1552 = vmatpush.bf16.msrb.mxu2 %v10759_v57  ;;  %v886_v9 = vpop.f32.mrf.mxu3  ;;  %v15968_v57 = vpack.c.b16 %v1612_v43, %v1611_v42  ;;  %v10923_v12 = vor.u32 %v14511_v5, %v10920_v6  ;;  %v10871_v42 = vor.u32 %v14501_v34, %v10870_v33  ;;  %v14494_v43 = vld [vmem:[#allocation6 + $0x524] sm:$0xf]  ;;  %v10840_v5 = vld [vmem:[#allocation6 + $0x518] sm:$0xf0] }
 0x2f6   :  { %1566 = vmatpush.bf16.msrb.mxu0 %v10763_v59  ;;  %1779 = vmatpush.bf16.msrb.mxu1 %v10879_v60  ;;  %v948_v1 = vpack.c.bf16 %v886_v9, %v886_v9  ;;  %v10931_v60 = vor.u32 %v14514_v49, %v10928_v52  ;;  %v10915_v9 = vor.u32 %v14510_v62, %v10912_v0  ;;  %v14446_v52 = vld [vmem:[#allocation6 + $0x3a4] sm:$0xf] }
 0x2f7   :  { %2750 = vmatpush.bf16.msra.mxu3 %v11347_v7  ;;  %v14502_v7 = vld [vmem:[#allocation6 + $0x564] sm:$0xf]  ;;  %v11555_v6 = vor.u32 %v14446_v52, %v11552_v53  ;;  %v14380_v52 = vld [vmem:[#allocation6 + $0x18c] sm:$0xf0] }
 0x2f8   :  { %v2088_v44 = vunpack.c.l.b16 %v948_v1  ;;  %v11584_v1 = vld [vmem:[#allocation6 + $0x3f0] sm:$0xf0]  ;;  %v14438_v30 = vld [vmem:[#allocation6 + $0x364] sm:$0xf] }
 0x2f9   :  { %1553 = vmatpush.bf16.msrb.mxu2 %v10743_v10  ;;  %v10919_v10 = vor.u32 %v14513_v3, %v10918_v2  ;;  %v14493_v2 = vld [vmem:[#allocation6 + $0x514] sm:$0xf0]  ;;  %v14491_v3 = vld [vmem:[#allocation6 + $0x50c] sm:$0xf]  ;;  %v14378_v53 = vld [vmem:[#allocation6 + $0x184] sm:$0xf] }
 0x2fa   :  { %1567 = vmatpush.bf16.msrb.mxu0 %v10747_v15  ;;  %1780 = vmatpush.bf16.msrb.mxu1 %v10863_v16  ;;  %v10902_v15 = vld [vmem:[#allocation6 + $0x588] sm:$0xf]  ;;  %v14509_v16 = vld [vmem:[#allocation6 + $0x594] sm:$0xf0] }
 0x2fb   :  { %v10903_v21 = vor.u32 %v14509_v16, %v10902_v15  ;;  %v14393_v15 = vld [vmem:[#allocation6 + $0x1f4] sm:$0xf0] }
 0x2fd   :  { %1554 = vmatpush.bf16.msrb.mxu2 %v10727_v22  ;;  %v888_v35 = vpop.f32.mrf.mxu3  ;;  %v10907_v22 = vor.u32 %v14507_v18, %v10904_v19  ;;  %v14442_v18 = vld [vmem:[#allocation6 + $0x384] sm:$0xf]  ;;  %v11536_v19 = vld [vmem:[#allocation6 + $0x390] sm:$0xf0] }
 0x2fe   :  { %1568 = vmatpush.bf16.msrb.mxu0 %v10731_v8  ;;  %1781 = vmatpush.bf16.msrb.mxu1 %v10847_v23  ;;  %v949_v45 = vpack.c.bf16 %v888_v35, %v888_v35  ;;  %v10880_v8 = vld [vmem:[#allocation6 + $0x570] sm:$0xf0]  ;;  %v10886_v23 = vld [vmem:[#allocation6 + $0x568] sm:$0xf]  ;;  %v11587_v35 = vor.u32 %v14454_v58, %v11584_v1  ;;  %v11539_v58 = vor.u32 %v14442_v18, %v11536_v19 }
 0x2ff   :  { %v10883_v17 = vor.u32 %v14502_v7, %v10880_v8  ;;  %v10887_v29 = vor.u32 %v14505_v25, %v10886_v23  ;;  %v10843_v7 = vor.u32 %v14491_v3, %v10840_v5  ;;  %v11056_v1 = vld [vmem:[#allocation6 + $0x1d0] sm:$0xf0]  ;;  %v14376_v3 = vld [vmem:[#allocation6 + $0x16c] sm:$0xf0]  ;;  %v14374_v5 = vld [vmem:[#allocation6 + $0x164] sm:$0xf] }
 0x300   :  { %v2089_v50 = vunpack.c.l.b16 %v949_v45  ;;  %v10848_v45 = vld [vmem:[#allocation6 + $0x530] sm:$0xf0]  ;;  %v11059_v34 = vor.u32 %v14386_v28, %v11056_v1  ;;  %v14610_v1 = vld [vmem:[#allocation6 + $0x8c4] sm:$0xf] }
 0x301   :  { %1555 = vmatpush.bf16.msrb.mxu2 %v10711_v37  ;;  %v14499_v37 = vld [vmem:[#allocation6 + $0x54c] sm:$0xf]  ;;  %v10851_v54 = vor.u32 %v14494_v43, %v10848_v45  ;;  %v14385_v43 = vld [vmem:[#allocation6 + $0x1b4] sm:$0xf0]  ;;  %v11504_v45 = vld [vmem:[#allocation6 + $0x350] sm:$0xf0] }
 0x302   :  { %v15970_v59 = vpack.c.b16 %v2089_v50, %v2088_v44  ;;  %1569 = vmatpush.bf16.msrb.mxu0 %v10715_v38  ;;  %1782 = vmatpush.bf16.msrb.mxu1 %v10831_v40  ;;  %v10872_v38 = vld [vmem:[#allocation6 + $0x558] sm:$0xf0]  ;;  %v14450_v40 = vld [vmem:[#allocation6 + $0x3c4] sm:$0xf]  ;;  %v14495_v50 = vld [vmem:[#allocation6 + $0x52c] sm:$0xf] }
 0x303   :  { %10571 = vmatmul.msk.bf16.gmra.mxu3 %vm795_vm11, %v14329_v48  ;;  %v10875_v44 = vor.u32 %v14499_v37, %v10872_v38  ;;  %v11571_v49 = vor.u32 %v14450_v40, %v11568_v20  ;;  %v11038_v37 = vld [vmem:[#allocation6 + $0x1a0] sm:$0xf]  ;;  %v14384_v38 = vld [vmem:[#allocation6 + $0x1ac] sm:$0xf0]  ;;  %v14382_v40 = vld [vmem:[#allocation6 + $0x1a4] sm:$0xf] }
 0x304   :  { %1556 = vmatmul.bf16.vlgmr.msrb.gmra.mxu2 %v15938_v36 }
 0x305   :  { %1789 = vmatpush.bf16.msra.mxu2 %v10947_v46  ;;  %1570 = vmatmul.bf16.vlgmr.msrb.gmra.mxu0 %v15938_v36  ;;  %v15975_v4 = vpop.f32.mrf.mxu3  ;;  %v10899_v36 = vor.u32 %v14506_v11, %v10896_v13  ;;  %v10854_v46 = vld [vmem:[#allocation6 + $0x528] sm:$0xf]  ;;  %v14390_v11 = vld [vmem:[#allocation6 + $0x1e4] sm:$0xf] }
 0x306   :  { %1803 = vmatpush.bf16.msra.mxu0 %v10951_v47  ;;  %1817 = vmatpush.bf16.msra.mxu1 %v10955_v51  ;;  %v14497_v47 = vld [vmem:[#allocation6 + $0x534] sm:$0xf0]  ;;  %v10856_v51 = vld [vmem:[#allocation6 + $0x538] sm:$0xf0]  ;;  %v950_v62 = vpack.c.bf16 %v15975_v4, %v15975_v4  ;;  %v11078_v13 = vld [vmem:[#allocation6 + $0x1e8] sm:$0xf] }
 0x307   :  { %1783 = vmatmul.bf16.vlgmr.msrb.gmra.mxu1 %v15968_v57  ;;  %v10855_v55 = vor.u32 %v14497_v47, %v10854_v46  ;;  %v10859_v0 = vor.u32 %v14495_v50, %v10856_v51  ;;  %v11079_v25 = vor.u32 %v14393_v15, %v11078_v13  ;;  %v11039_v46 = vor.u32 %v14384_v38, %v11038_v37  ;;  %v11022_v51 = vld [vmem:[#allocation6 + $0x180] sm:$0xf]  ;;  %v11472_v13 = vld [vmem:[#allocation6 + $0x310] sm:$0xf0]  ;;  %v10982_v37 = vld [vmem:[#allocation6 + $0x128] sm:$0xf] }
 0x308   :  { %v14369_v38 = vld [vmem:[#allocation6 + $0x134] sm:$0xf0] }
 0x309   :  { %1790 = vmatpush.bf16.msra.mxu2 %v10931_v60  ;;  %v10832_v60 = vld [vmem:[#allocation6 + $0x510] sm:$0xf0] }
 0x30a   :  { %1804 = vmatpush.bf16.msra.mxu0 %v10935_v61  ;;  %1818 = vmatpush.bf16.msra.mxu1 %v10939_v63  ;;  %v10838_v61 = vld [vmem:[#allocation6 + $0x508] sm:$0xf]  ;;  %v10835_v16 = vor.u32 %v14490_v56, %v10832_v60  ;;  %v14381_v60 = vld [vmem:[#allocation6 + $0x194] sm:$0xf0] }
 0x30b   :  { %v10839_v4 = vor.u32 %v14493_v2, %v10838_v61  ;;  %v11030_v56 = vld [vmem:[#allocation6 + $0x188] sm:$0xf]  ;;  %v14430_v61 = vld [vmem:[#allocation6 + $0x324] sm:$0xf]  ;;  %v11006_v2 = vld [vmem:[#allocation6 + $0x160] sm:$0xf] }
 0x30c   :  { %v11007_v15 = vor.u32 %v14376_v3, %v11006_v2  ;;  %v11664_v2 = vld [vmem:[#allocation6 + $0x890] sm:$0xf0] }
 0x30d   :  { %1791 = vmatpush.bf16.msra.mxu2 %v10915_v9  ;;  %v15978_v26 = vpop.f32.mrf.mxu3  ;;  %v11070_v9 = vld [vmem:[#allocation6 + $0x1e0] sm:$0xf] }
 0x30e   :  { %1805 = vmatpush.bf16.msra.mxu0 %v10919_v10  ;;  %1819 = vmatpush.bf16.msra.mxu1 %v10923_v12  ;;  %v951_v63 = vpack.c.bf16 %v15978_v26, %v15978_v26  ;;  %v14392_v10 = vld [vmem:[#allocation6 + $0x1ec] sm:$0xf0]  ;;  %v11072_v12 = vld [vmem:[#allocation6 + $0x1f0] sm:$0xf0]  ;;  %v11054_v26 = vld [vmem:[#allocation6 + $0x1c0] sm:$0xf] }
 0x30f   :  { %v11075_v23 = vor.u32 %v14390_v11, %v11072_v12  ;;  %v11055_v33 = vor.u32 %v14388_v27, %v11054_v26  ;;  %v14377_v11 = vld [vmem:[#allocation6 + $0x174] sm:$0xf0]  ;;  %v14426_v12 = vld [vmem:[#allocation6 + $0x304] sm:$0xf]  ;;  %v10998_v26 = vld [vmem:[#allocation6 + $0x148] sm:$0xf] }
 0x310   :  { %v14373_v27 = vld [vmem:[#allocation6 + $0x154] sm:$0xf0] }
 0x311   :  { %1792 = vmatpush.bf16.msra.mxu2 %v10899_v36  ;;  %v2565_v36 = vunpack.c.l.b16 %v950_v62  ;;  %v11023_v62 = vor.u32 %v14380_v52, %v11022_v51  ;;  %v10960_v51 = vld [vmem:[#allocation6 + $0x110] sm:$0xf0]  ;;  %v10966_v52 = vld [vmem:[#allocation6 + $0x108] sm:$0xf] }
 0x312   :  { %1806 = vmatpush.bf16.msra.mxu0 %v10903_v21  ;;  %1820 = vmatpush.bf16.msra.mxu1 %v10907_v22  ;;  %v2566_v21 = vunpack.c.l.b16 %v951_v63  ;;  %v11071_v22 = vor.u32 %v14392_v10, %v11070_v9  ;;  %v11008_v9 = vld [vmem:[#allocation6 + $0x170] sm:$0xf0]  ;;  %v11014_v10 = vld [vmem:[#allocation6 + $0x168] sm:$0xf] }
 0x313   :  { %2496 = vmatmul.bf16.vlgmr.msrb.gmra.mxu3 %v15944_v14  ;;  %v11011_v19 = vor.u32 %v14374_v5, %v11008_v9 }
 0x314   :  { %2965 = vmatpush.bf16.msrb.mxu3 %v11587_v35  ;;  %v15989_v32 = vpack.c.b16 %v2566_v21, %v2565_v36  ;;  %v11015_v36 = vor.u32 %v14377_v11, %v11014_v10  ;;  %v10990_v21 = vld [vmem:[#allocation6 + $0x140] sm:$0xf]  ;;  %v14387_v10 = vld [vmem:[#allocation6 + $0x1cc] sm:$0xf]  ;;  %v11064_v11 = vld [vmem:[#allocation6 + $0x1d8] sm:$0xf0] }
 0x315   :  { %1793 = vmatpush.bf16.msra.mxu2 %v10883_v17  ;;  %v15981_v48 = vpop.f32.mrf.mxu3  ;;  %v11062_v17 = vld [vmem:[#allocation6 + $0x1c8] sm:$0xf] }
 0x316   :  { %1807 = vmatpush.bf16.msra.mxu0 %v10887_v29  ;;  %1821 = vmatpush.bf16.msra.mxu1 %v10891_v31  ;;  %v14389_v29 = vld [vmem:[#allocation6 + $0x1d4] sm:$0xf0]  ;;  %v11520_v31 = vld [vmem:[#allocation6 + $0x370] sm:$0xf0] }
 0x317   :  { %v11063_v35 = vor.u32 %v14389_v29, %v11062_v17  ;;  %v11523_v20 = vor.u32 %v14438_v30, %v11520_v31  ;;  %v11696_v17 = vld [vmem:[#allocation6 + $0x8d0] sm:$0xf0]  ;;  %v10999_v30 = vor.u32 %v14373_v27, %v10998_v26  ;;  %v10974_v31 = vld [vmem:[#allocation6 + $0x120] sm:$0xf]  ;;  %v11048_v26 = vld [vmem:[#allocation6 + $0x1b8] sm:$0xf0] }
 0x318   :  { %2966 = vmatpush.bf16.msrb.mxu3 %v11571_v49 }
 0x319   :  { %1794 = vmatpush.bf16.msra.mxu2 %v10867_v41  ;;  %v11040_v41 = vld [vmem:[#allocation6 + $0x1b0] sm:$0xf0] }
 0x31a   :  { %1808 = vmatpush.bf16.msra.mxu0 %v10871_v42  ;;  %1822 = vmatpush.bf16.msra.mxu1 %v10875_v44  ;;  %v11046_v42 = vld [vmem:[#allocation6 + $0x1a8] sm:$0xf]  ;;  %v14434_v44 = vld [vmem:[#allocation6 + $0x344] sm:$0xf]  ;;  %v11043_v49 = vor.u32 %v14382_v40, %v11040_v41  ;;  %v11699_v40 = vor.u32 %v14610_v1, %v11696_v17  ;;  %v14544_v1 = vld [vmem:[#allocation6 + $0x6ac] sm:$0xf0] }
 0x31b   :  { %v11047_v50 = vor.u32 %v14385_v43, %v11046_v42  ;;  %v11680_v42 = vld [vmem:[#allocation6 + $0x8b0] sm:$0xf0]  ;;  %v10958_v43 = vld [vmem:[#allocation6 + $0x100] sm:$0xf]  ;;  %v14542_v17 = vld [vmem:[#allocation6 + $0x6a4] sm:$0xf] }
 0x31c   :  { %2967 = vmatpush.bf16.msrb.mxu3 %v11555_v6 }
 0x31d   :  { %1795 = vmatpush.bf16.msra.mxu2 %v10851_v54  ;;  %v15987_v8 = vpop.f32.mrf.mxu3  ;;  %v11507_v54 = vor.u32 %v14434_v44, %v11504_v45  ;;  %v14364_v44 = vld [vmem:[#allocation6 + $0x10c] sm:$0xf0] }
 0x31e   :  { %1809 = vmatpush.bf16.msra.mxu0 %v10855_v55  ;;  %1823 = vmatpush.bf16.msra.mxu1 %v10859_v0  ;;  %v11024_v55 = vld [vmem:[#allocation6 + $0x190] sm:$0xf0]  ;;  %v11031_v0 = vor.u32 %v14381_v60, %v11030_v56  ;;  %v11198_v60 = vld [vmem:[#allocation6 + $0x6e0] sm:$0xf] }
 0x31f   :  { %v11027_v63 = vor.u32 %v14378_v53, %v11024_v55  ;;  %v14365_v53 = vld [vmem:[#allocation6 + $0x114] sm:$0xf0]  ;;  %v11080_v55 = vld [vmem:[#allocation6 + $0x1f8] sm:$0xf0] }
 0x320   :  { %2968 = vmatpush.bf16.msrb.mxu3 %v11539_v58  ;;  %v10967_v5 = vor.u32 %v14365_v53, %v10966_v52 }
 0x321   :  { %1796 = vmatpush.bf16.msra.mxu2 %v10835_v16  ;;  %v14614_v16 = vld [vmem:[#allocation6 + $0x8e4] sm:$0xf] }
 0x322   :  { %1810 = vmatpush.bf16.msra.mxu0 %v10839_v4  ;;  %1824 = vmatpush.bf16.msra.mxu1 %v10843_v7  ;;  %v11712_v4 = vld [vmem:[#allocation6 + $0x8f0] sm:$0xf0]  ;;  %v14372_v7 = vld [vmem:[#allocation6 + $0x14c] sm:$0xf0] }
 0x323   :  { %2751 = vmatmul.bf16.vlgmr.msra.gmra.mxu3 %v15989_v32  ;;  %v11715_v28 = vor.u32 %v14614_v16, %v11712_v4  ;;  %v10991_v58 = vor.u32 %v14372_v7, %v10990_v21  ;;  %v14548_v16 = vld [vmem:[#allocation6 + $0x6cc] sm:$0xf0]  ;;  %v14546_v4 = vld [vmem:[#allocation6 + $0x6c4] sm:$0xf]  ;;  %v11648_v21 = vld [vmem:[#allocation6 + $0x870] sm:$0xf0] }
 0x324   :  { %1797 = vmatmul.bf16.vlgmr.msra.gmra.mxu2 %v15968_v57  ;;  %2969 = vmatpush.bf16.msrb.mxu3 %v11523_v20  ;;  %v14606_v20 = vld [vmem:[#allocation6 + $0x8a4] sm:$0xf] }
 0x325   :  { %1997 = vmatpush.bf16.msrb.mxu2 %v11071_v22  ;;  %1811 = vmatmul.bf16.vlgmr.msra.gmra.mxu0 %v15968_v57  ;;  %v15995_v47 = vpop.f32.mrf.mxu3  ;;  %v14370_v22 = vld [vmem:[#allocation6 + $0x144] sm:$0xf]  ;;  %v11683_v56 = vor.u32 %v14606_v20, %v11680_v42  ;;  %v11150_v20 = vld [vmem:[#allocation6 + $0x680] sm:$0xf] }
 0x326   :  { %2011 = vmatpush.bf16.msrb.mxu0 %v11075_v23  ;;  %2025 = vmatpush.bf16.msrb.mxu1 %v11079_v25  ;;  %v11475_v23 = vor.u32 %v14426_v12, %v11472_v13  ;;  %v10992_v25 = vld [vmem:[#allocation6 + $0x150] sm:$0xf0]  ;;  %v14538_v42 = vld [vmem:[#allocation6 + $0x684] sm:$0xf] }
 0x327   :  { %1825 = vmatmul.bf16.vlgmr.msra.gmra.mxu1 %v15968_v57  ;;  %v11488_v57 = vld [vmem:[#allocation6 + $0x330] sm:$0xf0]  ;;  %v10995_v29 = vor.u32 %v14370_v22, %v10992_v25  ;;  %v11067_v22 = vor.u32 %v14387_v10, %v11064_v11  ;;  %v14383_v25 = vld [vmem:[#allocation6 + $0x1ac] sm:$0xf] }
 0x328   :  { %2970 = vmatpush.bf16.msrb.mxu3 %v11507_v54  ;;  %v11491_v6 = vor.u32 %v14430_v61, %v11488_v57  ;;  %v14391_v54 = vld [vmem:[#allocation6 + $0x1ec] sm:$0xf]  ;;  %v14552_v61 = vld [vmem:[#allocation6 + $0x6ec] sm:$0xf0]  ;;  %v14550_v57 = vld [vmem:[#allocation6 + $0x6e4] sm:$0xf] }
 0x329   :  { %1998 = vmatpush.bf16.msrb.mxu2 %v11055_v33  ;;  %v14368_v33 = vld [vmem:[#allocation6 + $0x12c] sm:$0xf0]  ;;  %v11199_v9 = vor.u32 %v14552_v61, %v11198_v60  ;;  %v11134_v61 = vld [vmem:[#allocation6 + $0x660] sm:$0xf] }
 0x32a   :  { %2012 = vmatpush.bf16.msrb.mxu0 %v11059_v34  ;;  %2026 = vmatpush.bf16.msrb.mxu1 %v11063_v35  ;;  %v14366_v34 = vld [vmem:[#allocation6 + $0x124] sm:$0xf]  ;;  %v10976_v35 = vld [vmem:[#allocation6 + $0x130] sm:$0xf0]  ;;  %v10975_v41 = vor.u32 %v14368_v33, %v10974_v31  ;;  %v11051_v33 = vor.u32 %v14383_v25, %v11048_v26 }
 0x32b   :  { %v11632_v31 = vld [vmem:[#allocation6 + $0x850] sm:$0xf0] }
 0x32c   :  { %2971 = vmatpush.bf16.msrb.mxu3 %v11491_v6  ;;  %v11083_v6 = vor.u32 %v14391_v54, %v11080_v55  ;;  %v14375_v54 = vld [vmem:[#allocation6 + $0x16c] sm:$0xf]  ;;  %v11016_v55 = vld [vmem:[#allocation6 + $0x178] sm:$0xf0] }
 0x32d   :  { %1999 = vmatpush.bf16.msrb.mxu2 %v11039_v46  ;;  %v15997_v18 = vpop.f32.mrf.mxu3  ;;  %v10979_v46 = vor.u32 %v14366_v34, %v10976_v35  ;;  %v14379_v35 = vld [vmem:[#allocation6 + $0x18c] sm:$0xf] }
 0x32e   :  { %2013 = vmatpush.bf16.msrb.mxu0 %v11043_v49  ;;  %2027 = vmatpush.bf16.msrb.mxu1 %v11047_v50  ;;  %v10983_v49 = vor.u32 %v14369_v38, %v10982_v37  ;;  %v14362_v50 = vld [vmem:[#allocation6 + $0x104] sm:$0xf]  ;;  %v11032_v37 = vld [vmem:[#allocation6 + $0x198] sm:$0xf0] }
 0x32f   :  { %v10963_v3 = vor.u32 %v14362_v50, %v10960_v51  ;;  %v953_v51 = vpack.c.bf16 %v15987_v8, %v15987_v8  ;;  %v11035_v52 = vor.u32 %v14379_v35, %v11032_v37  ;;  %v11808_v35 = vld [vmem:[#allocation6 + $0x9b0] sm:$0xf0] }
 0x330   :  { %2972 = vmatpush.bf16.msrb.mxu3 %v11475_v23 }
 0x331   :  { %2000 = vmatpush.bf16.msrb.mxu2 %v11023_v62  ;;  %v10959_v62 = vor.u32 %v14364_v44, %v10958_v43  ;;  %v11152_v43 = vld [vmem:[#allocation6 + $0x690] sm:$0xf0]  ;;  %v14590_v44 = vld [vmem:[#allocation6 + $0x824] sm:$0xf]  ;;  %v3043_v8 = vunpack.c.l.b16 %v953_v51  ;;  %v11206_v51 = vld [vmem:[#allocation6 + $0x6e8] sm:$0xf] }
 0x332   :  { %2014 = vmatpush.bf16.msrb.mxu0 %v11027_v63  ;;  %2028 = vmatpush.bf16.msrb.mxu1 %v11031_v0  ;;  %v11200_v63 = vld [vmem:[#allocation6 + $0x6f0] sm:$0xf0]  ;;  %v14602_v0 = vld [vmem:[#allocation6 + $0x884] sm:$0xf] }
 0x333   :  { %2973 = vmatmul.bf16.vlgmr.msrb.gmra.mxu3 %v15947_v39  ;;  %v11203_v12 = vor.u32 %v14550_v57, %v11200_v63  ;;  %v11667_v13 = vor.u32 %v14602_v0, %v11664_v2  ;;  %v14536_v57 = vld [vmem:[#allocation6 + $0x66c] sm:$0xf0]  ;;  %v11136_v63 = vld [vmem:[#allocation6 + $0x670] sm:$0xf0]  ;;  %v14646_v2 = vld [vmem:[#allocation6 + $0x9e4] sm:$0xf] }
 0x334   :  { %3220 = vmatpush.bf16.msra.mxu3 %v11715_v28  ;;  %v11600_v0 = vld [vmem:[#allocation6 + $0x810] sm:$0xf0] }
 0x335   :  { %2001 = vmatpush.bf16.msrb.mxu2 %v11007_v15  ;;  %v15999_v45 = vpop.f32.mrf.mxu3  ;;  %v11182_v15 = vld [vmem:[#allocation6 + $0x6c0] sm:$0xf] }
 0x336   :  { %2015 = vmatpush.bf16.msrb.mxu0 %v11011_v19  ;;  %2029 = vmatpush.bf16.msrb.mxu1 %v11015_v36  ;;  %v11184_v19 = vld [vmem:[#allocation6 + $0x6d0] sm:$0xf0]  ;;  %v14598_v36 = vld [vmem:[#allocation6 + $0x864] sm:$0xf]  ;;  %v11183_v23 = vor.u32 %v14548_v16, %v11182_v15  ;;  %v11118_v15 = vld [vmem:[#allocation6 + $0x640] sm:$0xf] }
 0x337   :  { %v11187_v27 = vor.u32 %v14546_v4, %v11184_v19  ;;  %v11651_v28 = vor.u32 %v14598_v36, %v11648_v21  ;;  %v14532_v4 = vld [vmem:[#allocation6 + $0x64c] sm:$0xf0]  ;;  %v14530_v19 = vld [vmem:[#allocation6 + $0x644] sm:$0xf]  ;;  %v11120_v36 = vld [vmem:[#allocation6 + $0x650] sm:$0xf0] }
 0x338   :  { %3221 = vmatpush.bf16.msra.mxu3 %v11699_v40 }
 0x339   :  { %2002 = vmatpush.bf16.msrb.mxu2 %v10991_v58  ;;  %v11166_v58 = vld [vmem:[#allocation6 + $0x6a0] sm:$0xf] }
 0x33a   :  { %2016 = vmatpush.bf16.msrb.mxu0 %v10995_v29  ;;  %2030 = vmatpush.bf16.msrb.mxu1 %v10999_v30  ;;  %v11168_v29 = vld [vmem:[#allocation6 + $0x6b0] sm:$0xf0]  ;;  %v14594_v30 = vld [vmem:[#allocation6 + $0x844] sm:$0xf]  ;;  %v11167_v34 = vor.u32 %v14544_v1, %v11166_v58  ;;  %v14367_v58 = vld [vmem:[#allocation6 + $0x12c] sm:$0xf] }
 0x33b   :  { %v11171_v38 = vor.u32 %v14542_v17, %v11168_v29  ;;  %v11635_v40 = vor.u32 %v14594_v30, %v11632_v31  ;;  %v10984_v1 = vld [vmem:[#allocation6 + $0x138] sm:$0xf0]  ;;  %v11102_v17 = vld [vmem:[#allocation6 + $0x620] sm:$0xf]  ;;  %v14528_v30 = vld [vmem:[#allocation6 + $0x62c] sm:$0xf0] }
 0x33c   :  { %3222 = vmatpush.bf16.msra.mxu3 %v11683_v56  ;;  %v11155_v56 = vor.u32 %v14538_v42, %v11152_v43  ;;  %v14526_v31 = vld [vmem:[#allocation6 + $0x624] sm:$0xf]  ;;  %v10987_v37 = vor.u32 %v14367_v58, %v10984_v1  ;;  %v11086_v42 = vld [vmem:[#allocation6 + $0x600] sm:$0xf]  ;;  %v14524_v43 = vld [vmem:[#allocation6 + $0x60c] sm:$0xf0] }
 0x33d   :  { %2003 = vmatpush.bf16.msrb.mxu2 %v10975_v41  ;;  %v16002_v7 = vpop.f32.mrf.mxu3  ;;  %v14540_v41 = vld [vmem:[#allocation6 + $0x68c] sm:$0xf0]  ;;  %v11294_v58 = vld [vmem:[#allocation6 + $0x2a0] sm:$0xf] }
 0x33e   :  { %2017 = vmatpush.bf16.msrb.mxu0 %v10979_v46  ;;  %2031 = vmatpush.bf16.msrb.mxu1 %v10983_v49  ;;  %v11616_v46 = vld [vmem:[#allocation6 + $0x830] sm:$0xf0]  ;;  %v952_v49 = vpack.c.bf16 %v15981_v48, %v15981_v48  ;;  %v11151_v53 = vor.u32 %v14540_v41, %v11150_v20  ;;  %v14586_v48 = vld [vmem:[#allocation6 + $0x804] sm:$0xf]  ;;  %v11103_v20 = vor.u32 %v14528_v30, %v11102_v17  ;;  %v14416_v1 = vld [vmem:[#allocation6 + $0x2ac] sm:$0xf0] }
 0x33f   :  { %v11619_v60 = vor.u32 %v14590_v44, %v11616_v46  ;;  %v11603_v11 = vor.u32 %v14586_v48, %v11600_v0  ;;  %v14522_v44 = vld [vmem:[#allocation6 + $0x604] sm:$0xf] }
 0x340   :  { %3223 = vmatpush.bf16.msra.mxu3 %v11667_v13  ;;  %v11000_v13 = vld [vmem:[#allocation6 + $0x158] sm:$0xf0]  ;;  %v14626_v17 = vld [vmem:[#allocation6 + $0x944] sm:$0xf] }
 0x341   :  { %2004 = vmatpush.bf16.msrb.mxu2 %v10959_v62  ;;  %v14534_v62 = vld [vmem:[#allocation6 + $0x664] sm:$0xf] }
 0x342   :  { %2018 = vmatpush.bf16.msrb.mxu0 %v10963_v3  ;;  %2032 = vmatpush.bf16.msrb.mxu1 %v10967_v5  ;;  %v11840_v3 = vld [vmem:[#allocation6 + $0x9f0] sm:$0xf0]  ;;  %v3042_v5 = vunpack.c.l.b16 %v952_v49  ;;  %v11139_v10 = vor.u32 %v14534_v62, %v11136_v63  ;;  %v11087_v63 = vor.u32 %v14524_v43, %v11086_v42  ;;  %v14412_v42 = vld [vmem:[#allocation6 + $0x28c] sm:$0xf0]  ;;  %v14622_v43 = vld [vmem:[#allocation6 + $0x924] sm:$0xf] }
 0x343   :  { %v11843_v16 = vor.u32 %v14646_v2, %v11840_v3  ;;  %v11088_v49 = vld [vmem:[#allocation6 + $0x610] sm:$0xf0]  ;;  %v11190_v3 = vld [vmem:[#allocation6 + $0x6c8] sm:$0xf] }
 0x344   :  { %2005 = vmatmul.bf16.vlgmr.msrb.gmra.mxu2 %v15941_v24  ;;  %3224 = vmatpush.bf16.msra.mxu3 %v11651_v28  ;;  %v16015_v25 = vpack.c.b16 %v3043_v8, %v3042_v5  ;;  %v11123_v28 = vor.u32 %v14530_v19, %v11120_v36  ;;  %v11792_v62 = vld [vmem:[#allocation6 + $0x990] sm:$0xf0]  ;;  %v11091_v48 = vor.u32 %v14522_v44, %v11088_v49  ;;  %v14549_v5 = vld [vmem:[#allocation6 + $0x6d4] sm:$0xf0]  ;;  %v11174_v19 = vld [vmem:[#allocation6 + $0x6a8] sm:$0xf] }
 0x345   :  { %2039 = vmatpush.bf16.msra.mxu2 %v11083_v6  ;;  %2019 = vmatmul.bf16.vlgmr.msrb.gmra.mxu0 %v15941_v24  ;;  %v16009_v50 = vpop.f32.mrf.mxu3  ;;  %v11019_v6 = vor.u32 %v14375_v54, %v11016_v55  ;;  %v14551_v54 = vld [vmem:[#allocation6 + $0x6ec] sm:$0xf]  ;;  %v11208_v55 = vld [vmem:[#allocation6 + $0x6f8] sm:$0xf0]  ;;  %v14545_v36 = vld [vmem:[#allocation6 + $0x6b4] sm:$0xf0]  ;;  %v955_v49 = vpack.c.bf16 %v15997_v18, %v15997_v18 }
 0x346   :  { %2252 = vmatpush.bf16.msra.mxu0 %v11199_v9  ;;  %2266 = vmatpush.bf16.msra.mxu1 %v11203_v12  ;;  %v11135_v9 = vor.u32 %v14536_v57, %v11134_v61  ;;  %v14371_v12 = vld [vmem:[#allocation6 + $0x14c] sm:$0xf]  ;;  %v14424_v61 = vld [vmem:[#allocation6 + $0x2ec] sm:$0xf0]  ;;  %v14634_v57 = vld [vmem:[#allocation6 + $0x984] sm:$0xf]  ;;  %v11211_v2 = vor.u32 %v14551_v54, %v11208_v55  ;;  %v11175_v30 = vor.u32 %v14545_v36, %v11174_v19 }
 0x347   :  { %2033 = vmatmul.bf16.vlgmr.msrb.gmra.mxu1 %v15941_v24  ;;  %v11003_v26 = vor.u32 %v14371_v12, %v11000_v13  ;;  %v14420_v12 = vld [vmem:[#allocation6 + $0x2cc] sm:$0xf0]  ;;  %v14630_v13 = vld [vmem:[#allocation6 + $0x964] sm:$0xf]  ;;  %v11744_v44 = vld [vmem:[#allocation6 + $0x930] sm:$0xf0] }
 0x348   :  { %3225 = vmatpush.bf16.msra.mxu3 %v11635_v40  ;;  %v10968_v40 = vld [vmem:[#allocation6 + $0x118] sm:$0xf0]  ;;  %v11142_v54 = vld [vmem:[#allocation6 + $0x668] sm:$0xf]  ;;  %v14537_v55 = vld [vmem:[#allocation6 + $0x674] sm:$0xf0] }
 0x349   :  { %2040 = vmatpush.bf16.msra.mxu2 %v11067_v22  ;;  %v14642_v22 = vld [vmem:[#allocation6 + $0x9c4] sm:$0xf]  ;;  %v11128_v36 = vld [vmem:[#allocation6 + $0x658] sm:$0xf0] }
 0x34a   :  { %2253 = vmatpush.bf16.msra.mxu0 %v11183_v23  ;;  %2267 = vmatpush.bf16.msra.mxu1 %v11187_v27  ;;  %v11824_v23 = vld [vmem:[#allocation6 + $0x9d0] sm:$0xf0]  ;;  %v11119_v27 = vor.u32 %v14532_v4, %v11118_v15  ;;  %v14678_v18 = vld [vmem:[#allocation6 + $0xae4] sm:$0xf] }
 0x34b   :  { %v11827_v29 = vor.u32 %v14642_v22, %v11824_v23  ;;  %v11776_v15 = vld [vmem:[#allocation6 + $0x970] sm:$0xf0] }
 0x34c   :  { %3226 = vmatpush.bf16.msra.mxu3 %v11619_v60  ;;  %v11779_v23 = vor.u32 %v14630_v13, %v11776_v15  ;;  %v11126_v13 = vld [vmem:[#allocation6 + $0x648] sm:$0xf]  ;;  %v14533_v15 = vld [vmem:[#allocation6 + $0x654] sm:$0xf0] }
 0x34d   :  { %2041 = vmatpush.bf16.msra.mxu2 %v11051_v33  ;;  %v16013_v21 = vpop.f32.mrf.mxu3  ;;  %v11104_v33 = vld [vmem:[#allocation6 + $0x630] sm:$0xf0] }
 0x34e   :  { %2254 = vmatpush.bf16.msra.mxu0 %v11167_v34  ;;  %2268 = vmatpush.bf16.msra.mxu1 %v11171_v38  ;;  %v14638_v34 = vld [vmem:[#allocation6 + $0x9a4] sm:$0xf]  ;;  %v14363_v38 = vld [vmem:[#allocation6 + $0x10c] sm:$0xf]  ;;  %v11107_v41 = vor.u32 %v14526_v31, %v11104_v33  ;;  %v11158_v33 = vld [vmem:[#allocation6 + $0x688] sm:$0xf] }
 0x34f   :  { %v11811_v46 = vor.u32 %v14638_v34, %v11808_v35  ;;  %v10971_v60 = vor.u32 %v14363_v38, %v10968_v40  ;;  %v14541_v34 = vld [vmem:[#allocation6 + $0x694] sm:$0xf0]  ;;  %v11295_v35 = vor.u32 %v14416_v1, %v11294_v58  ;;  %v11160_v40 = vld [vmem:[#allocation6 + $0x698] sm:$0xf0]  ;;  %v11127_v1 = vor.u32 %v14533_v15, %v11126_v13 }
 0x350   :  { %3227 = vmatpush.bf16.msra.mxu3 %v11603_v11  ;;  %v11310_v11 = vld [vmem:[#allocation6 + $0x2c0] sm:$0xf] }
 0x351   :  { %2042 = vmatpush.bf16.msra.mxu2 %v11035_v52  ;;  %v14553_v52 = vld [vmem:[#allocation6 + $0x6f4] sm:$0xf0]  ;;  %v11311_v22 = vor.u32 %v14420_v12, %v11310_v11 }
 0x352   :  { %2255 = vmatpush.bf16.msra.mxu0 %v11151_v53  ;;  %2269 = vmatpush.bf16.msra.mxu1 %v11155_v56  ;;  %v11326_v56 = vld [vmem:[#allocation6 + $0x2e0] sm:$0xf]  ;;  %v11207_v0 = vor.u32 %v14553_v52, %v11206_v51  ;;  %v11159_v51 = vor.u32 %v14541_v34, %v11158_v33  ;;  %v14529_v33 = vld [vmem:[#allocation6 + $0x634] sm:$0xf0]  ;;  %v14527_v34 = vld [vmem:[#allocation6 + $0x62c] sm:$0xf] }
 0x353   :  { %3228 = vmatmul.bf16.vlgmr.msra.gmra.mxu3 %v16015_v25  ;;  %v11327_v8 = vor.u32 %v14424_v61, %v11326_v56 }
 0x354   :  { %3483 = vmatpush.bf16.msrb.mxu3 %v11843_v16  ;;  %v11191_v16 = vor.u32 %v14549_v5, %v11190_v3  ;;  %v11968_v3 = vld [vmem:[#allocation6 + $0xaf0] sm:$0xf0] }
 0x355   :  { %2043 = vmatpush.bf16.msra.mxu2 %v11019_v6  ;;  %v16018_v53 = vpop.f32.mrf.mxu3  ;;  %v11795_v6 = vor.u32 %v14634_v57, %v11792_v62  ;;  %v14535_v57 = vld [vmem:[#allocation6 + $0x66c] sm:$0xf]  ;;  %v11144_v62 = vld [vmem:[#allocation6 + $0x678] sm:$0xf0]  ;;  %v11971_v19 = vor.u32 %v14678_v18, %v11968_v3 }
 0x356   :  { %2256 = vmatpush.bf16.msra.mxu0 %v11135_v9  ;;  %2270 = vmatpush.bf16.msra.mxu1 %v11139_v10  ;;  %v14547_v9 = vld [vmem:[#allocation6 + $0x6cc] sm:$0xf]  ;;  %v11192_v10 = vld [vmem:[#allocation6 + $0x6d8] sm:$0xf0] }
 0x357   :  { %v11195_v4 = vor.u32 %v14547_v9, %v11192_v10  ;;  %v11147_v9 = vor.u32 %v14535_v57, %v11144_v62  ;;  %v14423_v3 = vld [vmem:[#allocation6 + $0x2ec] sm:$0xf] }
 0x358   :  { %3484 = vmatpush.bf16.msrb.mxu3 %v11827_v29  ;;  %v11760_v29 = vld [vmem:[#allocation6 + $0x950] sm:$0xf0] }
 0x359   :  { %2044 = vmatpush.bf16.msra.mxu2 %v11003_v26 }
 0x35a   :  { %2257 = vmatpush.bf16.msra.mxu0 %v11119_v27  ;;  %2271 = vmatpush.bf16.msra.mxu1 %v11123_v28  ;;  %v14543_v27 = vld [vmem:[#allocation6 + $0x6ac] sm:$0xf]  ;;  %v11176_v28 = vld [vmem:[#allocation6 + $0x6b8] sm:$0xf0] }
 0x35b   :  { %v11179_v31 = vor.u32 %v14543_v27, %v11176_v28  ;;  %v14674_v27 = vld [vmem:[#allocation6 + $0xac4] sm:$0xf]  ;;  %v11952_v28 = vld [vmem:[#allocation6 + $0xad0] sm:$0xf0] }
 0x35c   :  { %3485 = vmatpush.bf16.msrb.mxu3 %v11811_v46  ;;  %v954_v46 = vpack.c.bf16 %v15995_v47, %v15995_v47  ;;  %v14618_v47 = vld [vmem:[#allocation6 + $0x904] sm:$0xf] }
 0x35d   :  { %2045 = vmatpush.bf16.msra.mxu2 %v10987_v37  ;;  %v16020_v26 = vpop.f32.mrf.mxu3  ;;  %v11763_v37 = vor.u32 %v14626_v17, %v11760_v29 }
 0x35e   :  { %2258 = vmatpush.bf16.msra.mxu0 %v11103_v20  ;;  %2272 = vmatpush.bf16.msra.mxu1 %v11107_v41  ;;  %v11278_v20 = vld [vmem:[#allocation6 + $0x280] sm:$0xf]  ;;  %v3305_v5 = vunpack.c.l.b16 %v954_v46  ;;  %v11094_v46 = vld [vmem:[#allocation6 + $0x608] sm:$0xf] }
 0x35f   :  { %v11279_v56 = vor.u32 %v14412_v42, %v11278_v20  ;;  %v14670_v42 = vld [vmem:[#allocation6 + $0xaa4] sm:$0xf] }
 0x360   :  { %3486 = vmatpush.bf16.msrb.mxu3 %v11795_v6  ;;  %v11143_v6 = vor.u32 %v14537_v55, %v11142_v54  ;;  %v14523_v55 = vld [vmem:[#allocation6 + $0x60c] sm:$0xf] }
 0x361   :  { %2046 = vmatpush.bf16.msra.mxu2 %v10971_v60  ;;  %v16025_v38 = vpop.f32.mrf.mxu0  ;;  %v11747_v60 = vor.u32 %v14622_v43, %v11744_v44  ;;  %v11936_v43 = vld [vmem:[#allocation6 + $0xab0] sm:$0xf0] }
 0x362   :  { %2259 = vmatpush.bf16.msra.mxu0 %v11087_v63  ;;  %2273 = vmatpush.bf16.msra.mxu1 %v11091_v48  ;;  %v16027_v41 = vpop.f32.mrf.mxu1  ;;  %v11262_v63 = vld [vmem:[#allocation6 + $0x260] sm:$0xf]  ;;  %v14408_v48 = vld [vmem:[#allocation6 + $0x26c] sm:$0xf0] }
 0x363   :  { %v11263_v10 = vor.u32 %v14408_v48, %v11262_v63  ;;  %v11939_v63 = vor.u32 %v14670_v42, %v11936_v43  ;;  %v14396_v48 = vld [vmem:[#allocation6 + $0x20c] sm:$0xf0] }
 0x364   :  { %2047 = vmatmul.bf16.vlgmr.msra.gmra.mxu2 %v15941_v24  ;;  %3487 = vmatpush.bf16.msrb.mxu3 %v11779_v23  ;;  %v14539_v24 = vld [vmem:[#allocation6 + $0x68c] sm:$0xf]  ;;  %v14404_v23 = vld [vmem:[#allocation6 + $0x24c] sm:$0xf0] }
 0x365   :  { %2280 = vmatpush.bf16.msrb.mxu2 %v11207_v0  ;;  %2274 = vmatmul.bf16.vlgmr.msra.gmra.mxu1 %v15970_v59  ;;  %v11163_v52 = vor.u32 %v14539_v24, %v11160_v40  ;;  %v16033_v61 = vpop.f32.mrf.mxu3  ;;  %v11728_v0 = vld [vmem:[#allocation6 + $0x910] sm:$0xf0]  ;;  %v11230_v24 = vld [vmem:[#allocation6 + $0x220] sm:$0xf]  ;;  %v14400_v40 = vld [vmem:[#allocation6 + $0x22c] sm:$0xf0] }
 0x366   :  { %2294 = vmatpush.bf16.msrb.mxu0 %v11211_v2  ;;  %2474 = vmatpush.bf16.msrb.mxu1 %v11327_v8  ;;  %v3306_v8 = vunpack.c.l.b16 %v955_v49  ;;  %v11731_v11 = vor.u32 %v14618_v47, %v11728_v0  ;;  %v14525_v49 = vld [vmem:[#allocation6 + $0x614] sm:$0xf0]  ;;  %v11334_v47 = vld [vmem:[#allocation6 + $0x2e8] sm:$0xf] }
 0x367   :  { %2260 = vmatmul.bf16.vlgmr.msra.gmra.mxu0 %v15970_v59  ;;  %v1307_v2 = vpop.f32.mrf.mxu2  ;;  %v14425_v0 = vld [vmem:[#allocation6 + $0x2f4] sm:$0xf0] }
 0x368   :  { %3488 = vmatpush.bf16.msrb.mxu3 %v11763_v37  ;;  %v16039_v58 = vpack.c.b16 %v3306_v8, %v3305_v5  ;;  %v11112_v37 = vld [vmem:[#allocation6 + $0x638] sm:$0xf0]  ;;  %v11454_v8 = vld [vmem:[#allocation6 + $0x7e0] sm:$0xf] }
 0x369   :  { %2281 = vmatpush.bf16.msrb.mxu2 %v11191_v16  ;;  %v16035_v12 = vpop.f32.mrf.mxu0  ;;  %v14531_v16 = vld [vmem:[#allocation6 + $0x64c] sm:$0xf]  ;;  %v11336_v5 = vld [vmem:[#allocation6 + $0x2f8] sm:$0xf0] }
 0x36a   :  { %2295 = vmatpush.bf16.msrb.mxu0 %v11195_v4  ;;  %2475 = vmatpush.bf16.msrb.mxu1 %v11311_v22  ;;  %v16037_v4 = vpop.f32.mrf.mxu1  ;;  %v11246_v22 = vld [vmem:[#allocation6 + $0x240] sm:$0xf]  ;;  %v11131_v17 = vor.u32 %v14531_v16, %v11128_v36  ;;  %v11335_v16 = vor.u32 %v14425_v0, %v11334_v47  ;;  %v11318_v36 = vld [vmem:[#allocation6 + $0x2c8] sm:$0xf] }
 0x36b   :  { %v11247_v29 = vor.u32 %v14404_v23, %v11246_v22 }
 0x36c   :  { %3489 = vmatpush.bf16.msrb.mxu3 %v11747_v60  ;;  %v11214_v60 = vld [vmem:[#allocation6 + $0x200] sm:$0xf] }
 0x36d   :  { %2282 = vmatpush.bf16.msrb.mxu2 %v11175_v30  ;;  %v16041_v30 = vpop.f32.mrf.mxu3  ;;  %v11215_v13 = vor.u32 %v14396_v48, %v11214_v60 }
 0x36e   :  { %2296 = vmatpush.bf16.msrb.mxu0 %v11179_v31  ;;  %2476 = vmatpush.bf16.msrb.mxu1 %v11295_v35  ;;  %v11110_v31 = vld [vmem:[#allocation6 + $0x628] sm:$0xf]  ;;  %v11955_v35 = vor.u32 %v14674_v27, %v11952_v28  ;;  %v14419_v28 = vld [vmem:[#allocation6 + $0x2cc] sm:$0xf] }
 0x36f   :  { %v16043_v20 = vpop.f32.mrf.mxu2  ;;  %v11111_v44 = vor.u32 %v14529_v33, %v11110_v31  ;;  %v14662_v31 = vld [vmem:[#allocation6 + $0xa64] sm:$0xf]  ;;  %v11904_v33 = vld [vmem:[#allocation6 + $0xa70] sm:$0xf0] }
 0x370   :  { %3490 = vmatpush.bf16.msrb.mxu3 %v11731_v11  ;;  %v11920_v11 = vld [vmem:[#allocation6 + $0xa90] sm:$0xf0]  ;;  %v11907_v43 = vor.u32 %v14662_v31, %v11904_v33 }
 0x371   :  { %2283 = vmatpush.bf16.msrb.mxu2 %v11159_v51  ;;  %v11115_v51 = vor.u32 %v14527_v34, %v11112_v37  ;;  %v1529_v54 = vpop.f32.mrf.mxu0  ;;  %v11856_v31 = vld [vmem:[#allocation6 + $0xa10] sm:$0xf0] }
 0x372   :  { %2297 = vmatpush.bf16.msrb.mxu0 %v11163_v52  ;;  %2477 = vmatpush.bf16.msrb.mxu1 %v11279_v56  ;;  %v11231_v52 = vor.u32 %v14400_v40, %v11230_v24  ;;  %v11096_v56 = vld [vmem:[#allocation6 + $0x618] sm:$0xf0]  ;;  %v16046_v57 = vadd.f32 %v1529_v54, %v1307_v2  ;;  %v1543_v62 = vpop.f32.mrf.mxu1  ;;  %v11302_v24 = vld [vmem:[#allocation6 + $0x2a8] sm:$0xf]  ;;  %v14417_v40 = vld [vmem:[#allocation6 + $0x2b4] sm:$0xf0] }
 0x373   :  { %3491 = vmatmul.bf16.vlgmr.msrb.gmra.mxu3 %v16039_v58  ;;  %v16049_v18 = vadd.f32 %v1543_v62, %v16025_v38  ;;  %v11099_v2 = vor.u32 %v14523_v55, %v11096_v56  ;;  %v14421_v38 = vld [vmem:[#allocation6 + $0x2d4] sm:$0xf0]  ;;  %v11888_v54 = vld [vmem:[#allocation6 + $0xa50] sm:$0xf0]  ;;  %v11303_v56 = vor.u32 %v14417_v40, %v11302_v24  ;;  %v11286_v62 = vld [vmem:[#allocation6 + $0x288] sm:$0xf] }
 0x374   :  { %3746 = vmatpush.bf16.msra.mxu3 %v11971_v19  ;;  %v11339_v19 = vor.u32 %v14423_v3, %v11336_v5  ;;  %v11288_v3 = vld [vmem:[#allocation6 + $0x298] sm:$0xf0]  ;;  %v11406_v5 = vld [vmem:[#allocation6 + $0x780] sm:$0xf]  ;;  %v12096_v33 = vld [vmem:[#allocation6 + $0xbf0] sm:$0xf0] }
 0x375   :  { %2284 = vmatpush.bf16.msrb.mxu2 %v11143_v6  ;;  %v11095_v6 = vor.u32 %v14525_v49, %v11094_v46  ;;  %v11304_v46 = vld [vmem:[#allocation6 + $0x2b8] sm:$0xf0]  ;;  %v11422_v49 = vld [vmem:[#allocation6 + $0x7a0] sm:$0xf] }
 0x376   :  { %2298 = vmatpush.bf16.msrb.mxu0 %v11147_v9  ;;  %2478 = vmatpush.bf16.msrb.mxu1 %v11263_v10  ;;  %v14584_v9 = vld [vmem:[#allocation6 + $0x7ec] sm:$0xf0]  ;;  %v14666_v10 = vld [vmem:[#allocation6 + $0xa84] sm:$0xf]  ;;  %v16051_v15 = vpop.f32.mrf.mxu3 }
 0x377   :  { %v11455_v22 = vor.u32 %v14584_v9, %v11454_v8  ;;  %v11923_v23 = vor.u32 %v14666_v10, %v11920_v11  ;;  %v1349_v27 = vpop.f32.mrf.mxu2  ;;  %v14572_v8 = vld [vmem:[#allocation6 + $0x78c] sm:$0xf0]  ;;  %v11872_v9 = vld [vmem:[#allocation6 + $0xa30] sm:$0xf0]  ;;  %v956_v10 = vpack.c.bf16 %v15999_v45, %v15999_v45  ;;  %v957_v11 = vpack.c.bf16 %v16002_v7, %v16002_v7  ;;  %v14710_v7 = vld [vmem:[#allocation6 + $0xbe4] sm:$0xf] }
 0x378   :  { %3747 = vmatpush.bf16.msra.mxu3 %v11955_v35  ;;  %v11319_v35 = vor.u32 %v14421_v38, %v11318_v36  ;;  %v14409_v36 = vld [vmem:[#allocation6 + $0x274] sm:$0xf0]  ;;  %v14568_v45 = vld [vmem:[#allocation6 + $0x76c] sm:$0xf0] }
 0x379   :  { %2285 = vmatpush.bf16.msrb.mxu2 %v11127_v1  ;;  %v11320_v1 = vld [vmem:[#allocation6 + $0x2d8] sm:$0xf0]  ;;  %v16053_v34 = vpop.f32.mrf.mxu0 }
 0x37a   :  { %2299 = vmatpush.bf16.msrb.mxu0 %v11131_v17  ;;  %2479 = vmatpush.bf16.msrb.mxu1 %v11247_v29  ;;  %v11438_v17 = vld [vmem:[#allocation6 + $0x7c0] sm:$0xf]  ;;  %v14580_v29 = vld [vmem:[#allocation6 + $0x7cc] sm:$0xf0]  ;;  %v11323_v37 = vor.u32 %v14419_v28, %v11320_v1  ;;  %v14407_v28 = vld [vmem:[#allocation6 + $0x26c] sm:$0xf] }
 0x37b   :  { %v11439_v42 = vor.u32 %v14580_v29, %v11438_v17  ;;  %v11272_v1 = vld [vmem:[#allocation6 + $0x278] sm:$0xf0]  ;;  %v11390_v17 = vld [vmem:[#allocation6 + $0x760] sm:$0xf]  ;;  %v14650_v29 = vld [vmem:[#allocation6 + $0xa04] sm:$0xf] }
 0x37c   :  { %3748 = vmatpush.bf16.msra.mxu3 %v11939_v63  ;;  %v14413_v63 = vld [vmem:[#allocation6 + $0x294] sm:$0xf0]  ;;  %v11275_v40 = vor.u32 %v14407_v28, %v11272_v1 }
 0x37d   :  { %2286 = vmatpush.bf16.msrb.mxu2 %v11111_v44  ;;  %v14415_v44 = vld [vmem:[#allocation6 + $0x2ac] sm:$0xf] }
 0x37e   :  { %2300 = vmatpush.bf16.msrb.mxu0 %v11115_v51  ;;  %2480 = vmatpush.bf16.msrb.mxu1 %v11231_v52  ;;  %v14576_v51 = vld [vmem:[#allocation6 + $0x7ac] sm:$0xf0]  ;;  %v14658_v52 = vld [vmem:[#allocation6 + $0xa44] sm:$0xf]  ;;  %v16058_v55 = vpop.f32.mrf.mxu3  ;;  %v11307_v60 = vor.u32 %v14415_v44, %v11304_v46  ;;  %v11254_v44 = vld [vmem:[#allocation6 + $0x248] sm:$0xf] }
 0x37f   :  { %v11423_v48 = vor.u32 %v14576_v51, %v11422_v49  ;;  %v11891_v47 = vor.u32 %v14658_v52, %v11888_v54  ;;  %v16060_v0 = vpop.f32.mrf.mxu2  ;;  %v14405_v46 = vld [vmem:[#allocation6 + $0x254] sm:$0xf0]  ;;  %v14403_v49 = vld [vmem:[#allocation6 + $0x24c] sm:$0xf]  ;;  %v12099_v51 = vor.u32 %v14710_v7, %v12096_v33  ;;  %v11256_v54 = vld [vmem:[#allocation6 + $0x258] sm:$0xf0] }
 0x380   :  { %3749 = vmatpush.bf16.msra.mxu3 %v11923_v23  ;;  %v14556_v33 = vld [vmem:[#allocation6 + $0x70c] sm:$0xf0] }
 0x381   :  { %2287 = vmatpush.bf16.msrb.mxu2 %v11095_v6  ;;  %v14654_v6 = vld [vmem:[#allocation6 + $0xa24] sm:$0xf] }
 0x382   :  { %2301 = vmatpush.bf16.msrb.mxu0 %v11099_v2  ;;  %2481 = vmatpush.bf16.msrb.mxu1 %v11215_v13  ;;  %v1571_v2 = vpop.f32.mrf.mxu0  ;;  %v11287_v13 = vor.u32 %v14413_v63, %v11286_v62  ;;  %v11875_v23 = vor.u32 %v14654_v6, %v11872_v9  ;;  %v14706_v63 = vld [vmem:[#allocation6 + $0xbc4] sm:$0xf]  ;;  %v14401_v6 = vld [vmem:[#allocation6 + $0x234] sm:$0xf0]  ;;  %v14399_v9 = vld [vmem:[#allocation6 + $0x22c] sm:$0xf] }
 0x383   :  { %v16066_v38 = vadd.f32 %v1571_v2, %v1349_v27  ;;  %v11358_v2 = vld [vmem:[#allocation6 + $0x720] sm:$0xf] }
 0x384   :  { %2288 = vmatmul.bf16.vlgmr.msrb.gmra.mxu2 %v15970_v59  ;;  %3750 = vmatpush.bf16.msra.mxu3 %v11907_v43  ;;  %v11859_v43 = vor.u32 %v14650_v29, %v11856_v31  ;;  %v11342_v29 = vld [vmem:[#allocation6 + $0x700] sm:$0xf]  ;;  %v16078_v31 = vpop.f32.mrf.mxu1 }
 0x385   :  { %2502 = vmatpush.bf16.msra.mxu2 %v11335_v16  ;;  %2302 = vmatmul.bf16.vlgmr.msrb.gmra.mxu0 %v15970_v59  ;;  %v14411_v59 = vld [vmem:[#allocation6 + $0x28c] sm:$0xf] }
 0x386   :  { %2516 = vmatpush.bf16.msra.mxu0 %v11339_v19  ;;  %2729 = vmatpush.bf16.msra.mxu1 %v11455_v22  ;;  %v11291_v16 = vor.u32 %v14411_v59, %v11288_v3  ;;  %v11270_v19 = vld [vmem:[#allocation6 + $0x268] sm:$0xf]  ;;  %v11407_v22 = vor.u32 %v14572_v8, %v11406_v5  ;;  %v16068_v27 = vpop.f32.mrf.mxu3  ;;  %v11255_v59 = vor.u32 %v14405_v46, %v11254_v44  ;;  %v14456_v44 = vld [vmem:[#allocation6 + $0x3ec] sm:$0xf0]  ;;  %v14698_v46 = vld [vmem:[#allocation6 + $0xb84] sm:$0xf] }
 0x387   :  { %2482 = vmatmul.bf16.vlgmr.msrb.gmra.mxu1 %v15944_v14  ;;  %v11271_v24 = vor.u32 %v14409_v36, %v11270_v19  ;;  %v1557_v52 = vpop.f32.mrf.mxu2  ;;  %v11259_v3 = vor.u32 %v14403_v49, %v11256_v54  ;;  %v11238_v8 = vld [vmem:[#allocation6 + $0x228] sm:$0xf]  ;;  %v12048_v49 = vld [vmem:[#allocation6 + $0xb90] sm:$0xf0] }
 0x388   :  { %3751 = vmatpush.bf16.msra.mxu3 %v11891_v47  ;;  %v16071_v62 = vadd.f32 %v1557_v52, %v16027_v41  ;;  %v14560_v41 = vld [vmem:[#allocation6 + $0x72c] sm:$0xf0]  ;;  %v11239_v19 = vor.u32 %v14401_v6, %v11238_v8  ;;  %v11222_v36 = vld [vmem:[#allocation6 + $0x208] sm:$0xf]  ;;  %v11343_v52 = vor.u32 %v14556_v33, %v11342_v29  ;;  %v11566_v8 = vld [vmem:[#allocation6 + $0x3c0] sm:$0xf] }
 0x389   :  { %2503 = vmatpush.bf16.msra.mxu2 %v11319_v35  ;;  %v3568_v35 = vunpack.c.l.b16 %v956_v10  ;;  %v11359_v1 = vor.u32 %v14560_v41, %v11358_v2  ;;  %v14452_v6 = vld [vmem:[#allocation6 + $0x3cc] sm:$0xf0]  ;;  %v14690_v29 = vld [vmem:[#allocation6 + $0xb44] sm:$0xf] }
 0x38a   :  { %2517 = vmatpush.bf16.msra.mxu0 %v11323_v37  ;;  %2730 = vmatpush.bf16.msra.mxu1 %v11439_v42  ;;  %v3569_v37 = vunpack.c.l.b16 %v957_v11  ;;  %v11391_v42 = vor.u32 %v14568_v45, %v11390_v17  ;;  %v11240_v11 = vld [vmem:[#allocation6 + $0x238] sm:$0xf0]  ;;  %v14395_v17 = vld [vmem:[#allocation6 + $0x20c] sm:$0xf] }
 0x38b   :  { %v11243_v28 = vor.u32 %v14399_v9, %v11240_v11  ;;  %v11224_v45 = vld [vmem:[#allocation6 + $0x218] sm:$0xf0]  ;;  %v14694_v9 = vld [vmem:[#allocation6 + $0xb64] sm:$0xf] }
 0x38c   :  { %3752 = vmatpush.bf16.msra.mxu3 %v11875_v23  ;;  %v16073_v47 = vpack.c.b16 %v3569_v37, %v3568_v35  ;;  %v11462_v35 = vld [vmem:[#allocation6 + $0x7e8] sm:$0xf]  ;;  %v14585_v37 = vld [vmem:[#allocation6 + $0x7f4] sm:$0xf0] }
 0x38d   :  { %2504 = vmatpush.bf16.msra.mxu2 %v11303_v56  ;;  %v11374_v56 = vld [vmem:[#allocation6 + $0x740] sm:$0xf]  ;;  %v11463_v54 = vor.u32 %v14585_v37, %v11462_v35  ;;  %v11414_v37 = vld [vmem:[#allocation6 + $0x788] sm:$0xf] }
 0x38e   :  { %2518 = vmatpush.bf16.msra.mxu0 %v11307_v60  ;;  %2731 = vmatpush.bf16.msra.mxu1 %v11423_v48  ;;  %v14564_v60 = vld [vmem:[#allocation6 + $0x74c] sm:$0xf0]  ;;  %v12080_v48 = vld [vmem:[#allocation6 + $0xbd0] sm:$0xf0]  ;;  %v16076_v23 = vpop.f32.mrf.mxu3 }
 0x38f   :  { %v11375_v5 = vor.u32 %v14564_v60, %v11374_v56  ;;  %v12083_v10 = vor.u32 %v14706_v63, %v12080_v48  ;;  %v11446_v60 = vld [vmem:[#allocation6 + $0x7c8] sm:$0xf]  ;;  %v14581_v63 = vld [vmem:[#allocation6 + $0x7d4] sm:$0xf0] }
 0x390   :  { %3753 = vmatpush.bf16.msra.mxu3 %v11859_v43  ;;  %v11447_v2 = vor.u32 %v14581_v63, %v11446_v60 }
 0x391   :  { %2505 = vmatpush.bf16.msra.mxu2 %v11287_v13  ;;  %v14702_v13 = vld [vmem:[#allocation6 + $0xba4] sm:$0xf] }
 0x392   :  { %2519 = vmatpush.bf16.msra.mxu0 %v11291_v16  ;;  %2732 = vmatpush.bf16.msra.mxu1 %v11407_v22  ;;  %v12064_v16 = vld [vmem:[#allocation6 + $0xbb0] sm:$0xf0]  ;;  %v14397_v22 = vld [vmem:[#allocation6 + $0x214] sm:$0xf0] }
 0x393   :  { %3754 = vmatmul.bf16.vlgmr.msra.gmra.mxu3 %v16073_v47  ;;  %v12067_v7 = vor.u32 %v14702_v13, %v12064_v16  ;;  %v11223_v43 = vor.u32 %v14397_v22, %v11222_v36  ;;  %v16082_v13 = vpop.f32.mrf.mxu1  ;;  %v11430_v16 = vld [vmem:[#allocation6 + $0x7a8] sm:$0xf]  ;;  %v11567_v36 = vor.u32 %v14452_v6, %v11566_v8  ;;  %v14567_v8 = vld [vmem:[#allocation6 + $0x76c] sm:$0xf]  ;;  %v11400_v6 = vld [vmem:[#allocation6 + $0x778] sm:$0xf0] }
 0x394   :  { %4009 = vmatpush.bf16.msrb.mxu3 %v12099_v51  ;;  %v11227_v51 = vor.u32 %v14395_v17, %v11224_v45  ;;  %v11550_v17 = vld [vmem:[#allocation6 + $0x3a0] sm:$0xf]  ;;  %v14448_v45 = vld [vmem:[#allocation6 + $0x3ac] sm:$0xf0] }
 0x395   :  { %2506 = vmatpush.bf16.msra.mxu2 %v11271_v24  ;;  %v14583_v24 = vld [vmem:[#allocation6 + $0x7ec] sm:$0xf] }
 0x396   :  { %2520 = vmatpush.bf16.msra.mxu0 %v11275_v40  ;;  %2733 = vmatpush.bf16.msra.mxu1 %v11391_v42  ;;  %v11464_v40 = vld [vmem:[#allocation6 + $0x7f8] sm:$0xf0]  ;;  %v11582_v42 = vld [vmem:[#allocation6 + $0x3e0] sm:$0xf]  ;;  %v16080_v11 = vpop.f32.mrf.mxu3 }
 0x397   :  { %v11467_v56 = vor.u32 %v14583_v24, %v11464_v40  ;;  %v11583_v48 = vor.u32 %v14456_v44, %v11582_v42  ;;  %v14573_v24 = vld [vmem:[#allocation6 + $0x794] sm:$0xf0]  ;;  %v11551_v40 = vor.u32 %v14448_v45, %v11550_v17  ;;  %v11416_v44 = vld [vmem:[#allocation6 + $0x798] sm:$0xf0] }
 0x398   :  { %4010 = vmatpush.bf16.msrb.mxu3 %v12083_v10  ;;  %v12032_v10 = vld [vmem:[#allocation6 + $0xb70] sm:$0xf0]  ;;  %v11415_v60 = vor.u32 %v14573_v24, %v11414_v37  ;;  %v11384_v37 = vld [vmem:[#allocation6 + $0x758] sm:$0xf0]  ;;  %v11502_v24 = vld [vmem:[#allocation6 + $0x340] sm:$0xf] }
 0x399   :  { %2507 = vmatpush.bf16.msra.mxu2 %v11255_v59  ;;  %v12051_v59 = vor.u32 %v14698_v46, %v12048_v49  ;;  %v12035_v22 = vor.u32 %v14694_v9, %v12032_v10  ;;  %v11534_v46 = vld [vmem:[#allocation6 + $0x380] sm:$0xf]  ;;  %v14444_v49 = vld [vmem:[#allocation6 + $0x38c] sm:$0xf0] }
 0x39a   :  { %2521 = vmatpush.bf16.msra.mxu0 %v11259_v3  ;;  %2734 = vmatpush.bf16.msra.mxu1 %v11375_v5  ;;  %v14579_v3 = vld [vmem:[#allocation6 + $0x7cc] sm:$0xf]  ;;  %v11448_v5 = vld [vmem:[#allocation6 + $0x7d8] sm:$0xf0]  ;;  %v11518_v9 = vld [vmem:[#allocation6 + $0x360] sm:$0xf] }
 0x39b   :  { %v11451_v41 = vor.u32 %v14579_v3, %v11448_v5  ;;  %v11535_v3 = vor.u32 %v14444_v49, %v11534_v46  ;;  %v16093_v10 = vpop.f32.mrf.mxu1 }
 0x39c   :  { %4011 = vmatpush.bf16.msrb.mxu3 %v12067_v7  ;;  %v12016_v7 = vld [vmem:[#allocation6 + $0xb50] sm:$0xf0]  ;;  %17205 = vst [vmem:[#allocation33_spill] sm:$0xff] %v16093_v10  ;;  %v11822_v10 = vld [vmem:[#allocation6 + $0x9c0] sm:$0xf] }
 0x39d   :  { %2508 = vmatpush.bf16.msra.mxu2 %v11239_v19  ;;  %v14577_v19 = vld [vmem:[#allocation6 + $0x7b4] sm:$0xf0]  ;;  %v12019_v42 = vor.u32 %v14690_v29, %v12016_v7  ;;  %v11382_v29 = vld [vmem:[#allocation6 + $0x748] sm:$0xf] }
 0x39e   :  { %2522 = vmatpush.bf16.msra.mxu0 %v11243_v28  ;;  %2735 = vmatpush.bf16.msra.mxu1 %v11359_v1  ;;  %v14575_v28 = vld [vmem:[#allocation6 + $0x7ac] sm:$0xf]  ;;  %v11432_v1 = vld [vmem:[#allocation6 + $0x7b8] sm:$0xf0]  ;;  %v11431_v33 = vor.u32 %v14577_v19, %v11430_v16  ;;  %v16095_v16 = vpop.f32.mrf.mxu0  ;;  %v12224_v19 = vld [vmem:[#allocation6 + $0xcf0] sm:$0xf0] }
 0x39f   :  { %v11435_v35 = vor.u32 %v14575_v28, %v11432_v1  ;;  %v11403_v1 = vor.u32 %v14567_v8, %v11400_v6  ;;  %v14565_v7 = vld [vmem:[#allocation6 + $0x754] sm:$0xf0]  ;;  %v14734_v6 = vld [vmem:[#allocation6 + $0xca4] sm:$0xf] }
 0x3a0   :  { %4012 = vmatpush.bf16.msrb.mxu3 %v12051_v59  ;;  %v14569_v59 = vld [vmem:[#allocation6 + $0x774] sm:$0xf0]  ;;  %v11383_v49 = vor.u32 %v14565_v7, %v11382_v29  ;;  %v11590_v29 = vld [vmem:[#allocation6 + $0x3e8] sm:$0xf] }
 0x3a1   :  { %2509 = vmatpush.bf16.msra.mxu2 %v11223_v43  ;;  %v14571_v43 = vld [vmem:[#allocation6 + $0x78c] sm:$0xf]  ;;  %v14457_v7 = vld [vmem:[#allocation6 + $0x3f4] sm:$0xf0] }
 0x3a2   :  { %2523 = vmatpush.bf16.msra.mxu0 %v11227_v51  ;;  %2736 = vmatpush.bf16.msra.mxu1 %v11343_v52  ;;  %v12000_v51 = vld [vmem:[#allocation6 + $0xb30] sm:$0xf0]  ;;  %v958_v52 = vpack.c.bf16 %v16009_v50, %v16009_v50  ;;  %v11419_v63 = vor.u32 %v14571_v43, %v11416_v44  ;;  %v14440_v50 = vld [vmem:[#allocation6 + $0x36c] sm:$0xf0]  ;;  %v14738_v43 = vld [vmem:[#allocation6 + $0xcc4] sm:$0xf] }
 0x3a3   :  { %v11519_v17 = vor.u32 %v14440_v50, %v11518_v9  ;;  %v12208_v44 = vld [vmem:[#allocation6 + $0xcd0] sm:$0xf0] }
 0x3a4   :  { %2510 = vmatmul.bf16.vlgmr.msra.gmra.mxu2 %v15944_v14  ;;  %4013 = vmatpush.bf16.msrb.mxu3 %v12035_v22  ;;  %v12192_v9 = vld [vmem:[#allocation6 + $0xcb0] sm:$0xf0]  ;;  %v16106_v50 = vpop.f32.mrf.mxu1 }
 0x3a5   :  { %2757 = vmatpush.bf16.msrb.mxu2 %v11463_v54  ;;  %2524 = vmatmul.bf16.vlgmr.msra.gmra.mxu0 %v15944_v14  ;;  %v14686_v14 = vld [vmem:[#allocation6 + $0xb24] sm:$0xf]  ;;  %v16089_v54 = vpop.f32.mrf.mxu3 }
 0x3a6   :  { %2771 = vmatpush.bf16.msrb.mxu0 %v11467_v56  ;;  %2951 = vmatpush.bf16.msrb.mxu1 %v11583_v48  ;;  %17204 = vst [vmem:[#allocation32_spill] sm:$0xff] %v16089_v54  ;;  %v959_v56 = vpack.c.bf16 %v16013_v21, %v16013_v21  ;;  %v11398_v48 = vld [vmem:[#allocation6 + $0x768] sm:$0xf]  ;;  %v12003_v5 = vor.u32 %v14686_v14, %v12000_v51  ;;  %v14742_v21 = vld [vmem:[#allocation6 + $0xce4] sm:$0xf]  ;;  %v16101_v14 = vpop.f32.mrf.mxu2  ;;  %v16103_v8 = vpop.f32.mrf.mxu0 }
 0x3a7   :  { %2737 = vmatmul.bf16.vlgmr.msra.gmra.mxu1 %v15989_v32  ;;  %v11399_v28 = vor.u32 %v14569_v59, %v11398_v48  ;;  %v12211_v48 = vor.u32 %v14738_v43, %v12208_v44  ;;  %v11368_v59 = vld [vmem:[#allocation6 + $0x738] sm:$0xf0]  ;;  %v14616_v43 = vld [vmem:[#allocation6 + $0x8ec] sm:$0xf0]  ;;  %v14730_v44 = vld [vmem:[#allocation6 + $0xc84] sm:$0xf] }
 0x3a8   :  { %4014 = vmatpush.bf16.msrb.mxu3 %v12019_v42  ;;  %v3832_v22 = vunpack.c.l.b16 %v959_v56  ;;  %v11366_v56 = vld [vmem:[#allocation6 + $0x728] sm:$0xf]  ;;  %v12160_v54 = vld [vmem:[#allocation6 + $0xc70] sm:$0xf0] }
 0x3a9   :  { %2758 = vmatpush.bf16.msrb.mxu2 %v11447_v2  ;;  %v14682_v2 = vld [vmem:[#allocation6 + $0xb04] sm:$0xf] }
 0x3aa   :  { %2772 = vmatpush.bf16.msrb.mxu0 %v11451_v41  ;;  %2952 = vmatpush.bf16.msrb.mxu1 %v11567_v36  ;;  %v11984_v41 = vld [vmem:[#allocation6 + $0xb10] sm:$0xf0]  ;;  %v3831_v36 = vunpack.c.l.b16 %v958_v52 }
 0x3ab   :  { %v11987_v45 = vor.u32 %v14682_v2, %v11984_v41  ;;  %v11350_v41 = vld [vmem:[#allocation6 + $0x708] sm:$0xf] }
 0x3ac   :  { %4015 = vmatpush.bf16.msrb.mxu3 %v12003_v5  ;;  %v16099_v46 = vpack.c.b16 %v3832_v22, %v3831_v36  ;;  %v14432_v5 = vld [vmem:[#allocation6 + $0x32c] sm:$0xf0]  ;;  %v14555_v22 = vld [vmem:[#allocation6 + $0x70c] sm:$0xf] }
 0x3ad   :  { %2759 = vmatpush.bf16.msrb.mxu2 %v11431_v33  ;;  %v14563_v33 = vld [vmem:[#allocation6 + $0x74c] sm:$0xf]  ;;  %v16097_v42 = vpop.f32.mrf.mxu3 }
 0x3ae   :  { %2773 = vmatpush.bf16.msrb.mxu0 %v11435_v35  ;;  %2953 = vmatpush.bf16.msrb.mxu1 %v11551_v40  ;;  %v12227_v35 = vor.u32 %v14742_v21, %v12224_v19  ;;  %v14436_v40 = vld [vmem:[#allocation6 + $0x34c] sm:$0xf0]  ;;  %v11387_v51 = vor.u32 %v14563_v33, %v11384_v37  ;;  %v14557_v21 = vld [vmem:[#allocation6 + $0x714] sm:$0xf0]  ;;  %v11592_v37 = vld [vmem:[#allocation6 + $0x3f8] sm:$0xf0] }
 0x3af   :  { %v11503_v52 = vor.u32 %v14436_v40, %v11502_v24  ;;  %v11710_v24 = vld [vmem:[#allocation6 + $0x8e0] sm:$0xf]  ;;  %v11351_v40 = vor.u32 %v14557_v21, %v11350_v41  ;;  %v14612_v41 = vld [vmem:[#allocation6 + $0x8cc] sm:$0xf0]  ;;  %v14726_v21 = vld [vmem:[#allocation6 + $0xc64] sm:$0xf] }
 0x3b0   :  { %4016 = vmatpush.bf16.msrb.mxu3 %v11987_v45  ;;  %v14428_v45 = vld [vmem:[#allocation6 + $0x30c] sm:$0xf0] }
 0x3b1   :  { %2760 = vmatpush.bf16.msrb.mxu2 %v11415_v60  ;;  %v14561_v60 = vld [vmem:[#allocation6 + $0x734] sm:$0xf0] }
 0x3b2   :  { %2774 = vmatpush.bf16.msrb.mxu0 %v11419_v63  ;;  %2954 = vmatpush.bf16.msrb.mxu1 %v11535_v3  ;;  %v14559_v63 = vld [vmem:[#allocation6 + $0x72c] sm:$0xf]  ;;  %v11486_v3 = vld [vmem:[#allocation6 + $0x320] sm:$0xf]  ;;  %v11367_v2 = vor.u32 %v14561_v60, %v11366_v56  ;;  %v11591_v60 = vor.u32 %v14457_v7, %v11590_v29  ;;  %v12163_v29 = vor.u32 %v14726_v21, %v12160_v54 }
 0x3b3   :  { %4017 = vmatmul.bf16.vlgmr.msrb.gmra.mxu3 %v16099_v46  ;;  %v11371_v19 = vor.u32 %v14559_v63, %v11368_v59  ;;  %v11487_v36 = vor.u32 %v14432_v5, %v11486_v3  ;;  %v14453_v59 = vld [vmem:[#allocation6 + $0x3d4] sm:$0xf0]  ;;  %v11711_v3 = vor.u32 %v14616_v43, %v11710_v24  ;;  %v14447_v7 = vld [vmem:[#allocation6 + $0x3ac] sm:$0xf]  ;;  %v14608_v24 = vld [vmem:[#allocation6 + $0x8ac] sm:$0xf0] }
 0x3b4   :  { %4272 = vmatpush.bf16.msra.mxu3 %v12227_v35  ;;  %v14455_v35 = vld [vmem:[#allocation6 + $0x3ec] sm:$0xf]  ;;  %v12144_v43 = vld [vmem:[#allocation6 + $0xc50] sm:$0xf0] }
 0x3b5   :  { %2761 = vmatpush.bf16.msrb.mxu2 %v11399_v28  ;;  %v11352_v28 = vld [vmem:[#allocation6 + $0x718] sm:$0xf0]  ;;  %v16108_v33 = vpop.f32.mrf.mxu3  ;;  %v11595_v63 = vor.u32 %v14455_v35, %v11592_v37  ;;  %v11678_v37 = vld [vmem:[#allocation6 + $0x8a0] sm:$0xf] }
 0x3b6   :  { %2775 = vmatpush.bf16.msrb.mxu0 %v11403_v1  ;;  %2955 = vmatpush.bf16.msrb.mxu1 %v11519_v17  ;;  %v11470_v1 = vld [vmem:[#allocation6 + $0x300] sm:$0xf]  ;;  %v12195_v17 = vor.u32 %v14734_v6, %v12192_v9  ;;  %v14451_v6 = vld [vmem:[#allocation6 + $0x3cc] sm:$0xf]  ;;  %v11576_v9 = vld [vmem:[#allocation6 + $0x3d8] sm:$0xf0] }
 0x3b7   :  { %v11471_v56 = vor.u32 %v14428_v45, %v11470_v1  ;;  %v11558_v1 = vld [vmem:[#allocation6 + $0x3a8] sm:$0xf]  ;;  %v11560_v35 = vld [vmem:[#allocation6 + $0x3b8] sm:$0xf0] }
 0x3b8   :  { %4273 = vmatpush.bf16.msra.mxu3 %v12211_v48  ;;  %v11574_v48 = vld [vmem:[#allocation6 + $0x3c8] sm:$0xf]  ;;  %v11563_v54 = vor.u32 %v14447_v7, %v11560_v35 }
 0x3b9   :  { %2762 = vmatpush.bf16.msrb.mxu2 %v11383_v49  ;;  %v12176_v49 = vld [vmem:[#allocation6 + $0xc90] sm:$0xf0] }
 0x3ba   :  { %2776 = vmatpush.bf16.msrb.mxu0 %v11387_v51  ;;  %2956 = vmatpush.bf16.msrb.mxu1 %v11503_v52  ;;  %v16110_v51 = vpop.f32.mrf.mxu2  ;;  %v11355_v52 = vor.u32 %v14555_v22, %v11352_v28  ;;  %v12179_v5 = vor.u32 %v14730_v44, %v12176_v49  ;;  %v11575_v22 = vor.u32 %v14453_v59, %v11574_v48  ;;  %v14443_v59 = vld [vmem:[#allocation6 + $0x38c] sm:$0xf] }
 0x3bb   :  { %v11579_v28 = vor.u32 %v14451_v6, %v11576_v9  ;;  %v14604_v6 = vld [vmem:[#allocation6 + $0x88c] sm:$0xf0]  ;;  %v14718_v9 = vld [vmem:[#allocation6 + $0xc24] sm:$0xf] }
 0x3bc   :  { %4274 = vmatpush.bf16.msra.mxu3 %v12195_v17  ;;  %v14449_v17 = vld [vmem:[#allocation6 + $0x3b4] sm:$0xf0] }
 0x3bd   :  { %2763 = vmatpush.bf16.msrb.mxu2 %v11367_v2  ;;  %v11694_v2 = vld [vmem:[#allocation6 + $0x8c0] sm:$0xf]  ;;  %v2974_v44 = vpop.f32.mrf.mxu3 }
 0x3be   :  { %2777 = vmatpush.bf16.msrb.mxu0 %v11371_v19  ;;  %2957 = vmatpush.bf16.msrb.mxu1 %v11487_v36  ;;  %v16112_v19 = vpop.f32.mrf.mxu0  ;;  %v16114_v36 = vpop.f32.mrf.mxu1  ;;  %v11695_v45 = vor.u32 %v14612_v41, %v11694_v2  ;;  %v16120_v49 = vadd.f32 %v2974_v44, %v16097_v42  ;;  %v12128_v2 = vld [vmem:[#allocation6 + $0xc30] sm:$0xf0]  ;;  %v960_v42 = vpack.c.bf16 %v16018_v53, %v16018_v53 }
 0x3bf   :  { %17206 = vst [vmem:[#allocation34_spill] sm:$0xff] %v16112_v19  ;;  %v961_v41 = vpack.c.bf16 %v16020_v26, %v16020_v26  ;;  %v12131_v35 = vor.u32 %v14718_v9, %v12128_v2  ;;  %v11528_v26 = vld [vmem:[#allocation6 + $0x378] sm:$0xf0]  ;;  %v12112_v44 = vld [vmem:[#allocation6 + $0xc10] sm:$0xf0] }
 0x3c0   :  { %17207 = vst [vmem:[#allocation35_spill] sm:$0xff] %v16114_v36  ;;  %4275 = vmatpush.bf16.msra.mxu3 %v12179_v5  ;;  %v11662_v5 = vld [vmem:[#allocation6 + $0x880] sm:$0xf]  ;;  %v11704_v36 = vld [vmem:[#allocation6 + $0x8d8] sm:$0xf0] }
 0x3c1   :  { %2764 = vmatpush.bf16.msrb.mxu2 %v11351_v40  ;;  %v14722_v40 = vld [vmem:[#allocation6 + $0xc44] sm:$0xf]  ;;  %v11663_v53 = vor.u32 %v14604_v6, %v11662_v5  ;;  %v14437_v5 = vld [vmem:[#allocation6 + $0x354] sm:$0xf0]  ;;  %v14435_v6 = vld [vmem:[#allocation6 + $0x34c] sm:$0xf] }
 0x3c2   :  { %2778 = vmatpush.bf16.msrb.mxu0 %v11355_v52  ;;  %2958 = vmatpush.bf16.msrb.mxu1 %v11471_v56  ;;  %v11559_v52 = vor.u32 %v14449_v17, %v11558_v1  ;;  %v11542_v56 = vld [vmem:[#allocation6 + $0x388] sm:$0xf]  ;;  %v12147_v48 = vor.u32 %v14722_v40, %v12144_v43  ;;  %v14600_v40 = vld [vmem:[#allocation6 + $0x86c] sm:$0xf0]  ;;  %v14714_v43 = vld [vmem:[#allocation6 + $0xc04] sm:$0xf] }
 0x3c4   :  { %2765 = vmatmul.bf16.vlgmr.msrb.gmra.mxu2 %v15989_v32  ;;  %4276 = vmatpush.bf16.msra.mxu3 %v12163_v29  ;;  %v14441_v29 = vld [vmem:[#allocation6 + $0x374] sm:$0xf0] }
 0x3c5   :  { %2979 = vmatpush.bf16.msra.mxu2 %v11591_v60  ;;  %2779 = vmatmul.bf16.vlgmr.msrb.gmra.mxu0 %v15989_v32  ;;  %v14445_v60 = vld [vmem:[#allocation6 + $0x394] sm:$0xf0]  ;;  %v11679_v32 = vor.u32 %v14608_v24, %v11678_v37  ;;  %v14439_v37 = vld [vmem:[#allocation6 + $0x36c] sm:$0xf]  ;;  %v11646_v24 = vld [vmem:[#allocation6 + $0x860] sm:$0xf] }
 0x3c6   :  { %2993 = vmatpush.bf16.msra.mxu0 %v11595_v63  ;;  %3206 = vmatpush.bf16.msra.mxu1 %v11711_v3  ;;  %v16122_v63 = vpop.f32.mrf.mxu2  ;;  %v11544_v3 = vld [vmem:[#allocation6 + $0x398] sm:$0xf0]  ;;  %v2020_v21 = vpop.f32.mrf.mxu0  ;;  %v11543_v1 = vor.u32 %v14445_v60, %v11542_v56  ;;  %v4095_v56 = vunpack.c.l.b16 %v961_v41  ;;  %v14770_v41 = vld [vmem:[#allocation6 + $0xdc4] sm:$0xf] }
 0x3c7   :  { %2959 = vmatmul.bf16.vlgmr.msrb.gmra.mxu1 %v15947_v39  ;;  %v11547_v17 = vor.u32 %v14443_v59, %v11544_v3  ;;  %v11510_v3 = vld [vmem:[#allocation6 + $0x348] sm:$0xf] }
 0x3c8   :  { %4277 = vmatpush.bf16.msra.mxu3 %v12147_v48  ;;  %v12115_v48 = vor.u32 %v14714_v43, %v12112_v44  ;;  %v14592_v43 = vld [vmem:[#allocation6 + $0x82c] sm:$0xf0]  ;;  %v14766_v44 = vld [vmem:[#allocation6 + $0xda4] sm:$0xf] }
 0x3c9   :  { %2980 = vmatpush.bf16.msra.mxu2 %v11575_v22  ;;  %v16129_v22 = vadd.f32 %v2020_v21, %v16110_v51  ;;  %v14774_v51 = vld [vmem:[#allocation6 + $0xde4] sm:$0xf]  ;;  %v11512_v21 = vld [vmem:[#allocation6 + $0x358] sm:$0xf0] }
 0x3ca   :  { %2994 = vmatpush.bf16.msra.mxu0 %v11579_v28  ;;  %3207 = vmatpush.bf16.msra.mxu1 %v11695_v45  ;;  %v2034_v28 = vpop.f32.mrf.mxu1  ;;  %v11526_v45 = vld [vmem:[#allocation6 + $0x368] sm:$0xf] }
 0x3cb   :  { %v16132_v7 = vadd.f32 %v2034_v28, %v16103_v8  ;;  %v11527_v60 = vor.u32 %v14441_v29, %v11526_v45  ;;  %v11647_v8 = vor.u32 %v14600_v40, %v11646_v24  ;;  %v11630_v28 = vld [vmem:[#allocation6 + $0x840] sm:$0xf]  ;;  %v11511_v45 = vor.u32 %v14437_v5, %v11510_v3  ;;  %v11496_v24 = vld [vmem:[#allocation6 + $0x338] sm:$0xf0]  ;;  %v14588_v5 = vld [vmem:[#allocation6 + $0x80c] sm:$0xf0] }
 0x3cc   :  { %4278 = vmatpush.bf16.msra.mxu3 %v12131_v35  ;;  %v11515_v29 = vor.u32 %v14435_v6, %v11512_v21  ;;  %v11494_v35 = vld [vmem:[#allocation6 + $0x328] sm:$0xf]  ;;  %v11614_v40 = vld [vmem:[#allocation6 + $0x820] sm:$0xf]  ;;  %v16140_v21 = vpop.f32.mrf.mxu3 }
 0x3cd   :  { %2981 = vmatpush.bf16.msra.mxu2 %v11559_v52  ;;  %v12352_v52 = vld [vmem:[#allocation6 + $0xdf0] sm:$0xf0]  ;;  %v11718_v6 = vld [vmem:[#allocation6 + $0x8e8] sm:$0xf] }
 0x3ce   :  { %2995 = vmatpush.bf16.msra.mxu0 %v11563_v54  ;;  %3208 = vmatpush.bf16.msra.mxu1 %v11679_v32  ;;  %v4094_v54 = vunpack.c.l.b16 %v960_v42  ;;  %v11531_v32 = vor.u32 %v14439_v37, %v11528_v26  ;;  %v2006_v59 = vpop.f32.mrf.mxu2  ;;  %v12355_v2 = vor.u32 %v14774_v51, %v12352_v52  ;;  %v14596_v42 = vld [vmem:[#allocation6 + $0x84c] sm:$0xf0]  ;;  %v14433_v37 = vld [vmem:[#allocation6 + $0x334] sm:$0xf0]  ;;  %v14431_v26 = vld [vmem:[#allocation6 + $0x32c] sm:$0xf] }
 0x3cf   :  { %v16135_v9 = vadd.f32 %v2006_v59, %v16082_v13  ;;  %v12320_v51 = vld [vmem:[#allocation6 + $0xdb0] sm:$0xf0]  ;;  %v11495_v52 = vor.u32 %v14433_v37, %v11494_v35  ;;  %v11598_v59 = vld [vmem:[#allocation6 + $0x800] sm:$0xf] }
 0x3d0   :  { %4279 = vmatpush.bf16.msra.mxu3 %v12115_v48  ;;  %v11480_v48 = vld [vmem:[#allocation6 + $0x318] sm:$0xf0]  ;;  %v12323_v3 = vor.u32 %v14766_v44, %v12320_v51  ;;  %v11599_v37 = vor.u32 %v14588_v5, %v11598_v59  ;;  %v14611_v51 = vld [vmem:[#allocation6 + $0x8cc] sm:$0xf] }
 0x3d1   :  { %2982 = vmatpush.bf16.msra.mxu2 %v11543_v1  ;;  %v12336_v1 = vld [vmem:[#allocation6 + $0xdd0] sm:$0xf0] }
 0x3d2   :  { %2996 = vmatpush.bf16.msra.mxu0 %v11547_v17  ;;  %3209 = vmatpush.bf16.msra.mxu1 %v11663_v53  ;;  %v16137_v17 = vpack.c.b16 %v4095_v56, %v4094_v54  ;;  %v11631_v53 = vor.u32 %v14596_v42, %v11630_v28  ;;  %v12339_v13 = vor.u32 %v14770_v41, %v12336_v1  ;;  %v11478_v54 = vld [vmem:[#allocation6 + $0x308] sm:$0xf]  ;;  %v14429_v56 = vld [vmem:[#allocation6 + $0x314] sm:$0xf0]  ;;  %v14615_v28 = vld [vmem:[#allocation6 + $0x8ec] sm:$0xf]  ;;  %v16142_v19 = vpop.f32.mrf.mxu1 }
 0x3d3   :  { %v11720_v42 = vld [vmem:[#allocation6 + $0x8f8] sm:$0xf0]  ;;  %v11838_v41 = vld [vmem:[#allocation6 + $0x9e0] sm:$0xf]  ;;  %v11479_v1 = vor.u32 %v14429_v56, %v11478_v54  ;;  %v14758_v54 = vld [vmem:[#allocation6 + $0xd64] sm:$0xf] }
 0x3d4   :  { %4535 = vmatpush.bf16.msrb.mxu3 %v12355_v2  ;;  %v14617_v2 = vld [vmem:[#allocation6 + $0x8f4] sm:$0xf0]  ;;  %v12288_v56 = vld [vmem:[#allocation6 + $0xd70] sm:$0xf0]  ;;  %17208 = vst [vmem:[#allocation36_spill] sm:$0xff] %v16142_v19 }
 0x3d5   :  { %2983 = vmatpush.bf16.msra.mxu2 %v11527_v60  ;;  %4280 = vmatmul.bf16.vlgmr.msra.gmra.mxu3 %v16137_v17  ;;  %v11499_v60 = vor.u32 %v14431_v26, %v11496_v24  ;;  %v11719_v26 = vor.u32 %v14617_v2, %v11718_v6  ;;  %v11702_v24 = vld [vmem:[#allocation6 + $0x8c8] sm:$0xf]  ;;  %v14607_v6 = vld [vmem:[#allocation6 + $0x8ac] sm:$0xf]  ;;  %v11688_v2 = vld [vmem:[#allocation6 + $0x8b8] sm:$0xf0] }
 0x3d6   :  { %2997 = vmatpush.bf16.msra.mxu0 %v11531_v32  ;;  %3210 = vmatpush.bf16.msra.mxu1 %v11647_v8  ;;  %v11615_v32 = vor.u32 %v14592_v43, %v11614_v40  ;;  %v14427_v8 = vld [vmem:[#allocation6 + $0x30c] sm:$0xf]  ;;  %v14613_v40 = vld [vmem:[#allocation6 + $0x8d4] sm:$0xf0]  ;;  %v3229_v5 = vpop.f32.mrf.mxu3 }
 0x3d7   :  { %v11483_v35 = vor.u32 %v14427_v8, %v11480_v48  ;;  %v11686_v8 = vld [vmem:[#allocation6 + $0x8a8] sm:$0xf]  ;;  %v14609_v48 = vld [vmem:[#allocation6 + $0x8b4] sm:$0xf0] }
 0x3d8   :  { %4536 = vmatpush.bf16.msrb.mxu3 %v12339_v13  ;;  %v11723_v13 = vor.u32 %v14615_v28, %v11720_v42  ;;  %v11806_v28 = vld [vmem:[#allocation6 + $0x9a0] sm:$0xf]  ;;  %v16147_v42 = vadd.f32 %v3229_v5, %v16049_v18  ;;  %v11672_v18 = vld [vmem:[#allocation6 + $0x898] sm:$0xf0] }
 0x3d9   :  { %2984 = vmatpush.bf16.msra.mxu2 %v11511_v45  ;;  %v14648_v45 = vld [vmem:[#allocation6 + $0x9ec] sm:$0xf0]  ;;  %v11656_v5 = vld [vmem:[#allocation6 + $0x878] sm:$0xf0] }
 0x3da   :  { %2998 = vmatpush.bf16.msra.mxu0 %v11515_v29  ;;  %3211 = vmatpush.bf16.msra.mxu1 %v11631_v53  ;;  %v14762_v29 = vld [vmem:[#allocation6 + $0xd84] sm:$0xf]  ;;  %v12304_v53 = vld [vmem:[#allocation6 + $0xd90] sm:$0xf0]  ;;  %v11839_v43 = vor.u32 %v14648_v45, %v11838_v41  ;;  %v14640_v41 = vld [vmem:[#allocation6 + $0x9ac] sm:$0xf0]  ;;  %v11691_v45 = vor.u32 %v14607_v6, %v11688_v2 }
 0x3db   :  { %v12307_v44 = vor.u32 %v14762_v29, %v12304_v53  ;;  %v11670_v29 = vld [vmem:[#allocation6 + $0x888] sm:$0xf]  ;;  %v14605_v53 = vld [vmem:[#allocation6 + $0x894] sm:$0xf0]  ;;  %v14632_v6 = vld [vmem:[#allocation6 + $0x96c] sm:$0xf0] }
 0x3dc   :  { %4537 = vmatpush.bf16.msrb.mxu3 %v12323_v3  ;;  %v12291_v3 = vor.u32 %v14758_v54, %v12288_v56  ;;  %v11671_v56 = vor.u32 %v14605_v53, %v11670_v29  ;;  %v14746_v2 = vld [vmem:[#allocation6 + $0xd04] sm:$0xf] }
 0x3dd   :  { %2985 = vmatpush.bf16.msra.mxu2 %v11495_v52  ;;  %v14644_v52 = vld [vmem:[#allocation6 + $0x9cc] sm:$0xf0] }
 0x3de   :  { %2999 = vmatpush.bf16.msra.mxu0 %v11499_v60  ;;  %3212 = vmatpush.bf16.msra.mxu1 %v11615_v32  ;;  %v11703_v60 = vor.u32 %v14613_v40, %v11702_v24  ;;  %v11707_v32 = vor.u32 %v14611_v51, %v11704_v36  ;;  %v11823_v59 = vor.u32 %v14644_v52, %v11822_v10  ;;  %v12272_v36 = vld [vmem:[#allocation6 + $0xd50] sm:$0xf0]  ;;  %v14636_v24 = vld [vmem:[#allocation6 + $0x98c] sm:$0xf0]  ;;  %v14750_v40 = vld [vmem:[#allocation6 + $0xd24] sm:$0xf] }
 0x3df   :  { %v11687_v10 = vor.u32 %v14609_v48, %v11686_v8  ;;  %v963_v51 = vpack.c.bf16 %v16041_v30, %v16041_v30  ;;  %v14601_v8 = vld [vmem:[#allocation6 + $0x874] sm:$0xf0]  ;;  %v12240_v30 = vld [vmem:[#allocation6 + $0xd10] sm:$0xf0] }
 0x3e0   :  { %4538 = vmatpush.bf16.msrb.mxu3 %v12307_v44  ;;  %v962_v44 = vpack.c.bf16 %v16033_v61, %v16033_v61  ;;  %v11774_v61 = vld [vmem:[#allocation6 + $0x960] sm:$0xf]  ;;  %v12243_v29 = vor.u32 %v14746_v2, %v12240_v30  ;;  %v12448_v2 = vld [vmem:[#allocation6 + $0xeb0] sm:$0xf0] }
 0x3e1   :  { %2986 = vmatpush.bf16.msra.mxu2 %v11479_v1  ;;  %v14754_v1 = vld [vmem:[#allocation6 + $0xd44] sm:$0xf] }
 0x3e2   :  { %3000 = vmatpush.bf16.msra.mxu0 %v11483_v35  ;;  %3213 = vmatpush.bf16.msra.mxu1 %v11599_v37  ;;  %v16150_v35 = vpop.f32.mrf.mxu2  ;;  %v11807_v37 = vor.u32 %v14640_v41, %v11806_v28  ;;  %v2275_v52 = vpop.f32.mrf.mxu1  ;;  %v14806_v28 = vld [vmem:[#allocation6 + $0xee4] sm:$0xf]  ;;  %v12480_v41 = vld [vmem:[#allocation6 + $0xef0] sm:$0xf0] }
 0x3e3   :  { %17209 = vst [vmem:[#allocation37_spill] sm:$0xff] %v16150_v35  ;;  %v16157_v54 = vadd.f32 %v16080_v11, %v2275_v52 }
 0x3e4   :  { %2987 = vmatmul.bf16.vlgmr.msra.gmra.mxu2 %v15947_v39  ;;  %4539 = vmatpush.bf16.msrb.mxu3 %v12291_v3  ;;  %v14599_v3 = vld [vmem:[#allocation6 + $0x86c] sm:$0xf] }
 0x3e5   :  { %3234 = vmatpush.bf16.msrb.mxu2 %v11719_v26  ;;  %3001 = vmatmul.bf16.vlgmr.msra.gmra.mxu0 %v15947_v39  ;;  %v12275_v39 = vor.u32 %v14754_v1, %v12272_v36  ;;  %v14603_v26 = vld [vmem:[#allocation6 + $0x88c] sm:$0xf]  ;;  %v4357_v1 = vunpack.c.l.b16 %v962_v44  ;;  %v4358_v36 = vunpack.c.l.b16 %v963_v51  ;;  %v14802_v44 = vld [vmem:[#allocation6 + $0xec4] sm:$0xf]  ;;  %v12464_v51 = vld [vmem:[#allocation6 + $0xed0] sm:$0xf0] }
 0x3e6   :  { %3248 = vmatpush.bf16.msrb.mxu0 %v11723_v13  ;;  %3469 = vmatpush.bf16.msrb.mxu1 %v11839_v43  ;;  %v11790_v13 = vld [vmem:[#allocation6 + $0x980] sm:$0xf]  ;;  %v12256_v43 = vld [vmem:[#allocation6 + $0xd30] sm:$0xf0] }
 0x3e7   :  { %3214 = vmatmul.bf16.vlgmr.msra.gmra.mxu1 %v16015_v25  ;;  %v11791_v48 = vor.u32 %v14636_v24, %v11790_v13  ;;  %v12483_v13 = vor.u32 %v14806_v28, %v12480_v41  ;;  %v11640_v24 = vld [vmem:[#allocation6 + $0x858] sm:$0xf0]  ;;  %v16162_v52 = vpack.c.b16 %v4358_v36, %v4357_v1  ;;  %v11606_v28 = vld [vmem:[#allocation6 + $0x808] sm:$0xf]  ;;  %v14589_v41 = vld [vmem:[#allocation6 + $0x814] sm:$0xf0]  ;;  %v16165_v1 = vpop.f32.mrf.mxu0 }
 0x3e8   :  { %4540 = vmatpush.bf16.msrb.mxu3 %v12275_v39  ;;  %v14597_v39 = vld [vmem:[#allocation6 + $0x854] sm:$0xf0] }
 0x3e9   :  { %3235 = vmatpush.bf16.msrb.mxu2 %v11703_v60  ;;  %v11675_v60 = vor.u32 %v14603_v26, %v11672_v18  ;;  %v14595_v26 = vld [vmem:[#allocation6 + $0x84c] sm:$0xf] }
 0x3ea   :  { %3249 = vmatpush.bf16.msrb.mxu0 %v11707_v32  ;;  %3470 = vmatpush.bf16.msrb.mxu1 %v11823_v59  ;;  %v11654_v32 = vld [vmem:[#allocation6 + $0x868] sm:$0xf]  ;;  %v12259_v59 = vor.u32 %v14750_v40, %v12256_v43  ;;  %v2048_v53 = vpop.f32.mrf.mxu2  ;;  %v11758_v40 = vld [vmem:[#allocation6 + $0x940] sm:$0xf]  ;;  %v14628_v43 = vld [vmem:[#allocation6 + $0x94c] sm:$0xf0] }
 0x3eb   :  { %v11655_v11 = vor.u32 %v14601_v8, %v11654_v32  ;;  %v16160_v18 = vadd.f32 %v2048_v53, %v16106_v50  ;;  %v11759_v32 = vor.u32 %v14628_v43, %v11758_v40  ;;  %v11622_v8 = vld [vmem:[#allocation6 + $0x828] sm:$0xf]  ;;  %v12467_v50 = vor.u32 %v14802_v44, %v12464_v51  ;;  %v11848_v40 = vld [vmem:[#allocation6 + $0x9f8] sm:$0xf0]  ;;  %v11966_v43 = vld [vmem:[#allocation6 + $0xae0] sm:$0xf] }
 0x3ec   :  { %4541 = vmatpush.bf16.msrb.mxu3 %v12259_v59  ;;  %v14591_v59 = vld [vmem:[#allocation6 + $0x82c] sm:$0xf]  ;;  %v11607_v44 = vor.u32 %v14589_v41, %v11606_v28  ;;  %v14680_v51 = vld [vmem:[#allocation6 + $0xaec] sm:$0xf0]  ;;  %v14790_v28 = vld [vmem:[#allocation6 + $0xe64] sm:$0xf] }
 0x3ed   :  { %3236 = vmatpush.bf16.msrb.mxu2 %v11687_v10  ;;  %v11659_v10 = vor.u32 %v14599_v3, %v11656_v5  ;;  %v11624_v3 = vld [vmem:[#allocation6 + $0x838] sm:$0xf0]  ;;  %v11742_v5 = vld [vmem:[#allocation6 + $0x920] sm:$0xf]  ;;  %v12416_v41 = vld [vmem:[#allocation6 + $0xe70] sm:$0xf0] }
 0x3ee   :  { %3250 = vmatpush.bf16.msrb.mxu0 %v11691_v45  ;;  %3471 = vmatpush.bf16.msrb.mxu1 %v11807_v37  ;;  %v11775_v45 = vor.u32 %v14632_v6, %v11774_v61  ;;  %v11638_v37 = vld [vmem:[#allocation6 + $0x848] sm:$0xf]  ;;  %v14624_v61 = vld [vmem:[#allocation6 + $0x92c] sm:$0xf0]  ;;  %v14798_v6 = vld [vmem:[#allocation6 + $0xea4] sm:$0xf]  ;;  %v11627_v36 = vor.u32 %v14591_v59, %v11624_v3 }
 0x3ef   :  { %v12451_v53 = vor.u32 %v14798_v6, %v12448_v2  ;;  %v14645_v3 = vld [vmem:[#allocation6 + $0x9d4] sm:$0xf0]  ;;  %v14643_v6 = vld [vmem:[#allocation6 + $0x9cc] sm:$0xf]  ;;  %v11832_v2 = vld [vmem:[#allocation6 + $0x9d8] sm:$0xf0]  ;;  %v2261_v35 = vpop.f32.mrf.mxu0 }
 0x3f0   :  { %4542 = vmatpush.bf16.msrb.mxu3 %v12243_v29  ;;  %v11726_v29 = vld [vmem:[#allocation6 + $0x900] sm:$0xf] }
 0x3f1   :  { %3237 = vmatpush.bf16.msrb.mxu2 %v11671_v56  ;;  %v11639_v56 = vor.u32 %v14597_v39, %v11638_v37  ;;  %v14620_v37 = vld [vmem:[#allocation6 + $0x90c] sm:$0xf0]  ;;  %v11846_v39 = vld [vmem:[#allocation6 + $0x9e8] sm:$0xf] }
 0x3f2   :  { %3251 = vmatpush.bf16.msrb.mxu0 %v11675_v60  ;;  %3472 = vmatpush.bf16.msrb.mxu1 %v11791_v48  ;;  %v11643_v60 = vor.u32 %v14595_v26, %v11640_v24  ;;  %v14593_v48 = vld [vmem:[#allocation6 + $0x834] sm:$0xf0]  ;;  %v14647_v24 = vld [vmem:[#allocation6 + $0x9ec] sm:$0xf] }
 0x3f3   :  { %4543 = vmatmul.bf16.vlgmr.msrb.gmra.mxu3 %v16162_v52  ;;  %v11623_v30 = vor.u32 %v14593_v48, %v11622_v8  ;;  %v14649_v26 = vld [vmem:[#allocation6 + $0x9f4] sm:$0xf0]  ;;  %v11727_v8 = vor.u32 %v14620_v37, %v11726_v29  ;;  %v11851_v59 = vor.u32 %v14647_v24, %v11848_v40  ;;  %v12419_v37 = vor.u32 %v14790_v28, %v12416_v41  ;;  %v11816_v24 = vld [vmem:[#allocation6 + $0x9b8] sm:$0xf0]  ;;  %v11934_v40 = vld [vmem:[#allocation6 + $0xaa0] sm:$0xf] }
 0x3f4   :  { %4798 = vmatpush.bf16.msra.mxu3 %v12483_v13  ;;  %v16167_v13 = vpop.f32.mrf.mxu3  ;;  %v11847_v48 = vor.u32 %v14649_v26, %v11846_v39  ;;  %v14641_v29 = vld [vmem:[#allocation6 + $0x9b4] sm:$0xf0]  ;;  %v14639_v26 = vld [vmem:[#allocation6 + $0x9ac] sm:$0xf] }
 0x3f5   :  { %3238 = vmatpush.bf16.msrb.mxu2 %v11655_v11  ;;  %v11743_v11 = vor.u32 %v14624_v61, %v11742_v5  ;;  %17210 = vst [vmem:[#allocation38_spill] sm:$0xff] %v16167_v13  ;;  %v11967_v5 = vor.u32 %v14680_v51, %v11966_v43  ;;  %v11950_v13 = vld [vmem:[#allocation6 + $0xac0] sm:$0xf]  ;;  %v14786_v51 = vld [vmem:[#allocation6 + $0xe44] sm:$0xf] }
 0x3f6   :  { %3252 = vmatpush.bf16.msrb.mxu0 %v11659_v10  ;;  %3473 = vmatpush.bf16.msrb.mxu1 %v11775_v45  ;;  %v14587_v10 = vld [vmem:[#allocation6 + $0x80c] sm:$0xf]  ;;  %v11608_v45 = vld [vmem:[#allocation6 + $0x818] sm:$0xf0] }
 0x3f8   :  { %4799 = vmatpush.bf16.msra.mxu3 %v12467_v50  ;;  %v11830_v50 = vld [vmem:[#allocation6 + $0x9c8] sm:$0xf] }
 0x3f9   :  { %3239 = vmatpush.bf16.msrb.mxu2 %v11639_v56  ;;  %v14794_v56 = vld [vmem:[#allocation6 + $0xe84] sm:$0xf] }
 0x3fa   :  { %3253 = vmatpush.bf16.msrb.mxu0 %v11643_v60  ;;  %3474 = vmatpush.bf16.msrb.mxu1 %v11759_v32  ;;  %v12432_v60 = vld [vmem:[#allocation6 + $0xe90] sm:$0xf0]  ;;  %v11611_v32 = vor.u32 %v14587_v10, %v11608_v45  ;;  %v11835_v10 = vor.u32 %v14643_v6, %v11832_v2  ;;  %v11814_v45 = vld [vmem:[#allocation6 + $0x9a8] sm:$0xf]  ;;  %v964_v6 = vpack.c.bf16 %v16051_v15, %v16051_v15  ;;  %v11784_v15 = vld [vmem:[#allocation6 + $0x978] sm:$0xf0] }
 0x3fb   :  { %v12435_v61 = vor.u32 %v14794_v56, %v12432_v60  ;;  %v12400_v56 = vld [vmem:[#allocation6 + $0xe50] sm:$0xf0]  ;;  %v11819_v60 = vor.u32 %v14639_v26, %v11816_v24  ;;  %v965_v2 = vpack.c.bf16 %v16058_v55, %v16058_v55  ;;  %v11902_v26 = vld [vmem:[#allocation6 + $0xa60] sm:$0xf]  ;;  %v14664_v24 = vld [vmem:[#allocation6 + $0xa6c] sm:$0xf0] }
 0x3fc   :  { %4800 = vmatpush.bf16.msra.mxu3 %v12451_v53  ;;  %v3492_v39 = vpop.f32.mrf.mxu3  ;;  %v14778_v55 = vld [vmem:[#allocation6 + $0xe04] sm:$0xf] }
 0x3fd   :  { %3240 = vmatpush.bf16.msrb.mxu2 %v11623_v30  ;;  %v14676_v30 = vld [vmem:[#allocation6 + $0xacc] sm:$0xf0]  ;;  %v16174_v43 = vadd.f32 %v3492_v39, %v16129_v22  ;;  %v14631_v39 = vld [vmem:[#allocation6 + $0x96c] sm:$0xf] }
 0x3fe   :  { %3254 = vmatpush.bf16.msrb.mxu0 %v11627_v36  ;;  %3475 = vmatpush.bf16.msrb.mxu1 %v11743_v11  ;;  %v16169_v36 = vpop.f32.mrf.mxu1  ;;  %v11831_v11 = vor.u32 %v14645_v3, %v11830_v50  ;;  %v11951_v53 = vor.u32 %v14676_v30, %v11950_v13  ;;  %v11815_v13 = vor.u32 %v14641_v29, %v11814_v45  ;;  %v14635_v50 = vld [vmem:[#allocation6 + $0x98c] sm:$0xf]  ;;  %v11918_v3 = vld [vmem:[#allocation6 + $0xa80] sm:$0xf]  ;;  %v14668_v22 = vld [vmem:[#allocation6 + $0xa8c] sm:$0xf0]  ;;  %v16181_v45 = vpop.f32.mrf.mxu0 }
 0x3ff   :  { %17211 = vst [vmem:[#allocation39_spill] sm:$0xff] %v16169_v36  ;;  %v12544_v36 = vld [vmem:[#allocation6 + $0xf70] sm:$0xf0] }
 0x400   :  { %4801 = vmatpush.bf16.msra.mxu3 %v12435_v61  ;;  %v12384_v61 = vld [vmem:[#allocation6 + $0xe30] sm:$0xf0]  ;;  %17212 = vst [vmem:[#allocation40_spill] sm:$0xff] %v16181_v45 }
 0x401   :  { %3241 = vmatpush.bf16.msrb.mxu2 %v11607_v44  ;;  %v14672_v44 = vld [vmem:[#allocation6 + $0xaac] sm:$0xf0] }
 0x402   :  { %3255 = vmatpush.bf16.msrb.mxu0 %v11611_v32  ;;  %3476 = vmatpush.bf16.msrb.mxu1 %v11727_v8  ;;  %v11798_v32 = vld [vmem:[#allocation6 + $0x988] sm:$0xf]  ;;  %v14637_v8 = vld [vmem:[#allocation6 + $0x994] sm:$0xf0] }
 0x403   :  { %v11799_v28 = vor.u32 %v14637_v8, %v11798_v32  ;;  %v11787_v32 = vor.u32 %v14631_v39, %v11784_v15  ;;  %v11752_v39 = vld [vmem:[#allocation6 + $0x938] sm:$0xf0]  ;;  %v11870_v15 = vld [vmem:[#allocation6 + $0xa20] sm:$0xf] }
 0x404   :  { %3242 = vmatmul.bf16.vlgmr.msrb.gmra.mxu2 %v16015_v25  ;;  %4802 = vmatpush.bf16.msra.mxu3 %v12419_v37 }
 0x405   :  { %3497 = vmatpush.bf16.msra.mxu2 %v11847_v48  ;;  %3256 = vmatmul.bf16.vlgmr.msrb.gmra.mxu0 %v16015_v25  ;;  %v11935_v48 = vor.u32 %v14672_v44, %v11934_v40  ;;  %v11800_v25 = vld [vmem:[#allocation6 + $0x998] sm:$0xf0]  ;;  %v12368_v40 = vld [vmem:[#allocation6 + $0xe10] sm:$0xf0]  ;;  %v14838_v44 = vld [vmem:[#allocation6 + $0xfe4] sm:$0xf] }
 0x406   :  { %3511 = vmatpush.bf16.msra.mxu0 %v11851_v59  ;;  %3732 = vmatpush.bf16.msra.mxu1 %v11967_v5  ;;  %v12403_v59 = vor.u32 %v14786_v51, %v12400_v56  ;;  %v14782_v5 = vld [vmem:[#allocation6 + $0xe24] sm:$0xf]  ;;  %v2483_v30 = vpop.f32.mrf.mxu1  ;;  %v11803_v41 = vor.u32 %v14635_v50, %v11800_v25  ;;  %v12608_v51 = vld [vmem:[#allocation6 + $0xff0] sm:$0xf0]  ;;  %v4620_v56 = vunpack.c.l.b16 %v964_v6  ;;  %v12371_v8 = vor.u32 %v14778_v55, %v12368_v40  ;;  %v14627_v50 = vld [vmem:[#allocation6 + $0x94c] sm:$0xf] }
 0x407   :  { %3477 = vmatmul.bf16.vlgmr.msrb.gmra.mxu1 %v16039_v58  ;;  %v16183_v29 = vadd.f32 %v2483_v30, %v2261_v35  ;;  %v12387_v37 = vor.u32 %v14782_v5, %v12384_v61  ;;  %v11903_v35 = vor.u32 %v14664_v24, %v11902_v26  ;;  %v12611_v25 = vor.u32 %v14838_v44, %v12608_v51  ;;  %v14660_v5 = vld [vmem:[#allocation6 + $0xa4c] sm:$0xf0]  ;;  %v14834_v61 = vld [vmem:[#allocation6 + $0xfc4] sm:$0xf]  ;;  %v12592_v30 = vld [vmem:[#allocation6 + $0xfd0] sm:$0xf0]  ;;  %v16189_v24 = vpop.f32.mrf.mxu0 }
 0x408   :  { %4803 = vmatpush.bf16.msra.mxu3 %v12403_v59  ;;  %v14629_v59 = vld [vmem:[#allocation6 + $0x954] sm:$0xf0]  ;;  %v14656_v26 = vld [vmem:[#allocation6 + $0xa2c] sm:$0xf0]  ;;  %v14830_v55 = vld [vmem:[#allocation6 + $0xfa4] sm:$0xf] }
 0x409   :  { %3498 = vmatpush.bf16.msra.mxu2 %v11831_v11  ;;  %v11782_v11 = vld [vmem:[#allocation6 + $0x968] sm:$0xf]  ;;  %v12576_v40 = vld [vmem:[#allocation6 + $0xfb0] sm:$0xf0] }
 0x40a   :  { %3512 = vmatpush.bf16.msra.mxu0 %v11835_v10  ;;  %3733 = vmatpush.bf16.msra.mxu1 %v11951_v53  ;;  %v14633_v10 = vld [vmem:[#allocation6 + $0x974] sm:$0xf0]  ;;  %v11919_v53 = vor.u32 %v14668_v22, %v11918_v3  ;;  %v11768_v3 = vld [vmem:[#allocation6 + $0x958] sm:$0xf0]  ;;  %v11886_v22 = vld [vmem:[#allocation6 + $0xa40] sm:$0xf] }
 0x40b   :  { %v11734_v51 = vld [vmem:[#allocation6 + $0x908] sm:$0xf] }
 0x40c   :  { %4804 = vmatpush.bf16.msra.mxu3 %v12387_v37  ;;  %v12595_v37 = vor.u32 %v14834_v61, %v12592_v30  ;;  %v12094_v61 = vld [vmem:[#allocation6 + $0xbe0] sm:$0xf] }
 0x40d   :  { %3499 = vmatpush.bf16.msra.mxu2 %v11815_v13  ;;  %v4621_v13 = vunpack.c.l.b16 %v965_v2  ;;  %v16187_v2 = vpop.f32.mrf.mxu2 }
 0x40e   :  { %3513 = vmatpush.bf16.msra.mxu0 %v11819_v60  ;;  %3734 = vmatpush.bf16.msra.mxu1 %v11935_v48  ;;  %v11783_v60 = vor.u32 %v14633_v10, %v11782_v11  ;;  %v11766_v48 = vld [vmem:[#allocation6 + $0x948] sm:$0xf]  ;;  %17213 = vst [vmem:[#allocation41_spill] sm:$0xff] %v16187_v2  ;;  %v14625_v10 = vld [vmem:[#allocation6 + $0x934] sm:$0xf0] }
 0x40f   :  { %v16185_v45 = vpack.c.b16 %v4621_v13, %v4620_v56  ;;  %v11767_v6 = vor.u32 %v14629_v59, %v11766_v48  ;;  %v11750_v11 = vld [vmem:[#allocation6 + $0x928] sm:$0xf]  ;;  %v14621_v56 = vld [vmem:[#allocation6 + $0x914] sm:$0xf0]  ;;  %v12579_v48 = vor.u32 %v14830_v55, %v12576_v40  ;;  %v14652_v59 = vld [vmem:[#allocation6 + $0xa0c] sm:$0xf0]  ;;  %v16196_v19 = vpop.f32.mrf.mxu0 }
 0x410   :  { %4805 = vmatpush.bf16.msra.mxu3 %v12371_v8  ;;  %v11751_v44 = vor.u32 %v14625_v10, %v11750_v11  ;;  %v11854_v8 = vld [vmem:[#allocation6 + $0xa00] sm:$0xf]  ;;  %v11735_v30 = vor.u32 %v14621_v56, %v11734_v51  ;;  %v11960_v2 = vld [vmem:[#allocation6 + $0xad8] sm:$0xf0]  ;;  %v14708_v51 = vld [vmem:[#allocation6 + $0xbcc] sm:$0xf0] }
 0x411   :  { %3500 = vmatpush.bf16.msra.mxu2 %v11799_v28  ;;  %v11771_v28 = vor.u32 %v14627_v50, %v11768_v3  ;;  %v11974_v50 = vld [vmem:[#allocation6 + $0xae8] sm:$0xf]  ;;  %v16192_v3 = vpop.f32.mrf.mxu3  ;;  %v14822_v56 = vld [vmem:[#allocation6 + $0xf64] sm:$0xf]  ;;  %17215 = vst [vmem:[#allocation43_spill] sm:$0xff] %v16196_v19 }
 0x412   :  { %3514 = vmatpush.bf16.msra.mxu0 %v11803_v41  ;;  %3735 = vmatpush.bf16.msra.mxu1 %v11919_v53  ;;  %v11887_v41 = vor.u32 %v14660_v5, %v11886_v22  ;;  %v14623_v53 = vld [vmem:[#allocation6 + $0x92c] sm:$0xf]  ;;  %17214 = vst [vmem:[#allocation42_spill] sm:$0xff] %v16192_v3  ;;  %v11976_v5 = vld [vmem:[#allocation6 + $0xaf8] sm:$0xf0] }
 0x413   :  { %4806 = vmatmul.bf16.vlgmr.msra.gmra.mxu3 %v16185_v45  ;;  %v11755_v13 = vor.u32 %v14623_v53, %v11752_v39  ;;  %v14679_v22 = vld [vmem:[#allocation6 + $0xaec] sm:$0xf]  ;;  %v11855_v53 = vor.u32 %v14652_v59, %v11854_v8  ;;  %v14772_v19 = vld [vmem:[#allocation6 + $0xdcc] sm:$0xf0] }
 0x414   :  { %5061 = vmatpush.bf16.msrb.mxu3 %v12611_v25  ;;  %v14681_v25 = vld [vmem:[#allocation6 + $0xaf4] sm:$0xf0]  ;;  %v11979_v39 = vor.u32 %v14679_v22, %v11976_v5  ;;  %v14675_v3 = vld [vmem:[#allocation6 + $0xacc] sm:$0xf]  ;;  %v12062_v22 = vld [vmem:[#allocation6 + $0xba0] sm:$0xf] }
 0x415   :  { %3501 = vmatpush.bf16.msra.mxu2 %v11783_v60  ;;  %v11871_v60 = vor.u32 %v14656_v26, %v11870_v15  ;;  %v16194_v11 = vpop.f32.mrf.mxu2  ;;  %v11958_v15 = vld [vmem:[#allocation6 + $0xac8] sm:$0xf]  ;;  %v14677_v26 = vld [vmem:[#allocation6 + $0xad4] sm:$0xf0] }
 0x416   :  { %3515 = vmatpush.bf16.msra.mxu0 %v11787_v32  ;;  %3736 = vmatpush.bf16.msra.mxu1 %v11903_v35  ;;  %v14619_v32 = vld [vmem:[#allocation6 + $0x90c] sm:$0xf]  ;;  %v11736_v35 = vld [vmem:[#allocation6 + $0x918] sm:$0xf0] }
 0x417   :  { %v11739_v10 = vor.u32 %v14619_v32, %v11736_v35  ;;  %v11942_v32 = vld [vmem:[#allocation6 + $0xaa8] sm:$0xf]  ;;  %v14673_v35 = vld [vmem:[#allocation6 + $0xab4] sm:$0xf0] }
 0x418   :  { %5062 = vmatpush.bf16.msrb.mxu3 %v12595_v37  ;;  %v11975_v37 = vor.u32 %v14681_v25, %v11974_v50  ;;  %v14671_v50 = vld [vmem:[#allocation6 + $0xaac] sm:$0xf]  ;;  %v11944_v25 = vld [vmem:[#allocation6 + $0xab8] sm:$0xf0] }
 0x419   :  { %3502 = vmatpush.bf16.msra.mxu2 %v11767_v6  ;;  %v14712_v6 = vld [vmem:[#allocation6 + $0xbec] sm:$0xf0]  ;;  %v3755_v59 = vpop.f32.mrf.mxu3 }
 0x41a   :  { %3516 = vmatpush.bf16.msra.mxu0 %v11771_v28  ;;  %3737 = vmatpush.bf16.msra.mxu1 %v11887_v41  ;;  %v14826_v28 = vld [vmem:[#allocation6 + $0xf84] sm:$0xf]  ;;  %v12560_v41 = vld [vmem:[#allocation6 + $0xf90] sm:$0xf0]  ;;  %v12095_v55 = vor.u32 %v14712_v6, %v12094_v61  ;;  %v16201_v5 = vadd.f32 %v3755_v59, %v16157_v54  ;;  %v14704_v61 = vld [vmem:[#allocation6 + $0xbac] sm:$0xf0] }
 0x41b   :  { %v12563_v40 = vor.u32 %v14826_v28, %v12560_v41  ;;  %v11926_v6 = vld [vmem:[#allocation6 + $0xa88] sm:$0xf]  ;;  %v14669_v28 = vld [vmem:[#allocation6 + $0xa94] sm:$0xf0]  ;;  %v11928_v54 = vld [vmem:[#allocation6 + $0xa98] sm:$0xf0] }
 0x41c   :  { %5063 = vmatpush.bf16.msrb.mxu3 %v12579_v48  ;;  %v12547_v48 = vor.u32 %v14822_v56, %v12544_v36  ;;  %v11947_v36 = vor.u32 %v14671_v50, %v11944_v25  ;;  %v11927_v56 = vor.u32 %v14669_v28, %v11926_v6  ;;  %v11912_v59 = vld [vmem:[#allocation6 + $0xa78] sm:$0xf0]  ;;  %v14696_v50 = vld [vmem:[#allocation6 + $0xb6c] sm:$0xf0]  ;;  %v14810_v25 = vld [vmem:[#allocation6 + $0xf04] sm:$0xf] }
 0x41d   :  { %3503 = vmatpush.bf16.msra.mxu2 %v11751_v44  ;;  %v12078_v44 = vld [vmem:[#allocation6 + $0xbc0] sm:$0xf]  ;;  %v16204_v41 = vpop.f32.mrf.mxu2  ;;  %v11894_v28 = vld [vmem:[#allocation6 + $0xa48] sm:$0xf] }
 0x41e   :  { %3517 = vmatpush.bf16.msra.mxu0 %v11755_v13  ;;  %3738 = vmatpush.bf16.msra.mxu1 %v11871_v60  ;;  %v11959_v13 = vor.u32 %v14677_v26, %v11958_v15  ;;  %v11963_v60 = vor.u32 %v14675_v3, %v11960_v2  ;;  %v12079_v8 = vor.u32 %v14708_v51, %v12078_v44  ;;  %v12528_v2 = vld [vmem:[#allocation6 + $0xf50] sm:$0xf0]  ;;  %v14814_v15 = vld [vmem:[#allocation6 + $0xf24] sm:$0xf] }
 0x41f   :  { %v11943_v3 = vor.u32 %v14673_v35, %v11942_v32  ;;  %17216 = vst [vmem:[#allocation44_spill] sm:$0xff] %v16204_v41  ;;  %v12512_v26 = vld [vmem:[#allocation6 + $0xf30] sm:$0xf0]  ;;  %v14665_v32 = vld [vmem:[#allocation6 + $0xa74] sm:$0xf0] }
 0x420   :  { %5064 = vmatpush.bf16.msrb.mxu3 %v12563_v40  ;;  %v967_v40 = vpack.c.bf16 %v16076_v23, %v16076_v23  ;;  %v12496_v23 = vld [vmem:[#allocation6 + $0xf10] sm:$0xf0]  ;;  %v12216_v41 = vld [vmem:[#allocation6 + $0xcd8] sm:$0xf0] }
 0x421   :  { %3504 = vmatpush.bf16.msra.mxu2 %v11735_v30  ;;  %v14818_v30 = vld [vmem:[#allocation6 + $0xf44] sm:$0xf] }
 0x422   :  { %3518 = vmatpush.bf16.msra.mxu0 %v11739_v10  ;;  %3739 = vmatpush.bf16.msra.mxu1 %v11855_v53  ;;  %v12063_v10 = vor.u32 %v14704_v61, %v12062_v22  ;;  %v14667_v53 = vld [vmem:[#allocation6 + $0xa8c] sm:$0xf]  ;;  %v2525_v44 = vpop.f32.mrf.mxu0  ;;  %v4884_v61 = vunpack.c.l.b16 %v967_v40 }
 0x423   :  { %v16211_v51 = vadd.f32 %v2525_v44, %v16189_v24  ;;  %v11878_v44 = vld [vmem:[#allocation6 + $0xa28] sm:$0xf] }
 0x424   :  { %3505 = vmatmul.bf16.vlgmr.msra.gmra.mxu2 %v16039_v58  ;;  %5065 = vmatpush.bf16.msrb.mxu3 %v12547_v48  ;;  %v14663_v48 = vld [vmem:[#allocation6 + $0xa6c] sm:$0xf] }
 0x425   :  { %3760 = vmatpush.bf16.msrb.mxu2 %v11975_v37  ;;  %3519 = vmatmul.bf16.vlgmr.msra.gmra.mxu0 %v16039_v58  ;;  %v12531_v58 = vor.u32 %v14818_v30, %v12528_v2  ;;  %v12046_v37 = vld [vmem:[#allocation6 + $0xb80] sm:$0xf]  ;;  %v16213_v30 = vpop.f32.mrf.mxu1  ;;  %v11915_v2 = vor.u32 %v14663_v48, %v11912_v59  ;;  %v11862_v48 = vld [vmem:[#allocation6 + $0xa08] sm:$0xf] }
 0x426   :  { %3774 = vmatpush.bf16.msrb.mxu0 %v11979_v39  ;;  %3995 = vmatpush.bf16.msrb.mxu1 %v12095_v55  ;;  %v14700_v39 = vld [vmem:[#allocation6 + $0xb8c] sm:$0xf0]  ;;  %v966_v55 = vpack.c.bf16 %v16068_v27, %v16068_v27  ;;  %v12030_v27 = vld [vmem:[#allocation6 + $0xb60] sm:$0xf] }
 0x427   :  { %3740 = vmatmul.bf16.vlgmr.msra.gmra.mxu1 %v16073_v47  ;;  %v12047_v35 = vor.u32 %v14700_v39, %v12046_v37  ;;  %v2511_v6 = vpop.f32.mrf.mxu2  ;;  %v12014_v37 = vld [vmem:[#allocation6 + $0xb40] sm:$0xf]  ;;  %v14692_v39 = vld [vmem:[#allocation6 + $0xb4c] sm:$0xf0] }
 0x428   :  { %5066 = vmatpush.bf16.msrb.mxu3 %v12531_v58  ;;  %v4883_v22 = vunpack.c.l.b16 %v966_v55  ;;  %v14659_v58 = vld [vmem:[#allocation6 + $0xa4c] sm:$0xf]  ;;  %v12015_v40 = vor.u32 %v14692_v39, %v12014_v37 }
 0x429   :  { %3761 = vmatpush.bf16.msrb.mxu2 %v11959_v13  ;;  %v11931_v13 = vor.u32 %v14667_v53, %v11928_v54  ;;  %v16216_v53 = vadd.f32 %v2511_v6, %v16194_v11  ;;  %v11896_v54 = vld [vmem:[#allocation6 + $0xa58] sm:$0xf0] }
 0x42a   :  { %3775 = vmatpush.bf16.msrb.mxu0 %v11963_v60  ;;  %3996 = vmatpush.bf16.msrb.mxu1 %v12079_v8  ;;  %v11910_v60 = vld [vmem:[#allocation6 + $0xa68] sm:$0xf]  ;;  %v12515_v8 = vor.u32 %v14814_v15, %v12512_v26  ;;  %v16218_v15 = vpack.c.b16 %v4884_v61, %v4883_v22  ;;  %v11899_v55 = vor.u32 %v14659_v58, %v11896_v54  ;;  %v11982_v22 = vld [vmem:[#allocation6 + $0xb00] sm:$0xf]  ;;  %v14684_v61 = vld [vmem:[#allocation6 + $0xb0c] sm:$0xf0] }
 0x42b   :  { %v11911_v24 = vor.u32 %v14665_v32, %v11910_v60  ;;  %v11880_v60 = vld [vmem:[#allocation6 + $0xa38] sm:$0xf0]  ;;  %v11998_v32 = vld [vmem:[#allocation6 + $0xb20] sm:$0xf]  ;;  %v11983_v54 = vor.u32 %v14684_v61, %v11982_v22  ;;  %v14736_v22 = vld [vmem:[#allocation6 + $0xcac] sm:$0xf0] }
 0x42c   :  { %5067 = vmatpush.bf16.msrb.mxu3 %v12515_v8 }
 0x42d   :  { %3762 = vmatpush.bf16.msrb.mxu2 %v11943_v3  ;;  %v12031_v3 = vor.u32 %v14696_v50, %v12030_v27  ;;  %v16221_v11 = vpop.f32.mrf.mxu1  ;;  %v14653_v50 = vld [vmem:[#allocation6 + $0xa14] sm:$0xf0] }
 0x42e   :  { %3776 = vmatpush.bf16.msrb.mxu0 %v11947_v36  ;;  %3997 = vmatpush.bf16.msrb.mxu1 %v12063_v10  ;;  %v12499_v36 = vor.u32 %v14810_v25, %v12496_v23  ;;  %v14661_v10 = vld [vmem:[#allocation6 + $0xa54] sm:$0xf0]  ;;  %v14651_v25 = vld [vmem:[#allocation6 + $0xa0c] sm:$0xf]  ;;  %v11864_v23 = vld [vmem:[#allocation6 + $0xa18] sm:$0xf0]  ;;  %v11863_v6 = vor.u32 %v14653_v50, %v11862_v48 }
 0x42f   :  { %v11895_v26 = vor.u32 %v14661_v10, %v11894_v28  ;;  %v12222_v28 = vld [vmem:[#allocation6 + $0xce0] sm:$0xf]  ;;  %v14744_v10 = vld [vmem:[#allocation6 + $0xcec] sm:$0xf0]  ;;  %v11867_v58 = vor.u32 %v14651_v25, %v11864_v23  ;;  %v12070_v48 = vld [vmem:[#allocation6 + $0xba8] sm:$0xf] }
 0x430   :  { %5068 = vmatpush.bf16.msrb.mxu3 %v12499_v36  ;;  %v12104_v36 = vld [vmem:[#allocation6 + $0xbf8] sm:$0xf0]  ;;  %v14703_v50 = vld [vmem:[#allocation6 + $0xbac] sm:$0xf]  ;;  %v12190_v23 = vld [vmem:[#allocation6 + $0xca0] sm:$0xf] }
 0x431   :  { %3763 = vmatpush.bf16.msrb.mxu2 %v11927_v56  ;;  %v14657_v56 = vld [vmem:[#allocation6 + $0xa34] sm:$0xf0]  ;;  %v12072_v25 = vld [vmem:[#allocation6 + $0xbb8] sm:$0xf0] }
 0x432   :  { %3777 = vmatpush.bf16.msrb.mxu0 %v11931_v13  ;;  %3998 = vmatpush.bf16.msrb.mxu1 %v12047_v35  ;;  %v14655_v13 = vld [vmem:[#allocation6 + $0xa2c] sm:$0xf]  ;;  %v14688_v35 = vld [vmem:[#allocation6 + $0xb2c] sm:$0xf0]  ;;  %v11879_v8 = vor.u32 %v14657_v56, %v11878_v44  ;;  %v12088_v56 = vld [vmem:[#allocation6 + $0xbd8] sm:$0xf0] }
 0x433   :  { %5069 = vmatmul.bf16.vlgmr.msrb.gmra.mxu3 %v16218_v15  ;;  %v11883_v59 = vor.u32 %v14655_v13, %v11880_v60  ;;  %v11999_v27 = vor.u32 %v14688_v35, %v11998_v32  ;;  %v14707_v44 = vld [vmem:[#allocation6 + $0xbcc] sm:$0xf]  ;;  %v12206_v13 = vld [vmem:[#allocation6 + $0xcc0] sm:$0xf]  ;;  %v14740_v60 = vld [vmem:[#allocation6 + $0xccc] sm:$0xf0] }
 0x435   :  { %3764 = vmatpush.bf16.msrb.mxu2 %v11911_v24  ;;  %v12102_v24 = vld [vmem:[#allocation6 + $0xbe8] sm:$0xf]  ;;  %v16223_v32 = vpop.f32.mrf.mxu1 }
 0x436   :  { %3778 = vmatpush.bf16.msrb.mxu0 %v11915_v2  ;;  %3999 = vmatpush.bf16.msrb.mxu1 %v12031_v3  ;;  %v14713_v2 = vld [vmem:[#allocation6 + $0xbf4] sm:$0xf0]  ;;  %v14711_v3 = vld [vmem:[#allocation6 + $0xbec] sm:$0xf] }
 0x437   :  { %v12103_v37 = vor.u32 %v14713_v2, %v12102_v24  ;;  %v12107_v39 = vor.u32 %v14711_v3, %v12104_v36  ;;  %v12075_v24 = vor.u32 %v14703_v50, %v12072_v25  ;;  %v12054_v2 = vld [vmem:[#allocation6 + $0xb88] sm:$0xf]  ;;  %v12191_v3 = vor.u32 %v14736_v22, %v12190_v23  ;;  %v14701_v36 = vld [vmem:[#allocation6 + $0xb94] sm:$0xf0]  ;;  %v14691_v25 = vld [vmem:[#allocation6 + $0xb4c] sm:$0xf] }
 0x438   :  { %v14693_v50 = vld [vmem:[#allocation6 + $0xb54] sm:$0xf0]  ;;  %v12024_v23 = vld [vmem:[#allocation6 + $0xb58] sm:$0xf0]  ;;  %v14724_v22 = vld [vmem:[#allocation6 + $0xc4c] sm:$0xf0] }
 0x439   :  { %3765 = vmatpush.bf16.msrb.mxu2 %v11895_v26  ;;  %v12086_v26 = vld [vmem:[#allocation6 + $0xbc8] sm:$0xf] }
 0x43a   :  { %3779 = vmatpush.bf16.msrb.mxu0 %v11899_v55  ;;  %4000 = vmatpush.bf16.msrb.mxu1 %v12015_v40  ;;  %v12223_v55 = vor.u32 %v14744_v10, %v12222_v28  ;;  %v14709_v40 = vld [vmem:[#allocation6 + $0xbd4] sm:$0xf0]  ;;  %v12056_v28 = vld [vmem:[#allocation6 + $0xb98] sm:$0xf0]  ;;  %v12174_v10 = vld [vmem:[#allocation6 + $0xc80] sm:$0xf] }
 0x43b   :  { %v12087_v35 = vor.u32 %v14709_v40, %v12086_v26  ;;  %v14697_v40 = vld [vmem:[#allocation6 + $0xb74] sm:$0xf0] }
 0x43d   :  { %3766 = vmatpush.bf16.msrb.mxu2 %v11879_v8  ;;  %v12091_v8 = vor.u32 %v14707_v44, %v12088_v56  ;;  %v14695_v44 = vld [vmem:[#allocation6 + $0xb6c] sm:$0xf]  ;;  %v12040_v56 = vld [vmem:[#allocation6 + $0xb78] sm:$0xf0] }
 0x43e   :  { %3780 = vmatpush.bf16.msrb.mxu0 %v11883_v59  ;;  %4001 = vmatpush.bf16.msrb.mxu1 %v11999_v27  ;;  %v12207_v59 = vor.u32 %v14740_v60, %v12206_v13  ;;  %v14705_v27 = vld [vmem:[#allocation6 + $0xbb4] sm:$0xf0]  ;;  %v12158_v13 = vld [vmem:[#allocation6 + $0xc60] sm:$0xf]  ;;  %v14728_v60 = vld [vmem:[#allocation6 + $0xc6c] sm:$0xf0] }
 0x43f   :  { %v12071_v61 = vor.u32 %v14705_v27, %v12070_v48  ;;  %v12043_v48 = vor.u32 %v14695_v44, %v12040_v56  ;;  %v12159_v27 = vor.u32 %v14728_v60, %v12158_v13  ;;  %v14685_v44 = vld [vmem:[#allocation6 + $0xb14] sm:$0xf0]  ;;  %v14683_v56 = vld [vmem:[#allocation6 + $0xb0c] sm:$0xf]  ;;  %v11992_v60 = vld [vmem:[#allocation6 + $0xb18] sm:$0xf0] }
 0x441   :  { %3767 = vmatpush.bf16.msrb.mxu2 %v11863_v6  ;;  %v14699_v6 = vld [vmem:[#allocation6 + $0xb8c] sm:$0xf] }
 0x442   :  { %3781 = vmatpush.bf16.msrb.mxu0 %v11867_v58  ;;  %4002 = vmatpush.bf16.msrb.mxu1 %v11983_v54  ;;  %v14732_v58 = vld [vmem:[#allocation6 + $0xc8c] sm:$0xf0] }
 0x444   :  { %3768 = vmatmul.bf16.vlgmr.msrb.gmra.mxu2 %v16073_v47  ;;  %v2960_v54 = vpop.f32.mrf.mxu1 }
 0x445   :  { %4023 = vmatpush.bf16.msra.mxu2 %v12103_v37  ;;  %3782 = vmatmul.bf16.vlgmr.msrb.gmra.mxu0 %v16073_v47  ;;  %v12055_v47 = vor.u32 %v14701_v36, %v12054_v2  ;;  %v12059_v37 = vor.u32 %v14699_v6, %v12056_v28  ;;  %v16229_v26 = vadd.f32 %v2960_v54, %v16221_v11  ;;  %v12142_v11 = vld [vmem:[#allocation6 + $0xc40] sm:$0xf]  ;;  %v12006_v2 = vld [vmem:[#allocation6 + $0xb28] sm:$0xf]  ;;  %v16235_v36 = vpop.f32.mrf.mxu2  ;;  %v14689_v28 = vld [vmem:[#allocation6 + $0xb34] sm:$0xf0] }
 0x446   :  { %4037 = vmatpush.bf16.msra.mxu0 %v12107_v39  ;;  %4258 = vmatpush.bf16.msra.mxu1 %v12223_v55  ;;  %v12038_v39 = vld [vmem:[#allocation6 + $0xb68] sm:$0xf]  ;;  %v12175_v55 = vor.u32 %v14732_v58, %v12174_v10  ;;  %17219 = vst [vmem:[#allocation47_spill] sm:$0xff] %v16235_v36  ;;  %v12143_v6 = vor.u32 %v14724_v22, %v12142_v11  ;;  %v14687_v10 = vld [vmem:[#allocation6 + $0xb2c] sm:$0xf] }
 0x447   :  { %4003 = vmatmul.bf16.vlgmr.msrb.gmra.mxu1 %v16099_v46  ;;  %v12008_v58 = vld [vmem:[#allocation6 + $0xb38] sm:$0xf0]  ;;  %v12126_v54 = vld [vmem:[#allocation6 + $0xc20] sm:$0xf]  ;;  %v14776_v11 = vld [vmem:[#allocation6 + $0xdec] sm:$0xf0] }
 0x448   :  { %v14739_v36 = vld [vmem:[#allocation6 + $0xccc] sm:$0xf] }
 0x449   :  { %4024 = vmatpush.bf16.msra.mxu2 %v12087_v35  ;;  %v16231_v35 = vpop.f32.mrf.mxu0 }
 0x44a   :  { %4038 = vmatpush.bf16.msra.mxu0 %v12091_v8  ;;  %4259 = vmatpush.bf16.msra.mxu1 %v12207_v59  ;;  %17217 = vst [vmem:[#allocation45_spill] sm:$0xff] %v16231_v35  ;;  %v12039_v8 = vor.u32 %v14697_v40, %v12038_v39  ;;  %v12022_v59 = vld [vmem:[#allocation6 + $0xb48] sm:$0xf]  ;;  %v12007_v39 = vor.u32 %v14689_v28, %v12006_v2  ;;  %v12334_v35 = vld [vmem:[#allocation6 + $0xdc0] sm:$0xf] }
 0x44b   :  { %v11990_v40 = vld [vmem:[#allocation6 + $0xb08] sm:$0xf] }
 0x44c   :  { %v11991_v22 = vor.u32 %v14685_v44, %v11990_v40  ;;  %v16245_v40 = vpop.f32.mrf.mxu1  ;;  %v12219_v44 = vor.u32 %v14739_v36, %v12216_v41  ;;  %v12182_v41 = vld [vmem:[#allocation6 + $0xc88] sm:$0xf] }
 0x44d   :  { %4025 = vmatpush.bf16.msra.mxu2 %v12071_v61  ;;  %v12023_v61 = vor.u32 %v14693_v50, %v12022_v59  ;;  %v12230_v59 = vld [vmem:[#allocation6 + $0xce8] sm:$0xf]  ;;  %v14743_v50 = vld [vmem:[#allocation6 + $0xcec] sm:$0xf]  ;;  %v16241_v2 = vpop.f32.mrf.mxu2 }
 0x44e   :  { %4039 = vmatpush.bf16.msra.mxu0 %v12075_v24  ;;  %4260 = vmatpush.bf16.msra.mxu1 %v12191_v3  ;;  %v12027_v24 = vor.u32 %v14691_v25, %v12024_v23  ;;  %v16233_v3 = vpop.f32.mrf.mxu3  ;;  %v12232_v25 = vld [vmem:[#allocation6 + $0xcf8] sm:$0xf0]  ;;  %v12350_v23 = vld [vmem:[#allocation6 + $0xde0] sm:$0xf] }
 0x44f   :  { %17218 = vst [vmem:[#allocation46_spill] sm:$0xff] %v16233_v3  ;;  %v14804_v3 = vld [vmem:[#allocation6 + $0xecc] sm:$0xf0] }
 0x451   :  { %4026 = vmatpush.bf16.msra.mxu2 %v12055_v47  ;;  %v14720_v47 = vld [vmem:[#allocation6 + $0xc2c] sm:$0xf0] }
 0x452   :  { %4040 = vmatpush.bf16.msra.mxu0 %v12059_v37  ;;  %4261 = vmatpush.bf16.msra.mxu1 %v12175_v55  ;;  %v16237_v37 = vpop.f32.mrf.mxu0  ;;  %v12011_v55 = vor.u32 %v14687_v10, %v12008_v58  ;;  %v12127_v13 = vor.u32 %v14720_v47, %v12126_v54  ;;  %v12235_v10 = vor.u32 %v14743_v50, %v12232_v25  ;;  %v12214_v54 = vld [vmem:[#allocation6 + $0xcc8] sm:$0xf]  ;;  %v14741_v47 = vld [vmem:[#allocation6 + $0xcd4] sm:$0xf0] }
 0x453   :  { %v12351_v58 = vor.u32 %v14776_v11, %v12350_v23 }
 0x455   :  { %4027 = vmatpush.bf16.msra.mxu2 %v12039_v8  ;;  %v12110_v8 = vld [vmem:[#allocation6 + $0xc00] sm:$0xf]  ;;  %v16252_v11 = vpop.f32.mrf.mxu2 }
 0x456   :  { %4041 = vmatpush.bf16.msra.mxu0 %v12043_v48  ;;  %4262 = vmatpush.bf16.msra.mxu1 %v12159_v27  ;;  %v14716_v48 = vld [vmem:[#allocation6 + $0xc0c] sm:$0xf0]  ;;  %v14745_v27 = vld [vmem:[#allocation6 + $0xcf4] sm:$0xf0]  ;;  %17222 = vst [vmem:[#allocation50_spill] sm:$0xff] %v16252_v11 }
 0x457   :  { %v12231_v28 = vor.u32 %v14745_v27, %v12230_v59  ;;  %v12318_v59 = vld [vmem:[#allocation6 + $0xda0] sm:$0xf]  ;;  %v14768_v27 = vld [vmem:[#allocation6 + $0xdac] sm:$0xf0]  ;;  %v14771_v11 = vld [vmem:[#allocation6 + $0xdcc] sm:$0xf] }
 0x458   :  { %v12319_v23 = vor.u32 %v14768_v27, %v12318_v59 }
 0x459   :  { %4028 = vmatpush.bf16.msra.mxu2 %v12023_v61  ;;  %v11995_v61 = vor.u32 %v14683_v56, %v11992_v60  ;;  %v12335_v56 = vor.u32 %v14772_v19, %v12334_v35  ;;  %v14737_v60 = vld [vmem:[#allocation6 + $0xcb4] sm:$0xf0]  ;;  %v14731_v35 = vld [vmem:[#allocation6 + $0xc8c] sm:$0xf] }
 0x45a   :  { %4042 = vmatpush.bf16.msra.mxu0 %v12027_v24  ;;  %4263 = vmatpush.bf16.msra.mxu1 %v12143_v6  ;;  %v16239_v24 = vpop.f32.mrf.mxu3  ;;  %v12111_v6 = vor.u32 %v14716_v48, %v12110_v8  ;;  %v14735_v8 = vld [vmem:[#allocation6 + $0xcac] sm:$0xf]  ;;  %v12200_v48 = vld [vmem:[#allocation6 + $0xcb8] sm:$0xf0]  ;;  %v14733_v19 = vld [vmem:[#allocation6 + $0xc94] sm:$0xf0] }
 0x45b   :  { %v12203_v25 = vor.u32 %v14735_v8, %v12200_v48  ;;  %v12286_v8 = vld [vmem:[#allocation6 + $0xd60] sm:$0xf]  ;;  %v14760_v48 = vld [vmem:[#allocation6 + $0xd6c] sm:$0xf0] }
 0x45d   :  { %4029 = vmatpush.bf16.msra.mxu2 %v12007_v39  ;;  %v16243_v39 = vpop.f32.mrf.mxu0 }
 0x45e   :  { %4043 = vmatpush.bf16.msra.mxu0 %v12011_v55  ;;  %4264 = vmatpush.bf16.msra.mxu1 %v12127_v13  ;;  %17220 = vst [vmem:[#allocation48_spill] sm:$0xff] %v16243_v39  ;;  %v12215_v55 = vor.u32 %v14741_v47, %v12214_v54  ;;  %v12198_v13 = vld [vmem:[#allocation6 + $0xca8] sm:$0xf]  ;;  %v12344_v39 = vld [vmem:[#allocation6 + $0xdd8] sm:$0xf0] }
 0x45f   :  { %v12199_v50 = vor.u32 %v14737_v60, %v12198_v13  ;;  %v12168_v60 = vld [vmem:[#allocation6 + $0xc78] sm:$0xf0] }
 0x461   :  { %4030 = vmatpush.bf16.msra.mxu2 %v11991_v22  ;;  %v12184_v22 = vld [vmem:[#allocation6 + $0xc98] sm:$0xf0] }
 0x462   :  { %4044 = vmatpush.bf16.msra.mxu0 %v11995_v61  ;;  %4265 = vmatpush.bf16.msra.mxu1 %v12111_v6  ;;  %v16250_v36 = vpop.f32.mrf.mxu3  ;;  %v14764_v61 = vld [vmem:[#allocation6 + $0xd8c] sm:$0xf0]  ;;  %v12187_v54 = vor.u32 %v14731_v35, %v12184_v22  ;;  %v12152_v35 = vld [vmem:[#allocation6 + $0xc58] sm:$0xf0]  ;;  %v12270_v22 = vld [vmem:[#allocation6 + $0xd40] sm:$0xf] }
 0x463   :  { %17221 = vst [vmem:[#allocation49_spill] sm:$0xff] %v16250_v36  ;;  %v12462_v36 = vld [vmem:[#allocation6 + $0xec0] sm:$0xf] }
 0x464   :  { %4031 = vmatmul.bf16.vlgmr.msra.gmra.mxu2 %v16099_v46 }
 0x465   :  { %4286 = vmatpush.bf16.msrb.mxu2 %v12231_v28  ;;  %4045 = vmatmul.bf16.vlgmr.msra.gmra.mxu0 %v16099_v46  ;;  %v12302_v46 = vld [vmem:[#allocation6 + $0xd80] sm:$0xf]  ;;  %v3002_v6 = vpop.f32.mrf.mxu0  ;;  %v12183_v28 = vor.u32 %v14733_v19, %v12182_v41 }
 0x466   :  { %4300 = vmatpush.bf16.msrb.mxu0 %v12235_v10  ;;  %4521 = vmatpush.bf16.msrb.mxu1 %v12351_v58  ;;  %v16255_v10 = vadd.f32 %v3002_v6, %v16237_v37  ;;  %v3215_v58 = vpop.f32.mrf.mxu1  ;;  %v12303_v47 = vor.u32 %v14764_v61, %v12302_v46  ;;  %v12150_v37 = vld [vmem:[#allocation6 + $0xc48] sm:$0xf]  ;;  %v14756_v46 = vld [vmem:[#allocation6 + $0xd4c] sm:$0xf0] }
 0x467   :  { %4266 = vmatmul.bf16.vlgmr.msra.gmra.mxu1 %v16137_v17  ;;  %v16258_v13 = vadd.f32 %v3215_v58, %v16046_v57  ;;  %v2988_v19 = vpop.f32.mrf.mxu2  ;;  %v12134_v58 = vld [vmem:[#allocation6 + $0xc28] sm:$0xf] }
 0x468   :  { %v16263_v57 = vadd.f32 %v2988_v19, %v16241_v2  ;;  %v14717_v19 = vld [vmem:[#allocation6 + $0xc14] sm:$0xf0] }
 0x469   :  { %4287 = vmatpush.bf16.msrb.mxu2 %v12215_v55  ;;  %v12166_v55 = vld [vmem:[#allocation6 + $0xc68] sm:$0xf] }
 0x46a   :  { %4301 = vmatpush.bf16.msrb.mxu0 %v12219_v44  ;;  %4522 = vmatpush.bf16.msrb.mxu1 %v12335_v56  ;;  %v14729_v44 = vld [vmem:[#allocation6 + $0xc74] sm:$0xf0]  ;;  %v14727_v56 = vld [vmem:[#allocation6 + $0xc6c] sm:$0xf]  ;;  %v16260_v41 = vpop.f32.mrf.mxu3  ;;  %17223 = vst [vmem:[#allocation51_spill] sm:$0xff] %v16263_v57 }
 0x46b   :  { %v12167_v59 = vor.u32 %v14729_v44, %v12166_v55  ;;  %v12171_v27 = vor.u32 %v14727_v56, %v12168_v60  ;;  %v12136_v55 = vld [vmem:[#allocation6 + $0xc38] sm:$0xf0]  ;;  %v12254_v44 = vld [vmem:[#allocation6 + $0xd20] sm:$0xf]  ;;  %v14752_v56 = vld [vmem:[#allocation6 + $0xd2c] sm:$0xf0] }
 0x46c   :  { %v12255_v2 = vor.u32 %v14752_v56, %v12254_v44  ;;  %v14773_v56 = vld [vmem:[#allocation6 + $0xdd4] sm:$0xf0] }
 0x46d   :  { %4288 = vmatpush.bf16.msrb.mxu2 %v12199_v50  ;;  %v12287_v50 = vor.u32 %v14760_v48, %v12286_v8  ;;  %v12118_v8 = vld [vmem:[#allocation6 + $0xc08] sm:$0xf] }
 0x46e   :  { %4302 = vmatpush.bf16.msrb.mxu0 %v12203_v25  ;;  %4523 = vmatpush.bf16.msrb.mxu1 %v12319_v23  ;;  %v14725_v25 = vld [vmem:[#allocation6 + $0xc54] sm:$0xf0]  ;;  %v14723_v23 = vld [vmem:[#allocation6 + $0xc4c] sm:$0xf]  ;;  %v12119_v57 = vor.u32 %v14717_v19, %v12118_v8  ;;  %v16269_v19 = vpop.f32.mrf.mxu1 }
 0x46f   :  { %v12151_v61 = vor.u32 %v14725_v25, %v12150_v37  ;;  %v12155_v6 = vor.u32 %v14723_v23, %v12152_v35  ;;  %v12120_v37 = vld [vmem:[#allocation6 + $0xc18] sm:$0xf0]  ;;  %v12358_v25 = vld [vmem:[#allocation6 + $0xde8] sm:$0xf]  ;;  %v14777_v23 = vld [vmem:[#allocation6 + $0xdf4] sm:$0xf0] }
 0x470   :  { %v14775_v35 = vld [vmem:[#allocation6 + $0xdec] sm:$0xf] }
 0x471   :  { %4289 = vmatpush.bf16.msrb.mxu2 %v12183_v28  ;;  %v12271_v28 = vor.u32 %v14756_v46, %v12270_v22  ;;  %v12360_v22 = vld [vmem:[#allocation6 + $0xdf8] sm:$0xf0] }
 0x472   :  { %4303 = vmatpush.bf16.msrb.mxu0 %v12187_v54  ;;  %4524 = vmatpush.bf16.msrb.mxu1 %v12303_v47  ;;  %v14721_v54 = vld [vmem:[#allocation6 + $0xc34] sm:$0xf0]  ;;  %v14719_v47 = vld [vmem:[#allocation6 + $0xc2c] sm:$0xf]  ;;  %v16265_v46 = vpop.f32.mrf.mxu3 }
 0x473   :  { %v12135_v60 = vor.u32 %v14721_v54, %v12134_v58  ;;  %v12139_v48 = vor.u32 %v14719_v47, %v12136_v55  ;;  %v14808_v58 = vld [vmem:[#allocation6 + $0xeec] sm:$0xf0]  ;;  %v12359_v54 = vor.u32 %v14777_v23, %v12358_v25  ;;  %v12363_v47 = vor.u32 %v14775_v35, %v12360_v22  ;;  %v12342_v55 = vld [vmem:[#allocation6 + $0xdc8] sm:$0xf]  ;;  %v12446_v25 = vld [vmem:[#allocation6 + $0xea0] sm:$0xf] }
 0x474   :  { %v12343_v8 = vor.u32 %v14773_v56, %v12342_v55  ;;  %v14800_v23 = vld [vmem:[#allocation6 + $0xeac] sm:$0xf0]  ;;  %v12294_v55 = vld [vmem:[#allocation6 + $0xd68] sm:$0xf] }
 0x475   :  { %4290 = vmatpush.bf16.msrb.mxu2 %v12167_v59  ;;  %v14715_v59 = vld [vmem:[#allocation6 + $0xc0c] sm:$0xf] }
 0x476   :  { %4304 = vmatpush.bf16.msrb.mxu0 %v12171_v27  ;;  %4525 = vmatpush.bf16.msrb.mxu1 %v12287_v50  ;;  %v12238_v27 = vld [vmem:[#allocation6 + $0xd00] sm:$0xf]  ;;  %v14748_v50 = vld [vmem:[#allocation6 + $0xd0c] sm:$0xf0] }
 0x479   :  { %4291 = vmatpush.bf16.msrb.mxu2 %v12151_v61  ;;  %v12478_v61 = vld [vmem:[#allocation6 + $0xee0] sm:$0xf] }
 0x47a   :  { %4305 = vmatpush.bf16.msrb.mxu0 %v12155_v6  ;;  %4526 = vmatpush.bf16.msrb.mxu1 %v12271_v28  ;;  %v12123_v6 = vor.u32 %v14715_v59, %v12120_v37  ;;  %v12239_v28 = vor.u32 %v14748_v50, %v12238_v27  ;;  %v12479_v44 = vor.u32 %v14808_v58, %v12478_v61  ;;  %v14769_v37 = vld [vmem:[#allocation6 + $0xdb4] sm:$0xf0]  ;;  %v14767_v27 = vld [vmem:[#allocation6 + $0xdac] sm:$0xf]  ;;  %v4544_v50 = vpop.f32.mrf.mxu3 }
 0x47b   :  { %v12463_v59 = vor.u32 %v14804_v3, %v12462_v36  ;;  %v12310_v3 = vld [vmem:[#allocation6 + $0xd88] sm:$0xf]  ;;  %v12447_v61 = vor.u32 %v14800_v23, %v12446_v25  ;;  %v14763_v58 = vld [vmem:[#allocation6 + $0xd8c] sm:$0xf] }
 0x47c   :  { %v12278_v23 = vld [vmem:[#allocation6 + $0xd48] sm:$0xf] }
 0x47d   :  { %4292 = vmatpush.bf16.msrb.mxu2 %v12135_v60  ;;  %v16267_v60 = vpop.f32.mrf.mxu0 }
 0x47e   :  { %4306 = vmatpush.bf16.msrb.mxu0 %v12139_v48  ;;  %4527 = vmatpush.bf16.msrb.mxu1 %v12255_v2  ;;  %v12347_v48 = vor.u32 %v14771_v11, %v12344_v39  ;;  %v12326_v2 = vld [vmem:[#allocation6 + $0xda8] sm:$0xf]  ;;  %v4315_v39 = vadd.f32 %v16260_v41, %v16147_v42  ;;  %v4578_v11 = vadd.f32 %v4544_v50, %v16174_v43 }
 0x47f   :  { %v12327_v35 = vor.u32 %v14769_v37, %v12326_v2  ;;  %v14759_v2 = vld [vmem:[#allocation6 + $0xd6c] sm:$0xf] }
 0x480   :  { %v16277_v36 = vadd.f32 %v4578_v11, %v4315_v39  ;;  %v14757_v11 = vld [vmem:[#allocation6 + $0xd54] sm:$0xf0] }
 0x481   :  { %4293 = vmatpush.bf16.msrb.mxu2 %v12119_v57  ;;  %v12328_v57 = vld [vmem:[#allocation6 + $0xdb8] sm:$0xf0] }
 0x482   :  { %4307 = vmatpush.bf16.msrb.mxu0 %v12123_v6  ;;  %4528 = vmatpush.bf16.msrb.mxu1 %v12239_v28  ;;  %v12331_v22 = vor.u32 %v14767_v27, %v12328_v57  ;;  %v12312_v6 = vld [vmem:[#allocation6 + $0xd98] sm:$0xf0]  ;;  %v16279_v28 = vpop.f32.mrf.mxu2  ;;  %v12414_v27 = vld [vmem:[#allocation6 + $0xe60] sm:$0xf]  ;;  %v14792_v57 = vld [vmem:[#allocation6 + $0xe6c] sm:$0xf0] }
 0x483   :  { %17224 = vst [vmem:[#allocation52_spill] sm:$0xff] %v16279_v28  ;;  %v12315_v41 = vor.u32 %v14763_v58, %v12312_v6  ;;  %v12415_v39 = vor.u32 %v14792_v57, %v12414_v27  ;;  %v12262_v6 = vld [vmem:[#allocation6 + $0xd28] sm:$0xf]  ;;  %v12248_v27 = vld [vmem:[#allocation6 + $0xd18] sm:$0xf0] }
 0x484   :  { %4294 = vmatmul.bf16.vlgmr.msrb.gmra.mxu2 %v16137_v17  ;;  %v3478_v56 = vpop.f32.mrf.mxu1  ;;  %v12366_v57 = vld [vmem:[#allocation6 + $0xe00] sm:$0xf] }
 0x485   :  { %4549 = vmatpush.bf16.msra.mxu2 %v12359_v54  ;;  %4308 = vmatmul.bf16.vlgmr.msrb.gmra.mxu0 %v16137_v17  ;;  %v14765_v17 = vld [vmem:[#allocation6 + $0xd94] sm:$0xf0]  ;;  %v12430_v54 = vld [vmem:[#allocation6 + $0xe80] sm:$0xf]  ;;  %v3257_v42 = vpop.f32.mrf.mxu0  ;;  %v16285_v37 = vadd.f32 %v3478_v56, %v16135_v9  ;;  %v12279_v9 = vor.u32 %v14757_v11, %v12278_v23  ;;  %v12488_v11 = vld [vmem:[#allocation6 + $0xef8] sm:$0xf0] }
 0x486   :  { %4563 = vmatpush.bf16.msra.mxu0 %v12363_v47  ;;  %4784 = vmatpush.bf16.msra.mxu1 %v12479_v44  ;;  %v14796_v47 = vld [vmem:[#allocation6 + $0xe8c] sm:$0xf0]  ;;  %v12311_v43 = vor.u32 %v14765_v17, %v12310_v3  ;;  %v16282_v44 = vadd.f32 %v3257_v42, %v16066_v38  ;;  %v14755_v38 = vld [vmem:[#allocation6 + $0xd4c] sm:$0xf]  ;;  %v12398_v3 = vld [vmem:[#allocation6 + $0xe40] sm:$0xf] }
 0x487   :  { %4529 = vmatmul.bf16.vlgmr.msrb.gmra.mxu1 %v16162_v52  ;;  %v14751_v42 = vld [vmem:[#allocation6 + $0xd2c] sm:$0xf]  ;;  %v14809_v23 = vld [vmem:[#allocation6 + $0xef4] sm:$0xf0] }
 0x489   :  { %4550 = vmatpush.bf16.msra.mxu2 %v12343_v8  ;;  %v12431_v8 = vor.u32 %v14796_v47, %v12430_v54  ;;  %v14753_v47 = vld [vmem:[#allocation6 + $0xd34] sm:$0xf0] }
 0x48a   :  { %4564 = vmatpush.bf16.msra.mxu0 %v12347_v48  ;;  %4785 = vmatpush.bf16.msra.mxu1 %v12463_v59  ;;  %v14761_v48 = vld [vmem:[#allocation6 + $0xd74] sm:$0xf0]  ;;  %v12296_v59 = vld [vmem:[#allocation6 + $0xd78] sm:$0xf0]  ;;  %v12263_v56 = vor.u32 %v14753_v47, %v12262_v6 }
 0x48b   :  { %v12295_v50 = vor.u32 %v14761_v48, %v12294_v55  ;;  %v12299_v25 = vor.u32 %v14759_v2, %v12296_v59  ;;  %v14784_v55 = vld [vmem:[#allocation6 + $0xe2c] sm:$0xf0]  ;;  %v12246_v48 = vld [vmem:[#allocation6 + $0xd08] sm:$0xf]  ;;  %v14749_v2 = vld [vmem:[#allocation6 + $0xd14] sm:$0xf0] }
 0x48c   :  { %v14805_v47 = vld [vmem:[#allocation6 + $0xed4] sm:$0xf0] }
 0x48d   :  { %4551 = vmatpush.bf16.msra.mxu2 %v12327_v35  ;;  %v12280_v35 = vld [vmem:[#allocation6 + $0xd58] sm:$0xf0] }
 0x48e   :  { %4565 = vmatpush.bf16.msra.mxu0 %v12331_v22  ;;  %4786 = vmatpush.bf16.msra.mxu1 %v12447_v61  ;;  %v3243_v22 = vpop.f32.mrf.mxu2  ;;  %v14788_v61 = vld [vmem:[#allocation6 + $0xe4c] sm:$0xf0]  ;;  %v12283_v58 = vor.u32 %v14755_v38, %v12280_v35  ;;  %v12606_v38 = vld [vmem:[#allocation6 + $0xfe0] sm:$0xf] }
 0x48f   :  { %v16288_v17 = vadd.f32 %v3243_v22, %v16071_v62  ;;  %v12399_v54 = vor.u32 %v14788_v61, %v12398_v3  ;;  %v14747_v62 = vld [vmem:[#allocation6 + $0xd0c] sm:$0xf]  ;;  %v14840_v35 = vld [vmem:[#allocation6 + $0xfec] sm:$0xf0]  ;;  %v12247_v22 = vor.u32 %v14749_v2, %v12246_v48  ;;  %v12454_v2 = vld [vmem:[#allocation6 + $0xea8] sm:$0xf] }
 0x490   :  { %v12251_v3 = vor.u32 %v14747_v62, %v12248_v27  ;;  %v12607_v6 = vor.u32 %v14840_v35, %v12606_v38  ;;  %v14801_v62 = vld [vmem:[#allocation6 + $0xeb4] sm:$0xf0]  ;;  %v16292_v27 = vpop.f32.mrf.mxu1  ;;  %v12438_v38 = vld [vmem:[#allocation6 + $0xe88] sm:$0xf] }
 0x491   :  { %4552 = vmatpush.bf16.msra.mxu2 %v12311_v43  ;;  %v12264_v43 = vld [vmem:[#allocation6 + $0xd38] sm:$0xf0]  ;;  %v14797_v35 = vld [vmem:[#allocation6 + $0xe94] sm:$0xf0] }
 0x492   :  { %4566 = vmatpush.bf16.msra.mxu0 %v12315_v41  ;;  %4787 = vmatpush.bf16.msra.mxu1 %v12431_v8  ;;  %v12382_v41 = vld [vmem:[#allocation6 + $0xe20] sm:$0xf]  ;;  %v12267_v8 = vor.u32 %v14751_v42, %v12264_v43  ;;  %v14803_v42 = vld [vmem:[#allocation6 + $0xecc] sm:$0xf]  ;;  %v12472_v43 = vld [vmem:[#allocation6 + $0xed8] sm:$0xf0] }
 0x493   :  { %v12383_v59 = vor.u32 %v14784_v55, %v12382_v41  ;;  %v12590_v41 = vld [vmem:[#allocation6 + $0xfc0] sm:$0xf]  ;;  %v14836_v55 = vld [vmem:[#allocation6 + $0xfcc] sm:$0xf0] }
 0x494   :  { %v12591_v48 = vor.u32 %v14836_v55, %v12590_v41  ;;  %v14791_v41 = vld [vmem:[#allocation6 + $0xe6c] sm:$0xf] }
 0x495   :  { %4553 = vmatpush.bf16.msra.mxu2 %v12295_v50  ;;  %v14780_v50 = vld [vmem:[#allocation6 + $0xe0c] sm:$0xf0] }
 0x496   :  { %4567 = vmatpush.bf16.msra.mxu0 %v12299_v25  ;;  %4788 = vmatpush.bf16.msra.mxu1 %v12415_v39  ;;  %v12486_v25 = vld [vmem:[#allocation6 + $0xee8] sm:$0xf]  ;;  %v14807_v39 = vld [vmem:[#allocation6 + $0xeec] sm:$0xf]  ;;  %v12367_v61 = vor.u32 %v14780_v50, %v12366_v57  ;;  %v12456_v57 = vld [vmem:[#allocation6 + $0xeb8] sm:$0xf0] }
 0x497   :  { %v12574_v50 = vld [vmem:[#allocation6 + $0xfa0] sm:$0xf] }
 0x499   :  { %4554 = vmatpush.bf16.msra.mxu2 %v12279_v9  ;;  %v12487_v9 = vor.u32 %v14809_v23, %v12486_v25  ;;  %v14832_v25 = vld [vmem:[#allocation6 + $0xfac] sm:$0xf0]  ;;  %v12455_v23 = vor.u32 %v14801_v62, %v12454_v2  ;;  %v12542_v2 = vld [vmem:[#allocation6 + $0xf60] sm:$0xf] }
 0x49a   :  { %4568 = vmatpush.bf16.msra.mxu0 %v12283_v58  ;;  %4789 = vmatpush.bf16.msra.mxu1 %v12399_v54  ;;  %v12491_v58 = vor.u32 %v14807_v39, %v12488_v11  ;;  %v12470_v54 = vld [vmem:[#allocation6 + $0xec8] sm:$0xf]  ;;  %v12575_v11 = vor.u32 %v14832_v25, %v12574_v50  ;;  %v14824_v62 = vld [vmem:[#allocation6 + $0xf6c] sm:$0xf0] }
 0x49b   :  { %v12471_v28 = vor.u32 %v14805_v47, %v12470_v54  ;;  %v12543_v25 = vor.u32 %v14824_v62, %v12542_v2 }
 0x49d   :  { %4555 = vmatpush.bf16.msra.mxu2 %v12263_v56  ;;  %v16290_v56 = vpop.f32.mrf.mxu0 }
 0x49e   :  { %4569 = vmatpush.bf16.msra.mxu0 %v12267_v8  ;;  %4790 = vmatpush.bf16.msra.mxu1 %v12383_v59  ;;  %v12475_v8 = vor.u32 %v14803_v42, %v12472_v43  ;;  %v14799_v59 = vld [vmem:[#allocation6 + $0xeac] sm:$0xf]  ;;  %v12422_v42 = vld [vmem:[#allocation6 + $0xe68] sm:$0xf]  ;;  %v14793_v43 = vld [vmem:[#allocation6 + $0xe74] sm:$0xf0] }
 0x49f   :  { %v12459_v39 = vor.u32 %v14799_v59, %v12456_v57  ;;  %v12423_v57 = vor.u32 %v14793_v43, %v12422_v42  ;;  %v12392_v42 = vld [vmem:[#allocation6 + $0xe38] sm:$0xf0]  ;;  %v12510_v43 = vld [vmem:[#allocation6 + $0xf20] sm:$0xf] }
 0x4a1   :  { %4556 = vmatpush.bf16.msra.mxu2 %v12247_v22  ;;  %v14795_v22 = vld [vmem:[#allocation6 + $0xe8c] sm:$0xf] }
 0x4a2   :  { %4570 = vmatpush.bf16.msra.mxu0 %v12251_v3  ;;  %4791 = vmatpush.bf16.msra.mxu1 %v12367_v61  ;;  %v12440_v3 = vld [vmem:[#allocation6 + $0xe98] sm:$0xf0]  ;;  %v12558_v61 = vld [vmem:[#allocation6 + $0xf80] sm:$0xf] }
 0x4a3   :  { %v12443_v54 = vor.u32 %v14795_v22, %v12440_v3 }
 0x4a4   :  { %4557 = vmatmul.bf16.vlgmr.msra.gmra.mxu2 %v16162_v52 }
 0x4a5   :  { %4812 = vmatpush.bf16.msrb.mxu2 %v12487_v9  ;;  %4571 = vmatmul.bf16.vlgmr.msra.gmra.mxu0 %v16162_v52  ;;  %v14828_v9 = vld [vmem:[#allocation6 + $0xf8c] sm:$0xf0]  ;;  %v16299_v52 = vpop.f32.mrf.mxu2 }
 0x4a6   :  { %4826 = vmatpush.bf16.msrb.mxu0 %v12491_v58  ;;  %5047 = vmatpush.bf16.msrb.mxu1 %v12607_v6  ;;  %v16297_v58 = vpop.f32.mrf.mxu3  ;;  %v12439_v6 = vor.u32 %v14797_v35, %v12438_v38  ;;  %v12559_v47 = vor.u32 %v14828_v9, %v12558_v61  ;;  %v12408_v38 = vld [vmem:[#allocation6 + $0xe58] sm:$0xf0]  ;;  %v12526_v35 = vld [vmem:[#allocation6 + $0xf40] sm:$0xf] }
 0x4a7   :  { %4792 = vmatmul.bf16.vlgmr.msra.gmra.mxu1 %v16185_v45 }
 0x4a9   :  { %4813 = vmatpush.bf16.msrb.mxu2 %v12471_v28  ;;  %v3520_v28 = vpop.f32.mrf.mxu0 }
 0x4aa   :  { %4827 = vmatpush.bf16.msrb.mxu0 %v12475_v8  ;;  %5048 = vmatpush.bf16.msrb.mxu1 %v12591_v48  ;;  %v16302_v55 = vadd.f32 %v3520_v28, %v16160_v18  ;;  %v3741_v8 = vpop.f32.mrf.mxu1  ;;  %v12424_v48 = vld [vmem:[#allocation6 + $0xe78] sm:$0xf0]  ;;  %v14820_v18 = vld [vmem:[#allocation6 + $0xf4c] sm:$0xf0]  ;;  %v12390_v28 = vld [vmem:[#allocation6 + $0xe28] sm:$0xf] }
 0x4ab   :  { %v16305_v59 = vadd.f32 %v3741_v8, %v16183_v29  ;;  %v12427_v50 = vor.u32 %v14791_v41, %v12424_v48  ;;  %v14816_v41 = vld [vmem:[#allocation6 + $0xf2c] sm:$0xf0]  ;;  %v12374_v48 = vld [vmem:[#allocation6 + $0xe08] sm:$0xf] }
 0x4ac   :  { %v12511_v62 = vor.u32 %v14816_v41, %v12510_v43  ;;  %v12600_v43 = vld [vmem:[#allocation6 + $0xfd8] sm:$0xf0] }
 0x4ad   :  { %4814 = vmatpush.bf16.msrb.mxu2 %v12455_v23  ;;  %v12406_v23 = vld [vmem:[#allocation6 + $0xe48] sm:$0xf]  ;;  %v3506_v3 = vpop.f32.mrf.mxu2 }
 0x4ae   :  { %4828 = vmatpush.bf16.msrb.mxu0 %v12459_v39  ;;  %5049 = vmatpush.bf16.msrb.mxu1 %v12575_v11  ;;  %v14789_v39 = vld [vmem:[#allocation6 + $0xe54] sm:$0xf0]  ;;  %v14787_v11 = vld [vmem:[#allocation6 + $0xe4c] sm:$0xf]  ;;  %v4807_v22 = vpop.f32.mrf.mxu3  ;;  %v16308_v61 = vadd.f32 %v3506_v3, %v16132_v7 }
 0x4af   :  { %v12407_v29 = vor.u32 %v14789_v39, %v12406_v23  ;;  %v12411_v9 = vor.u32 %v14787_v11, %v12408_v38  ;;  %v14781_v7 = vld [vmem:[#allocation6 + $0xe14] sm:$0xf0]  ;;  %v12376_v23 = vld [vmem:[#allocation6 + $0xe18] sm:$0xf0]  ;;  %v12614_v39 = vld [vmem:[#allocation6 + $0xfe8] sm:$0xf] }
 0x4b0   :  { %v14841_v11 = vld [vmem:[#allocation6 + $0xff4] sm:$0xf0]  ;;  %v14839_v38 = vld [vmem:[#allocation6 + $0xfec] sm:$0xf] }
 0x4b1   :  { %4815 = vmatpush.bf16.msrb.mxu2 %v12439_v6  ;;  %v12527_v6 = vor.u32 %v14820_v18, %v12526_v35  ;;  %v12616_v35 = vld [vmem:[#allocation6 + $0xff8] sm:$0xf0]  ;;  %v12375_v18 = vor.u32 %v14781_v7, %v12374_v48  ;;  %v12582_v48 = vld [vmem:[#allocation6 + $0xfa8] sm:$0xf]  ;;  %v16312_v7 = vpop.f32.mrf.mxu0 }
 0x4b2   :  { %4829 = vmatpush.bf16.msrb.mxu0 %v12443_v54  ;;  %5050 = vmatpush.bf16.msrb.mxu1 %v12559_v47  ;;  %v14785_v54 = vld [vmem:[#allocation6 + $0xe34] sm:$0xf0]  ;;  %v14783_v47 = vld [vmem:[#allocation6 + $0xe2c] sm:$0xf] }
 0x4b3   :  { %v12391_v8 = vor.u32 %v14785_v54, %v12390_v28  ;;  %v12395_v2 = vor.u32 %v14783_v47, %v12392_v42  ;;  %v12619_v28 = vor.u32 %v14839_v38, %v12616_v35  ;;  %v12598_v54 = vld [vmem:[#allocation6 + $0xfc8] sm:$0xf]  ;;  %v14837_v47 = vld [vmem:[#allocation6 + $0xfd4] sm:$0xf0]  ;;  %v14835_v42 = vld [vmem:[#allocation6 + $0xfcc] sm:$0xf] }
 0x4b4   :  { %v12599_v41 = vor.u32 %v14837_v47, %v12598_v54  ;;  %v12566_v35 = vld [vmem:[#allocation6 + $0xf88] sm:$0xf]  ;;  %v14825_v54 = vld [vmem:[#allocation6 + $0xf74] sm:$0xf0]  ;;  %v14823_v47 = vld [vmem:[#allocation6 + $0xf6c] sm:$0xf] }
 0x4b5   :  { %4816 = vmatpush.bf16.msrb.mxu2 %v12423_v57  ;;  %v14779_v57 = vld [vmem:[#allocation6 + $0xe0c] sm:$0xf] }
 0x4b6   :  { %4830 = vmatpush.bf16.msrb.mxu0 %v12427_v50  ;;  %5051 = vmatpush.bf16.msrb.mxu1 %v12543_v25  ;;  %v12494_v50 = vld [vmem:[#allocation6 + $0xf00] sm:$0xf]  ;;  %v14812_v25 = vld [vmem:[#allocation6 + $0xf0c] sm:$0xf0]  ;;  %v16310_v3 = vpop.f32.mrf.mxu3 }
 0x4b9   :  { %4817 = vmatpush.bf16.msrb.mxu2 %v12407_v29  ;;  %v12379_v29 = vor.u32 %v14779_v57, %v12376_v23  ;;  %v12584_v57 = vld [vmem:[#allocation6 + $0xfb8] sm:$0xf0]  ;;  %v4052_v23 = vadd.f32 %v16239_v24, %v16120_v49  ;;  %v12550_v24 = vld [vmem:[#allocation6 + $0xf68] sm:$0xf] }
 0x4ba   :  { %4831 = vmatpush.bf16.msrb.mxu0 %v12411_v9  ;;  %5052 = vmatpush.bf16.msrb.mxu1 %v12527_v6  ;;  %v12495_v9 = vor.u32 %v14812_v25, %v12494_v50  ;;  %v12615_v6 = vor.u32 %v14841_v11, %v12614_v39  ;;  %v4841_v50 = vadd.f32 %v4807_v22, %v16201_v5 }
 0x4bd   :  { %4818 = vmatpush.bf16.msrb.mxu2 %v12391_v8  ;;  %v12603_v8 = vor.u32 %v14835_v42, %v12600_v43  ;;  %v12552_v42 = vld [vmem:[#allocation6 + $0xf78] sm:$0xf0] }
 0x4be   :  { %4832 = vmatpush.bf16.msrb.mxu0 %v12395_v2  ;;  %5053 = vmatpush.bf16.msrb.mxu1 %v12511_v62  ;;  %v14833_v2 = vld [vmem:[#allocation6 + $0xfb4] sm:$0xf0]  ;;  %v14831_v62 = vld [vmem:[#allocation6 + $0xfac] sm:$0xf]  ;;  %v5070_v25 = vpop.f32.mrf.mxu3 }
 0x4bf   :  { %v5104_v39 = vadd.f32 %v5070_v25, %v4052_v23  ;;  %v12583_v11 = vor.u32 %v14833_v2, %v12582_v48  ;;  %v12587_v38 = vor.u32 %v14831_v62, %v12584_v57  ;;  %v12534_v48 = vld [vmem:[#allocation6 + $0xf48] sm:$0xf]  ;;  %v14821_v2 = vld [vmem:[#allocation6 + $0xf54] sm:$0xf0]  ;;  %v12536_v62 = vld [vmem:[#allocation6 + $0xf58] sm:$0xf0] }
 0x4c1   :  { %4819 = vmatpush.bf16.msrb.mxu2 %v12375_v18  ;;  %v14829_v18 = vld [vmem:[#allocation6 + $0xf94] sm:$0xf0] }
 0x4c2   :  { %4833 = vmatpush.bf16.msrb.mxu0 %v12379_v29  ;;  %5054 = vmatpush.bf16.msrb.mxu1 %v12495_v9  ;;  %v14827_v29 = vld [vmem:[#allocation6 + $0xf8c] sm:$0xf]  ;;  %v12568_v9 = vld [vmem:[#allocation6 + $0xf98] sm:$0xf0]  ;;  %v3783_v22 = vpop.f32.mrf.mxu0 }
 0x4c3   :  { %v12571_v5 = vor.u32 %v14827_v29, %v12568_v9  ;;  %v16326_v43 = vadd.f32 %v3783_v22, %v16211_v51  ;;  %v14815_v51 = vld [vmem:[#allocation6 + $0xf2c] sm:$0xf]  ;;  %v12502_v29 = vld [vmem:[#allocation6 + $0xf08] sm:$0xf]  ;;  %v14813_v9 = vld [vmem:[#allocation6 + $0xf14] sm:$0xf0] }
 0x4c4   :  { %4820 = vmatmul.bf16.vlgmr.msrb.gmra.mxu2 %v16185_v45  ;;  %v15667_v22 = vmov 65535  }
 0x4c5   :  { %5075 = vmatpush.bf16.msra.mxu2 %v12615_v6  ;;  %4834 = vmatmul.bf16.vlgmr.msrb.gmra.mxu0 %v16185_v45  ;;  %v16320_v6 = vpop.f32.mrf.mxu2  ;;  %v12567_v45 = vor.u32 %v14829_v18, %v12566_v35 }
 0x4c6   :  { %5089 = vmatpush.bf16.msra.mxu0 %v12619_v28  ;;  %5055 = vmatmul.bf16.vlgmr.msrb.gmra.mxu1 %v16218_v15  ;;  %v5120_v28 = vadd.f32 %v5104_v39, %v4841_v50  ;;  %v12535_v50 = vor.u32 %v14821_v2, %v12534_v48  ;;  %v12518_v39 = vld [vmem:[#allocation6 + $0xf28] sm:$0xf] }
 0x4c8   :  { %v16323_v49 = vadd.f32 %v5120_v28, %v16277_v36  ;;  %v14819_v36 = vld [vmem:[#allocation6 + $0xf4c] sm:$0xf] }
 0x4c9   :  { %5076 = vmatpush.bf16.msra.mxu2 %v12599_v41  ;;  %v12551_v41 = vor.u32 %v14825_v54, %v12550_v24  ;;  %v12539_v25 = vor.u32 %v14819_v36, %v12536_v62  ;;  %v14811_v28 = vld [vmem:[#allocation6 + $0xf0c] sm:$0xf]  ;;  %v5214_v54 = vsel %vm512_vm0, 4294967295, %v15667_v22  ;;  %v14842_v36 = vld [vmem:[#allocation7] sm:$0xff] }
 0x4ca   :  { %5090 = vmatpush.bf16.msra.mxu0 %v12603_v8  ;;  %v12555_v8 = vor.u32 %v14823_v47, %v12552_v42  ;;  %v5215_v42 = vsel %vm5213_vm12, %v5214_v54, 0 }
 0x4cd   :  { %5077 = vmatpush.bf16.msra.mxu2 %v12583_v11  ;;  %v3769_v57 = vpop.f32.mrf.mxu2  ;;  %v14817_v11 = vld [vmem:[#allocation6 + $0xf34] sm:$0xf0] }
 0x4ce   :  { %5091 = vmatpush.bf16.msra.mxu0 %v12587_v38  ;;  %v16329_v23 = vadd.f32 %v3769_v57, %v16216_v53  ;;  %v12520_v38 = vld [vmem:[#allocation6 + $0xf38] sm:$0xf0]  ;;  %v12519_v35 = vor.u32 %v14817_v11, %v12518_v39  ;;  %v12503_v53 = vor.u32 %v14813_v9, %v12502_v29  ;;  %v14846_v57 = vld [vmem:[%s17175_s1 + $0xc] sm:$0x10]  ;;  %v16354_v11 = vpop.f32.mrf.mxu0  ;;  %v12638_v29 = vld [vmem:[%s17175_s1 + $0x8] sm:$0xf] }
 0x4cf   :  { %v12523_v18 = vor.u32 %v14815_v51, %v12520_v38  ;;  %v14843_v51 = vld [vmem:[#allocation7 + $0x8] sm:$0xff]  ;;  %v14847_v9 = vld [vmem:[%s17175_s1 + $0x14] sm:$0x10] }
 0x4d1   :  { %5078 = vmatpush.bf16.msra.mxu2 %v12567_v45  ;;  %v12504_v45 = vld [vmem:[#allocation6 + $0xf18] sm:$0xf0] }
 0x4d2   :  { %5092 = vmatpush.bf16.msra.mxu0 %v12571_v5  ;;  %v16331_v5 = vpop.f32.mrf.mxu1  ;;  %v12507_v24 = vor.u32 %v14811_v28, %v12504_v45  ;;  %v12639_v45 = vor.u32 %v14847_v9, %v12638_v29 }
 0x4d4   :  { %v5223_v54 = vand.u32 %v12639_v45, %v5215_v42 }
 0x4d5   :  { %5079 = vmatpush.bf16.msra.mxu2 %v12551_v41  ;;  %v14844_v41 = vld [vmem:[%s17175_s1 + $0x4] sm:$0xf]  ;;  %v16357_v38 = vpop.f32.mrf.mxu2 }
 0x4d6   :  { %5093 = vmatpush.bf16.msra.mxu0 %v12555_v8  ;;  %v12632_v8 = vld [vmem:[%s17175_s1 + $0x10] sm:$0x10] }
 0x4d7   :  { %v12635_v48 = vor.u32 %v14844_v41, %v12632_v8 }
 0x4d9   :  { %5080 = vmatpush.bf16.msra.mxu2 %v12535_v50  ;;  %v5220_v2 = vand.u32 %v12635_v48, %v5215_v42  ;;  %v14845_v48 = vld [vmem:[%s17175_s1 + $0xc] sm:$0xf] }
 0x4da   :  { %5094 = vmatpush.bf16.msra.mxu0 %v12539_v25  ;;  %v16336_v47 = vpop.f32.mrf.mxu1 }
 0x4db   :  { %5254 = vmatpush.bf16.msra.mxu3 %v5220_v2  ;;  %v12640_v2 = vld [vmem:[%s17175_s1 + $0x18] sm:$0x10] }
 0x4dd   :  { %5081 = vmatpush.bf16.msra.mxu2 %v12519_v35 }
 0x4de   :  { %5095 = vmatpush.bf16.msra.mxu0 %v12523_v18  ;;  %12646 = vmatmul.msk.bf16.vlgmr.msra.gmra.mxu3 %vm5206_vm13, %v14842_v36 }
 0x4df   :  { %15238 = vmatpush.bf16.msrb.mxu3 %v5223_v54 }
 0x4e1   :  { %5082 = vmatpush.bf16.msra.mxu2 %v12503_v53 }
 0x4e2   :  { %5096 = vmatpush.bf16.msra.mxu0 %v12507_v24  ;;  %v16344_v62 = vpop.f32.mrf.mxu1  ;;  %v16361_v18 = vpop.f32.mrf.mxu0 }
 0x4e4   :  { %5083 = vmatmul.bf16.vlgmr.msra.gmra.mxu2 %v16218_v15 }
 0x4e5   :  { %5097 = vmatmul.bf16.vlgmr.msra.gmra.mxu0 %v16218_v15  ;;  %v12630_v15 = vld [vmem:[%s17175_s1] sm:$0xf]  ;;  %5273 = vmatpush.bf16.msrb.mxu2 %v5223_v54 }
 0x4e6   :  { %v12631_v50 = vor.u32 %v14846_v57, %v12630_v15 }
 0x4e7   :  { %v16370_v28 = vpop.f32.mrf.mxu2 }
 0x4e8   :  { %v5217_v25 = vand.u32 %v12631_v50, %v5215_v42 }
 0x4ea   :  { %5235 = vmatpush.bf16.msra.mxu1 %v5217_v25  ;;  %v4267_v39 = vpop.f32.mrf.mxu1  ;;  %v16374_v41 = vpop.f32.mrf.mxu0 }
 0x4eb   :  { %v4314_v24 = vadd.f32 %v4267_v39, %v16258_v13  ;;  %v12643_v13 = vor.u32 %v14845_v48, %v12640_v2  ;;  %v4051_v2 = vadd.f32 %v16336_v47, %v16229_v26 }
 0x4ed   :  { %12644 = vmatmul.msk.bf16.vlgmr.msra.gmra.mxu1 %vm5206_vm13, %v14842_v36  ;;  %v5226_v15 = vand.u32 %v12643_v13, %v5215_v42 }
 0x4ee   :  { %12647 = vmatmul.msk.bf16.gmra.mxu3 %vm5206_vm13, %v14843_v51 }
 0x4ef   :  { %15239 = vmatpush.bf16.msrb.mxu1 %v5226_v15  ;;  %5292 = vmatpush.bf16.msrb.mxu0 %v5226_v15 }
 0x4f2   :  { %v16359_v35 = vpop.f32.mrf.mxu1 }
 0x4f4   :  { %12648 = vmatmul.msk.bf16.vlgmr.msrb.gmra.mxu2 %vm5206_vm13, %v14842_v36 }
 0x4f5   :  { %12650 = vmatmul.msk.bf16.vlgmr.msrb.gmra.mxu0 %vm5206_vm13, %v14842_v36 }
 0x4fd   :  { %12645 = vmatmul.msk.bf16.gmra.mxu1 %vm5206_vm13, %v14843_v51 }
 0x4fe   :  { %12649 = vmatmul.msk.bf16.vlgmr.msrb.gmra.mxu3 %vm5206_vm13, %v14843_v51 }
 0x502   :  { %v4309_v57 = vpop.f32.mrf.mxu0 }
 0x503   :  { %v4317_v9 = vadd.f32 %v4309_v57, %v16282_v44 }
 0x504   :  { %v4530_v53 = vpop.f32.mrf.mxu1 }
 0x505   :  { %v4577_v22 = vadd.f32 %v4530_v53, %v16285_v37  ;;  %v16384_v37 = vpop.f32.mrf.mxu2 }
 0x506   :  { %17225 = vst [vmem:[#allocation53_spill] sm:$0xff] %v16384_v37 }
 0x507   :  { %v5111_v8 = vadd.f32 %v4577_v22, %v4314_v24 }
 0x50a   :  { %v16388_v25 = vpop.f32.mrf.mxu0 }
 0x50c   :  { %v16396_v42 = vpop.f32.mrf.mxu1 }
 0x50d   :  { %12651 = vmatmul.msk.bf16.vlgmr.msrb.gmra.mxu1 %vm5206_vm13, %v14843_v51  ;;  %v4295_v50 = vpop.f32.mrf.mxu2 }
 0x50e   :  { %v4316_v22 = vadd.f32 %v4295_v50, %v16288_v17 }
 0x515   :  { %v16390_v39 = vpop.f32.mrf.mxu2 }
 0x516   :  { %17226 = vst [vmem:[#allocation54_spill] sm:$0xff] %v16390_v39  ;;  %v1546_v39 = vadd.f32 %v16078_v31, %v16035_v12  ;;  %v17239_v12 = vld [vmem:[#allocation32_spill] sm:$0xff] }
 0x522   :  { %v4572_v29 = vpop.f32.mrf.mxu0 }
 0x523   :  { %v4580_v45 = vadd.f32 %v4572_v29, %v16302_v55 }
 0x524   :  { %v4793_v54 = vpop.f32.mrf.mxu1 }
 0x525   :  { %v16394_v53 = vadd.f32 %v4580_v45, %v4317_v9  ;;  %v4840_v55 = vadd.f32 %v4793_v54, %v16305_v59  ;;  %v5140_v59 = vpop.permute.xlu1 %5139 }
 0x527   :  { %v4558_v24 = vpop.f32.mrf.mxu2 }
 0x528   :  { %v4579_v51 = vadd.f32 %v4558_v24, %v16308_v61  ;;  %v16411_v61 = vld [vmem:[#allocation21] sm:$0xf] }
 0x529   :  { %17228 = vst [vmem:[#allocation56_spill] sm:$0xff] %v16411_v61  ;;  %v5148_v45 = vperm.slane %v16411_v61, 0  ;;  %v5149_v24 = vperm.slane %v16411_v61, 1  ;;  %v17192_v26 = vperm.slane %v16411_v61, 2  ;;  %v17195_v47 = vperm.slane %v16411_v61, 3 }
 0x52a   :  { %v16400_v36 = vadd.f32 %v4579_v51, %v4316_v22  ;;  %v16407_v15 = vpop.f32.mrf.mxu0  ;;  %v16419_v51 = vpop.permute.xlu0 %5144  ;;  %v1560_v61 = vadd.f32 %v16101_v14, %v16037_v4  ;;  %v17242_v4 = vld [vmem:[#allocation35_spill] sm:$0xff]  ;;  %v17243_v14 = vld [vmem:[#allocation41_spill] sm:$0xff] }
 0x52b   :  { %17229 = vst [vmem:[#allocation57_spill] sm:$0xff] %v16419_v51  ;;  %v5157_v54 = vmul.f32 %v5149_v24, %v5140_v59  ;;  %v2051_v37 = vadd.f32 %v17243_v14, %v17242_v4  ;;  %v17249_v4 = vld [vmem:[#allocation45_spill] sm:$0xff] }
 0x52c   :  { %v16402_v48 = vpop.f32.mrf.mxu1 }
 0x52f   :  { %v16409_v9 = vpop.f32.mrf.mxu2 }
 0x530   :  { %17227 = vst [vmem:[#allocation55_spill] sm:$0xff] %v16409_v9 }
 0x542   :  { %v4835_v17 = vpop.f32.mrf.mxu0 }
 0x543   :  { %v5056_v44 = vpop.f32.mrf.mxu1 }
 0x544   :  { %v5103_v13 = vadd.f32 %v5056_v44, %v4051_v2  ;;  %v16423_v2 = vmul.f32 %v17192_v26, %v5140_v59  ;;  %v16427_v44 = vmul.f32 %v17195_v47, %v5140_v59  ;;  %v1574_v26 = vadd.f32 %v16095_v16, %v16060_v0  ;;  %v17235_v47 = vld [vmem:[#allocation36_spill] sm:$0xff]  ;;  %v17241_v0 = vld [vmem:[#allocation38_spill] sm:$0xff] }
 0x545   :  { %v3267_v16 = vadd.f32 %v17241_v0, %v1546_v39 }
 0x546   :  { %v5119_v57 = vadd.f32 %v5103_v13, %v4840_v55  ;;  %17230 = vst [vmem:[#allocation58_spill] sm:$0xff] %v16423_v2  ;;  %v16430_v55 = vmul.f32 %v5148_v45, %v16419_v51  ;;  %v16433_v13 = vmul.f32 %v5149_v24, %v16419_v51  ;;  %v17234_v24 = vld [vmem:[#allocation34_spill] sm:$0xff] }
 0x547   :  { %v4821_v50 = vpop.f32.mrf.mxu2  ;;  %17231 = vst [vmem:[#allocation59_spill] sm:$0xff] %v16427_v44  ;;  %v2037_v51 = vadd.f32 %v17235_v47, %v17234_v24  ;;  %v17248_v44 = vld [vmem:[#allocation43_spill] sm:$0xff] }
 0x548   :  { %v5127_v29 = vadd.f32 %v5119_v57, %v5111_v8  ;;  %v5156_v8 = vmul.f32 %v5148_v45, %v5140_v59  ;;  %17232 = vst [vmem:[#allocation60_spill] sm:$0xff] %v16430_v55  ;;  %v1532_v57 = vadd.f32 %v16053_v34, %v16043_v20  ;;  %v2977_v59 = vadd.f32 %v16140_v21, %v16108_v33  ;;  %v17237_v20 = vld [vmem:[#allocation37_spill] sm:$0xff]  ;;  %v17238_v55 = vld [vmem:[#allocation39_spill] sm:$0xff] }
 0x549   :  { %17233 = vst [vmem:[#allocation61_spill] sm:$0xff] %v16433_v13  ;;  %v2023_v45 = vadd.f32 %v16165_v1, %v16122_v63  ;;  %v17236_v13 = vld [vmem:[#allocation33_spill] sm:$0xff]  ;;  %v2500_v31 = vadd.f32 %v17239_v12, %v17238_v55  ;;  %v2963_v33 = vadd.f32 %v16245_v40, %v16223_v32  ;;  %v5072_v63 = vpop.f32.mrf.mxu3  ;;  %v4054_v21 = vadd.f32 %v16361_v18, %v16255_v10  ;;  %v17244_v1 = vld [vmem:[#allocation42_spill] sm:$0xff]  ;;  %v17250_v10 = vld [vmem:[#allocation44_spill] sm:$0xff] }
 0x54a   :  { %v16417_v22 = vpop.f32.mrf.mxu0  ;;  %v2009_v34 = vadd.f32 %v17237_v20, %v17236_v13  ;;  %v17245_v13 = vld [vmem:[#allocation40_spill] sm:$0xff]  ;;  %v17246_v55 = vld [vmem:[#allocation46_spill] sm:$0xff]  ;;  %v17247_v12 = vld [vmem:[#allocation49_spill] sm:$0xff]  ;;  %v2528_v14 = vadd.f32 %v17249_v4, %v17248_v44  ;;  %v4843_v40 = vadd.f32 %v4835_v17, %v16326_v43 }
 0x54b   :  { %v3530_v47 = vadd.f32 %v17244_v1, %v2023_v45  ;;  %v2486_v24 = vadd.f32 %v16213_v30, %v17245_v13  ;;  %v3793_v20 = vadd.f32 %v17246_v55, %v2500_v31  ;;  %v5058_v39 = vpop.f32.mrf.mxu1  ;;  %v4055_v32 = vadd.f32 %v16344_v62, %v2963_v33  ;;  %v17251_v18 = vld [vmem:[#allocation47_spill] sm:$0xff]  ;;  %v17252_v30 = vld [vmem:[#allocation48_spill] sm:$0xff]  ;;  %v17253_v33 = vld [vmem:[#allocation50_spill] sm:$0xff] }
 0x54c   :  { %v2514_v45 = vadd.f32 %v17251_v18, %v17250_v10  ;;  %v4319_v1 = vadd.f32 %v16265_v46, %v3267_v16  ;;  %v3005_v31 = vadd.f32 %v16267_v60, %v17252_v30  ;;  %v3266_v62 = vadd.f32 %v16269_v19, %v1532_v57  ;;  %v17254_v43 = vld [vmem:[#allocation52_spill] sm:$0xff]  ;;  %v17255_v46 = vld [vmem:[#allocation51_spill] sm:$0xff] }
 0x54d   :  { %v3792_v55 = vadd.f32 %v16331_v5, %v2486_v24  ;;  %v2991_v17 = vadd.f32 %v17254_v43, %v17253_v33  ;;  %v4053_v16 = vadd.f32 %v16370_v28, %v17255_v46  ;;  %v16492_v57 = vadd.f32 %v5156_v8, %v5127_v29  ;;  %v17259_v4 = vld [vmem:[#allocation58_spill] sm:$0xff]  ;;  %v17265_v46 = vld [vmem:[#allocation56_spill] sm:$0xff] }
 0x54e   :  { %v3531_v24 = vadd.f32 %v16320_v6, %v2037_v51  ;;  %v17257_v51 = vld [vmem:[#allocation59_spill] sm:$0xff] }
 0x54f   :  { %v16453_v2 = vpop.f32.mrf.mxu2 }
 0x550   :  { %17240 = vst [vmem:[#allocation34_spill] sm:$0xff] %v16453_v2  ;;  %v4056_v2 = vadd.f32 %v17247_v12, %v2977_v59  ;;  %v3529_v59 = vadd.f32 %v16292_v27, %v2009_v34  ;;  %v5107_v12 = vadd.f32 %v5058_v39, %v4055_v32  ;;  %v4844_v27 = vadd.f32 %v16402_v48, %v3792_v55  ;;  %v17263_v55 = vld [vmem:[#allocation61_spill] sm:$0xff] }
 0x551   :  { %v4842_v34 = vadd.f32 %v4821_v50, %v16329_v23  ;;  %v3269_v48 = vadd.f32 %v16290_v56, %v1574_v26  ;;  %v5550_v23 = vmul.f32 %v16492_v57, %v16492_v57  ;;  %v17256_v26 = vld [vmem:[#allocation55_spill] sm:$0xff] }
 0x552   :  { %v5108_v13 = vadd.f32 %v5072_v63, %v4056_v2  ;;  %v4581_v60 = vadd.f32 %v16396_v42, %v3529_v59  ;;  %v4058_v2 = vadd.f32 %v16374_v41, %v3005_v31  ;;  %v5123_v28 = vadd.f32 %v5107_v12, %v4844_v27 }
 0x553   :  { %v4583_v6 = vadd.f32 %v17256_v26, %v3531_v24  ;;  %v17267_v27 = vperm.slane %v17265_v46, 3 }
 0x562   :  { %v5098_v0 = vpop.f32.mrf.mxu0 }
 0x563   :  { %v5106_v9 = vadd.f32 %v5098_v0, %v4054_v21  ;;  %v4582_v21 = vadd.f32 %v16297_v58, %v3530_v47  ;;  %v4845_v0 = vadd.f32 %v16310_v3, %v3793_v20  ;;  %v4318_v3 = vadd.f32 %v16359_v35, %v3266_v62  ;;  %v17258_v20 = vld [vmem:[#allocation53_spill] sm:$0xff] }
 0x564   :  { %v3795_v47 = vadd.f32 %v16354_v11, %v2528_v14  ;;  %v3794_v11 = vadd.f32 %v16357_v38, %v2514_v45  ;;  %v4057_v39 = vadd.f32 %v17258_v20, %v2991_v17  ;;  %v17261_v38 = vld [vmem:[#allocation34_spill] sm:$0xff] }
 0x565   :  { %v5122_v44 = vadd.f32 %v5106_v9, %v4843_v40  ;;  %v16489_v9 = vadd.f32 %v5157_v54, %v16323_v49  ;;  %v5124_v19 = vadd.f32 %v5108_v13, %v4845_v0  ;;  %v5116_v42 = vadd.f32 %v4582_v21, %v4319_v1  ;;  %v17260_v40 = vld [vmem:[#allocation54_spill] sm:$0xff]  ;;  %v17262_v1 = vld [vmem:[#allocation60_spill] sm:$0xff]  ;;  %v17264_v0 = vld [vmem:[#allocation57_spill] sm:$0xff] }
 0x566   :  { %v3532_v49 = vadd.f32 %v16312_v7, %v2051_v37  ;;  %v5115_v41 = vadd.f32 %v4581_v60, %v4318_v3  ;;  %v4846_v18 = vadd.f32 %v17261_v38, %v3794_v11 }
 0x567   :  { %v5130_v5 = vadd.f32 %v5122_v44, %v16394_v53  ;;  %v5084_v58 = vpop.f32.mrf.mxu2  ;;  %v3268_v53 = vadd.f32 %v16299_v52, %v1560_v61  ;;  %v5551_v56 = vmul.f32 %v16489_v9, %v16489_v9  ;;  %v5132_v50 = vadd.f32 %v5124_v19, %v5116_v42 }
 0x568   :  { %v5105_v63 = vadd.f32 %v5084_v58, %v4053_v16  ;;  %v4584_v35 = vadd.f32 %v16407_v15, %v3532_v49  ;;  %v4847_v52 = vadd.f32 %v16417_v22, %v3795_v47  ;;  %v5131_v7 = vadd.f32 %v5123_v28, %v5115_v41 }
 0x569   :  { %v4321_v61 = vadd.f32 %v16388_v25, %v3269_v48  ;;  %v16512_v15 = vadd.f32 %v17257_v51, %v5130_v5  ;;  %v5540_v22 = vadd.f32 %v16489_v9, %v16492_v57  ;;  %v5558_v45 = vadd.f32 %v5551_v56, %v5550_v23  ;;  %v5538_v23 = vld [vmem:[#allocation22 + $0xa8] sm:$0xff] }
 0x56a   :  { %v5100_v54 = vpop.f32.mrf.mxu0  ;;  %v5121_v29 = vadd.f32 %v5105_v63, %v4842_v34  ;;  %v16523_v30 = vadd.f32 %v17262_v1, %v5131_v7  ;;  %v16529_v12 = vadd.f32 %v17263_v55, %v5132_v50  ;;  %v17266_v16 = vperm.slane %v17265_v46, 2 }
 0x56b   :  { %v5110_v8 = vadd.f32 %v5100_v54, %v4058_v2  ;;  %v5118_v10 = vadd.f32 %v4584_v35, %v4321_v61  ;;  %v5553_v62 = vmul.f32 %v16512_v15, %v16512_v15  ;;  %v5163_v5 = vmul.f32 %v17267_v27, %v17264_v0 }
 0x56c   :  { %v5129_v37 = vadd.f32 %v5121_v29, %v16400_v36  ;;  %v4320_v36 = vadd.f32 %v17260_v40, %v3268_v53  ;;  %v5162_v60 = vmul.f32 %v17266_v16, %v17264_v0  ;;  %v5554_v58 = vmul.f32 %v16523_v30, %v16523_v30  ;;  %v16556_v29 = vpop.f32.mrf.mxu3 }
 0x56d   :  { %v5126_v32 = vadd.f32 %v5110_v8, %v4847_v52  ;;  %v5545_v28 = vadd.f32 %v16529_v12, %v16523_v30  ;;  %v5555_v63 = vmul.f32 %v16529_v12, %v16529_v12  ;;  %v16558_v8 = vpop.f32.mrf.mxu1 }
 0x56e   :  { %v16516_v14 = vadd.f32 %v17259_v4, %v5129_v37  ;;  %v5117_v44 = vadd.f32 %v4583_v6, %v4320_v36  ;;  %v5312_v4 = vadd.f32 %v16556_v29, %v16558_v8 }
 0x56f   :  { %v5086_v25 = vpop.f32.mrf.mxu2  ;;  %v5134_v33 = vadd.f32 %v5126_v32, %v5118_v10  ;;  %v5563_v53 = vadd.f32 %v5555_v63, %v5554_v58 }
 0x570   :  { %v5109_v31 = vadd.f32 %v5086_v25, %v4057_v39  ;;  %v5541_v13 = vadd.f32 %v5540_v22, %v16516_v14  ;;  %v5552_v59 = vmul.f32 %v16516_v14, %v16516_v14 }
 0x571   :  { %v16544_v34 = vadd.f32 %v5163_v5, %v5134_v33 }
 0x572   :  { %v5125_v43 = vadd.f32 %v5109_v31, %v4846_v18  ;;  %v5542_v17 = vadd.f32 %v5541_v13, %v16512_v15  ;;  %v5559_v21 = vadd.f32 %v5558_v45, %v5552_v59  ;;  %v16585_v39 = vpop.f32.mrf.mxu0  ;;  %v5310_v59 = vld [vmem:[#allocation22 + $0x88] sm:$0xff] }
 0x573   :  { %v5557_v54 = vmul.f32 %v16544_v34, %v16544_v34 }
 0x574   :  { %v5133_v19 = vadd.f32 %v5125_v43, %v5117_v44  ;;  %5543 = vadd.xlane.f32.xlu2 %v5542_v17  ;;  %v5560_v2 = vadd.f32 %v5559_v21, %v5553_v62  ;;  %v16560_v24 = vpop.f32.mrf.mxu3  ;;  %v5308_v21 = vld [vmem:[#allocation22 + $0x78] sm:$0xff] }
 0x575   :  { %v16562_v35 = vpop.f32.mrf.mxu1  ;;  %v5337_v22 = vmul.f32 %v16560_v24, %v16560_v24 }
 0x576   :  { %v16542_v3 = vadd.f32 %v5162_v60, %v5133_v19  ;;  %5561 = vadd.xlane.f32.xlu0 %v5560_v2  ;;  %v5336_v40 = vmul.f32 %v16562_v35, %v16562_v35 }
 0x577   :  { %v16580_v6 = vpop.f32.mrf.mxu2 }
 0x578   :  { %v5546_v42 = vadd.f32 %v5545_v28, %v16542_v3  ;;  %v5556_v48 = vmul.f32 %v16542_v3, %v16542_v3  ;;  %v5313_v36 = vadd.f32 %v5312_v4, %v16580_v6  ;;  %v5353_v25 = vadd.f32 %v5337_v22, %v5336_v40 }
 0x57a   :  { %v5547_v49 = vadd.f32 %v5546_v42, %v16544_v34  ;;  %v5564_v47 = vadd.f32 %v5563_v53, %v5556_v48  ;;  %v5314_v38 = vadd.f32 %v5313_v36, %v16585_v39  ;;  %v16600_v45 = vpop.f32.mrf.mxu0 }
 0x57b   :  { %v5339_v1 = vmul.f32 %v16600_v45, %v16600_v45 }
 0x57c   :  { %5548 = vadd.xlane.f32.xlu1 %v5547_v49  ;;  %v5565_v41 = vadd.f32 %v5564_v47, %v5557_v54  ;;  %v16564_v56 = vpop.f32.mrf.mxu3  ;;  %v5536_v54 = vld [vmem:[#allocation22 + $0x98] sm:$0xff] }
 0x57d   :  { %v16566_v50 = vpop.f32.mrf.mxu1 }
 0x57e   :  { %5566 = vadd.xlane.f32.xlu2 %v5565_v41 }
 0x57f   :  { %v16595_v10 = vpop.f32.mrf.mxu2 }
 0x580   :  { %v5338_v18 = vmul.f32 %v16595_v10, %v16595_v10 }
 0x582   :  { %v5354_v31 = vadd.f32 %v5353_v25, %v5338_v18  ;;  %v5322_v18 = vadd.f32 %v16564_v56, %v16566_v50 }
 0x584   :  { %v16568_v52 = vpop.f32.mrf.mxu3  ;;  %v5355_v13 = vadd.f32 %v5354_v31, %v5339_v1 }
 0x585   :  { %v16570_v7 = vpop.f32.mrf.mxu1  ;;  %v5345_v25 = vmul.f32 %v16568_v52, %v16568_v52 }
 0x586   :  { %v5327_v61 = vadd.f32 %v16568_v52, %v16570_v7  ;;  %v5344_v1 = vmul.f32 %v16570_v7, %v16570_v7 }
 0x58c   :  { %v16572_v37 = vpop.f32.mrf.mxu3 }
 0x58d   :  { %v16574_v11 = vpop.f32.mrf.mxu1  ;;  %v5323_v31 = vadd.f32 %v5322_v18, %v16572_v37 }
 0x594   :  { %v16578_v26 = vpop.f32.mrf.mxu3 }
 0x595   :  { %v5328_v51 = vadd.f32 %v5327_v61, %v16578_v26  ;;  %v16583_v20 = vpop.f32.mrf.mxu1 }
 0x596   :  { %5628 = vperm.xlu2 %15266, %v5538_v23  }
 0x597   :  { %v5329_v32 = vadd.f32 %v5328_v51, %v16583_v20 }
 0x5bf   :  { %5330 = vadd.xlane.f32.xlu2 %v5329_v32  ;;  %v5537_v32 = vld [vmem:[#allocation22 + $0xa0] sm:$0xff] }
 0x5c7   :  { %5315 = vadd.xlane.f32.xlu2 %v5314_v38  ;;  %v5539_v38 = vld [vmem:[#allocation22 + $0xb0] sm:$0xff] }
 0x5cf   :  { %5356 = vadd.xlane.f32.xlu2 %v5355_v13  ;;  %v5324_v13 = vadd.f32 %v5323_v31, %v16574_v11 }
 0x5e7   :  { %v5544_v55 = vpop.xlane.xlu2 %5543  ;;  %5496 = vperm.xlu2 %15266, %v5310_v59   ;;  %v5346_v59 = vmul.f32 %v16578_v26, %v16578_v26 }
 0x5e8   :  { %v16604_v44 = vmul.f32 0.0025510204, %v5544_v55  ;;  %v5363_v55 = vadd.f32 %v5345_v25, %v5344_v1 }
 0x5e9   :  { %v5562_v62 = vpop.xlane.xlu0 %5561 }
 0x5ea   :  { %v5570_v33 = vmul.f32 0.0025510204, %v5562_v62  ;;  %v5572_v43 = vmul.f32 %v16604_v44, %v16604_v44  ;;  %v5333_v62 = vmul.f32 %v16556_v29, %v16556_v29 }
 0x5ec   :  { %v5574_v17 = vsub.f32 %v5570_v33, %v5572_v43  ;;  %v5332_v33 = vmul.f32 %v16558_v8, %v16558_v8  ;;  %v5341_v43 = vmul.f32 %v16564_v56, %v16564_v56 }
 0x5ee   :  { %v5576_v0 = vadd.f32 1e-05, %v5574_v17  ;;  %v5340_v17 = vmul.f32 %v16566_v50, %v16566_v50 }
 0x5ef   :  { %5486 = vperm.xlu2 %15266, %v5308_v21   ;;  %v5549_v46 = vpop.xlane.xlu1 %5548  ;;  %v5347_v21 = vmul.f32 %v16583_v20, %v16583_v20 }
 0x5f0   :  { %15274 = vrsqrt.f32 %v5576_v0  ;;  %v16608_v16 = vmul.f32 0.0025510204, %v5549_v46  ;;  %vm5584_vm15 = vweird.f32 %v5576_v0  ;;  %v5342_v46 = vmul.f32 %v16572_v37, %v16572_v37 }
 0x5f1   :  { %v5567_v60 = vpop.xlane.xlu2 %5566 }
 0x5f2   :  { %v5571_v27 = vmul.f32 0.0025510204, %v5567_v60  ;;  %v5573_v5 = vmul.f32 %v16608_v16, %v16608_v16  ;;  %v5334_v60 = vmul.f32 %v16580_v6, %v16580_v6  ;;  %v5604_v25 = vsub.f32 %v16523_v30, %v16608_v16 }
 0x5f4   :  { %v5575_v19 = vsub.f32 %v5571_v27, %v5573_v5  ;;  %v5348_v5 = vadd.f32 %v5333_v62, %v5332_v33 }
 0x5f6   :  { %v15275_v2 = vpop.eup %15274  ;;  %v5577_v58 = vadd.f32 1e-05, %v5575_v19  ;;  %v5358_v19 = vadd.f32 %v5341_v43, %v5340_v17 }
 0x5f7   :  { %v5579_v28 = vmul.f32 %v15275_v2, %v5576_v0  ;;  %vm5585_vm14 = vweird.f32 %v15275_v2  ;;  %v5364_v0 = vadd.f32 %v5363_v55, %v5346_v59 }
 0x5f8   :  { %15276 = vrsqrt.f32 %v5577_v58  ;;  %vm5586_vm0 = vmor %vm5584_vm15, %vm5585_vm14  ;;  %vm5594_vm2 = vweird.f32 %v5577_v58 }
 0x5f9   :  { %v5580_v63 = vmul.f32 %v15275_v2, %v5579_v28  ;;  %v5365_v27 = vadd.f32 %v5364_v0, %v5347_v21  ;;  %v5343_v28 = vmul.f32 %v16574_v11, %v16574_v11  ;;  %v5629_v18 = vpop.permute.xlu2 %5628 }
 0x5fb   :  { %v5581_v42 = vmul.f32 0.5, %v5580_v63  ;;  %v5359_v63 = vadd.f32 %v5358_v19, %v5342_v46 }
 0x5fd   :  { %v5582_v48 = vsub.f32 1.5, %v5581_v42 }
 0x5fe   :  { %v15277_v53 = vpop.eup %15276 }
 0x5ff   :  { %v5589_v49 = vmul.f32 %v15277_v53, %v5577_v58  ;;  %v5583_v47 = vmul.f32 %v15275_v2, %v5582_v48  ;;  %vm5595_vm1 = vweird.f32 %v15277_v53  ;;  %v5349_v58 = vadd.f32 %v5348_v5, %v5334_v60 }
 0x600   :  { %vm5596_vm3 = vmor %vm5594_vm2, %vm5595_vm1  ;;  %v5360_v48 = vadd.f32 %v5359_v63, %v5343_v28  ;;  %v14857_v28 = vld [vmem:[#allocation10] sm:$0xff]  ;;  %vm6034_vm1 = vcmask 261120  }
 0x601   :  { %v5590_v41 = vmul.f32 %v15277_v53, %v5589_v49  ;;  %v5587_v23 = vsel %vm5586_vm0, %v15275_v2, %v5583_v47  ;;  %v5335_v2 = vmul.f32 %v16585_v39, %v16585_v39  ;;  %v5311_v47 = vld [vmem:[#allocation22 + $0x90] sm:$0xff] }
 0x602   :  { %v5598_v61 = vmul.f32 %v5587_v23, %v5536_v54  ;;  %v5600_v23 = vsub.f32 %v16492_v57, %v16604_v44  ;;  %v5605_v57 = vsub.f32 %v16529_v12, %v16608_v16 }
 0x603   :  { %v5591_v51 = vmul.f32 0.5, %v5590_v41  ;;  %v5350_v42 = vadd.f32 %v5349_v58, %v5335_v2 }
 0x604   :  { %5610 = vperm.xlu1 %15265, %v5598_v61   ;;  %v5601_v61 = vsub.f32 %v16489_v9, %v16604_v44  ;;  %v5606_v9 = vsub.f32 %v16542_v3, %v16608_v16 }
 0x605   :  { %v5592_v4 = vsub.f32 1.5, %v5591_v51  ;;  %v5602_v51 = vsub.f32 %v16516_v14, %v16604_v44  ;;  %v5607_v14 = vsub.f32 %v16544_v34, %v16608_v16 }
 0x607   :  { %v5593_v22 = vmul.f32 %v15277_v53, %v5592_v4  ;;  %v5603_v4 = vsub.f32 %v16512_v15, %v16604_v44 }
 0x609   :  { %v5597_v40 = vsel %vm5596_vm3, %v15277_v53, %v5593_v22  ;;  %v5317_v53 = vadd.f32 %v16560_v24, %v16562_v35 }
 0x60a   :  { %v5599_v36 = vmul.f32 %v5597_v40, %v5537_v32 }
 0x60b   :  { %v5318_v49 = vadd.f32 %v5317_v53, %v16595_v10 }
 0x60c   :  { %5615 = vperm.xlu0 %15264, %v5599_v36  }
 0x60d   :  { %v5319_v54 = vadd.f32 %v5318_v49, %v16600_v45 }
 0x614   :  { %5633 = vperm.xlu0 %15264, %v5539_v38  }
 0x62e   :  { %5325 = vadd.xlane.f32.xlu1 %v5324_v13 }
 0x636   :  { %5366 = vadd.xlane.f32.xlu1 %v5365_v27 }
 0x63e   :  { %5351 = vadd.xlane.f32.xlu1 %v5350_v42  ;;  %5361 = vadd.xlane.f32.xlu0 %v5360_v48  ;;  %v5331_v42 = vpop.xlane.xlu2 %5330 }
 0x63f   :  { %v16664_v48 = vmul.f32 0.0025510204, %v5331_v42 }
 0x641   :  { %v5379_v49 = vmul.f32 %v16664_v48, %v16664_v48 }
 0x646   :  { %5320 = vadd.xlane.f32.xlu0 %v5319_v54 }
 0x65a   :  { %5501 = vperm.xlu0 %15264, %v5311_v47  }
 0x676   :  { %v5611_v41 = vpop.permute.xlu1 %5610 }
 0x677   :  { %v5618_v22 = vmul.f32 %v5611_v41, %v5600_v23  ;;  %v5619_v40 = vmul.f32 %v5611_v41, %v5601_v61  ;;  %v5620_v36 = vmul.f32 %v5611_v41, %v5602_v51  ;;  %v5621_v38 = vmul.f32 %v5611_v41, %v5603_v4  ;;  %v5316_v41 = vpop.xlane.xlu2 %5315  ;;  %v14858_v51 = vld [vmem:[#allocation10 + $0x8] sm:$0xff] }
 0x678   :  { %v16672_v4 = vmul.f32 0.0025510204, %v5316_v41 }
 0x679   :  { %v5636_v1 = vadd.f32 %v5629_v18, %v5618_v22  ;;  %v5637_v15 = vadd.f32 %v5629_v18, %v5619_v40  ;;  %v5638_v44 = vadd.f32 %v5629_v18, %v5620_v36  ;;  %v5639_v31 = vadd.f32 %v5629_v18, %v5621_v38 }
 0x67a   :  { %v5376_v38 = vmul.f32 %v16672_v4, %v16672_v4 }
 0x67b   :  { %v5644_v12 = vmax.f32 %v5636_v1, 0.0  ;;  %v5645_v0 = vmax.f32 %v5637_v15, 0.0  ;;  %v5646_v46 = vmax.f32 %v5638_v44, 0.0  ;;  %v5647_v3 = vmax.f32 %v5639_v31, 0.0 }
 0x67e   :  { %v5616_v32 = vpop.permute.xlu0 %5615 }
 0x67f   :  { %v5622_v13 = vmul.f32 %v5616_v32, %v5604_v25  ;;  %v5623_v59 = vmul.f32 %v5616_v32, %v5605_v57  ;;  %v5624_v55 = vmul.f32 %v5616_v32, %v5606_v9  ;;  %v5625_v62 = vmul.f32 %v5616_v32, %v5607_v14  ;;  %v5357_v31 = vpop.xlane.xlu2 %5356 }
 0x686   :  { %v5634_v33 = vpop.permute.xlu0 %5633 }
 0x687   :  { %v5640_v43 = vadd.f32 %v5634_v33, %v5622_v13  ;;  %v5641_v30 = vadd.f32 %v5634_v33, %v5623_v59  ;;  %v5642_v17 = vadd.f32 %v5634_v33, %v5624_v55  ;;  %v5643_v21 = vadd.f32 %v5634_v33, %v5625_v62  ;;  %v14859_v62 = vld [vmem:[#allocation10 + $0x10] sm:$0xff] }
 0x688   :  { %v5373_v13 = vmul.f32 0.0025510204, %v5357_v31  ;;  %v14862_v31 = vld [vmem:[#allocation10 + $0x28] sm:$0xff] }
 0x689   :  { %v5648_v60 = vmax.f32 %v5640_v43, 0.0  ;;  %v5649_v27 = vmax.f32 %v5641_v30, 0.0  ;;  %v5650_v34 = vmax.f32 %v5642_v17, 0.0  ;;  %v5651_v16 = vmax.f32 %v5643_v21, 0.0 }
 0x68b   :  { %v5696_v5 = vpack.c.bf16 %v5648_v60, %v5644_v12  ;;  %v5697_v19 = vpack.c.bf16 %v5649_v27, %v5645_v0  ;;  %v5698_v2 = vpack.c.bf16 %v5650_v34, %v5646_v46  ;;  %v5699_v58 = vpack.c.bf16 %v5651_v16, %v5647_v3 }
 0x68d   :  { %5780 = vmatpush.bf16.msra.mxu1 %v5696_v5  ;;  %5834 = vmatpush.bf16.msra.mxu3 %v5697_v19  ;;  %v5306_v19 = vld [vmem:[#allocation22 + $0x68] sm:$0xff] }
 0x68e   :  { %5888 = vmatpush.bf16.msra.mxu2 %v5698_v2  ;;  %5942 = vmatpush.bf16.msra.mxu0 %v5699_v58 }
 0x690   :  { %12688 = vmatmul.msk.bf16.vlgmr.msra.gmra.mxu1 %vm5745_vm4, %v14857_v28  ;;  %12697 = vmatmul.msk.bf16.vlgmr.msra.gmra.mxu3 %vm5745_vm4, %v14857_v28 }
 0x691   :  { %12706 = vmatmul.msk.bf16.vlgmr.msra.gmra.mxu2 %vm5745_vm4, %v14857_v28  ;;  %12715 = vmatmul.msk.bf16.vlgmr.msra.gmra.mxu0 %vm5745_vm4, %v14857_v28 }
 0x6a0   :  { %12689 = vmatmul.msk.bf16.gmra.mxu1 %vm5745_vm4, %v14858_v51  ;;  %12698 = vmatmul.msk.bf16.gmra.mxu3 %vm5745_vm4, %v14858_v51 }
 0x6a1   :  { %v5326_v63 = vpop.xlane.xlu1 %5325  ;;  %12707 = vmatmul.msk.bf16.gmra.mxu2 %vm5745_vm4, %v14858_v51  ;;  %12716 = vmatmul.msk.bf16.gmra.mxu0 %vm5745_vm4, %v14858_v51 }
 0x6a2   :  { %v16668_v23 = vmul.f32 0.0025510204, %v5326_v63  ;;  %v5304_v63 = vld [vmem:[#allocation22 + $0x58] sm:$0xff] }
 0x6a4   :  { %v5378_v36 = vmul.f32 %v16668_v23, %v16668_v23 }
 0x6a9   :  { %v5367_v53 = vpop.xlane.xlu1 %5366 }
 0x6aa   :  { %v5375_v54 = vmul.f32 0.0025510204, %v5367_v53 }
 0x6ac   :  { %v5383_v47 = vsub.f32 %v5375_v54, %v5379_v49 }
 0x6ae   :  { %v16670_v61 = vadd.f32 1e-05, %v5383_v47 }
 0x6b0   :  { %15278 = vrsqrt.f32 %v16670_v61  ;;  %12690 = vmatmul.msk.bf16.gmra.mxu1 %vm5745_vm4, %v14859_v62  ;;  %12699 = vmatmul.msk.bf16.gmra.mxu3 %vm5745_vm4, %v14859_v62  ;;  %vm5424_vm12 = vweird.f32 %v16670_v61 }
 0x6b1   :  { %v5362_v32 = vpop.xlane.xlu0 %5361  ;;  %v5352_v22 = vpop.xlane.xlu1 %5351  ;;  %12708 = vmatmul.msk.bf16.gmra.mxu2 %vm5745_vm4, %v14859_v62  ;;  %12717 = vmatmul.msk.bf16.gmra.mxu0 %vm5745_vm4, %v14859_v62 }
 0x6b2   :  { %v5374_v40 = vmul.f32 0.0025510204, %v5362_v32  ;;  %v5372_v18 = vmul.f32 0.0025510204, %v5352_v22 }
 0x6b4   :  { %v5382_v25 = vsub.f32 %v5374_v40, %v5378_v36  ;;  %v5380_v57 = vsub.f32 %v5372_v18, %v5376_v38  ;;  %v14860_v40 = vld [vmem:[#allocation10 + $0x18] sm:$0xff]  ;;  %v5307_v38 = vld [vmem:[#allocation22 + $0x70] sm:$0xff] }
 0x6b6   :  { %v5386_v9 = vadd.f32 1e-05, %v5382_v25  ;;  %v5384_v14 = vadd.f32 1e-05, %v5380_v57  ;;  %v16683_v1 = vpop.eup %15278  ;;  %v5305_v25 = vld [vmem:[#allocation22 + $0x60] sm:$0xff] }
 0x6b7   :  { %v5419_v59 = vmul.f32 %v16683_v1, %v16670_v61  ;;  %vm5425_vm11 = vweird.f32 %v16683_v1 }
 0x6b8   :  { %15280 = vrsqrt.f32 %v5386_v9  ;;  %vm5414_vm7 = vweird.f32 %v5386_v9  ;;  %vm5394_vm8 = vweird.f32 %v5384_v14  ;;  %vm5426_vm13 = vmor %vm5424_vm12, %vm5425_vm11 }
 0x6b9   :  { %15282 = vrsqrt.f32 %v5384_v14  ;;  %v5321_v15 = vpop.xlane.xlu0 %5320  ;;  %v5420_v21 = vmul.f32 %v16683_v1, %v5419_v59  ;;  %v14864_v59 = vld [vmem:[#allocation10 + $0x38] sm:$0xff] }
 0x6ba   :  { %v16685_v44 = vmul.f32 0.0025510204, %v5321_v15  ;;  %v5309_v15 = vld [vmem:[#allocation22 + $0x80] sm:$0xff] }
 0x6bb   :  { %v5421_v27 = vmul.f32 0.5, %v5420_v21 }
 0x6bc   :  { %v5377_v55 = vmul.f32 %v16685_v44, %v16685_v44 }
 0x6bd   :  { %v5422_v28 = vsub.f32 1.5, %v5421_v27  ;;  %v5497_v27 = vpop.permute.xlu2 %5496 }
 0x6be   :  { %v15281_v33 = vpop.eup %15280  ;;  %v5381_v43 = vsub.f32 %v5373_v13, %v5377_v55  ;;  %v14863_v13 = vld [vmem:[#allocation10 + $0x30] sm:$0xff]  ;;  %v14865_v55 = vld [vmem:[#allocation10 + $0x40] sm:$0xff] }
 0x6bf   :  { %v15283_v30 = vpop.eup %15282  ;;  %v5409_v17 = vmul.f32 %v15281_v33, %v5386_v9  ;;  %vm5415_vm5 = vweird.f32 %v15281_v33  ;;  %v5423_v32 = vmul.f32 %v16683_v1, %v5422_v28  ;;  %v5442_v28 = vsub.f32 %v16572_v37, %v16668_v23 }
 0x6c0   :  { %v5389_v12 = vmul.f32 %v15283_v30, %v5384_v14  ;;  %v5385_v0 = vadd.f32 1e-05, %v5381_v43  ;;  %vm5395_vm6 = vweird.f32 %v15283_v30  ;;  %vm5416_vm9 = vmor %vm5414_vm7, %vm5415_vm5  ;;  %12691 = vmatmul.msk.bf16.gmra.mxu1 %vm5745_vm4, %v14860_v40  ;;  %12700 = vmatmul.msk.bf16.gmra.mxu3 %vm5745_vm4, %v14860_v40 }
 0x6c1   :  { %v5410_v46 = vmul.f32 %v15281_v33, %v5409_v17  ;;  %vm5396_vm10 = vmor %vm5394_vm8, %vm5395_vm6  ;;  %v5427_v18 = vsel %vm5426_vm13, %v16683_v1, %v5423_v32  ;;  %12709 = vmatmul.msk.bf16.gmra.mxu2 %vm5745_vm4, %v14860_v40  ;;  %12718 = vmatmul.msk.bf16.gmra.mxu0 %vm5745_vm4, %v14860_v40  ;;  %v14861_v1 = vld [vmem:[#allocation10 + $0x20] sm:$0xff]  ;;  %v5437_v40 = vsub.f32 %v16560_v24, %v16685_v44 }
 0x6c2   :  { %v5390_v3 = vmul.f32 %v15283_v30, %v5389_v12  ;;  %15284 = vrsqrt.f32 %v5385_v0  ;;  %vm5404_vm15 = vweird.f32 %v5385_v0  ;;  %v5431_v9 = vmul.f32 %v5427_v18, %v5307_v38 }
 0x6c3   :  { %v5411_v60 = vmul.f32 0.5, %v5410_v46 }
 0x6c4   :  { %v5391_v34 = vmul.f32 0.5, %v5390_v3 }
 0x6c5   :  { %v5412_v16 = vsub.f32 1.5, %v5411_v60  ;;  %v5487_v18 = vpop.permute.xlu2 %5486 }
 0x6c6   :  { %v5392_v5 = vsub.f32 1.5, %v5391_v34 }
 0x6c7   :  { %v5413_v2 = vmul.f32 %v15281_v33, %v5412_v16 }
 0x6c8   :  { %v15285_v58 = vpop.eup %15284  ;;  %v5393_v42 = vmul.f32 %v15283_v30, %v5392_v5 }
 0x6c9   :  { %v5417_v53 = vsel %vm5416_vm9, %v15281_v33, %v5413_v2  ;;  %v5399_v49 = vmul.f32 %v15285_v58, %v5385_v0  ;;  %vm5405_vm14 = vweird.f32 %v15285_v58  ;;  %v5440_v2 = vsub.f32 %v16566_v50, %v16668_v23 }
 0x6ca   :  { %v5430_v54 = vmul.f32 %v5417_v53, %v5306_v19  ;;  %v5397_v47 = vsel %vm5396_vm10, %v15283_v30, %v5393_v42  ;;  %vm5406_vm0 = vmor %vm5404_vm15, %vm5405_vm14  ;;  %v5432_v53 = vsub.f32 %v16558_v8, %v16672_v4  ;;  %v5434_v50 = vsub.f32 %v16580_v6, %v16672_v4 }
 0x6cb   :  { %v5428_v41 = vmul.f32 %v5397_v47, %v5304_v63  ;;  %v5400_v51 = vmul.f32 %v15285_v58, %v5399_v49  ;;  %v5443_v63 = vsub.f32 %v16574_v11, %v16668_v23  ;;  %v5433_v49 = vsub.f32 %v16556_v29, %v16672_v4 }
 0x6cc   :  { %5460 = vperm.xlu0 %15264, %v5430_v54   ;;  %v5502_v3 = vpop.permute.xlu0 %5501  ;;  %v5445_v8 = vsub.f32 %v16568_v52, %v16664_v48  ;;  %v5446_v29 = vsub.f32 %v16578_v26, %v16664_v48  ;;  %v5447_v6 = vsub.f32 %v16583_v20, %v16664_v48  ;;  %v5439_v52 = vsub.f32 %v16600_v45, %v16685_v44 }
 0x6cd   :  { %5450 = vperm.xlu1 %15265, %v5428_v41   ;;  %v5401_v22 = vmul.f32 0.5, %v5400_v51 }
 0x6cf   :  { %v5402_v36 = vsub.f32 1.5, %v5401_v22  ;;  %v5436_v22 = vsub.f32 %v16562_v35, %v16685_v44 }
 0x6d0   :  { %12692 = vmatmul.msk.bf16.gmra.mxu1 %vm5745_vm4, %v14861_v1  ;;  %12701 = vmatmul.msk.bf16.gmra.mxu3 %vm5745_vm4, %v14861_v1 }
 0x6d1   :  { %v5403_v57 = vmul.f32 %v15285_v58, %v5402_v36  ;;  %12710 = vmatmul.msk.bf16.gmra.mxu2 %vm5745_vm4, %v14861_v1  ;;  %12719 = vmatmul.msk.bf16.gmra.mxu0 %vm5745_vm4, %v14861_v1 }
 0x6d3   :  { %v5407_v61 = vsel %vm5406_vm0, %v15285_v58, %v5403_v57  ;;  %v5441_v58 = vsub.f32 %v16564_v56, %v16668_v23  ;;  %v5435_v56 = vsub.f32 %v16585_v39, %v16672_v4  ;;  %v5444_v23 = vsub.f32 %v16570_v7, %v16664_v48 }
 0x6d4   :  { %v5429_v14 = vmul.f32 %v5407_v61, %v5305_v25  ;;  %v5438_v7 = vsub.f32 %v16595_v10, %v16685_v44 }
 0x6d5   :  { %5465 = vperm.xlu1 %15265, %v5431_v9  }
 0x6d6   :  { %5455 = vperm.xlu0 %15264, %v5429_v14  }
 0x6dd   :  { %5491 = vperm.xlu1 %15265, %v5309_v15  }
 0x6e0   :  { %12693 = vmatmul.msk.bf16.gmra.mxu1 %vm5745_vm4, %v14862_v31  ;;  %12702 = vmatmul.msk.bf16.gmra.mxu3 %vm5745_vm4, %v14862_v31 }
 0x6e1   :  { %12711 = vmatmul.msk.bf16.gmra.mxu2 %vm5745_vm4, %v14862_v31  ;;  %12720 = vmatmul.msk.bf16.gmra.mxu0 %vm5745_vm4, %v14862_v31 }
 0x6f0   :  { %12694 = vmatmul.msk.bf16.gmra.mxu1 %vm5745_vm4, %v14863_v13  ;;  %12703 = vmatmul.msk.bf16.gmra.mxu3 %vm5745_vm4, %v14863_v13 }
 0x6f1   :  { %12712 = vmatmul.msk.bf16.gmra.mxu2 %vm5745_vm4, %v14863_v13  ;;  %12721 = vmatmul.msk.bf16.gmra.mxu0 %vm5745_vm4, %v14863_v13 }
 0x700   :  { %12695 = vmatmul.msk.bf16.gmra.mxu1 %vm5745_vm4, %v14864_v59  ;;  %12704 = vmatmul.msk.bf16.gmra.mxu3 %vm5745_vm4, %v14864_v59 }
 0x701   :  { %12713 = vmatmul.msk.bf16.gmra.mxu2 %vm5745_vm4, %v14864_v59  ;;  %12722 = vmatmul.msk.bf16.gmra.mxu0 %vm5745_vm4, %v14864_v59 }
 0x70d   :  { %v16726_v33 = vpop.f32.mrf.mxu1 }
 0x70e   :  { %v16724_v62 = vpop.f32.mrf.mxu0 }
 0x710   :  { %12696 = vmatmul.msk.bf16.gmra.mxu1 %vm5745_vm4, %v14865_v55  ;;  %12705 = vmatmul.msk.bf16.gmra.mxu3 %vm5745_vm4, %v14865_v55 }
 0x711   :  { %12714 = vmatmul.msk.bf16.gmra.mxu2 %vm5745_vm4, %v14865_v55  ;;  %12723 = vmatmul.msk.bf16.gmra.mxu0 %vm5745_vm4, %v14865_v55 }
 0x713   :  { %v16728_v43 = vpop.f32.mrf.mxu3 }
 0x714   :  { %v16730_v30 = vpop.f32.mrf.mxu2 }
 0x715   :  { %v16734_v21 = vpop.f32.mrf.mxu1 }
 0x716   :  { %v16732_v17 = vpop.f32.mrf.mxu0 }
 0x71b   :  { %v16736_v12 = vpop.f32.mrf.mxu3 }
 0x71c   :  { %v16738_v0 = vpop.f32.mrf.mxu2 }
 0x71d   :  { %v16742_v60 = vpop.f32.mrf.mxu1 }
 0x71e   :  { %v16740_v46 = vpop.f32.mrf.mxu0 }
 0x723   :  { %v16744_v34 = vpop.f32.mrf.mxu3 }
 0x724   :  { %v16746_v5 = vpop.f32.mrf.mxu2 }
 0x725   :  { %v16766_v54 = vpop.f32.mrf.mxu1 }
 0x726   :  { %v16756_v42 = vpop.f32.mrf.mxu0 }
 0x72b   :  { %v16784_v35 = vpop.f32.mrf.mxu3 }
 0x72c   :  { %v16786_v10 = vpop.f32.mrf.mxu2 }
 0x73e   :  { %v5461_v19 = vpop.permute.xlu0 %5460 }
 0x73f   :  { %v5451_v16 = vpop.permute.xlu1 %5450  ;;  %v5476_v37 = vmul.f32 %v5461_v19, %v5440_v2  ;;  %v5477_v47 = vmul.f32 %v5461_v19, %v5441_v58  ;;  %v5478_v41 = vmul.f32 %v5461_v19, %v5442_v28  ;;  %v5479_v11 = vmul.f32 %v5461_v19, %v5443_v63  ;;  %v16788_v2 = vpop.f32.mrf.mxu0 }
 0x740   :  { %v5468_v51 = vmul.f32 %v5451_v16, %v5432_v53  ;;  %v5469_v39 = vmul.f32 %v5451_v16, %v5433_v49  ;;  %v5470_v4 = vmul.f32 %v5451_v16, %v5434_v50  ;;  %v5471_v32 = vmul.f32 %v5451_v16, %v5435_v56  ;;  %v16790_v49 = vpop.f32.mrf.mxu1 }
 0x741   :  { %v5512_v26 = vadd.f32 %v5497_v27, %v5476_v37  ;;  %v5513_v36 = vadd.f32 %v5497_v27, %v5477_v47  ;;  %v5514_v38 = vadd.f32 %v5497_v27, %v5478_v41  ;;  %v5515_v20 = vadd.f32 %v5497_v27, %v5479_v11 }
 0x742   :  { %v5504_v14 = vadd.f32 %v5487_v18, %v5468_v51  ;;  %v5505_v24 = vadd.f32 %v5487_v18, %v5469_v39  ;;  %v5506_v15 = vadd.f32 %v5487_v18, %v5470_v4  ;;  %v5507_v1 = vadd.f32 %v5487_v18, %v5471_v32 }
 0x743   :  { %v5528_v55 = vmax.f32 %v5512_v26, 0.0  ;;  %v5529_v27 = vmax.f32 %v5513_v36, 0.0  ;;  %v5530_v16 = vmax.f32 %v5514_v38, 0.0  ;;  %v5531_v19 = vmax.f32 %v5515_v20, 0.0  ;;  %v16792_v38 = vpop.f32.mrf.mxu3  ;;  %v16794_v20 = vpop.f32.mrf.mxu2 }
 0x744   :  { %v5520_v4 = vmax.f32 %v5504_v14, 0.0  ;;  %v5521_v32 = vmax.f32 %v5505_v24, 0.0  ;;  %v5522_v26 = vmax.f32 %v5506_v15, 0.0  ;;  %v5523_v36 = vmax.f32 %v5507_v1, 0.0 }
 0x747   :  { %v5466_v48 = vpop.permute.xlu1 %5465 }
 0x748   :  { %v5480_v25 = vmul.f32 %v5466_v48, %v5444_v23  ;;  %v5481_v57 = vmul.f32 %v5466_v48, %v5445_v8  ;;  %v5482_v9 = vmul.f32 %v5466_v48, %v5446_v29  ;;  %v5483_v61 = vmul.f32 %v5466_v48, %v5447_v6  ;;  %v5456_v59 = vpop.permute.xlu0 %5455  ;;  %v16798_v14 = vpop.f32.mrf.mxu1 }
 0x749   :  { %v5472_v50 = vmul.f32 %v5456_v59, %v5436_v22  ;;  %v5473_v56 = vmul.f32 %v5456_v59, %v5437_v40  ;;  %v5474_v37 = vmul.f32 %v5456_v59, %v5438_v7  ;;  %v5475_v47 = vmul.f32 %v5456_v59, %v5439_v52  ;;  %17269 = vst [vmem:[#allocation33_spill] sm:$0xff] %v16798_v14  ;;  %v15024_v14 = vld [vmem:[#allocation12 + $0x4f0] sm:$0xff] }
 0x74a   :  { %v5516_v31 = vadd.f32 %v5502_v3, %v5480_v25  ;;  %v5517_v45 = vadd.f32 %v5502_v3, %v5481_v57  ;;  %v5518_v44 = vadd.f32 %v5502_v3, %v5482_v9  ;;  %v5519_v13 = vadd.f32 %v5502_v3, %v5483_v61  ;;  %v14848_v9 = vld [vmem:[#allocation9] sm:$0xff]  ;;  %v16796_v61 = vpop.f32.mrf.mxu0 }
 0x74b   :  { %17268 = vst [vmem:[#allocation36_spill] sm:$0xff] %v16796_v61  ;;  %v16804_v24 = vpop.f32.mrf.mxu3  ;;  %v16806_v15 = vpop.f32.mrf.mxu2  ;;  %v15008_v61 = vld [vmem:[#allocation12 + $0x470] sm:$0xff] }
 0x74c   :  { %v5532_v58 = vmax.f32 %v5516_v31, 0.0  ;;  %v5533_v28 = vmax.f32 %v5517_v45, 0.0  ;;  %v5534_v63 = vmax.f32 %v5518_v44, 0.0  ;;  %v5535_v53 = vmax.f32 %v5519_v13, 0.0  ;;  %17270 = vst [vmem:[#allocation37_spill] sm:$0xff] %v16804_v24  ;;  %v14849_v45 = vld [vmem:[#allocation9 + $0x8] sm:$0xff] }
 0x74d   :  { %17271 = vst [vmem:[#allocation39_spill] sm:$0xff] %v16806_v15 }
 0x74e   :  { %v5674_v41 = vpack.c.bf16 %v5532_v58, %v5528_v55  ;;  %v5675_v11 = vpack.c.bf16 %v5533_v28, %v5529_v27  ;;  %v5676_v3 = vpack.c.bf16 %v5534_v63, %v5530_v16  ;;  %v5677_v23 = vpack.c.bf16 %v5535_v53, %v5531_v19  ;;  %v14850_v28 = vld [vmem:[#allocation9 + $0x10] sm:$0xff] }
 0x74f   :  { %v5492_v8 = vpop.permute.xlu1 %5491 }
 0x750   :  { %v5508_v29 = vadd.f32 %v5492_v8, %v5472_v50  ;;  %v5509_v6 = vadd.f32 %v5492_v8, %v5473_v56  ;;  %v5510_v51 = vadd.f32 %v5492_v8, %v5474_v37  ;;  %v5511_v39 = vadd.f32 %v5492_v8, %v5475_v47  ;;  %6068 = vmatpush.bf16.msrb.mxu1 %v5674_v41  ;;  %v16810_v31 = vpop.f32.mrf.mxu1  ;;  %v14851_v47 = vld [vmem:[#allocation9 + $0x18] sm:$0xff] }
 0x751   :  { %6122 = vmatpush.bf16.msrb.mxu3 %v5675_v11  ;;  %6176 = vmatpush.bf16.msrb.mxu2 %v5676_v3 }
 0x752   :  { %6230 = vmatpush.bf16.msrb.mxu0 %v5677_v23  ;;  %v5524_v22 = vmax.f32 %v5508_v29, 0.0  ;;  %v5525_v40 = vmax.f32 %v5509_v6, 0.0  ;;  %v5526_v7 = vmax.f32 %v5510_v51, 0.0  ;;  %v5527_v52 = vmax.f32 %v5511_v39, 0.0  ;;  %v16808_v1 = vpop.f32.mrf.mxu0  ;;  %v14852_v51 = vld [vmem:[#allocation9 + $0x20] sm:$0xff] }
 0x753   :  { %v16812_v44 = vpop.f32.mrf.mxu3  ;;  %v16814_v13 = vpop.f32.mrf.mxu2 }
 0x754   :  { %v5670_v48 = vpack.c.bf16 %v5524_v22, %v5520_v4  ;;  %v5671_v18 = vpack.c.bf16 %v5525_v40, %v5521_v32  ;;  %v5672_v25 = vpack.c.bf16 %v5526_v7, %v5522_v26  ;;  %v5673_v57 = vpack.c.bf16 %v5527_v52, %v5523_v36  ;;  %v14853_v40 = vld [vmem:[#allocation9 + $0x28] sm:$0xff] }
 0x756   :  { %6069 = vmatpush.bf16.msrb.mxu1 %v5670_v48  ;;  %6123 = vmatpush.bf16.msrb.mxu3 %v5671_v18 }
 0x757   :  { %6177 = vmatpush.bf16.msrb.mxu2 %v5672_v25  ;;  %6231 = vmatpush.bf16.msrb.mxu0 %v5673_v57 }
 0x758   :  { %v16822_v55 = vpop.f32.mrf.mxu1 }
 0x759   :  { %12760 = vmatmul.msk.bf16.vlgmr.msrb.gmra.mxu1 %vm6034_vm1, %v14848_v9  ;;  %12769 = vmatmul.msk.bf16.vlgmr.msrb.gmra.mxu3 %vm6034_vm1, %v14848_v9  ;;  %17273 = vst [vmem:[#allocation38_spill] sm:$0xff] %v16822_v55 }
 0x75a   :  { %12778 = vmatmul.msk.bf16.vlgmr.msrb.gmra.mxu2 %vm6034_vm1, %v14848_v9  ;;  %12787 = vmatmul.msk.bf16.vlgmr.msrb.gmra.mxu0 %vm6034_vm1, %v14848_v9  ;;  %v16818_v59 = vpop.f32.mrf.mxu0  ;;  %v14854_v9 = vld [vmem:[#allocation9 + $0x30] sm:$0xff] }
 0x75b   :  { %17272 = vst [vmem:[#allocation32_spill] sm:$0xff] %v16818_v59  ;;  %v16824_v27 = vpop.f32.mrf.mxu3  ;;  %v16826_v16 = vpop.f32.mrf.mxu2 }
 0x75c   :  { %17274 = vst [vmem:[#allocation35_spill] sm:$0xff] %v16824_v27  ;;  %v14855_v27 = vld [vmem:[#allocation9 + $0x38] sm:$0xff] }
 0x75d   :  { %17275 = vst [vmem:[#allocation41_spill] sm:$0xff] %v16826_v16 }
 0x760   :  { %v16830_v58 = vpop.f32.mrf.mxu1 }
 0x762   :  { %v16828_v19 = vpop.f32.mrf.mxu0 }
 0x763   :  { %v16836_v63 = vpop.f32.mrf.mxu3  ;;  %v16838_v53 = vpop.f32.mrf.mxu2 }
 0x768   :  { %v16842_v56 = vpop.f32.mrf.mxu1 }
 0x769   :  { %12761 = vmatmul.msk.bf16.gmra.mxu1 %vm6034_vm1, %v14849_v45  ;;  %12770 = vmatmul.msk.bf16.gmra.mxu3 %vm6034_vm1, %v14849_v45 }
 0x76a   :  { %12779 = vmatmul.msk.bf16.gmra.mxu2 %vm6034_vm1, %v14849_v45  ;;  %12788 = vmatmul.msk.bf16.gmra.mxu0 %vm6034_vm1, %v14849_v45  ;;  %v16840_v50 = vpop.f32.mrf.mxu0 }
 0x76b   :  { %v16844_v37 = vpop.f32.mrf.mxu3  ;;  %v16846_v41 = vpop.f32.mrf.mxu2 }
 0x770   :  { %v16850_v3 = vpop.f32.mrf.mxu1 }
 0x772   :  { %v16848_v11 = vpop.f32.mrf.mxu0 }
 0x773   :  { %v16856_v23 = vpop.f32.mrf.mxu3  ;;  %v16858_v8 = vpop.f32.mrf.mxu2 }
 0x778   :  { %v16862_v6 = vpop.f32.mrf.mxu1 }
 0x779   :  { %12762 = vmatmul.msk.bf16.gmra.mxu1 %vm6034_vm1, %v14850_v28  ;;  %12771 = vmatmul.msk.bf16.gmra.mxu3 %vm6034_vm1, %v14850_v28 }
 0x77a   :  { %12780 = vmatmul.msk.bf16.gmra.mxu2 %vm6034_vm1, %v14850_v28  ;;  %12789 = vmatmul.msk.bf16.gmra.mxu0 %vm6034_vm1, %v14850_v28  ;;  %v16860_v29 = vpop.f32.mrf.mxu0 }
 0x77b   :  { %v16864_v39 = vpop.f32.mrf.mxu3  ;;  %v16868_v4 = vpop.f32.mrf.mxu2 }
 0x780   :  { %v16874_v26 = vpop.f32.mrf.mxu1 }
 0x781   :  { %17277 = vst [vmem:[#allocation40_spill] sm:$0xff] %v16874_v26 }
 0x782   :  { %v16872_v32 = vpop.f32.mrf.mxu0 }
 0x783   :  { %17276 = vst [vmem:[#allocation42_spill] sm:$0xff] %v16872_v32  ;;  %v16876_v36 = vpop.f32.mrf.mxu3  ;;  %v16878_v22 = vpop.f32.mrf.mxu2 }
 0x784   :  { %17278 = vst [vmem:[#allocation46_spill] sm:$0xff] %v16876_v36 }
 0x785   :  { %17279 = vst [vmem:[#allocation49_spill] sm:$0xff] %v16878_v22 }
 0x788   :  { %v16882_v52 = vpop.f32.mrf.mxu1 }
 0x789   :  { %12763 = vmatmul.msk.bf16.gmra.mxu1 %vm6034_vm1, %v14851_v47  ;;  %12772 = vmatmul.msk.bf16.gmra.mxu3 %vm6034_vm1, %v14851_v47  ;;  %17281 = vst [vmem:[#allocation45_spill] sm:$0xff] %v16882_v52 }
 0x78a   :  { %12781 = vmatmul.msk.bf16.gmra.mxu2 %vm6034_vm1, %v14851_v47  ;;  %12790 = vmatmul.msk.bf16.gmra.mxu0 %vm6034_vm1, %v14851_v47  ;;  %v16880_v7 = vpop.f32.mrf.mxu0 }
 0x78b   :  { %17280 = vst [vmem:[#allocation43_spill] sm:$0xff] %v16880_v7  ;;  %v16888_v48 = vpop.f32.mrf.mxu3  ;;  %v16890_v18 = vpop.f32.mrf.mxu2 }
 0x790   :  { %v16894_v57 = vpop.f32.mrf.mxu1 }
 0x791   :  { %17283 = vst [vmem:[#allocation47_spill] sm:$0xff] %v16894_v57 }
 0x792   :  { %v16892_v25 = vpop.f32.mrf.mxu0 }
 0x793   :  { %17282 = vst [vmem:[#allocation44_spill] sm:$0xff] %v16892_v25  ;;  %v16896_v45 = vpop.f32.mrf.mxu3  ;;  %v16898_v28 = vpop.f32.mrf.mxu2 }
 0x794   :  { %17284 = vst [vmem:[#allocation48_spill] sm:$0xff] %v16896_v45 }
 0x795   :  { %17285 = vst [vmem:[#allocation50_spill] sm:$0xff] %v16898_v28  ;;  %v15009_v28 = vld [vmem:[#allocation12 + $0x478] sm:$0xff] }
 0x796   :  { %6864 = vmatpush.bf16.msra.mxu3 %v15009_v28  ;;  %v15007_v28 = vld [vmem:[#allocation12 + $0x468] sm:$0xff] }
 0x799   :  { %12764 = vmatmul.msk.bf16.gmra.mxu1 %vm6034_vm1, %v14852_v51  ;;  %12773 = vmatmul.msk.bf16.gmra.mxu3 %vm6034_vm1, %v14852_v51 }
 0x79a   :  { %12782 = vmatmul.msk.bf16.gmra.mxu2 %vm6034_vm1, %v14852_v51  ;;  %12791 = vmatmul.msk.bf16.gmra.mxu0 %vm6034_vm1, %v14852_v51  ;;  %v16902_v47 = vpop.f32.mrf.mxu0  ;;  %v16906_v51 = vpop.f32.mrf.mxu1 }
 0x79b   :  { %17286 = vst [vmem:[#allocation52_spill] sm:$0xff] %v16902_v47  ;;  %v16910_v59 = vpop.f32.mrf.mxu2  ;;  %6865 = vmatpush.bf16.msra.mxu3 %v15008_v61 }
 0x79c   :  { %17287 = vst [vmem:[#allocation51_spill] sm:$0xff] %v16906_v51  ;;  %v15025_v51 = vld [vmem:[#allocation12 + $0x4f8] sm:$0xff] }
 0x79d   :  { %17289 = vst [vmem:[#allocation59_spill] sm:$0xff] %v16910_v59  ;;  %6892 = vmatpush.bf16.msra.mxu0 %v15025_v51  ;;  %v15015_v51 = vld [vmem:[#allocation12 + $0x4a8] sm:$0xff] }
 0x79f   :  { %6866 = vmatpush.bf16.msra.mxu3 %v15007_v28  ;;  %v15020_v28 = vld [vmem:[#allocation12 + $0x4d0] sm:$0xff] }
 0x7a1   :  { %6893 = vmatpush.bf16.msra.mxu0 %v15024_v14  ;;  %v14998_v14 = vld [vmem:[#allocation12 + $0x420] sm:$0xff] }
 0x7a2   :  { %v16912_v55 = vpop.f32.mrf.mxu0  ;;  %v16914_v16 = vpop.f32.mrf.mxu1 }
 0x7a3   :  { %17290 = vst [vmem:[#allocation53_spill] sm:$0xff] %v16912_v55  ;;  %v16922_v25 = vpop.f32.mrf.mxu2  ;;  %v15001_v55 = vld [vmem:[#allocation12 + $0x438] sm:$0xff] }
 0x7a4   :  { %17291 = vst [vmem:[#allocation58_spill] sm:$0xff] %v16914_v16  ;;  %v15017_v16 = vld [vmem:[#allocation12 + $0x4b8] sm:$0xff]  ;;  %6850 = vmatpush.bf16.msra.mxu1 %v15001_v55  ;;  %v14999_v55 = vld [vmem:[#allocation12 + $0x428] sm:$0xff] }
 0x7a5   :  { %17293 = vst [vmem:[#allocation34_spill] sm:$0xff] %v16922_v25  ;;  %6878 = vmatpush.bf16.msra.mxu2 %v15017_v16  ;;  %v15000_v25 = vld [vmem:[#allocation12 + $0x430] sm:$0xff] }
 0x7a8   :  { %6851 = vmatpush.bf16.msra.mxu1 %v15000_v25 }
 0x7a9   :  { %12765 = vmatmul.msk.bf16.gmra.mxu1 %vm6034_vm1, %v14853_v40  ;;  %12774 = vmatmul.msk.bf16.gmra.mxu3 %vm6034_vm1, %v14853_v40 }
 0x7aa   :  { %12783 = vmatmul.msk.bf16.gmra.mxu2 %vm6034_vm1, %v14853_v40  ;;  %12792 = vmatmul.msk.bf16.gmra.mxu0 %vm6034_vm1, %v14853_v40  ;;  %v16908_v40 = vpop.f32.mrf.mxu3  ;;  %v16924_v57 = vpop.f32.mrf.mxu0 }
 0x7ab   :  { %17288 = vst [vmem:[#allocation55_spill] sm:$0xff] %v16908_v40  ;;  %v16926_v47 = vpop.f32.mrf.mxu1  ;;  %v16930_v45 = vpop.f32.mrf.mxu2  ;;  %v14856_v40 = vld [vmem:[#allocation9 + $0x40] sm:$0xff] }
 0x7ac   :  { %17294 = vst [vmem:[#allocation60_spill] sm:$0xff] %v16924_v57  ;;  %v15016_v57 = vld [vmem:[#allocation12 + $0x4b0] sm:$0xff]  ;;  %6852 = vmatpush.bf16.msra.mxu1 %v14999_v55 }
 0x7ad   :  { %17295 = vst [vmem:[#allocation61_spill] sm:$0xff] %v16926_v47  ;;  %6879 = vmatpush.bf16.msra.mxu2 %v15016_v57  ;;  %v15023_v47 = vld [vmem:[#allocation12 + $0x4e8] sm:$0xff]  ;;  %v15006_v57 = vld [vmem:[#allocation12 + $0x460] sm:$0xff] }
 0x7ae   :  { %17297 = vst [vmem:[#allocation56_spill] sm:$0xff] %v16930_v45  ;;  %6894 = vmatpush.bf16.msra.mxu0 %v15023_v47  ;;  %6867 = vmatpush.bf16.msra.mxu3 %v15006_v57  ;;  %v15012_v47 = vld [vmem:[#allocation12 + $0x490] sm:$0xff]  ;;  %v15011_v57 = vld [vmem:[#allocation12 + $0x488] sm:$0xff] }
 0x7b0   :  { %6853 = vmatpush.bf16.msra.mxu1 %v14998_v14 }
 0x7b1   :  { %6880 = vmatpush.bf16.msra.mxu2 %v15015_v51  ;;  %v15003_v51 = vld [vmem:[#allocation12 + $0x448] sm:$0xff] }
 0x7b9   :  { %12766 = vmatmul.msk.bf16.gmra.mxu1 %vm6034_vm1, %v14854_v9  ;;  %12775 = vmatmul.msk.bf16.gmra.mxu3 %vm6034_vm1, %v14854_v9 }
 0x7ba   :  { %12784 = vmatmul.msk.bf16.gmra.mxu2 %vm6034_vm1, %v14854_v9  ;;  %12793 = vmatmul.msk.bf16.gmra.mxu0 %vm6034_vm1, %v14854_v9  ;;  %v16920_v9 = vpop.f32.mrf.mxu3 }
 0x7bb   :  { %17292 = vst [vmem:[#allocation54_spill] sm:$0xff] %v16920_v9 }
 0x7c2   :  { %v16928_v59 = vpop.f32.mrf.mxu3 }
 0x7c3   :  { %17296 = vst [vmem:[#allocation57_spill] sm:$0xff] %v16928_v59 }
 0x7c9   :  { %12767 = vmatmul.msk.bf16.gmra.mxu1 %vm6034_vm1, %v14855_v27  ;;  %12776 = vmatmul.msk.bf16.gmra.mxu3 %vm6034_vm1, %v14855_v27 }
 0x7ca   :  { %12785 = vmatmul.msk.bf16.gmra.mxu2 %vm6034_vm1, %v14855_v27  ;;  %12794 = vmatmul.msk.bf16.gmra.mxu0 %vm6034_vm1, %v14855_v27 }
 0x7d6   :  { %v6071_v27 = vpop.f32.mrf.mxu1 }
 0x7d7   :  { %v6233_v9 = vpop.f32.mrf.mxu0  ;;  %v6072_v45 = vadd.f32 %v6071_v27, %v16726_v33  ;;  %v15014_v33 = vld [vmem:[#allocation12 + $0x4a0] sm:$0xff] }
 0x7d8   :  { %v6234_v24 = vadd.f32 %v6233_v9, %v16724_v62  ;;  %v14997_v62 = vld [vmem:[#allocation12 + $0x418] sm:$0xff]  ;;  %6881 = vmatpush.bf16.msra.mxu2 %v15014_v33  ;;  %v15019_v33 = vld [vmem:[#allocation12 + $0x4c8] sm:$0xff] }
 0x7d9   :  { %12768 = vmatmul.msk.bf16.gmra.mxu1 %vm6034_vm1, %v14856_v40  ;;  %12777 = vmatmul.msk.bf16.gmra.mxu3 %vm6034_vm1, %v14856_v40 }
 0x7da   :  { %12786 = vmatmul.msk.bf16.gmra.mxu2 %vm6034_vm1, %v14856_v40  ;;  %12795 = vmatmul.msk.bf16.gmra.mxu0 %vm6034_vm1, %v14856_v40 }
 0x7db   :  { %6854 = vmatpush.bf16.msra.mxu1 %v14997_v62 }
 0x7dc   :  { %v6125_v16 = vpop.f32.mrf.mxu3 }
 0x7dd   :  { %v6126_v59 = vadd.f32 %v6125_v16, %v16728_v43  ;;  %v6179_v15 = vpop.f32.mrf.mxu2  ;;  %v15022_v43 = vld [vmem:[#allocation12 + $0x4e0] sm:$0xff]  ;;  %v14995_v16 = vld [vmem:[#allocation12 + $0x408] sm:$0xff] }
 0x7de   :  { %v6180_v32 = vadd.f32 %v6179_v15, %v16730_v30  ;;  %v16940_v26 = vpop.f32.mrf.mxu1  ;;  %v15005_v30 = vld [vmem:[#allocation12 + $0x458] sm:$0xff]  ;;  %6895 = vmatpush.bf16.msra.mxu0 %v15022_v43 }
 0x7df   :  { %v16942_v25 = vpack.c.bf16 %v6126_v59, %v6072_v45  ;;  %v16944_v61 = vpop.f32.mrf.mxu0  ;;  %v15013_v59 = vld [vmem:[#allocation12 + $0x498] sm:$0xff]  ;;  %6868 = vmatpush.bf16.msra.mxu3 %v15005_v30 }
 0x7e0   :  { %v16946_v40 = vpack.c.bf16 %v6234_v24, %v6180_v32  ;;  %v15021_v45 = vld [vmem:[#allocation12 + $0x4d8] sm:$0xff]  ;;  %v14996_v24 = vld [vmem:[#allocation12 + $0x410] sm:$0xff]  ;;  %6882 = vmatpush.bf16.msra.mxu2 %v15013_v59 }
 0x7e1   :  { %v15004_v32 = vld [vmem:[#allocation12 + $0x450] sm:$0xff]  ;;  %6855 = vmatpush.bf16.msra.mxu1 %v14996_v24 }
 0x7e2   :  { %6896 = vmatpush.bf16.msra.mxu0 %v15021_v45 }
 0x7e3   :  { %6869 = vmatpush.bf16.msra.mxu3 %v15004_v32 }
 0x7e4   :  { %v16948_v15 = vpop.f32.mrf.mxu3  ;;  %6883 = vmatpush.bf16.msra.mxu2 %v15012_v47  ;;  %v14994_v47 = vld [vmem:[#allocation12 + $0x400] sm:$0xff] }
 0x7e5   :  { %v16950_v9 = vpop.f32.mrf.mxu2  ;;  %6856 = vmatpush.bf16.msra.mxu1 %v14995_v16 }
 0x7e6   :  { %v6076_v27 = vpop.f32.mrf.mxu1  ;;  %6897 = vmatpush.bf16.msra.mxu0 %v15020_v28  ;;  %v15002_v28 = vld [vmem:[#allocation12 + $0x440] sm:$0xff] }
 0x7e7   :  { %v6238_v55 = vpop.f32.mrf.mxu0  ;;  %v6077_v43 = vadd.f32 %v6076_v27, %v16742_v60  ;;  %6870 = vmatpush.bf16.msra.mxu3 %v15003_v51  ;;  %v15010_v60 = vld [vmem:[#allocation12 + $0x480] sm:$0xff]  ;;  %v14873_v27 = vld [vmem:[#allocation12 + $0x38] sm:$0xff]  ;;  %v14880_v51 = vld [vmem:[#allocation12 + $0x70] sm:$0xff] }
 0x7e8   :  { %v6239_v7 = vadd.f32 %v6238_v55, %v16740_v46  ;;  %6884 = vmatpush.bf16.msra.mxu2 %v15011_v57  ;;  %v14881_v46 = vld [vmem:[#allocation12 + $0x78] sm:$0xff] }
 0x7e9   :  { %v14889_v55 = vld [vmem:[#allocation12 + $0xb8] sm:$0xff]  ;;  %6857 = vmatpush.bf16.msra.mxu1 %v14994_v47  ;;  %v14887_v47 = vld [vmem:[#allocation12 + $0xa8] sm:$0xff] }
 0x7ea   :  { %6898 = vmatpush.bf16.msra.mxu0 %v15019_v33  ;;  %v14888_v33 = vld [vmem:[#allocation12 + $0xb0] sm:$0xff] }
 0x7eb   :  { %6871 = vmatpush.bf16.msra.mxu3 %v15002_v28  ;;  %v14895_v28 = vld [vmem:[#allocation12 + $0xe8] sm:$0xff] }
 0x7ec   :  { %v6130_v14 = vpop.f32.mrf.mxu3  ;;  %6885 = vmatpush.bf16.msra.mxu2 %v15010_v60 }
 0x7ed   :  { %v6131_v62 = vadd.f32 %v6130_v14, %v16744_v34  ;;  %v6184_v30 = vpop.f32.mrf.mxu2  ;;  %v15018_v34 = vld [vmem:[#allocation12 + $0x4c0] sm:$0xff]  ;;  %7118 = vmatpush.bf16.msrb.mxu1 %v14873_v27 }
 0x7ee   :  { %v6185_v59 = vadd.f32 %v6184_v30, %v16746_v5  ;;  %v16956_v45 = vpop.f32.mrf.mxu1  ;;  %v14897_v5 = vld [vmem:[#allocation12 + $0xf8] sm:$0xff]  ;;  %6899 = vmatpush.bf16.msra.mxu0 %v15018_v34  ;;  %v14871_v30 = vld [vmem:[#allocation12 + $0x28] sm:$0xff] }
 0x7ef   :  { %v16958_v24 = vpack.c.bf16 %v6131_v62, %v6077_v43  ;;  %v16960_v32 = vpop.f32.mrf.mxu0  ;;  %7132 = vmatpush.bf16.msrb.mxu3 %v14881_v46  ;;  %v14896_v43 = vld [vmem:[#allocation12 + $0xf0] sm:$0xff] }
 0x7f0   :  { %v16962_v22 = vpack.c.bf16 %v6239_v7, %v6185_v59  ;;  %v14872_v7 = vld [vmem:[#allocation12 + $0x30] sm:$0xff]  ;;  %7146 = vmatpush.bf16.msrb.mxu2 %v14889_v55  ;;  %v14879_v59 = vld [vmem:[#allocation12 + $0x68] sm:$0xff]  ;;  %v14870_v55 = vld [vmem:[#allocation12 + $0x20] sm:$0xff] }
 0x7f1   :  { %7119 = vmatpush.bf16.msrb.mxu1 %v14872_v7 }
 0x7f2   :  { %7160 = vmatpush.bf16.msrb.mxu0 %v14897_v5  ;;  %v14878_v5 = vld [vmem:[#allocation12 + $0x60] sm:$0xff] }
 0x7f3   :  { %7133 = vmatpush.bf16.msrb.mxu3 %v14880_v51 }
 0x7f4   :  { %v16964_v14 = vpop.f32.mrf.mxu3  ;;  %7147 = vmatpush.bf16.msrb.mxu2 %v14888_v33  ;;  %v14886_v33 = vld [vmem:[#allocation12 + $0xa0] sm:$0xff] }
 0x7f5   :  { %v16966_v16 = vpop.f32.mrf.mxu2  ;;  %7120 = vmatpush.bf16.msrb.mxu1 %v14871_v30  ;;  %v14877_v30 = vld [vmem:[#allocation12 + $0x58] sm:$0xff] }
 0x7f6   :  { %v6081_v57 = vpop.f32.mrf.mxu1  ;;  %7161 = vmatpush.bf16.msrb.mxu0 %v14896_v43  ;;  %v14894_v43 = vld [vmem:[#allocation12 + $0xe0] sm:$0xff] }
 0x7f7   :  { %v6243_v62 = vpop.f32.mrf.mxu0  ;;  %v6082_v34 = vadd.f32 %v6081_v57, %v16790_v49  ;;  %7134 = vmatpush.bf16.msrb.mxu3 %v14879_v59  ;;  %v14869_v57 = vld [vmem:[#allocation12 + $0x18] sm:$0xff] }
 0x7f8   :  { %v6244_v52 = vadd.f32 %v6243_v62, %v16788_v2  ;;  %7148 = vmatpush.bf16.msrb.mxu2 %v14887_v47  ;;  %v14885_v2 = vld [vmem:[#allocation12 + $0x98] sm:$0xff]  ;;  %v14868_v47 = vld [vmem:[#allocation12 + $0x10] sm:$0xff] }
 0x7f9   :  { %7121 = vmatpush.bf16.msrb.mxu1 %v14870_v55  ;;  %v14875_v55 = vld [vmem:[#allocation12 + $0x48] sm:$0xff] }
 0x7fa   :  { %7162 = vmatpush.bf16.msrb.mxu0 %v14895_v28  ;;  %v14876_v28 = vld [vmem:[#allocation12 + $0x50] sm:$0xff] }
 0x7fb   :  { %7135 = vmatpush.bf16.msrb.mxu3 %v14878_v5  ;;  %v14883_v5 = vld [vmem:[#allocation12 + $0x88] sm:$0xff] }
 0x7fc   :  { %v6135_v60 = vpop.f32.mrf.mxu3  ;;  %7149 = vmatpush.bf16.msrb.mxu2 %v14886_v33 }
 0x7fd   :  { %v6136_v27 = vadd.f32 %v6135_v60, %v16792_v38  ;;  %v6189_v46 = vpop.f32.mrf.mxu2  ;;  %7122 = vmatpush.bf16.msrb.mxu1 %v14869_v57 }
 0x7fe   :  { %v6190_v7 = vadd.f32 %v6189_v46, %v16794_v20  ;;  %v16972_v51 = vpop.f32.mrf.mxu1  ;;  %7163 = vmatpush.bf16.msrb.mxu0 %v14894_v43  ;;  %v14893_v20 = vld [vmem:[#allocation12 + $0xd8] sm:$0xff]  ;;  %v14867_v46 = vld [vmem:[#allocation12 + $0x8] sm:$0xff] }
 0x7ff   :  { %v16974_v36 = vpack.c.bf16 %v6136_v27, %v6082_v34  ;;  %v16976_v49 = vpop.f32.mrf.mxu0  ;;  %7136 = vmatpush.bf16.msrb.mxu3 %v14877_v30  ;;  %v14892_v34 = vld [vmem:[#allocation12 + $0xd0] sm:$0xff] }
 0x800   :  { %v16978_v38 = vpack.c.bf16 %v6244_v52, %v6190_v7  ;;  %7150 = vmatpush.bf16.msrb.mxu2 %v14885_v2  ;;  %v14884_v52 = vld [vmem:[#allocation12 + $0x90] sm:$0xff]  ;;  %v14891_v7 = vld [vmem:[#allocation12 + $0xc8] sm:$0xff]  ;;  %v14866_v2 = vld [vmem:[#allocation12] sm:$0xff] }
 0x801   :  { %17298 = vst [vmem:[#allocation62_spill] sm:$0xff] %v16974_v36  ;;  %7123 = vmatpush.bf16.msrb.mxu1 %v14868_v47 }
 0x802   :  { %17299 = vst [vmem:[#allocation63_spill] sm:$0xff] %v16978_v38  ;;  %7164 = vmatpush.bf16.msrb.mxu0 %v14893_v20  ;;  %v14874_v20 = vld [vmem:[#allocation12 + $0x40] sm:$0xff] }
 0x803   :  { %7137 = vmatpush.bf16.msrb.mxu3 %v14876_v28 }
 0x804   :  { %v16980_v62 = vpop.f32.mrf.mxu3  ;;  %7151 = vmatpush.bf16.msrb.mxu2 %v14884_v52  ;;  %v14882_v52 = vld [vmem:[#allocation12 + $0x80] sm:$0xff] }
 0x805   :  { %v16982_v59 = vpop.f32.mrf.mxu2  ;;  %7124 = vmatpush.bf16.msrb.mxu1 %v14867_v46 }
 0x806   :  { %v6086_v60 = vpop.f32.mrf.mxu1  ;;  %7165 = vmatpush.bf16.msrb.mxu0 %v14892_v34  ;;  %v14890_v34 = vld [vmem:[#allocation12 + $0xc0] sm:$0xff] }
 0x807   :  { %v6248_v27 = vpop.f32.mrf.mxu0  ;;  %v6087_v43 = vadd.f32 %v6086_v60, %v16810_v31  ;;  %7138 = vmatpush.bf16.msrb.mxu3 %v14875_v55 }
 0x808   :  { %v6249_v38 = vadd.f32 %v6248_v27, %v16808_v1  ;;  %7152 = vmatpush.bf16.msrb.mxu2 %v14883_v5 }
 0x809   :  { %7125 = vmatpush.bf16.msrb.mxu1 %v14866_v2 }
 0x80a   :  { %7166 = vmatpush.bf16.msrb.mxu0 %v14891_v7 }
 0x80b   :  { %7139 = vmatpush.bf16.msrb.mxu3 %v14874_v20 }
 0x80c   :  { %v6140_v33 = vpop.f32.mrf.mxu3  ;;  %7153 = vmatpush.bf16.msrb.mxu2 %v14882_v52 }
 0x80d   :  { %v6141_v57 = vadd.f32 %v6140_v33, %v16812_v44  ;;  %v6194_v30 = vpop.f32.mrf.mxu2 }
 0x80e   :  { %v6195_v47 = vadd.f32 %v6194_v30, %v16814_v13  ;;  %v16988_v28 = vpop.f32.mrf.mxu1  ;;  %7167 = vmatpush.bf16.msrb.mxu0 %v14890_v34 }
 0x80f   :  { %v16990_v36 = vpack.c.bf16 %v6141_v57, %v6087_v43  ;;  %v16992_v31 = vpop.f32.mrf.mxu0 }
 0x810   :  { %17301 = vst [vmem:[#allocation65_spill] sm:$0xff] %v16992_v31  ;;  %v16994_v44 = vpack.c.bf16 %v6249_v38, %v6195_v47 }
 0x811   :  { %17300 = vst [vmem:[#allocation64_spill] sm:$0xff] %v16990_v36 }
 0x812   :  { %17302 = vst [vmem:[#allocation66_spill] sm:$0xff] %v16994_v44 }
 0x814   :  { %v16996_v60 = vpop.f32.mrf.mxu3 }
 0x815   :  { %v16998_v1 = vpop.f32.mrf.mxu2 }
 0x816   :  { %v6091_v13 = vpop.f32.mrf.mxu1 }
 0x817   :  { %v6253_v27 = vpop.f32.mrf.mxu0  ;;  %v6092_v38 = vadd.f32 %v6091_v13, %v16830_v58 }
 0x818   :  { %v6254_v57 = vadd.f32 %v6253_v27, %v16828_v19 }
 0x81c   :  { %v6145_v46 = vpop.f32.mrf.mxu3 }
 0x81d   :  { %v6199_v55 = vpop.f32.mrf.mxu2  ;;  %v6146_v5 = vadd.f32 %v6145_v46, %v16836_v63 }
 0x81e   :  { %v6200_v7 = vadd.f32 %v6199_v55, %v16838_v53  ;;  %v6093_v33 = vpop.f32.mrf.mxu1 }
 0x81f   :  { %v6255_v43 = vpop.f32.mrf.mxu0  ;;  %v6294_v2 = vpack.c.bf16 %v6146_v5, %v6092_v38  ;;  %v6094_v20 = vadd.f32 %v6093_v33, %v16842_v56  ;;  %v15033_v33 = vld [vmem:[#allocation12 + $0x538] sm:$0xff] }
 0x820   :  { %v6295_v34 = vpack.c.bf16 %v6254_v57, %v6200_v7  ;;  %v6256_v44 = vadd.f32 %v6255_v43, %v16840_v50  ;;  %v15049_v57 = vld [vmem:[#allocation12 + $0x5b8] sm:$0xff]  ;;  %v15040_v43 = vld [vmem:[#allocation12 + $0x570] sm:$0xff] }
 0x821   :  { %v6642_v55 = vunpack.c.l.b16 %v6294_v2  ;;  %v6643_v36 = vunpack.c.h.b16 %v6294_v2  ;;  %v15057_v50 = vld [vmem:[#allocation12 + $0x5f8] sm:$0xff]  ;;  %v15056_v2 = vld [vmem:[#allocation12 + $0x5f0] sm:$0xff] }
 0x822   :  { %v6644_v31 = vunpack.c.l.b16 %v6295_v34  ;;  %v6645_v19 = vunpack.c.h.b16 %v6295_v34 }
 0x824   :  { %v6147_v30 = vpop.f32.mrf.mxu3 }
 0x825   :  { %v6148_v47 = vadd.f32 %v6147_v30, %v16844_v37  ;;  %v6201_v52 = vpop.f32.mrf.mxu2  ;;  %v15041_v37 = vld [vmem:[#allocation12 + $0x578] sm:$0xff] }
 0x826   :  { %v6202_v63 = vadd.f32 %v6201_v52, %v16846_v41  ;;  %v6128_v41 = vadd.f32 %v16948_v15, %v16736_v12  ;;  %v15031_v12 = vld [vmem:[#allocation12 + $0x528] sm:$0xff] }
 0x827   :  { %v6296_v46 = vpack.c.bf16 %v6148_v47, %v6094_v20  ;;  %v6074_v20 = vadd.f32 %v16940_v26, %v16734_v21  ;;  %v6236_v47 = vadd.f32 %v16944_v61, %v16732_v17  ;;  %v15039_v15 = vld [vmem:[#allocation12 + $0x568] sm:$0xff]  ;;  %v15030_v21 = vld [vmem:[#allocation12 + $0x520] sm:$0xff] }
 0x828   :  { %v6297_v53 = vpack.c.bf16 %v6256_v44, %v6202_v63  ;;  %v15032_v44 = vld [vmem:[#allocation12 + $0x530] sm:$0xff]  ;;  %v15038_v17 = vld [vmem:[#allocation12 + $0x560] sm:$0xff] }
 0x829   :  { %v6646_v58 = vunpack.c.l.b16 %v6296_v46  ;;  %v6647_v13 = vunpack.c.h.b16 %v6296_v46  ;;  %v6280_v52 = vpack.c.bf16 %v6128_v41, %v6074_v20  ;;  %v15044_v20 = vld [vmem:[#allocation12 + $0x590] sm:$0xff] }
 0x82a   :  { %v6648_v27 = vunpack.c.l.b16 %v6297_v53  ;;  %v6649_v5 = vunpack.c.h.b16 %v6297_v53  ;;  %v6096_v53 = vpop.f32.mrf.mxu1 }
 0x82b   :  { %v6650_v38 = vpack.c.b16 %v6646_v58, %v6642_v55  ;;  %v6651_v56 = vpack.c.b16 %v6647_v13, %v6643_v36  ;;  %v6182_v36 = vadd.f32 %v16950_v9, %v16738_v0  ;;  %v15047_v0 = vld [vmem:[#allocation12 + $0x5a8] sm:$0xff]  ;;  %v6914_v55 = vunpack.c.l.b16 %v6280_v52  ;;  %v6258_v13 = vpop.f32.mrf.mxu0 }
 0x82c   :  { %v6652_v30 = vpack.c.b16 %v6648_v27, %v6644_v31  ;;  %v6653_v7 = vpack.c.b16 %v6649_v5, %v6645_v19  ;;  %v15048_v31 = vld [vmem:[#allocation12 + $0x5b0] sm:$0xff]  ;;  %v6150_v63 = vpop.f32.mrf.mxu3  ;;  %v15055_v9 = vld [vmem:[#allocation12 + $0x5e8] sm:$0xff]  ;;  %v6915_v58 = vunpack.c.h.b16 %v6280_v52  ;;  %v15046_v19 = vld [vmem:[#allocation12 + $0x5a0] sm:$0xff]  ;;  %v6910_v5 = vunpack.c.l.b16 %v16942_v25 }
 0x82d   :  { %6858 = vmatmul.bf16.vlgmr.msra.gmra.mxu1 %v6650_v38  ;;  %6872 = vmatmul.bf16.vlgmr.msra.gmra.mxu3 %v6651_v56  ;;  %v6281_v34 = vpack.c.bf16 %v6236_v47, %v6182_v36  ;;  %v6204_v46 = vpop.f32.mrf.mxu2  ;;  %v15054_v27 = vld [vmem:[#allocation12 + $0x5e0] sm:$0xff]  ;;  %v6911_v38 = vunpack.c.h.b16 %v16942_v25  ;;  %v6912_v56 = vunpack.c.l.b16 %v16946_v40  ;;  %v15052_v47 = vld [vmem:[#allocation12 + $0x5d0] sm:$0xff] }
 0x82e   :  { %6886 = vmatmul.bf16.vlgmr.msra.gmra.mxu2 %v6652_v30  ;;  %6900 = vmatmul.bf16.vlgmr.msra.gmra.mxu0 %v6653_v7  ;;  %v15029_v7 = vld [vmem:[#allocation12 + $0x518] sm:$0xff] }
 0x82f   :  { %7451 = vmatpush.bf16.msra.mxu1 %v15033_v33  ;;  %7465 = vmatpush.bf16.msra.mxu3 %v15041_v37  ;;  %v6916_v26 = vunpack.c.l.b16 %v6281_v34  ;;  %v6917_v61 = vunpack.c.h.b16 %v6281_v34  ;;  %v6913_v33 = vunpack.c.h.b16 %v16946_v40  ;;  %v6918_v37 = vpack.c.b16 %v6914_v55, %v6910_v5  ;;  %v15028_v40 = vld [vmem:[#allocation12 + $0x510] sm:$0xff]  ;;  %v15035_v55 = vld [vmem:[#allocation12 + $0x548] sm:$0xff] }
 0x830   :  { %7479 = vmatpush.bf16.msra.mxu2 %v15049_v57  ;;  %7493 = vmatpush.bf16.msra.mxu0 %v15057_v50  ;;  %v6919_v30 = vpack.c.b16 %v6915_v58, %v6911_v38  ;;  %v15037_v57 = vld [vmem:[#allocation12 + $0x558] sm:$0xff]  ;;  %v6151_v34 = vadd.f32 %v6150_v63, %v16856_v23  ;;  %v6205_v58 = vadd.f32 %v6204_v46, %v16858_v8  ;;  %v15042_v8 = vld [vmem:[#allocation12 + $0x580] sm:$0xff] }
 0x831   :  { %v6920_v50 = vpack.c.b16 %v6916_v26, %v6912_v56  ;;  %v6921_v41 = vpack.c.b16 %v6917_v61, %v6913_v33  ;;  %v15051_v26 = vld [vmem:[#allocation12 + $0x5c8] sm:$0xff]  ;;  %v14905_v38 = vld [vmem:[#allocation12 + $0x138] sm:$0xff] }
 0x832   :  { %v14913_v56 = vld [vmem:[#allocation12 + $0x178] sm:$0xff] }
 0x833   :  { %7452 = vmatpush.bf16.msra.mxu1 %v15032_v44  ;;  %7466 = vmatpush.bf16.msra.mxu3 %v15040_v43  ;;  %v15045_v44 = vld [vmem:[#allocation12 + $0x598] sm:$0xff]  ;;  %v6260_v52 = vpop.f32.mrf.mxu0 }
 0x834   :  { %7480 = vmatpush.bf16.msra.mxu2 %v15048_v31  ;;  %7494 = vmatpush.bf16.msra.mxu0 %v15056_v2  ;;  %v15053_v43 = vld [vmem:[#allocation12 + $0x5d8] sm:$0xff]  ;;  %v6152_v36 = vpop.f32.mrf.mxu3  ;;  %v15036_v31 = vld [vmem:[#allocation12 + $0x550] sm:$0xff]  ;;  %v6098_v2 = vpop.f32.mrf.mxu1 }
 0x835   :  { %v6206_v25 = vpop.f32.mrf.mxu2 }
 0x837   :  { %7453 = vmatpush.bf16.msra.mxu1 %v15031_v12  ;;  %7467 = vmatpush.bf16.msra.mxu3 %v15039_v15  ;;  %v6153_v12 = vadd.f32 %v6152_v36, %v16864_v39  ;;  %v6207_v15 = vadd.f32 %v6206_v25, %v16868_v4  ;;  %v6097_v39 = vadd.f32 %v6096_v53, %v16850_v3  ;;  %v14921_v53 = vld [vmem:[#allocation12 + $0x1b8] sm:$0xff]  ;;  %v14920_v25 = vld [vmem:[#allocation12 + $0x1b0] sm:$0xff] }
 0x838   :  { %7481 = vmatpush.bf16.msra.mxu2 %v15047_v0  ;;  %7495 = vmatpush.bf16.msra.mxu0 %v15055_v9  ;;  %v6099_v0 = vadd.f32 %v6098_v2, %v16862_v6  ;;  %v15027_v9 = vld [vmem:[#allocation12 + $0x508] sm:$0xff]  ;;  %v6259_v4 = vadd.f32 %v6258_v13, %v16848_v11  ;;  %v15026_v6 = vld [vmem:[#allocation12 + $0x500] sm:$0xff] }
 0x839   :  { %v6298_v63 = vpack.c.bf16 %v6151_v34, %v6097_v39  ;;  %v14911_v2 = vld [vmem:[#allocation12 + $0x168] sm:$0xff]  ;;  %v14926_v34 = vld [vmem:[#allocation12 + $0x1e0] sm:$0xff]  ;;  %v14924_v39 = vld [vmem:[#allocation12 + $0x1d0] sm:$0xff] }
 0x83a   :  { %v6300_v61 = vpack.c.bf16 %v6153_v12, %v6099_v0  ;;  %v14910_v12 = vld [vmem:[#allocation12 + $0x160] sm:$0xff]  ;;  %v14901_v0 = vld [vmem:[#allocation12 + $0x118] sm:$0xff] }
 0x83b   :  { %7454 = vmatpush.bf16.msra.mxu1 %v15030_v21  ;;  %7468 = vmatpush.bf16.msra.mxu3 %v15038_v17  ;;  %v6261_v21 = vadd.f32 %v6260_v52, %v16860_v29  ;;  %v15043_v17 = vld [vmem:[#allocation12 + $0x588] sm:$0xff]  ;;  %v15050_v29 = vld [vmem:[#allocation12 + $0x5c0] sm:$0xff]  ;;  %v7243_v11 = vunpack.c.l.b16 %v6298_v63  ;;  %v7244_v13 = vunpack.c.h.b16 %v6298_v63 }
 0x83c   :  { %7482 = vmatpush.bf16.msra.mxu2 %v15046_v19  ;;  %7496 = vmatpush.bf16.msra.mxu0 %v15054_v27  ;;  %v15034_v19 = vld [vmem:[#allocation12 + $0x540] sm:$0xff]  ;;  %v6299_v27 = vpack.c.bf16 %v6259_v4, %v6205_v58  ;;  %v7247_v46 = vunpack.c.l.b16 %v6300_v61  ;;  %v7248_v5 = vunpack.c.h.b16 %v6300_v61  ;;  %v14925_v58 = vld [vmem:[#allocation12 + $0x1d8] sm:$0xff]  ;;  %v6133_v61 = vadd.f32 %v16964_v14, %v16784_v35  ;;  %v14899_v63 = vld [vmem:[#allocation12 + $0x108] sm:$0xff] }
 0x83d   :  { %7126 = vmatmul.bf16.vlgmr.msrb.gmra.mxu1 %v6918_v37  ;;  %7140 = vmatmul.bf16.vlgmr.msrb.gmra.mxu3 %v6919_v30  ;;  %v6301_v23 = vpack.c.bf16 %v6261_v21, %v6207_v15  ;;  %v14929_v37 = vld [vmem:[#allocation12 + $0x1f8] sm:$0xff]  ;;  %v14902_v52 = vld [vmem:[#allocation12 + $0x120] sm:$0xff]  ;;  %v14900_v21 = vld [vmem:[#allocation12 + $0x110] sm:$0xff]  ;;  %v6187_v4 = vadd.f32 %v16966_v16, %v16786_v10 }
 0x83e   :  { %7154 = vmatmul.bf16.vlgmr.msrb.gmra.mxu2 %v6920_v50  ;;  %7168 = vmatmul.bf16.vlgmr.msrb.gmra.mxu0 %v6921_v41  ;;  %v7245_v30 = vunpack.c.l.b16 %v6299_v27  ;;  %v7252_v50 = vpack.c.b16 %v7248_v5, %v7244_v13  ;;  %v14904_v41 = vld [vmem:[#allocation12 + $0x130] sm:$0xff]  ;;  %v14918_v15 = vld [vmem:[#allocation12 + $0x1a0] sm:$0xff]  ;;  %v15065_v5 = vld [vmem:[#allocation12 + $0x638] sm:$0xff] }
 0x83f   :  { %7455 = vmatpush.bf16.msra.mxu1 %v15029_v7  ;;  %7469 = vmatpush.bf16.msra.mxu3 %v15037_v57  ;;  %v7249_v33 = vunpack.c.l.b16 %v6301_v23  ;;  %v7250_v3 = vunpack.c.h.b16 %v6301_v23  ;;  %v7246_v7 = vunpack.c.h.b16 %v6299_v27  ;;  %v7251_v57 = vpack.c.b16 %v7247_v46, %v7243_v11  ;;  %v14915_v27 = vld [vmem:[#allocation12 + $0x188] sm:$0xff]  ;;  %v14898_v35 = vld [vmem:[#allocation12 + $0x100] sm:$0xff] }
 0x840   :  { %7483 = vmatpush.bf16.msra.mxu2 %v15045_v44  ;;  %7497 = vmatpush.bf16.msra.mxu0 %v15053_v43  ;;  %v14912_v44 = vld [vmem:[#allocation12 + $0x170] sm:$0xff]  ;;  %v6079_v23 = vadd.f32 %v16956_v45, %v16766_v54  ;;  %v14906_v10 = vld [vmem:[#allocation12 + $0x140] sm:$0xff]  ;;  %v7514_v11 = vunpack.c.h.b16 %v16962_v22 }
 0x841   :  { %v7253_v43 = vpack.c.b16 %v7249_v33, %v7245_v30  ;;  %v7254_v36 = vpack.c.b16 %v7250_v3, %v7246_v7  ;;  %v14914_v54 = vld [vmem:[#allocation12 + $0x180] sm:$0xff]  ;;  %v15089_v33 = vld [vmem:[#allocation12 + $0x6f8] sm:$0xff]  ;;  %v7511_v3 = vunpack.c.l.b16 %v16958_v24  ;;  %v15064_v7 = vld [vmem:[#allocation12 + $0x630] sm:$0xff] }
 0x842   :  { %v14922_v45 = vld [vmem:[#allocation12 + $0x1c0] sm:$0xff] }
 0x843   :  { %7456 = vmatpush.bf16.msra.mxu1 %v15028_v40  ;;  %7470 = vmatpush.bf16.msra.mxu3 %v15036_v31  ;;  %v14928_v40 = vld [vmem:[#allocation12 + $0x1f0] sm:$0xff]  ;;  %v14903_v31 = vld [vmem:[#allocation12 + $0x128] sm:$0xff] }
 0x844   :  { %7484 = vmatpush.bf16.msra.mxu2 %v15044_v20  ;;  %7498 = vmatpush.bf16.msra.mxu0 %v15052_v47  ;;  %v14919_v20 = vld [vmem:[#allocation12 + $0x1a8] sm:$0xff] }
 0x845   :  { %v14927_v47 = vld [vmem:[#allocation12 + $0x1e8] sm:$0xff] }
 0x847   :  { %7457 = vmatpush.bf16.msra.mxu1 %v15027_v9  ;;  %7471 = vmatpush.bf16.msra.mxu3 %v15035_v55  ;;  %v14909_v9 = vld [vmem:[#allocation12 + $0x158] sm:$0xff] }
 0x848   :  { %7485 = vmatpush.bf16.msra.mxu2 %v15043_v17  ;;  %7499 = vmatpush.bf16.msra.mxu0 %v15051_v26  ;;  %v14917_v55 = vld [vmem:[#allocation12 + $0x198] sm:$0xff]  ;;  %v14908_v17 = vld [vmem:[#allocation12 + $0x150] sm:$0xff] }
 0x849   :  { %v14916_v26 = vld [vmem:[#allocation12 + $0x190] sm:$0xff] }
 0x84b   :  { %7458 = vmatpush.bf16.msra.mxu1 %v15026_v6  ;;  %7472 = vmatpush.bf16.msra.mxu3 %v15034_v19  ;;  %v14907_v6 = vld [vmem:[#allocation12 + $0x148] sm:$0xff]  ;;  %v6241_v19 = vadd.f32 %v16960_v32, %v16756_v42  ;;  %v15081_v32 = vld [vmem:[#allocation12 + $0x6b8] sm:$0xff] }
 0x84c   :  { %7486 = vmatpush.bf16.msra.mxu2 %v15042_v8  ;;  %7500 = vmatpush.bf16.msra.mxu0 %v15050_v29  ;;  %v14923_v8 = vld [vmem:[#allocation12 + $0x1c8] sm:$0xff]  ;;  %v6284_v29 = vpack.c.bf16 %v6133_v61, %v6079_v23  ;;  %v15084_v23 = vld [vmem:[#allocation12 + $0x6d0] sm:$0xff] }
 0x84d   :  { %v6285_v46 = vpack.c.bf16 %v6241_v19, %v6187_v4  ;;  %v15076_v4 = vld [vmem:[#allocation12 + $0x690] sm:$0xff] }
 0x84e   :  { %7459 = vmatmul.bf16.vlgmr.msra.gmra.mxu1 %v7251_v57  ;;  %7473 = vmatmul.bf16.vlgmr.msra.gmra.mxu3 %v7252_v50  ;;  %v7515_v14 = vunpack.c.l.b16 %v6284_v29  ;;  %v7516_v16 = vunpack.c.h.b16 %v6284_v29  ;;  %v15072_v57 = vld [vmem:[#allocation12 + $0x670] sm:$0xff] }
 0x84f   :  { %7719 = vmatpush.bf16.msrb.mxu1 %v14905_v38  ;;  %7733 = vmatpush.bf16.msrb.mxu3 %v14913_v56  ;;  %v15073_v38 = vld [vmem:[#allocation12 + $0x678] sm:$0xff]  ;;  %v7517_v56 = vunpack.c.l.b16 %v6285_v46  ;;  %v7518_v42 = vunpack.c.h.b16 %v6285_v46  ;;  %v15059_v46 = vld [vmem:[#allocation12 + $0x608] sm:$0xff] }
 0x850   :  { %7747 = vmatpush.bf16.msrb.mxu2 %v14921_v53  ;;  %7761 = vmatpush.bf16.msrb.mxu0 %v14929_v37  ;;  %v7512_v53 = vunpack.c.h.b16 %v16958_v24  ;;  %v7513_v37 = vunpack.c.l.b16 %v16962_v22  ;;  %v7519_v13 = vpack.c.b16 %v7515_v14, %v7511_v3  ;;  %v15088_v24 = vld [vmem:[#allocation12 + $0x6f0] sm:$0xff]  ;;  %v15063_v22 = vld [vmem:[#allocation12 + $0x628] sm:$0xff]  ;;  %v15058_v3 = vld [vmem:[#allocation12 + $0x600] sm:$0xff] }
 0x851   :  { %7487 = vmatmul.bf16.vlgmr.msra.gmra.mxu2 %v7253_v43  ;;  %7501 = vmatmul.bf16.vlgmr.msra.gmra.mxu0 %v7254_v36  ;;  %v15071_v43 = vld [vmem:[#allocation12 + $0x668] sm:$0xff]  ;;  %v6101_v36 = vpop.f32.mrf.mxu1  ;;  %v17303_v19 = vld [vmem:[#allocation46_spill] sm:$0xff] }
 0x852   :  { %v7520_v30 = vpack.c.b16 %v7516_v16, %v7512_v53  ;;  %v7521_v50 = vpack.c.b16 %v7517_v56, %v7513_v37  ;;  %v15075_v16 = vld [vmem:[#allocation12 + $0x688] sm:$0xff]  ;;  %v15066_v53 = vld [vmem:[#allocation12 + $0x640] sm:$0xff] }
 0x853   :  { %7720 = vmatpush.bf16.msrb.mxu1 %v14904_v41  ;;  %7734 = vmatpush.bf16.msrb.mxu3 %v14912_v44  ;;  %v7522_v41 = vpack.c.b16 %v7518_v42, %v7514_v11  ;;  %v15080_v44 = vld [vmem:[#allocation12 + $0x6b0] sm:$0xff] }
 0x854   :  { %7748 = vmatpush.bf16.msrb.mxu2 %v14920_v25  ;;  %7762 = vmatpush.bf16.msrb.mxu0 %v14928_v40  ;;  %v6155_v25 = vpop.f32.mrf.mxu3  ;;  %v15079_v40 = vld [vmem:[#allocation12 + $0x6a8] sm:$0xff] }
 0x857   :  { %7721 = vmatpush.bf16.msrb.mxu1 %v14903_v31  ;;  %7735 = vmatpush.bf16.msrb.mxu3 %v14911_v2  ;;  %v15087_v31 = vld [vmem:[#allocation12 + $0x6e8] sm:$0xff]  ;;  %v6209_v2 = vpop.f32.mrf.mxu2 }
 0x858   :  { %7749 = vmatpush.bf16.msrb.mxu2 %v14919_v20  ;;  %7763 = vmatpush.bf16.msrb.mxu0 %v14927_v47  ;;  %v6263_v20 = vpop.f32.mrf.mxu0  ;;  %v15062_v47 = vld [vmem:[#allocation12 + $0x620] sm:$0xff] }
 0x85b   :  { %7722 = vmatpush.bf16.msrb.mxu1 %v14902_v52  ;;  %7736 = vmatpush.bf16.msrb.mxu3 %v14910_v12  ;;  %v15070_v52 = vld [vmem:[#allocation12 + $0x660] sm:$0xff] }
 0x85c   :  { %7750 = vmatpush.bf16.msrb.mxu2 %v14918_v15  ;;  %7764 = vmatpush.bf16.msrb.mxu0 %v14926_v34  ;;  %v15078_v12 = vld [vmem:[#allocation12 + $0x6a0] sm:$0xff]  ;;  %v15061_v34 = vld [vmem:[#allocation12 + $0x618] sm:$0xff] }
 0x85d   :  { %v15086_v15 = vld [vmem:[#allocation12 + $0x6e0] sm:$0xff] }
 0x85f   :  { %7723 = vmatpush.bf16.msrb.mxu1 %v14901_v0  ;;  %7737 = vmatpush.bf16.msrb.mxu3 %v14909_v9  ;;  %v15069_v0 = vld [vmem:[#allocation12 + $0x658] sm:$0xff] }
 0x860   :  { %7751 = vmatpush.bf16.msrb.mxu2 %v14917_v55  ;;  %7765 = vmatpush.bf16.msrb.mxu0 %v14925_v58  ;;  %v15077_v9 = vld [vmem:[#allocation12 + $0x698] sm:$0xff]  ;;  %v6103_v58 = vpop.f32.mrf.mxu1  ;;  %v6265_v61 = vpop.f32.mrf.mxu0 }
 0x861   :  { %v15085_v55 = vld [vmem:[#allocation12 + $0x6d8] sm:$0xff] }
 0x863   :  { %7724 = vmatpush.bf16.msrb.mxu1 %v14900_v21  ;;  %7738 = vmatpush.bf16.msrb.mxu3 %v14908_v17  ;;  %v6157_v21 = vpop.f32.mrf.mxu3  ;;  %v6211_v17 = vpop.f32.mrf.mxu2 }
 0x864   :  { %7752 = vmatpush.bf16.msrb.mxu2 %v14916_v26  ;;  %7766 = vmatpush.bf16.msrb.mxu0 %v14924_v39  ;;  %v15060_v26 = vld [vmem:[#allocation12 + $0x610] sm:$0xff] }
 0x865   :  { %v15068_v39 = vld [vmem:[#allocation12 + $0x650] sm:$0xff] }
 0x867   :  { %7725 = vmatpush.bf16.msrb.mxu1 %v14899_v63  ;;  %7739 = vmatpush.bf16.msrb.mxu3 %v14907_v6  ;;  %v6158_v63 = vadd.f32 %v6157_v21, %v16888_v48  ;;  %v6212_v6 = vadd.f32 %v6211_v17, %v16890_v18  ;;  %v17308_v18 = vld [vmem:[#allocation42_spill] sm:$0xff]  ;;  %v14935_v21 = vld [vmem:[#allocation12 + $0x228] sm:$0xff] }
 0x868   :  { %7753 = vmatpush.bf16.msrb.mxu2 %v14915_v27  ;;  %7767 = vmatpush.bf16.msrb.mxu0 %v14923_v8  ;;  %v6156_v27 = vadd.f32 %v6155_v25, %v17303_v19  ;;  %v17304_v8 = vld [vmem:[#allocation45_spill] sm:$0xff]  ;;  %v6264_v42 = vadd.f32 %v6263_v20, %v17308_v18  ;;  %v17048_v11 = vpop.f32.mrf.mxu1  ;;  %v14958_v19 = vld [vmem:[#allocation12 + $0x2e0] sm:$0xff] }
 0x869   :  { %v6104_v29 = vadd.f32 %v6103_v58, %v17304_v8  ;;  %v14943_v17 = vld [vmem:[#allocation12 + $0x268] sm:$0xff]  ;;  %v17310_v18 = vld [vmem:[#allocation39_spill] sm:$0xff] }
 0x86b   :  { %7726 = vmatpush.bf16.msrb.mxu1 %v14898_v35  ;;  %7740 = vmatpush.bf16.msrb.mxu3 %v14906_v10  ;;  %v15067_v35 = vld [vmem:[#allocation12 + $0x648] sm:$0xff]  ;;  %v6304_v56 = vpack.c.bf16 %v6158_v63, %v6104_v29  ;;  %v17054_v58 = vpop.f32.mrf.mxu2  ;;  %v14942_v63 = vld [vmem:[#allocation12 + $0x260] sm:$0xff]  ;;  %v14933_v29 = vld [vmem:[#allocation12 + $0x218] sm:$0xff] }
 0x86c   :  { %7754 = vmatpush.bf16.msrb.mxu2 %v14914_v54  ;;  %7768 = vmatpush.bf16.msrb.mxu0 %v14922_v45  ;;  %v17305_v10 = vld [vmem:[#allocation49_spill] sm:$0xff]  ;;  %v17306_v45 = vld [vmem:[#allocation43_spill] sm:$0xff] }
 0x86d   :  { %v6210_v54 = vadd.f32 %v6209_v2, %v17305_v10  ;;  %v6266_v14 = vadd.f32 %v6265_v61, %v17306_v45  ;;  %v14959_v61 = vld [vmem:[#allocation12 + $0x2e8] sm:$0xff]  ;;  %v14957_v10 = vld [vmem:[#allocation12 + $0x2d8] sm:$0xff]  ;;  %v14932_v45 = vld [vmem:[#allocation12 + $0x210] sm:$0xff] }
 0x86e   :  { %7727 = vmatmul.bf16.vlgmr.msrb.gmra.mxu1 %v7519_v13  ;;  %7741 = vmatmul.bf16.vlgmr.msrb.gmra.mxu3 %v7520_v30  ;;  %v15074_v13 = vld [vmem:[#allocation12 + $0x680] sm:$0xff] }
 0x86f   :  { %8052 = vmatpush.bf16.msra.mxu1 %v15065_v5  ;;  %8066 = vmatpush.bf16.msra.mxu3 %v15073_v38  ;;  %v15083_v5 = vld [vmem:[#allocation12 + $0x6c8] sm:$0xff]  ;;  %v6303_v37 = vpack.c.bf16 %v6264_v42, %v6210_v54  ;;  %v15082_v30 = vld [vmem:[#allocation12 + $0x6c0] sm:$0xff]  ;;  %v6192_v42 = vadd.f32 %v16982_v59, %v17310_v18 }
 0x870   :  { %8080 = vmatpush.bf16.msra.mxu2 %v15081_v32  ;;  %8094 = vmatpush.bf16.msra.mxu0 %v15089_v33  ;;  %v17307_v38 = vld [vmem:[#allocation40_spill] sm:$0xff]  ;;  %v6305_v32 = vpack.c.bf16 %v6266_v14, %v6212_v6  ;;  %v14940_v14 = vld [vmem:[#allocation12 + $0x250] sm:$0xff] }
 0x871   :  { %7755 = vmatmul.bf16.vlgmr.msrb.gmra.mxu2 %v7521_v50  ;;  %7769 = vmatmul.bf16.vlgmr.msrb.gmra.mxu0 %v7522_v41  ;;  %v6102_v48 = vadd.f32 %v6101_v36, %v17307_v38  ;;  %v14937_v50 = vld [vmem:[#allocation12 + $0x238] sm:$0xff]  ;;  %v7847_v2 = vunpack.c.h.b16 %v6303_v37  ;;  %v14950_v6 = vld [vmem:[#allocation12 + $0x2a0] sm:$0xff]  ;;  %v14956_v38 = vld [vmem:[#allocation12 + $0x2d0] sm:$0xff] }
 0x872   :  { %v14945_v41 = vld [vmem:[#allocation12 + $0x278] sm:$0xff]  ;;  %v15102_v18 = vld [vmem:[#allocation12 + $0x760] sm:$0xff] }
 0x873   :  { %8053 = vmatpush.bf16.msra.mxu1 %v15064_v7  ;;  %8067 = vmatpush.bf16.msra.mxu3 %v15072_v57  ;;  %v6302_v33 = vpack.c.bf16 %v6156_v27, %v6102_v48  ;;  %v7848_v7 = vunpack.c.l.b16 %v6304_v56  ;;  %v7849_v57 = vunpack.c.h.b16 %v6304_v56  ;;  %v14961_v36 = vld [vmem:[#allocation12 + $0x2f8] sm:$0xff]  ;;  %v17062_v8 = vpop.f32.mrf.mxu2  ;;  %v17309_v48 = vld [vmem:[#allocation37_spill] sm:$0xff] }
 0x874   :  { %8081 = vmatpush.bf16.msra.mxu2 %v15080_v44  ;;  %8095 = vmatpush.bf16.msra.mxu0 %v15088_v24  ;;  %v7850_v44 = vunpack.c.l.b16 %v6305_v32  ;;  %v7851_v24 = vunpack.c.h.b16 %v6305_v32  ;;  %v6138_v56 = vadd.f32 %v16980_v62, %v17309_v48  ;;  %v17311_v32 = vld [vmem:[#allocation33_spill] sm:$0xff] }
 0x875   :  { %v7844_v25 = vunpack.c.l.b16 %v6302_v33 }
 0x877   :  { %8054 = vmatpush.bf16.msra.mxu1 %v15063_v22  ;;  %8068 = vmatpush.bf16.msra.mxu3 %v15071_v43  ;;  %v17050_v22 = vpop.f32.mrf.mxu0  ;;  %v14953_v43 = vld [vmem:[#allocation12 + $0x2b8] sm:$0xff]  ;;  %v7852_v20 = vpack.c.b16 %v7848_v7, %v7844_v25  ;;  %v14947_v7 = vld [vmem:[#allocation12 + $0x288] sm:$0xff] }
 0x878   :  { %8082 = vmatpush.bf16.msra.mxu2 %v15079_v40  ;;  %8096 = vmatpush.bf16.msra.mxu0 %v15087_v31  ;;  %v7845_v40 = vunpack.c.h.b16 %v6302_v33  ;;  %v7846_v31 = vunpack.c.l.b16 %v6303_v37  ;;  %v6084_v33 = vadd.f32 %v16972_v51, %v17311_v32  ;;  %v17312_v37 = vld [vmem:[#allocation36_spill] sm:$0xff]  ;;  %v15097_v25 = vld [vmem:[#allocation12 + $0x738] sm:$0xff] }
 0x879   :  { %v14930_v51 = vld [vmem:[#allocation12 + $0x200] sm:$0xff] }
 0x87a   :  { %v6288_v62 = vpack.c.bf16 %v6138_v56, %v6084_v33  ;;  %v15094_v56 = vld [vmem:[#allocation12 + $0x720] sm:$0xff] }
 0x87b   :  { %8055 = vmatpush.bf16.msra.mxu1 %v15062_v47  ;;  %8069 = vmatpush.bf16.msra.mxu3 %v15070_v52  ;;  %v7853_v47 = vpack.c.b16 %v7849_v57, %v7845_v40  ;;  %v14936_v52 = vld [vmem:[#allocation12 + $0x230] sm:$0xff]  ;;  %v14955_v57 = vld [vmem:[#allocation12 + $0x2c8] sm:$0xff]  ;;  %v15105_v40 = vld [vmem:[#allocation12 + $0x778] sm:$0xff] }
 0x87c   :  { %8083 = vmatpush.bf16.msra.mxu2 %v15078_v12  ;;  %8097 = vmatpush.bf16.msra.mxu0 %v15086_v15  ;;  %v14944_v12 = vld [vmem:[#allocation12 + $0x270] sm:$0xff]  ;;  %v7854_v15 = vpack.c.b16 %v7850_v44, %v7846_v31  ;;  %v15118_v32 = vld [vmem:[#allocation12 + $0x7e0] sm:$0xff] }
 0x87f   :  { %8056 = vmatpush.bf16.msra.mxu1 %v15061_v34  ;;  %8070 = vmatpush.bf16.msra.mxu3 %v15069_v0  ;;  %v7855_v34 = vpack.c.b16 %v7851_v24, %v7847_v2  ;;  %v17052_v0 = vpop.f32.mrf.mxu3  ;;  %v14946_v24 = vld [vmem:[#allocation12 + $0x280] sm:$0xff] }
 0x880   :  { %8084 = vmatpush.bf16.msra.mxu2 %v15077_v9  ;;  %8098 = vmatpush.bf16.msra.mxu0 %v15085_v55  ;;  %v14952_v9 = vld [vmem:[#allocation12 + $0x2b0] sm:$0xff] }
 0x881   :  { %v14960_v55 = vld [vmem:[#allocation12 + $0x2f0] sm:$0xff] }
 0x883   :  { %8057 = vmatpush.bf16.msra.mxu1 %v15060_v26  ;;  %8071 = vmatpush.bf16.msra.mxu3 %v15068_v39  ;;  %v17056_v26 = vpop.f32.mrf.mxu1  ;;  %v14951_v39 = vld [vmem:[#allocation12 + $0x2a8] sm:$0xff] }
 0x884   :  { %8085 = vmatpush.bf16.msra.mxu2 %v15076_v4  ;;  %8099 = vmatpush.bf16.msra.mxu0 %v15084_v23  ;;  %v17058_v4 = vpop.f32.mrf.mxu0  ;;  %v14934_v23 = vld [vmem:[#allocation12 + $0x220] sm:$0xff] }
 0x887   :  { %8058 = vmatpush.bf16.msra.mxu1 %v15059_v46  ;;  %8072 = vmatpush.bf16.msra.mxu3 %v15067_v35  ;;  %v17060_v27 = vpop.f32.mrf.mxu3  ;;  %v14941_v46 = vld [vmem:[#allocation12 + $0x258] sm:$0xff] }
 0x888   :  { %8086 = vmatpush.bf16.msra.mxu2 %v15075_v16  ;;  %8100 = vmatpush.bf16.msra.mxu0 %v15083_v5  ;;  %v14949_v35 = vld [vmem:[#allocation12 + $0x298] sm:$0xff]  ;;  %v14948_v5 = vld [vmem:[#allocation12 + $0x290] sm:$0xff] }
 0x88b   :  { %8059 = vmatpush.bf16.msra.mxu1 %v15058_v3  ;;  %8073 = vmatpush.bf16.msra.mxu3 %v15066_v53  ;;  %v17064_v54 = vpop.f32.mrf.mxu1  ;;  %v14931_v3 = vld [vmem:[#allocation12 + $0x208] sm:$0xff] }
 0x88c   :  { %8087 = vmatpush.bf16.msra.mxu2 %v15074_v13  ;;  %8101 = vmatpush.bf16.msra.mxu0 %v15082_v30  ;;  %v17066_v16 = vpop.f32.mrf.mxu0  ;;  %v14939_v53 = vld [vmem:[#allocation12 + $0x248] sm:$0xff]  ;;  %v6246_v13 = vadd.f32 %v16976_v49, %v17312_v37  ;;  %v14954_v49 = vld [vmem:[#allocation12 + $0x2c0] sm:$0xff] }
 0x88e   :  { %8060 = vmatmul.bf16.vlgmr.msra.gmra.mxu1 %v7852_v20  ;;  %8074 = vmatmul.bf16.vlgmr.msra.gmra.mxu3 %v7853_v47  ;;  %v6289_v59 = vpack.c.bf16 %v6246_v13, %v6192_v42  ;;  %v15113_v47 = vld [vmem:[#allocation12 + $0x7b8] sm:$0xff]  ;;  %v15110_v42 = vld [vmem:[#allocation12 + $0x7a0] sm:$0xff] }
 0x88f   :  { %8320 = vmatpush.bf16.msrb.mxu1 %v14937_v50  ;;  %8334 = vmatpush.bf16.msrb.mxu3 %v14945_v41  ;;  %v17076_v30 = vpop.f32.mrf.mxu3  ;;  %v17078_v50 = vpop.f32.mrf.mxu2  ;;  %v14938_v41 = vld [vmem:[#allocation12 + $0x240] sm:$0xff] }
 0x890   :  { %8348 = vmatpush.bf16.msrb.mxu2 %v14953_v43  ;;  %8362 = vmatpush.bf16.msrb.mxu0 %v14961_v36  ;;  %v8116_v43 = vunpack.c.l.b16 %v6288_v62  ;;  %v8117_v36 = vunpack.c.h.b16 %v6288_v62  ;;  %v8118_v31 = vunpack.c.l.b16 %v6289_v59  ;;  %v8119_v2 = vunpack.c.h.b16 %v6289_v59  ;;  %v15109_v62 = vld [vmem:[#allocation12 + $0x798] sm:$0xff] }
 0x891   :  { %8088 = vmatmul.bf16.vlgmr.msra.gmra.mxu2 %v7854_v15  ;;  %8102 = vmatmul.bf16.vlgmr.msra.gmra.mxu0 %v7855_v34  ;;  %v15117_v59 = vld [vmem:[#allocation12 + $0x7d8] sm:$0xff] }
 0x893   :  { %8321 = vmatpush.bf16.msrb.mxu1 %v14936_v52  ;;  %8335 = vmatpush.bf16.msrb.mxu3 %v14944_v12  ;;  %v17080_v44 = vpop.f32.mrf.mxu1  ;;  %v15121_v52 = vld [vmem:[#allocation12 + $0x7f8] sm:$0xff] }
 0x894   :  { %8349 = vmatpush.bf16.msrb.mxu2 %v14952_v9  ;;  %8363 = vmatpush.bf16.msrb.mxu0 %v14960_v55  ;;  %v17082_v20 = vpop.f32.mrf.mxu0  ;;  %v17313_v12 = vld [vmem:[#allocation62_spill] sm:$0xff]  ;;  %v17314_v9 = vld [vmem:[#allocation63_spill] sm:$0xff] }
 0x895   :  { %v8112_v15 = vunpack.c.l.b16 %v17313_v12  ;;  %v8113_v34 = vunpack.c.h.b16 %v17313_v12  ;;  %v8114_v55 = vunpack.c.l.b16 %v17314_v9 }
 0x897   :  { %8322 = vmatpush.bf16.msrb.mxu1 %v14935_v21  ;;  %8336 = vmatpush.bf16.msrb.mxu3 %v14943_v17  ;;  %v8115_v21 = vunpack.c.h.b16 %v17314_v9  ;;  %v8120_v17 = vpack.c.b16 %v8116_v43, %v8112_v15  ;;  %v15108_v43 = vld [vmem:[#allocation12 + $0x790] sm:$0xff]  ;;  %v17317_v15 = vld [vmem:[#allocation59_spill] sm:$0xff] }
 0x898   :  { %8350 = vmatpush.bf16.msrb.mxu2 %v14951_v39  ;;  %8364 = vmatpush.bf16.msrb.mxu0 %v14959_v61  ;;  %v8121_v39 = vpack.c.b16 %v8117_v36, %v8113_v34  ;;  %v15096_v61 = vld [vmem:[#allocation12 + $0x730] sm:$0xff]  ;;  %v6217_v34 = vadd.f32 %v17062_v8, %v17317_v15  ;;  %v15115_v8 = vld [vmem:[#allocation12 + $0x7c8] sm:$0xff] }
 0x899   :  { %v15116_v36 = vld [vmem:[#allocation12 + $0x7d0] sm:$0xff] }
 0x89a   :  { %v14984_v15 = vld [vmem:[#allocation12 + $0x3b0] sm:$0xff] }
 0x89b   :  { %8323 = vmatpush.bf16.msrb.mxu1 %v14934_v23  ;;  %8337 = vmatpush.bf16.msrb.mxu3 %v14942_v63  ;;  %v15104_v23 = vld [vmem:[#allocation12 + $0x770] sm:$0xff]  ;;  %v8122_v63 = vpack.c.b16 %v8118_v31, %v8114_v55  ;;  %v17318_v55 = vld [vmem:[#allocation51_spill] sm:$0xff] }
 0x89c   :  { %8351 = vmatpush.bf16.msrb.mxu2 %v14950_v6  ;;  %8365 = vmatpush.bf16.msrb.mxu0 %v14958_v19  ;;  %v8123_v6 = vpack.c.b16 %v8119_v2, %v8115_v21  ;;  %v17088_v19 = vpop.f32.mrf.mxu3  ;;  %v6109_v21 = vadd.f32 %v17056_v26, %v17318_v55 }
 0x89f   :  { %8324 = vmatpush.bf16.msrb.mxu1 %v14933_v29  ;;  %8338 = vmatpush.bf16.msrb.mxu3 %v14941_v46  ;;  %v15112_v29 = vld [vmem:[#allocation12 + $0x7b0] sm:$0xff] }
 0x8a0   :  { %8352 = vmatpush.bf16.msrb.mxu2 %v14949_v35  ;;  %8366 = vmatpush.bf16.msrb.mxu0 %v14957_v10  ;;  %v15120_v46 = vld [vmem:[#allocation12 + $0x7f0] sm:$0xff]  ;;  %v17090_v35 = vpop.f32.mrf.mxu2 }
 0x8a3   :  { %8325 = vmatpush.bf16.msrb.mxu1 %v14932_v45  ;;  %8339 = vmatpush.bf16.msrb.mxu3 %v14940_v14  ;;  %v15095_v45 = vld [vmem:[#allocation12 + $0x728] sm:$0xff] }
 0x8a4   :  { %8353 = vmatpush.bf16.msrb.mxu2 %v14948_v5  ;;  %8367 = vmatpush.bf16.msrb.mxu0 %v14956_v38  ;;  %v15103_v14 = vld [vmem:[#allocation12 + $0x768] sm:$0xff] }
 0x8a5   :  { %v15111_v5 = vld [vmem:[#allocation12 + $0x7a8] sm:$0xff] }
 0x8a6   :  { %v15119_v38 = vld [vmem:[#allocation12 + $0x7e8] sm:$0xff] }
 0x8a7   :  { %8326 = vmatpush.bf16.msrb.mxu1 %v14931_v3  ;;  %8340 = vmatpush.bf16.msrb.mxu3 %v14939_v53 }
 0x8a8   :  { %8354 = vmatpush.bf16.msrb.mxu2 %v14947_v7  ;;  %8368 = vmatpush.bf16.msrb.mxu0 %v14955_v57  ;;  %v15093_v7 = vld [vmem:[#allocation12 + $0x718] sm:$0xff] }
 0x8a9   :  { %v15101_v57 = vld [vmem:[#allocation12 + $0x758] sm:$0xff] }
 0x8aa   :  { %v6859_v10 = vpop.f32.mrf.mxu1 }
 0x8ab   :  { %8327 = vmatpush.bf16.msrb.mxu1 %v14930_v51  ;;  %8341 = vmatpush.bf16.msrb.mxu3 %v14938_v41  ;;  %v6901_v48 = vpop.f32.mrf.mxu0 }
 0x8ac   :  { %8355 = vmatpush.bf16.msrb.mxu2 %v14946_v24  ;;  %8369 = vmatpush.bf16.msrb.mxu0 %v14954_v49  ;;  %v15092_v24 = vld [vmem:[#allocation12 + $0x710] sm:$0xff] }
 0x8ad   :  { %v15100_v49 = vld [vmem:[#allocation12 + $0x750] sm:$0xff] }
 0x8ae   :  { %8328 = vmatmul.bf16.vlgmr.msrb.gmra.mxu1 %v8120_v17  ;;  %8342 = vmatmul.bf16.vlgmr.msrb.gmra.mxu3 %v8121_v39  ;;  %v15091_v39 = vld [vmem:[#allocation12 + $0x708] sm:$0xff] }
 0x8af   :  { %8653 = vmatpush.bf16.msra.mxu1 %v15097_v25  ;;  %8667 = vmatpush.bf16.msra.mxu3 %v15105_v40  ;;  %v17315_v40 = vld [vmem:[#allocation55_spill] sm:$0xff] }
 0x8b0   :  { %8681 = vmatpush.bf16.msra.mxu2 %v15113_v47  ;;  %8695 = vmatpush.bf16.msra.mxu0 %v15121_v52  ;;  %v6873_v33 = vpop.f32.mrf.mxu3  ;;  %v6163_v31 = vadd.f32 %v17060_v27, %v17315_v40  ;;  %v17316_v52 = vld [vmem:[#allocation48_spill] sm:$0xff] }
 0x8b1   :  { %8356 = vmatmul.bf16.vlgmr.msrb.gmra.mxu2 %v8122_v63  ;;  %8370 = vmatmul.bf16.vlgmr.msrb.gmra.mxu0 %v8123_v6  ;;  %v6874_v3 = vadd.f32 %v6873_v33, %v6859_v10  ;;  %v6887_v53 = vpop.f32.mrf.mxu2  ;;  %v6161_v12 = vadd.f32 %v17052_v0, %v17316_v52  ;;  %v17319_v63 = vld [vmem:[#allocation50_spill] sm:$0xff]  ;;  %v17320_v6 = vld [vmem:[#allocation52_spill] sm:$0xff] }
 0x8b2   :  { %v6861_v37 = vpop.f32.mrf.mxu1  ;;  %v6215_v27 = vadd.f32 %v17054_v58, %v17319_v63  ;;  %v15107_v0 = vld [vmem:[#allocation12 + $0x788] sm:$0xff]  ;;  %v6308_v26 = vpack.c.bf16 %v6163_v31, %v6109_v21  ;;  %v15090_v58 = vld [vmem:[#allocation12 + $0x700] sm:$0xff] }
 0x8b3   :  { %8654 = vmatpush.bf16.msra.mxu1 %v15096_v61  ;;  %8668 = vmatpush.bf16.msra.mxu3 %v15104_v23  ;;  %v6888_v13 = vadd.f32 %v6887_v53, %v6874_v3  ;;  %v6903_v41 = vpop.f32.mrf.mxu0  ;;  %v15099_v61 = vld [vmem:[#allocation12 + $0x748] sm:$0xff]  ;;  %v14969_v53 = vld [vmem:[#allocation12 + $0x338] sm:$0xff] }
 0x8b4   :  { %8682 = vmatpush.bf16.msra.mxu2 %v15112_v29  ;;  %8696 = vmatpush.bf16.msra.mxu0 %v15120_v46  ;;  %v6271_v29 = vadd.f32 %v17058_v4, %v17320_v6  ;;  %v17321_v46 = vld [vmem:[#allocation47_spill] sm:$0xff]  ;;  %v8449_v3 = vunpack.c.l.b16 %v6308_v26  ;;  %v14967_v21 = vld [vmem:[#allocation12 + $0x328] sm:$0xff] }
 0x8b5   :  { %v6902_v51 = vadd.f32 %v6901_v48, %v6888_v13  ;;  %v6107_v10 = vadd.f32 %v17048_v11, %v17321_v46  ;;  %v8450_v11 = vunpack.c.h.b16 %v6308_v26  ;;  %v14983_v63 = vld [vmem:[#allocation12 + $0x3a8] sm:$0xff]  ;;  %v14982_v46 = vld [vmem:[#allocation12 + $0x3a0] sm:$0xff] }
 0x8b7   :  { %8655 = vmatpush.bf16.msra.mxu1 %v15095_v45  ;;  %8669 = vmatpush.bf16.msra.mxu3 %v15103_v14  ;;  %v17322_v14 = vld [vmem:[#allocation44_spill] sm:$0xff]  ;;  %v6306_v48 = vpack.c.bf16 %v6161_v12, %v6107_v10 }
 0x8b8   :  { %8683 = vmatpush.bf16.msra.mxu2 %v15111_v5  ;;  %8697 = vmatpush.bf16.msra.mxu0 %v15119_v38  ;;  %v6875_v25 = vpop.f32.mrf.mxu3  ;;  %v6269_v5 = vadd.f32 %v17050_v22, %v17322_v14  ;;  %v6309_v38 = vpack.c.bf16 %v6271_v29, %v6217_v34  ;;  %v14992_v34 = vld [vmem:[#allocation12 + $0x3f0] sm:$0xff]  ;;  %v14990_v10 = vld [vmem:[#allocation12 + $0x3e0] sm:$0xff]  ;;  %v14973_v14 = vld [vmem:[#allocation12 + $0x358] sm:$0xff] }
 0x8b9   :  { %v6876_v2 = vadd.f32 %v6875_v25, %v6861_v37  ;;  %v6889_v47 = vpop.f32.mrf.mxu2  ;;  %v14977_v37 = vld [vmem:[#allocation12 + $0x378] sm:$0xff] }
 0x8ba   :  { %v7127_v9 = vpop.f32.mrf.mxu1  ;;  %v8451_v22 = vunpack.c.l.b16 %v6309_v38 }
 0x8bb   :  { %8656 = vmatpush.bf16.msra.mxu1 %v15094_v56  ;;  %8670 = vmatpush.bf16.msra.mxu3 %v15102_v18  ;;  %v6890_v17 = vadd.f32 %v6889_v47, %v6876_v2  ;;  %v7128_v23 = vadd.f32 %v7127_v9, %v6902_v51  ;;  %v15098_v56 = vld [vmem:[#allocation12 + $0x740] sm:$0xff]  ;;  %v6307_v18 = vpack.c.bf16 %v6269_v5, %v6215_v27  ;;  %v7169_v4 = vpop.f32.mrf.mxu0  ;;  %v8445_v51 = vunpack.c.l.b16 %v6306_v48  ;;  %v14968_v2 = vld [vmem:[#allocation12 + $0x330] sm:$0xff]  ;;  %v14991_v27 = vld [vmem:[#allocation12 + $0x3e8] sm:$0xff] }
 0x8bc   :  { %8684 = vmatpush.bf16.msra.mxu2 %v15110_v42  ;;  %8698 = vmatpush.bf16.msra.mxu0 %v15118_v32  ;;  %v15106_v42 = vld [vmem:[#allocation12 + $0x780] sm:$0xff]  ;;  %v14976_v47 = vld [vmem:[#allocation12 + $0x370] sm:$0xff]  ;;  %v14981_v5 = vld [vmem:[#allocation12 + $0x398] sm:$0xff] }
 0x8bd   :  { %v6904_v45 = vadd.f32 %v6903_v41, %v6890_v17  ;;  %v15114_v32 = vld [vmem:[#allocation12 + $0x7c0] sm:$0xff]  ;;  %v8446_v41 = vunpack.c.h.b16 %v6306_v48  ;;  %v8453_v25 = vpack.c.b16 %v8449_v3, %v8445_v51  ;;  %v14975_v17 = vld [vmem:[#allocation12 + $0x368] sm:$0xff]  ;;  %v14988_v3 = vld [vmem:[#allocation12 + $0x3d0] sm:$0xff] }
 0x8be   :  { %v17326_v51 = vld [vmem:[#allocation32_spill] sm:$0xff] }
 0x8bf   :  { %8657 = vmatpush.bf16.msra.mxu1 %v15093_v7  ;;  %8671 = vmatpush.bf16.msra.mxu3 %v15101_v57  ;;  %v8452_v57 = vunpack.c.h.b16 %v6309_v38  ;;  %v8454_v40 = vpack.c.b16 %v8450_v11, %v8446_v41  ;;  %v14989_v38 = vld [vmem:[#allocation12 + $0x3d8] sm:$0xff]  ;;  %v17327_v41 = vld [vmem:[#allocation65_spill] sm:$0xff] }
 0x8c0   :  { %8685 = vmatpush.bf16.msra.mxu2 %v15109_v62  ;;  %8699 = vmatpush.bf16.msra.mxu0 %v15117_v59  ;;  %v7141_v33 = vpop.f32.mrf.mxu3  ;;  %v14985_v62 = vld [vmem:[#allocation12 + $0x3b8] sm:$0xff] }
 0x8c1   :  { %v7142_v13 = vadd.f32 %v7141_v33, %v7128_v23  ;;  %v7155_v7 = vpop.f32.mrf.mxu2  ;;  %v14993_v59 = vld [vmem:[#allocation12 + $0x3f8] sm:$0xff]  ;;  %v14980_v33 = vld [vmem:[#allocation12 + $0x390] sm:$0xff] }
 0x8c2   :  { %v17323_v11 = vld [vmem:[#allocation35_spill] sm:$0xff] }
 0x8c3   :  { %8658 = vmatpush.bf16.msra.mxu1 %v15092_v24  ;;  %8672 = vmatpush.bf16.msra.mxu3 %v15100_v49  ;;  %v7156_v24 = vadd.f32 %v7155_v7, %v7142_v13  ;;  %v8447_v49 = vunpack.c.l.b16 %v6307_v18  ;;  %v7171_v23 = vpop.f32.mrf.mxu0  ;;  %v17324_v13 = vld [vmem:[#allocation41_spill] sm:$0xff] }
 0x8c4   :  { %8686 = vmatpush.bf16.msra.mxu2 %v15108_v43  ;;  %8700 = vmatpush.bf16.msra.mxu0 %v15116_v36  ;;  %v8448_v43 = vunpack.c.h.b16 %v6307_v18  ;;  %v7129_v36 = vpop.f32.mrf.mxu1  ;;  %v6197_v7 = vadd.f32 %v16998_v1, %v17324_v13  ;;  %v15134_v13 = vld [vmem:[#allocation12 + $0x860] sm:$0xff] }
 0x8c5   :  { %v17108_v31 = vadd.f32 %v7169_v4, %v7156_v24  ;;  %v8455_v52 = vpack.c.b16 %v8451_v22, %v8447_v49  ;;  %v7130_v9 = vadd.f32 %v7129_v36, %v6904_v45  ;;  %v14965_v45 = vld [vmem:[#allocation12 + $0x318] sm:$0xff]  ;;  %v6251_v24 = vadd.f32 %v17327_v41, %v17326_v51 }
 0x8c6   :  { %v8456_v12 = vpack.c.b16 %v8452_v57, %v8448_v43  ;;  %v17325_v22 = vld [vmem:[#allocation38_spill] sm:$0xff]  ;;  %v14979_v43 = vld [vmem:[#allocation12 + $0x388] sm:$0xff] }
 0x8c7   :  { %8659 = vmatpush.bf16.msra.mxu1 %v15091_v39  ;;  %8673 = vmatpush.bf16.msra.mxu3 %v15099_v61  ;;  %v6089_v57 = vadd.f32 %v16988_v28, %v17325_v22  ;;  %v15150_v22 = vld [vmem:[#allocation12 + $0x8e0] sm:$0xff]  ;;  %v15149_v51 = vld [vmem:[#allocation12 + $0x8d8] sm:$0xff] }
 0x8c8   :  { %8687 = vmatpush.bf16.msra.mxu2 %v15107_v0  ;;  %8701 = vmatpush.bf16.msra.mxu0 %v15115_v8  ;;  %v7143_v55 = vpop.f32.mrf.mxu3  ;;  %v14966_v0 = vld [vmem:[#allocation12 + $0x320] sm:$0xff] }
 0x8c9   :  { %v7144_v39 = vadd.f32 %v7143_v55, %v7130_v9  ;;  %v7157_v61 = vpop.f32.mrf.mxu2  ;;  %v14974_v8 = vld [vmem:[#allocation12 + $0x360] sm:$0xff] }
 0x8cb   :  { %8660 = vmatpush.bf16.msra.mxu1 %v15090_v58  ;;  %8674 = vmatpush.bf16.msra.mxu3 %v15098_v56  ;;  %v7158_v6 = vadd.f32 %v7157_v61, %v7144_v39 }
 0x8cc   :  { %8688 = vmatpush.bf16.msra.mxu2 %v15106_v42  ;;  %8702 = vmatpush.bf16.msra.mxu0 %v15114_v32  ;;  %v7460_v26 = vpop.f32.mrf.mxu1  ;;  %v14964_v42 = vld [vmem:[#allocation12 + $0x310] sm:$0xff] }
 0x8cd   :  { %v17110_v29 = vadd.f32 %v7171_v23, %v7158_v6  ;;  %v14972_v32 = vld [vmem:[#allocation12 + $0x350] sm:$0xff]  ;;  %v17328_v6 = vld [vmem:[#allocation64_spill] sm:$0xff] }
 0x8ce   :  { %8661 = vmatmul.bf16.vlgmr.msra.gmra.mxu1 %v8453_v25  ;;  %8675 = vmatmul.bf16.vlgmr.msra.gmra.mxu3 %v8454_v40  ;;  %v7502_v18 = vpop.f32.mrf.mxu0 }
 0x8cf   :  { %8921 = vmatpush.bf16.msrb.mxu1 %v14969_v53  ;;  %8935 = vmatpush.bf16.msrb.mxu3 %v14977_v37  ;;  %v6143_v53 = vadd.f32 %v16996_v60, %v17323_v11  ;;  %v14987_v60 = vld [vmem:[#allocation12 + $0x3c8] sm:$0xff] }
 0x8d0   :  { %8949 = vmatpush.bf16.msrb.mxu2 %v14985_v62  ;;  %8963 = vmatpush.bf16.msrb.mxu0 %v14993_v59  ;;  %v14963_v62 = vld [vmem:[#allocation12 + $0x308] sm:$0xff] }
 0x8d1   :  { %8689 = vmatmul.bf16.vlgmr.msra.gmra.mxu2 %v8455_v52  ;;  %8703 = vmatmul.bf16.vlgmr.msra.gmra.mxu0 %v8456_v12  ;;  %v7474_v48 = vpop.f32.mrf.mxu3  ;;  %v14971_v59 = vld [vmem:[#allocation12 + $0x348] sm:$0xff]  ;;  %v6292_v25 = vpack.c.bf16 %v6143_v53, %v6089_v57  ;;  %v14970_v52 = vld [vmem:[#allocation12 + $0x340] sm:$0xff]  ;;  %v15125_v57 = vld [vmem:[#allocation12 + $0x818] sm:$0xff] }
 0x8d2   :  { %v7475_v58 = vadd.f32 %v7474_v48, %v7460_v26  ;;  %v15126_v53 = vld [vmem:[#allocation12 + $0x820] sm:$0xff] }
 0x8d3   :  { %8922 = vmatpush.bf16.msrb.mxu1 %v14968_v2  ;;  %8936 = vmatpush.bf16.msrb.mxu3 %v14976_v47  ;;  %v6293_v2 = vpack.c.bf16 %v6251_v24, %v6197_v7  ;;  %v14962_v47 = vld [vmem:[#allocation12 + $0x300] sm:$0xff]  ;;  %v8717_v9 = vunpack.c.l.b16 %v6292_v25  ;;  %v8718_v55 = vunpack.c.h.b16 %v6292_v25  ;;  %v15124_v25 = vld [vmem:[#allocation12 + $0x810] sm:$0xff] }
 0x8d4   :  { %8950 = vmatpush.bf16.msrb.mxu2 %v14984_v15  ;;  %8964 = vmatpush.bf16.msrb.mxu0 %v14992_v34  ;;  %v7488_v56 = vpop.f32.mrf.mxu2  ;;  %v7462_v49 = vpop.f32.mrf.mxu1  ;;  %v14978_v15 = vld [vmem:[#allocation12 + $0x380] sm:$0xff] }
 0x8d5   :  { %v7489_v4 = vadd.f32 %v7488_v56, %v7475_v58  ;;  %v14986_v34 = vld [vmem:[#allocation12 + $0x3c0] sm:$0xff]  ;;  %v8719_v61 = vunpack.c.l.b16 %v6293_v2  ;;  %v8720_v23 = vunpack.c.h.b16 %v6293_v2  ;;  %v15144_v56 = vld [vmem:[#allocation12 + $0x8b0] sm:$0xff] }
 0x8d6   :  { %v7504_v12 = vpop.f32.mrf.mxu0  ;;  %v15142_v7 = vld [vmem:[#allocation12 + $0x8a0] sm:$0xff]  ;;  %v17330_v2 = vld [vmem:[#allocation57_spill] sm:$0xff] }
 0x8d7   :  { %8923 = vmatpush.bf16.msrb.mxu1 %v14967_v21  ;;  %8937 = vmatpush.bf16.msrb.mxu3 %v14975_v17  ;;  %v17114_v37 = vadd.f32 %v7502_v18, %v7489_v4  ;;  %v15129_v21 = vld [vmem:[#allocation12 + $0x838] sm:$0xff]  ;;  %v15152_v18 = vld [vmem:[#allocation12 + $0x8f0] sm:$0xff]  ;;  %v15127_v4 = vld [vmem:[#allocation12 + $0x828] sm:$0xff] }
 0x8d8   :  { %8951 = vmatpush.bf16.msrb.mxu2 %v14983_v63  ;;  %8965 = vmatpush.bf16.msrb.mxu0 %v14991_v27  ;;  %v15137_v17 = vld [vmem:[#allocation12 + $0x878] sm:$0xff] }
 0x8d9   :  { %v7476_v36 = vpop.f32.mrf.mxu3  ;;  %v15145_v63 = vld [vmem:[#allocation12 + $0x8b8] sm:$0xff] }
 0x8da   :  { %v7477_v40 = vadd.f32 %v7476_v36, %v7462_v49  ;;  %v15153_v27 = vld [vmem:[#allocation12 + $0x8f8] sm:$0xff] }
 0x8db   :  { %8924 = vmatpush.bf16.msrb.mxu1 %v14966_v0  ;;  %8938 = vmatpush.bf16.msrb.mxu3 %v14974_v8  ;;  %v8713_v0 = vunpack.c.l.b16 %v17328_v6  ;;  %v8714_v8 = vunpack.c.h.b16 %v17328_v6 }
 0x8dc   :  { %8952 = vmatpush.bf16.msrb.mxu2 %v14982_v46  ;;  %8966 = vmatpush.bf16.msrb.mxu0 %v14990_v10  ;;  %v7490_v1 = vpop.f32.mrf.mxu2  ;;  %v17329_v46 = vld [vmem:[#allocation66_spill] sm:$0xff] }
 0x8dd   :  { %v7491_v28 = vadd.f32 %v7490_v1, %v7477_v40  ;;  %v8715_v10 = vunpack.c.l.b16 %v17329_v46  ;;  %v8716_v26 = vunpack.c.h.b16 %v17329_v46  ;;  %v15132_v40 = vld [vmem:[#allocation12 + $0x850] sm:$0xff]  ;;  %v6168_v1 = vadd.f32 %v17088_v19, %v17330_v2 }
 0x8df   :  { %8925 = vmatpush.bf16.msrb.mxu1 %v14965_v45  ;;  %8939 = vmatpush.bf16.msrb.mxu3 %v14973_v14  ;;  %v17122_v39 = vadd.f32 %v7504_v12, %v7491_v28  ;;  %v8721_v45 = vpack.c.b16 %v8717_v9, %v8713_v0  ;;  %v8722_v14 = vpack.c.b16 %v8718_v55, %v8714_v8  ;;  %v15140_v28 = vld [vmem:[#allocation12 + $0x890] sm:$0xff]  ;;  %v15147_v0 = vld [vmem:[#allocation12 + $0x8c8] sm:$0xff] }
 0x8e0   :  { %8953 = vmatpush.bf16.msrb.mxu2 %v14981_v5  ;;  %8967 = vmatpush.bf16.msrb.mxu0 %v14989_v38  ;;  %v15128_v5 = vld [vmem:[#allocation12 + $0x830] sm:$0xff]  ;;  %v8723_v48 = vpack.c.b16 %v8719_v61, %v8715_v10  ;;  %v8724_v58 = vpack.c.b16 %v8720_v23, %v8716_v26  ;;  %v17335_v61 = vld [vmem:[#allocation60_spill] sm:$0xff] }
 0x8e1   :  { %v15136_v38 = vld [vmem:[#allocation12 + $0x870] sm:$0xff]  ;;  %v6276_v19 = vadd.f32 %v17082_v20, %v17335_v61  ;;  %v15123_v23 = vld [vmem:[#allocation12 + $0x808] sm:$0xff] }
 0x8e2   :  { %v17333_v55 = vld [vmem:[#allocation61_spill] sm:$0xff] }
 0x8e3   :  { %8926 = vmatpush.bf16.msrb.mxu1 %v14964_v42  ;;  %8940 = vmatpush.bf16.msrb.mxu3 %v14972_v32  ;;  %v15135_v42 = vld [vmem:[#allocation12 + $0x868] sm:$0xff] }
 0x8e4   :  { %8954 = vmatpush.bf16.msrb.mxu2 %v14980_v33  ;;  %8968 = vmatpush.bf16.msrb.mxu0 %v14988_v3  ;;  %v15143_v32 = vld [vmem:[#allocation12 + $0x8a8] sm:$0xff] }
 0x8e5   :  { %v15151_v33 = vld [vmem:[#allocation12 + $0x8e8] sm:$0xff] }
 0x8e7   :  { %8927 = vmatpush.bf16.msrb.mxu1 %v14963_v62  ;;  %8941 = vmatpush.bf16.msrb.mxu3 %v14971_v59  ;;  %v15133_v62 = vld [vmem:[#allocation12 + $0x858] sm:$0xff] }
 0x8e8   :  { %8955 = vmatpush.bf16.msrb.mxu2 %v14979_v43  ;;  %8969 = vmatpush.bf16.msrb.mxu0 %v14987_v60  ;;  %v15141_v59 = vld [vmem:[#allocation12 + $0x898] sm:$0xff] }
 0x8eb   :  { %8928 = vmatpush.bf16.msrb.mxu1 %v14962_v47  ;;  %8942 = vmatpush.bf16.msrb.mxu3 %v14970_v52  ;;  %v7728_v3 = vpop.f32.mrf.mxu1  ;;  %v15148_v47 = vld [vmem:[#allocation12 + $0x8d0] sm:$0xff]  ;;  %v17331_v52 = vld [vmem:[#allocation56_spill] sm:$0xff] }
 0x8ec   :  { %8956 = vmatpush.bf16.msrb.mxu2 %v14978_v15  ;;  %8970 = vmatpush.bf16.msrb.mxu0 %v14986_v34  ;;  %v7729_v11 = vadd.f32 %v7728_v3, %v17114_v37  ;;  %v6222_v12 = vadd.f32 %v17090_v35, %v17331_v52  ;;  %v17332_v34 = vld [vmem:[#allocation54_spill] sm:$0xff] }
 0x8ed   :  { %v6166_v9 = vadd.f32 %v17076_v30, %v17332_v34  ;;  %v15139_v30 = vld [vmem:[#allocation12 + $0x888] sm:$0xff] }
 0x8ee   :  { %8929 = vmatmul.bf16.vlgmr.msrb.gmra.mxu1 %v8721_v45  ;;  %8943 = vmatmul.bf16.vlgmr.msrb.gmra.mxu3 %v8722_v14  ;;  %v7770_v43 = vpop.f32.mrf.mxu0 }
 0x8ef   :  { %9254 = vmatpush.bf16.msra.mxu1 %v15129_v21  ;;  %9268 = vmatpush.bf16.msra.mxu3 %v15137_v17  ;;  %v6114_v21 = vadd.f32 %v17080_v44, %v17333_v55  ;;  %v17334_v17 = vld [vmem:[#allocation34_spill] sm:$0xff]  ;;  %v17337_v44 = vld [vmem:[#allocation53_spill] sm:$0xff] }
 0x8f0   :  { %9282 = vmatpush.bf16.msra.mxu2 %v15145_v63  ;;  %9296 = vmatpush.bf16.msra.mxu0 %v15153_v27  ;;  %v15131_v63 = vld [vmem:[#allocation12 + $0x848] sm:$0xff]  ;;  %v17336_v27 = vld [vmem:[#allocation58_spill] sm:$0xff]  ;;  %v6274_v46 = vadd.f32 %v17066_v16, %v17337_v44 }
 0x8f1   :  { %8957 = vmatmul.bf16.vlgmr.msrb.gmra.mxu2 %v8723_v48  ;;  %8971 = vmatmul.bf16.vlgmr.msrb.gmra.mxu0 %v8724_v58  ;;  %v7742_v41 = vpop.f32.mrf.mxu3  ;;  %v6112_v35 = vadd.f32 %v17064_v54, %v17336_v27  ;;  %v6312_v6 = vpack.c.bf16 %v6168_v1, %v6114_v21 }
 0x8f2   :  { %v7743_v24 = vadd.f32 %v7742_v41, %v7729_v11 }
 0x8f3   :  { %9255 = vmatpush.bf16.msra.mxu1 %v15128_v5  ;;  %9269 = vmatpush.bf16.msra.mxu3 %v15136_v38  ;;  %v7730_v60 = vpop.f32.mrf.mxu1  ;;  %v6310_v26 = vpack.c.bf16 %v6166_v9, %v6112_v35  ;;  %v15122_v5 = vld [vmem:[#allocation12 + $0x800] sm:$0xff]  ;;  %v9050_v54 = vunpack.c.l.b16 %v6312_v6  ;;  %v9051_v48 = vunpack.c.h.b16 %v6312_v6 }
 0x8f4   :  { %9283 = vmatpush.bf16.msra.mxu2 %v15144_v56  ;;  %9297 = vmatpush.bf16.msra.mxu0 %v15152_v18  ;;  %v7756_v49 = vpop.f32.mrf.mxu2  ;;  %v7731_v36 = vadd.f32 %v7730_v60, %v17122_v39  ;;  %v6220_v39 = vadd.f32 %v17078_v50, %v17334_v17  ;;  %v6313_v50 = vpack.c.bf16 %v6276_v19, %v6222_v12  ;;  %v15130_v38 = vld [vmem:[#allocation12 + $0x840] sm:$0xff] }
 0x8f5   :  { %v7757_v37 = vadd.f32 %v7756_v49, %v7743_v24  ;;  %v15138_v56 = vld [vmem:[#allocation12 + $0x880] sm:$0xff] }
 0x8f6   :  { %v6311_v45 = vpack.c.bf16 %v6274_v46, %v6220_v39  ;;  %v7772_v58 = vpop.f32.mrf.mxu0  ;;  %v15146_v18 = vld [vmem:[#allocation12 + $0x8c0] sm:$0xff] }
 0x8f7   :  { %9256 = vmatpush.bf16.msra.mxu1 %v15127_v4  ;;  %9270 = vmatpush.bf16.msra.mxu3 %v15135_v42  ;;  %v17134_v15 = vadd.f32 %v7770_v43, %v7757_v37  ;;  %v9052_v4 = vunpack.c.l.b16 %v6313_v50  ;;  %v9053_v42 = vunpack.c.h.b16 %v6313_v50 }
 0x8f8   :  { %9284 = vmatpush.bf16.msra.mxu2 %v15143_v32  ;;  %9298 = vmatpush.bf16.msra.mxu0 %v15151_v33  ;;  %v9046_v32 = vunpack.c.l.b16 %v6310_v26  ;;  %v9047_v33 = vunpack.c.h.b16 %v6310_v26  ;;  %v9048_v3 = vunpack.c.l.b16 %v6311_v45  ;;  %v9049_v11 = vunpack.c.h.b16 %v6311_v45 }
 0x8f9   :  { %v7744_v8 = vpop.f32.mrf.mxu3 }
 0x8fa   :  { %v7745_v10 = vadd.f32 %v7744_v8, %v7731_v36 }
 0x8fb   :  { %9257 = vmatpush.bf16.msra.mxu1 %v15126_v53  ;;  %9271 = vmatpush.bf16.msra.mxu3 %v15134_v13  ;;  %v9054_v53 = vpack.c.b16 %v9050_v54, %v9046_v32  ;;  %v9055_v13 = vpack.c.b16 %v9051_v48, %v9047_v33 }
 0x8fc   :  { %9285 = vmatpush.bf16.msra.mxu2 %v15142_v7  ;;  %9299 = vmatpush.bf16.msra.mxu0 %v15150_v22  ;;  %v7758_v20 = vpop.f32.mrf.mxu2  ;;  %v9056_v7 = vpack.c.b16 %v9052_v4, %v9048_v3  ;;  %v9057_v22 = vpack.c.b16 %v9053_v42, %v9049_v11 }
 0x8fd   :  { %v7759_v14 = vadd.f32 %v7758_v20, %v7745_v10 }
 0x8ff   :  { %9258 = vmatpush.bf16.msra.mxu1 %v15125_v57  ;;  %9272 = vmatpush.bf16.msra.mxu3 %v15133_v62  ;;  %v17148_v16 = vadd.f32 %v7772_v58, %v7759_v14 }
 0x900   :  { %9286 = vmatpush.bf16.msra.mxu2 %v15141_v59  ;;  %9300 = vmatpush.bf16.msra.mxu0 %v15149_v51 }
 0x903   :  { %9259 = vmatpush.bf16.msra.mxu1 %v15124_v25  ;;  %9273 = vmatpush.bf16.msra.mxu3 %v15132_v40 }
 0x904   :  { %9287 = vmatpush.bf16.msra.mxu2 %v15140_v28  ;;  %9301 = vmatpush.bf16.msra.mxu0 %v15148_v47 }
 0x907   :  { %9260 = vmatpush.bf16.msra.mxu1 %v15123_v23  ;;  %9274 = vmatpush.bf16.msra.mxu3 %v15131_v63 }
 0x908   :  { %9288 = vmatpush.bf16.msra.mxu2 %v15139_v30  ;;  %9302 = vmatpush.bf16.msra.mxu0 %v15147_v0 }
 0x90b   :  { %9261 = vmatpush.bf16.msra.mxu1 %v15122_v5  ;;  %9275 = vmatpush.bf16.msra.mxu3 %v15130_v38  ;;  %v8061_v57 = vpop.f32.mrf.mxu1 }
 0x90c   :  { %9289 = vmatpush.bf16.msra.mxu2 %v15138_v56  ;;  %9303 = vmatpush.bf16.msra.mxu0 %v15146_v18 }
 0x90e   :  { %9262 = vmatmul.bf16.vlgmr.msra.gmra.mxu1 %v9054_v53  ;;  %9276 = vmatmul.bf16.vlgmr.msra.gmra.mxu3 %v9055_v13  ;;  %v8103_v51 = vpop.f32.mrf.mxu0 }
 0x90f   :  { %9290 = vmatmul.bf16.vlgmr.msra.gmra.mxu2 %v9056_v7  ;;  %9304 = vmatmul.bf16.vlgmr.msra.gmra.mxu0 %v9057_v22 }
 0x911   :  { %v8075_v62 = vpop.f32.mrf.mxu3 }
 0x912   :  { %v8076_v27 = vadd.f32 %v8075_v62, %v8061_v57 }
 0x913   :  { %v8063_v41 = vpop.f32.mrf.mxu1 }
 0x914   :  { %v8089_v59 = vpop.f32.mrf.mxu2 }
 0x915   :  { %v8090_v30 = vadd.f32 %v8089_v59, %v8076_v27 }
 0x916   :  { %v8105_v43 = vpop.f32.mrf.mxu0 }
 0x917   :  { %v8104_v26 = vadd.f32 %v8103_v51, %v8090_v30 }
 0x919   :  { %v8077_v24 = vpop.f32.mrf.mxu3 }
 0x91a   :  { %v8078_v10 = vadd.f32 %v8077_v24, %v8063_v41 }
 0x91c   :  { %v8091_v49 = vpop.f32.mrf.mxu2 }
 0x91d   :  { %v8092_v54 = vadd.f32 %v8091_v49, %v8078_v10 }
 0x91f   :  { %v8106_v3 = vadd.f32 %v8105_v43, %v8092_v54 }
 0x92b   :  { %v8329_v60 = vpop.f32.mrf.mxu1 }
 0x92c   :  { %v8330_v45 = vadd.f32 %v8329_v60, %v8104_v26 }
 0x92e   :  { %v8371_v25 = vpop.f32.mrf.mxu0 }
 0x931   :  { %v8343_v37 = vpop.f32.mrf.mxu3 }
 0x932   :  { %v8344_v48 = vadd.f32 %v8343_v37, %v8330_v45 }
 0x933   :  { %v8331_v40 = vpop.f32.mrf.mxu1 }
 0x934   :  { %v8357_v36 = vpop.f32.mrf.mxu2  ;;  %v8332_v13 = vadd.f32 %v8331_v40, %v8106_v3 }
 0x935   :  { %v8358_v33 = vadd.f32 %v8357_v36, %v8344_v48 }
 0x936   :  { %v17150_v28 = vpop.f32.mrf.mxu0 }
 0x937   :  { %v8372_v62 = vadd.f32 %v8371_v25, %v8358_v33 }
 0x939   :  { %v8345_v2 = vpop.f32.mrf.mxu3 }
 0x93a   :  { %v8346_v59 = vadd.f32 %v8345_v2, %v8332_v13 }
 0x93c   :  { %v8359_v1 = vpop.f32.mrf.mxu2 }
 0x93d   :  { %v8360_v36 = vadd.f32 %v8359_v1, %v8346_v59 }
 0x93f   :  { %v8374_v25 = vadd.f32 %v17150_v28, %v8360_v36  ;;  %v15165_v36 = vld [vmem:[#allocation15 + $0x38] sm:$0xff] }
 0x940   :  { %9675 = vmatpush.bf16.msrb.mxu2 %v15165_v36  ;;  %v15175_v36 = vld [vmem:[#allocation15 + $0x88] sm:$0xff] }
 0x94b   :  { %v8662_v47 = vpop.f32.mrf.mxu1 }
 0x94e   :  { %v8704_v34 = vpop.f32.mrf.mxu0 }
 0x951   :  { %v8676_v52 = vpop.f32.mrf.mxu3 }
 0x952   :  { %v8677_v63 = vadd.f32 %v8676_v52, %v8662_v47 }
 0x953   :  { %v8664_v9 = vpop.f32.mrf.mxu1 }
 0x954   :  { %v8690_v12 = vpop.f32.mrf.mxu2 }
 0x955   :  { %v8691_v35 = vadd.f32 %v8690_v12, %v8677_v63 }
 0x956   :  { %v8706_v17 = vpop.f32.mrf.mxu0 }
 0x957   :  { %v8705_v44 = vadd.f32 %v8704_v34, %v8691_v35 }
 0x959   :  { %v8678_v55 = vpop.f32.mrf.mxu3 }
 0x95a   :  { %v8679_v8 = vadd.f32 %v8678_v55, %v8664_v9 }
 0x95c   :  { %v8692_v21 = vpop.f32.mrf.mxu2 }
 0x95d   :  { %v8693_v14 = vadd.f32 %v8692_v21, %v8679_v8 }
 0x95f   :  { %v8707_v18 = vadd.f32 %v8706_v17, %v8693_v14  ;;  %v9320_v17 = vld [vmem:[#allocation22 + $0xc8] sm:$0xff] }
 0x96b   :  { %v8930_v39 = vpop.f32.mrf.mxu1 }
 0x96c   :  { %v8931_v20 = vadd.f32 %v8930_v39, %v8705_v44 }
 0x96e   :  { %v8972_v23 = vpop.f32.mrf.mxu0 }
 0x971   :  { %v8944_v61 = vpop.f32.mrf.mxu3 }
 0x972   :  { %v8945_v5 = vadd.f32 %v8944_v61, %v8931_v20  ;;  %v9318_v20 = vld [vmem:[#allocation22 + $0xb8] sm:$0xff] }
 0x973   :  { %v8932_v6 = vpop.f32.mrf.mxu1 }
 0x974   :  { %v8958_v19 = vpop.f32.mrf.mxu2  ;;  %v8933_v11 = vadd.f32 %v8932_v6, %v8707_v18 }
 0x975   :  { %v8959_v56 = vadd.f32 %v8958_v19, %v8945_v5 }
 0x976   :  { %v8974_v50 = vpop.f32.mrf.mxu0 }
 0x977   :  { %v8973_v7 = vadd.f32 %v8972_v23, %v8959_v56  ;;  %v9321_v56 = vld [vmem:[#allocation22 + $0xd0] sm:$0xff] }
 0x979   :  { %v8946_v0 = vpop.f32.mrf.mxu3  ;;  %v9314_v49 = vadd.f32 %v8973_v7, %v8372_v62 }
 0x97a   :  { %v8947_v22 = vadd.f32 %v8946_v0, %v8933_v11 }
 0x97c   :  { %v8960_v46 = vpop.f32.mrf.mxu2 }
 0x97d   :  { %v8961_v60 = vadd.f32 %v8960_v46, %v8947_v22 }
 0x97f   :  { %v8975_v34 = vadd.f32 %v8974_v50, %v8961_v60  ;;  %v15154_v60 = vld [vmem:[#allocation13] sm:$0xff] }
 0x981   :  { %v9315_v55 = vadd.f32 %v8975_v34, %v8374_v25  ;;  %v15163_v34 = vld [vmem:[#allocation15 + $0x28] sm:$0xff]  ;;  %v15157_v25 = vld [vmem:[#allocation13 + $0x18] sm:$0xff] }
 0x98b   :  { %v9263_v38 = vpop.f32.mrf.mxu1 }
 0x98c   :  { %v9305_v32 = vpop.f32.mrf.mxu0 }
 0x991   :  { %v9277_v58 = vpop.f32.mrf.mxu3 }
 0x992   :  { %v9278_v4 = vadd.f32 %v9277_v58, %v9263_v38  ;;  %v9291_v42 = vpop.f32.mrf.mxu2 }
 0x993   :  { %v9265_v41 = vpop.f32.mrf.mxu1 }
 0x994   :  { %v9292_v53 = vadd.f32 %v9291_v42, %v9278_v4  ;;  %v9307_v40 = vpop.f32.mrf.mxu0  ;;  %v9319_v4 = vld [vmem:[#allocation22 + $0xc0] sm:$0xff] }
 0x996   :  { %v9306_v57 = vadd.f32 %v9305_v32, %v9292_v53 }
 0x998   :  { %v9310_v51 = vadd.f32 %v9306_v57, %v17108_v31 }
 0x999   :  { %v9279_v24 = vpop.f32.mrf.mxu3 }
 0x99a   :  { %v9280_v37 = vadd.f32 %v9279_v24, %v9265_v41  ;;  %v9312_v47 = vadd.f32 %v9310_v51, %v17134_v15  ;;  %v9293_v52 = vpop.f32.mrf.mxu2 }
 0x99c   :  { %v9294_v43 = vadd.f32 %v9293_v52, %v9280_v37  ;;  %v17154_v12 = vadd.f32 %v9314_v49, %v9312_v47  ;;  %v15155_v37 = vld [vmem:[#allocation13 + $0x8] sm:$0xff]  ;;  %v15156_v47 = vld [vmem:[#allocation13 + $0x10] sm:$0xff]  ;;  %v15197_v52 = vld [vmem:[#allocation15 + $0x138] sm:$0xff] }
 0x99d   :  { %9614 = vmatpush.bf16.msrb.mxu3 %v15197_v52  ;;  %v15225_v52 = vld [vmem:[#allocation15 + $0x218] sm:$0xff] }
 0x99e   :  { %v9308_v9 = vadd.f32 %v9307_v40, %v9294_v43  ;;  %9322 = vadd.xlane.f32.xlu0 %v17154_v12  ;;  %v9326_v31 = vmul.f32 %v17154_v12, %v17154_v12  ;;  %v15196_v43 = vld [vmem:[#allocation15 + $0x130] sm:$0xff]  ;;  %v15195_v40 = vld [vmem:[#allocation15 + $0x128] sm:$0xff] }
 0x9a0   :  { %v9311_v2 = vadd.f32 %v9308_v9, %v17110_v29  ;;  %9328 = vadd.xlane.f32.xlu1 %v9326_v31  ;;  %v15194_v9 = vld [vmem:[#allocation15 + $0x120] sm:$0xff] }
 0x9a1   :  { %9615 = vmatpush.bf16.msrb.mxu3 %v15196_v43  ;;  %v15162_v31 = vld [vmem:[#allocation15 + $0x20] sm:$0xff]  ;;  %v15215_v43 = vld [vmem:[#allocation15 + $0x1c8] sm:$0xff] }
 0x9a2   :  { %v9313_v15 = vadd.f32 %v9311_v2, %v17148_v16  ;;  %v15193_v2 = vld [vmem:[#allocation15 + $0x118] sm:$0xff] }
 0x9a4   :  { %v9317_v1 = vadd.f32 %v9315_v55, %v9313_v15  ;;  %v15161_v55 = vld [vmem:[#allocation15 + $0x18] sm:$0xff]  ;;  %v15192_v15 = vld [vmem:[#allocation15 + $0x110] sm:$0xff] }
 0x9a5   :  { %9616 = vmatpush.bf16.msrb.mxu3 %v15195_v40  ;;  %v15174_v40 = vld [vmem:[#allocation15 + $0x80] sm:$0xff] }
 0x9a6   :  { %9324 = vadd.xlane.f32.xlu2 %v9317_v1  ;;  %v9327_v21 = vmul.f32 %v9317_v1, %v9317_v1 }
 0x9a9   :  { %9617 = vmatpush.bf16.msrb.mxu3 %v15194_v9  ;;  %v15214_v9 = vld [vmem:[#allocation15 + $0x1c0] sm:$0xff] }
 0x9ad   :  { %9618 = vmatpush.bf16.msrb.mxu3 %v15193_v2 }
 0x9ae   :  { %9330 = vadd.xlane.f32.xlu2 %v9327_v21  ;;  %v9400_v21 = vld [vmem:[#allocation13 + $0x20] sm:$0xf] }
 0x9b1   :  { %9619 = vmatpush.bf16.msrb.mxu3 %v15192_v15 }
 0x9c6   :  { %9380 = vperm.xlu2 %15266, %v9320_v17   ;;  %v9419_v17 = vunpack.c.l.b16 %v9400_v21 }
 0xa11   :  { %v9323_v39 = vpop.xlane.xlu0 %9322 }
 0xa12   :  { %v9332_v61 = vmul.f32 0.010204081, %v9323_v39  ;;  %v9424_v39 = vpack.c.b16 %v9419_v17, %v9419_v17  ;;  %v15187_v17 = vld [vmem:[#allocation15 + $0xe8] sm:$0xff] }
 0xa13   :  { %v9329_v19 = vpop.xlane.xlu1 %9328 }
 0xa14   :  { %v9336_v23 = vmul.f32 %v9332_v61, %v9332_v61  ;;  %v9334_v63 = vmul.f32 0.010204081, %v9329_v19  ;;  %v9364_v11 = vsub.f32 %v17154_v12, %v9332_v61  ;;  %v15164_v12 = vld [vmem:[#allocation15 + $0x30] sm:$0xff]  ;;  %v15159_v61 = vld [vmem:[#allocation15 + $0x8] sm:$0xff]  ;;  %v15205_v19 = vld [vmem:[#allocation15 + $0x178] sm:$0xff] }
 0xa15   :  { %9676 = vmatpush.bf16.msrb.mxu2 %v15164_v12  ;;  %9753 = vmatpush.bf16.msrb.mxu0 %v15205_v19  ;;  %v15224_v12 = vld [vmem:[#allocation15 + $0x210] sm:$0xff] }
 0xa16   :  { %v9338_v27 = vsub.f32 %v9334_v63, %v9336_v23  ;;  %v15158_v23 = vld [vmem:[#allocation15] sm:$0xff]  ;;  %v15191_v63 = vld [vmem:[#allocation15 + $0x108] sm:$0xff] }
 0xa17   :  { %9620 = vmatpush.bf16.msrb.mxu3 %v15191_v63 }
 0xa18   :  { %v9340_v35 = vadd.f32 1e-05, %v9338_v27  ;;  %v15213_v27 = vld [vmem:[#allocation15 + $0x1b8] sm:$0xff] }
 0xa19   :  { %v9325_v28 = vpop.xlane.xlu2 %9324  ;;  %9677 = vmatpush.bf16.msrb.mxu2 %v15163_v34 }
 0xa1a   :  { %15286 = vrsqrt.f32 %v9340_v35  ;;  %v9333_v29 = vmul.f32 0.010204081, %v9325_v28  ;;  %vm9348_vm3 = vweird.f32 %v9340_v35  ;;  %v15190_v28 = vld [vmem:[#allocation15 + $0x100] sm:$0xff] }
 0xa1b   :  { %9621 = vmatpush.bf16.msrb.mxu3 %v15190_v28 }
 0xa1c   :  { %v9337_v16 = vmul.f32 %v9333_v29, %v9333_v29  ;;  %v9365_v13 = vsub.f32 %v9317_v1, %v9333_v29  ;;  %v15160_v1 = vld [vmem:[#allocation15 + $0x10] sm:$0xff]  ;;  %v15173_v29 = vld [vmem:[#allocation15 + $0x78] sm:$0xff] }
 0xa1d   :  { %9678 = vmatpush.bf16.msrb.mxu2 %v15162_v31  ;;  %v15223_v31 = vld [vmem:[#allocation15 + $0x208] sm:$0xff] }
 0xa1f   :  { %9814 = vmatpush.bf16.msra.mxu3 %v15173_v29  ;;  %v15183_v29 = vld [vmem:[#allocation15 + $0xc8] sm:$0xff] }
 0xa20   :  { %v15287_v6 = vpop.eup %15286 }
 0xa21   :  { %v9343_v30 = vmul.f32 %v15287_v6, %v9340_v35  ;;  %v9331_v0 = vpop.xlane.xlu2 %9330  ;;  %vm9349_vm2 = vweird.f32 %v15287_v6  ;;  %9679 = vmatpush.bf16.msrb.mxu2 %v15161_v55  ;;  %v15204_v35 = vld [vmem:[#allocation15 + $0x170] sm:$0xff]  ;;  %v15189_v55 = vld [vmem:[#allocation15 + $0xf8] sm:$0xff] }
 0xa22   :  { %v9335_v8 = vmul.f32 0.010204081, %v9331_v0  ;;  %vm9350_vm5 = vmor %vm9348_vm3, %vm9349_vm2  ;;  %9754 = vmatpush.bf16.msrb.mxu0 %v15204_v35  ;;  %v15212_v0 = vld [vmem:[#allocation15 + $0x1b0] sm:$0xff] }
 0xa23   :  { %v9344_v44 = vmul.f32 %v15287_v6, %v9343_v30  ;;  %v15172_v30 = vld [vmem:[#allocation15 + $0x70] sm:$0xff] }
 0xa24   :  { %v9339_v46 = vsub.f32 %v9335_v8, %v9337_v16  ;;  %v15202_v16 = vld [vmem:[#allocation15 + $0x160] sm:$0xff]  ;;  %v15211_v8 = vld [vmem:[#allocation15 + $0x1a8] sm:$0xff]  ;;  %9815 = vmatpush.bf16.msra.mxu3 %v15172_v30  ;;  %v15184_v35 = vld [vmem:[#allocation15 + $0xd0] sm:$0xff] }
 0xa25   :  { %v9345_v50 = vmul.f32 0.5, %v9344_v44  ;;  %9680 = vmatpush.bf16.msrb.mxu2 %v15160_v1  ;;  %v15171_v44 = vld [vmem:[#allocation15 + $0x68] sm:$0xff]  ;;  %v15188_v1 = vld [vmem:[#allocation15 + $0xf0] sm:$0xff] }
 0xa26   :  { %v9341_v10 = vadd.f32 1e-05, %v9339_v46  ;;  %v15201_v46 = vld [vmem:[#allocation15 + $0x158] sm:$0xff] }
 0xa27   :  { %v9346_v26 = vsub.f32 1.5, %v9345_v50  ;;  %v15170_v50 = vld [vmem:[#allocation15 + $0x60] sm:$0xff] }
 0xa28   :  { %15288 = vrsqrt.f32 %v9341_v10  ;;  %vm9358_vm7 = vweird.f32 %v9341_v10  ;;  %9816 = vmatpush.bf16.msra.mxu3 %v15171_v44 }
 0xa29   :  { %v9347_v45 = vmul.f32 %v15287_v6, %v9346_v26  ;;  %v9381_v7 = vpop.permute.xlu2 %9380  ;;  %9681 = vmatpush.bf16.msrb.mxu2 %v15159_v61  ;;  %v15200_v26 = vld [vmem:[#allocation15 + $0x150] sm:$0xff]  ;;  %v15186_v61 = vld [vmem:[#allocation15 + $0xe0] sm:$0xff] }
 0xa2b   :  { %v9351_v14 = vsel %vm9350_vm5, %v15287_v6, %v9347_v45  ;;  %v15203_v6 = vld [vmem:[#allocation15 + $0x168] sm:$0xff]  ;;  %v15169_v45 = vld [vmem:[#allocation15 + $0x58] sm:$0xff] }
 0xa2c   :  { %v9362_v5 = vmul.f32 %v9351_v14, %v9318_v20  ;;  %9755 = vmatpush.bf16.msrb.mxu0 %v15203_v6  ;;  %v15209_v20 = vld [vmem:[#allocation15 + $0x198] sm:$0xff]  ;;  %9817 = vmatpush.bf16.msra.mxu3 %v15170_v50  ;;  %v15199_v14 = vld [vmem:[#allocation15 + $0x148] sm:$0xff] }
 0xa2d   :  { %9682 = vmatpush.bf16.msrb.mxu2 %v15158_v23  ;;  %v15185_v23 = vld [vmem:[#allocation15 + $0xd8] sm:$0xff] }
 0xa2e   :  { %v15289_v38 = vpop.eup %15288  ;;  %9368 = vperm.xlu0 %15264, %v9362_v5   ;;  %v15168_v5 = vld [vmem:[#allocation15 + $0x50] sm:$0xff] }
 0xa2f   :  { %v9353_v54 = vmul.f32 %v15289_v38, %v9341_v10  ;;  %vm9359_vm6 = vweird.f32 %v15289_v38  ;;  %v15210_v10 = vld [vmem:[#allocation15 + $0x1a0] sm:$0xff] }
 0xa30   :  { %vm9360_vm8 = vmor %vm9358_vm7, %vm9359_vm6  ;;  %9756 = vmatpush.bf16.msrb.mxu0 %v15202_v16  ;;  %9818 = vmatpush.bf16.msra.mxu3 %v15169_v45 }
 0xa31   :  { %v9354_v48 = vmul.f32 %v15289_v38, %v9353_v54  ;;  %9892 = vmatpush.bf16.msra.mxu2 %v15213_v27  ;;  %v15198_v54 = vld [vmem:[#allocation15 + $0x140] sm:$0xff] }
 0xa33   :  { %v9355_v58 = vmul.f32 0.5, %v9354_v48  ;;  %v15207_v48 = vld [vmem:[#allocation15 + $0x188] sm:$0xff] }
 0xa34   :  { %9757 = vmatpush.bf16.msrb.mxu0 %v15201_v46  ;;  %9819 = vmatpush.bf16.msra.mxu3 %v15168_v5 }
 0xa35   :  { %v9356_v18 = vsub.f32 1.5, %v9355_v58  ;;  %9893 = vmatpush.bf16.msra.mxu2 %v15212_v0  ;;  %v15181_v58 = vld [vmem:[#allocation15 + $0xb8] sm:$0xff]  ;;  %v15182_v0 = vld [vmem:[#allocation15 + $0xc0] sm:$0xff] }
 0xa36   :  { %9385 = vperm.xlu0 %15264, %v9321_v56   ;;  %v15221_v56 = vld [vmem:[#allocation15 + $0x1f8] sm:$0xff] }
 0xa37   :  { %v9357_v42 = vmul.f32 %v15289_v38, %v9356_v18  ;;  %v15167_v18 = vld [vmem:[#allocation15 + $0x48] sm:$0xff] }
 0xa38   :  { %9758 = vmatpush.bf16.msrb.mxu0 %v15200_v26  ;;  %9820 = vmatpush.bf16.msra.mxu3 %v15167_v18 }
 0xa39   :  { %v9361_v32 = vsel %vm9360_vm8, %v15289_v38, %v9357_v42  ;;  %9894 = vmatpush.bf16.msra.mxu2 %v15211_v8  ;;  %v15208_v38 = vld [vmem:[#allocation15 + $0x190] sm:$0xff] }
 0xa3a   :  { %v9363_v33 = vmul.f32 %v9361_v32, %v9319_v4  ;;  %v15180_v4 = vld [vmem:[#allocation15 + $0xb0] sm:$0xff] }
 0xa3b   :  { %v15220_v42 = vld [vmem:[#allocation15 + $0x1f0] sm:$0xff] }
 0xa3c   :  { %9373 = vperm.xlu1 %15265, %v9363_v33   ;;  %9759 = vmatpush.bf16.msrb.mxu0 %v15199_v14 }
 0xa3d   :  { %9895 = vmatpush.bf16.msra.mxu2 %v15210_v10 }
 0xa40   :  { %9760 = vmatpush.bf16.msrb.mxu0 %v15198_v54 }
 0xa41   :  { %9896 = vmatpush.bf16.msra.mxu2 %v15209_v20 }
 0xa44   :  { %9953 = vmatpush.bf16.msra.mxu0 %v15181_v58 }
 0xa45   :  { %9897 = vmatpush.bf16.msra.mxu2 %v15208_v38 }
 0xa48   :  { %9954 = vmatpush.bf16.msra.mxu0 %v15180_v4 }
 0xa49   :  { %9898 = vmatpush.bf16.msra.mxu2 %v15207_v48 }
 0xaa0   :  { %v9369_v3 = vpop.permute.xlu0 %9368 }
 0xaa1   :  { %v9376_v53 = vmul.f32 %v9369_v3, %v9364_v11  ;;  %v15166_v3 = vld [vmem:[#allocation15 + $0x40] sm:$0xff] }
 0xaa2   :  { %v15206_v11 = vld [vmem:[#allocation15 + $0x180] sm:$0xff]  ;;  %9821 = vmatpush.bf16.msra.mxu3 %v15166_v3 }
 0xaa3   :  { %v9388_v57 = vadd.f32 %v9381_v7, %v9376_v53  ;;  %v15229_v53 = vld [vmem:[#allocation15 + $0x238] sm:$0xff]  ;;  %9899 = vmatpush.bf16.msra.mxu2 %v15206_v11  ;;  %v15219_v7 = vld [vmem:[#allocation15 + $0x1e8] sm:$0xff] }
 0xaa5   :  { %v9390_v41 = vmax.f32 %v9388_v57, 0.0  ;;  %v15178_v57 = vld [vmem:[#allocation15 + $0xa0] sm:$0xff] }
 0xaa8   :  { %v9386_v59 = vpop.permute.xlu0 %9385 }
 0xaae   :  { %v9374_v22 = vpop.permute.xlu1 %9373 }
 0xaaf   :  { %v9377_v62 = vmul.f32 %v9374_v22, %v9365_v13  ;;  %v15179_v13 = vld [vmem:[#allocation15 + $0xa8] sm:$0xff]  ;;  %v15228_v22 = vld [vmem:[#allocation15 + $0x230] sm:$0xff] }
 0xab0   :  { %9955 = vmatpush.bf16.msra.mxu0 %v15179_v13 }
 0xab1   :  { %v9389_v51 = vadd.f32 %v9386_v59, %v9377_v62  ;;  %v15218_v59 = vld [vmem:[#allocation15 + $0x1e0] sm:$0xff] }
 0xab3   :  { %v9391_v24 = vmax.f32 %v9389_v51, 0.0  ;;  %v15227_v51 = vld [vmem:[#allocation15 + $0x228] sm:$0xff] }
 0xab4   :  { %9956 = vmatpush.bf16.msra.mxu0 %v15178_v57 }
 0xab5   :  { %v9401_v49 = vpack.c.bf16 %v9391_v24, %v9390_v41  ;;  %v15177_v41 = vld [vmem:[#allocation15 + $0x98] sm:$0xff] }
 0xab6   :  { %v15217_v24 = vld [vmem:[#allocation15 + $0x1d8] sm:$0xff] }
 0xab7   :  { %9447 = vmatpush.bf16.msrb.mxu1 %v9401_v49  ;;  %v15226_v49 = vld [vmem:[#allocation15 + $0x220] sm:$0xff] }
 0xab8   :  { %9957 = vmatpush.bf16.msra.mxu0 %v15177_v41 }
 0xaba   :  { %13964 = vmatmul.msk.bf16.vlgmr.msrb.gmra.mxu1 %vm5745_vm4, %v15154_v60  ;;  %v15176_v60 = vld [vmem:[#allocation15 + $0x90] sm:$0xff] }
 0xabb   :  { %10031 = vmatpush.bf16.msra.mxu1 %v15221_v56 }
 0xabc   :  { %9958 = vmatpush.bf16.msra.mxu0 %v15176_v60 }
 0xabf   :  { %10032 = vmatpush.bf16.msra.mxu1 %v15220_v42 }
 0xac0   :  { %9959 = vmatpush.bf16.msra.mxu0 %v15175_v36 }
 0xac3   :  { %10033 = vmatpush.bf16.msra.mxu1 %v15219_v7 }
 0xac4   :  { %9960 = vmatpush.bf16.msra.mxu0 %v15174_v40 }
 0xac7   :  { %10034 = vmatpush.bf16.msra.mxu1 %v15218_v59 }
 0xaca   :  { %13965 = vmatmul.msk.bf16.gmra.mxu1 %vm5745_vm4, %v15155_v37 }
 0xacb   :  { %10035 = vmatpush.bf16.msra.mxu1 %v15217_v24 }
 0xada   :  { %13966 = vmatmul.msk.bf16.gmra.mxu1 %vm5745_vm4, %v15156_v47  ;;  %v15216_v47 = vld [vmem:[#allocation15 + $0x1d0] sm:$0xff] }
 0xadb   :  { %10036 = vmatpush.bf16.msra.mxu1 %v15216_v47 }
 0xadf   :  { %10037 = vmatpush.bf16.msra.mxu1 %v15215_v43 }
 0xae3   :  { %10038 = vmatpush.bf16.msra.mxu1 %v15214_v9 }
 0xaea   :  { %13967 = vmatmul.msk.bf16.gmra.mxu1 %vm5745_vm4, %v15157_v25  ;;  %v15222_v25 = vld [vmem:[#allocation15 + $0x200] sm:$0xff] }
 0xafa   :  { %13968 = vmatmul.msk.bf16.gmra.mxu1 %vm5745_vm4, %v9424_v39 }
 0xb37   :  { %v9449_v32 = vpop.f32.mrf.mxu1 }
 0xb38   :  { %v9473_v33 = vpack.c.bf16 %v9449_v32, %v9449_v32 }
 0xb3a   :  { %9683 = vmatmul.bf16.vlgmr.msrb.gmra.mxu2 %v9473_v33 }
 0xb3b   :  { %10170 = vmatpush.bf16.msrb.mxu2 %v15229_v53 }
 0xb3f   :  { %v9451_v62 = vpop.f32.mrf.mxu1  ;;  %10171 = vmatpush.bf16.msrb.mxu2 %v15228_v22 }
 0xb40   :  { %v9474_v63 = vpack.c.bf16 %v9451_v62, %v9451_v62 }
 0xb43   :  { %10172 = vmatpush.bf16.msrb.mxu2 %v15227_v51 }
 0xb47   :  { %v9454_v37 = vpop.f32.mrf.mxu1  ;;  %10173 = vmatpush.bf16.msrb.mxu2 %v15226_v49 }
 0xb48   :  { %v9475_v6 = vpack.c.bf16 %v9454_v37, %v9454_v37 }
 0xb4b   :  { %10174 = vmatpush.bf16.msrb.mxu2 %v15225_v52 }
 0xb4f   :  { %v9456_v34 = vpop.f32.mrf.mxu1  ;;  %10175 = vmatpush.bf16.msrb.mxu2 %v15224_v12 }
 0xb50   :  { %v9476_v8 = vpack.c.bf16 %v9456_v34, %v9456_v34  ;;  %v15237_v34 = vld [vmem:[#allocation18 + $0x38] sm:$0xff] }
 0xb53   :  { %10176 = vmatpush.bf16.msrb.mxu2 %v15223_v31  ;;  %v15236_v31 = vld [vmem:[#allocation18 + $0x30] sm:$0xff] }
 0xb57   :  { %v9459_v2 = vpop.f32.mrf.mxu1  ;;  %10177 = vmatpush.bf16.msrb.mxu2 %v15222_v25  ;;  %v10187_v25 = vld [vmem:[#allocation22 + $0xd8] sm:$0xff] }
 0xb58   :  { %v9477_v15 = vpack.c.bf16 %v9459_v2, %v9459_v2 }
 0xb5a   :  { %9622 = vmatmul.bf16.vlgmr.msrb.gmra.mxu3 %v9477_v15 }
 0xb5b   :  { %10092 = vmatpush.bf16.msrb.mxu3 %v15189_v55 }
 0xb5f   :  { %v9461_v21 = vpop.f32.mrf.mxu1  ;;  %10093 = vmatpush.bf16.msrb.mxu3 %v15188_v1  ;;  %v10188_v1 = vld [vmem:[#allocation22 + $0xe0] sm:$0xff] }
 0xb60   :  { %v9478_v39 = vpack.c.bf16 %v9461_v21, %v9461_v21  ;;  %v10302_v21 = vld [vmem:[#allocation22 + $0xe8] sm:$0xff] }
 0xb62   :  { %9761 = vmatmul.bf16.vlgmr.msrb.gmra.mxu0 %v9478_v39  ;;  %v15235_v39 = vld [vmem:[#allocation18 + $0x28] sm:$0xff] }
 0xb63   :  { %10094 = vmatpush.bf16.msrb.mxu3 %v15187_v17  ;;  %10362 = vmatpush.bf16.msrb.mxu0 %v15237_v34  ;;  %v10303_v17 = vld [vmem:[#allocation22 + $0xf0] sm:$0xff] }
 0xb67   :  { %v9464_v19 = vpop.f32.mrf.mxu1  ;;  %10095 = vmatpush.bf16.msrb.mxu3 %v15186_v61  ;;  %10363 = vmatpush.bf16.msrb.mxu0 %v15236_v31  ;;  %v15234_v61 = vld [vmem:[#allocation18 + $0x20] sm:$0xff] }
 0xb68   :  { %v9479_v27 = vpack.c.bf16 %v9464_v19, %v9464_v19  ;;  %v15233_v19 = vld [vmem:[#allocation18 + $0x18] sm:$0xff] }
 0xb6a   :  { %9822 = vmatmul.bf16.vlgmr.msra.gmra.mxu3 %v9474_v63  ;;  %9900 = vmatmul.bf16.vlgmr.msra.gmra.mxu2 %v9479_v27  ;;  %v15231_v63 = vld [vmem:[#allocation18 + $0x8] sm:$0xff]  ;;  %v15230_v27 = vld [vmem:[#allocation18] sm:$0xff] }
 0xb6b   :  { %10096 = vmatpush.bf16.msrb.mxu3 %v15185_v23  ;;  %10364 = vmatpush.bf16.msrb.mxu0 %v15235_v39  ;;  %v15232_v23 = vld [vmem:[#allocation18 + $0x10] sm:$0xff] }
 0xb6f   :  { %v9466_v28 = vpop.f32.mrf.mxu1  ;;  %10097 = vmatpush.bf16.msrb.mxu3 %v15184_v35  ;;  %10365 = vmatpush.bf16.msrb.mxu0 %v15234_v61 }
 0xb70   :  { %v9480_v30 = vpack.c.bf16 %v9466_v28, %v9466_v28 }
 0xb72   :  { %9961 = vmatmul.bf16.vlgmr.msra.gmra.mxu0 %v9475_v6  ;;  %10039 = vmatmul.bf16.vlgmr.msra.gmra.mxu1 %v9480_v30 }
 0xb73   :  { %10098 = vmatpush.bf16.msrb.mxu3 %v15183_v29  ;;  %10366 = vmatpush.bf16.msrb.mxu0 %v15233_v19 }
 0xb77   :  { %v9469_v16 = vpop.f32.mrf.mxu1  ;;  %10099 = vmatpush.bf16.msrb.mxu3 %v15182_v0  ;;  %10367 = vmatpush.bf16.msrb.mxu0 %v15232_v23  ;;  %v10224_v0 = vld [vmem:[#allocation16] sm:$0xff] }
 0xb78   :  { %v9481_v44 = vpack.c.bf16 %v9469_v16, %v9469_v16  ;;  %v10225_v16 = vld [vmem:[#allocation16 + $0x8] sm:$0xff] }
 0xb7a   :  { %10100 = vmatmul.bf16.vlgmr.msrb.gmra.mxu3 %v9476_v8  ;;  %10178 = vmatmul.bf16.vlgmr.msrb.gmra.mxu2 %v9481_v44  ;;  %v10230_v8 = vld [vmem:[#allocation16 + $0x10] sm:$0xff] }
 0xb7b   :  { %10368 = vmatpush.bf16.msrb.mxu0 %v15231_v63 }
 0xb7f   :  { %v9471_v46 = vpop.f32.mrf.mxu1  ;;  %10369 = vmatpush.bf16.msrb.mxu0 %v15230_v27 }
 0xb80   :  { %v10231_v46 = vld [vmem:[#allocation16 + $0x18] sm:$0xff] }
 0xbbd   :  { %v9684_v50 = vpop.f32.mrf.mxu2 }
 0xbc5   :  { %v9686_v10 = vpop.f32.mrf.mxu2 }
 0xbc6   :  { %v10237_v10 = vld [vmem:[#allocation16 + $0x28] sm:$0xff] }
 0xbdd   :  { %v9623_v26 = vpop.f32.mrf.mxu3 }
 0xbde   :  { %v9685_v42 = vadd.f32 %v9684_v50, %v9623_v26  ;;  %v10236_v50 = vld [vmem:[#allocation16 + $0x20] sm:$0xff]  ;;  %v10242_v26 = vld [vmem:[#allocation16 + $0x30] sm:$0xff] }
 0xbdf   :  { %v9762_v20 = vpop.f32.mrf.mxu0 }
 0xbe5   :  { %v9625_v45 = vpop.f32.mrf.mxu3 }
 0xbe6   :  { %v10248_v45 = vld [vmem:[#allocation16 + $0x40] sm:$0xff] }
 0xbe7   :  { %v9764_v14 = vpop.f32.mrf.mxu0 }
 0xbed   :  { %v9823_v5 = vpop.f32.mrf.mxu3  ;;  %v9901_v38 = vpop.f32.mrf.mxu2 }
 0xbee   :  { %v9824_v3 = vadd.f32 %v9823_v5, %v9762_v20  ;;  %v10243_v20 = vld [vmem:[#allocation16 + $0x38] sm:$0xff] }
 0xbef   :  { %v9962_v54 = vpop.f32.mrf.mxu0  ;;  %v10040_v48 = vpop.f32.mrf.mxu1 }
 0xbf0   :  { %v9963_v11 = vadd.f32 %v9962_v54, %v9901_v38 }
 0xbf5   :  { %v9825_v58 = vpop.f32.mrf.mxu3  ;;  %v9903_v56 = vpop.f32.mrf.mxu2 }
 0xbf6   :  { %v10254_v58 = vld [vmem:[#allocation16 + $0x50] sm:$0xff] }
 0xbf7   :  { %v9964_v18 = vpop.f32.mrf.mxu0  ;;  %v10042_v4 = vpop.f32.mrf.mxu1 }
 0xbf8   :  { %v10255_v18 = vld [vmem:[#allocation16 + $0x58] sm:$0xff] }
 0xbfd   :  { %v10101_v32 = vpop.f32.mrf.mxu3  ;;  %v10179_v33 = vpop.f32.mrf.mxu2 }
 0xbfe   :  { %v10102_v53 = vadd.f32 %v10101_v32, %v10040_v48  ;;  %v10183_v13 = vadd.f32 %v10179_v33, %v9685_v42  ;;  %v10249_v48 = vld [vmem:[#allocation16 + $0x48] sm:$0xff]  ;;  %v10260_v42 = vld [vmem:[#allocation16 + $0x60] sm:$0xff] }
 0xc00   :  { %v10185_v7 = vadd.f32 %v10102_v53, %v9963_v11  ;;  %v10184_v22 = vadd.f32 %v10183_v13, %v9824_v3 }
 0xc02   :  { %v10186_v57 = vadd.f32 %v10185_v7, %v10184_v22  ;;  %v10261_v7 = vld [vmem:[#allocation16 + $0x68] sm:$0xff]  ;;  %v10266_v22 = vld [vmem:[#allocation16 + $0x70] sm:$0xff] }
 0xc04   :  { %10189 = vadd.xlane.f32.xlu0 %v10186_v57  ;;  %v10191_v62 = vmul.f32 %v10186_v57, %v10186_v57 }
 0xc05   :  { %v10103_v59 = vpop.f32.mrf.mxu3  ;;  %v10181_v51 = vpop.f32.mrf.mxu2 }
 0xc06   :  { %10192 = vadd.xlane.f32.xlu2 %v10191_v62 }
 0xc77   :  { %v10190_v41 = vpop.xlane.xlu0 %10189 }
 0xc78   :  { %v10194_v24 = vmul.f32 0.03125, %v10190_v41 }
 0xc79   :  { %v10193_v49 = vpop.xlane.xlu2 %10192 }
 0xc7a   :  { %v10196_v60 = vmul.f32 %v10194_v24, %v10194_v24  ;;  %v10195_v37 = vmul.f32 0.03125, %v10193_v49  ;;  %v10210_v28 = vsub.f32 %v10186_v57, %v10194_v24  ;;  %v10267_v57 = vld [vmem:[#allocation16 + $0x78] sm:$0xff] }
 0xc7c   :  { %v10197_v47 = vsub.f32 %v10195_v37, %v10196_v60 }
 0xc7e   :  { %v10198_v52 = vadd.f32 1e-05, %v10197_v47 }
 0xc80   :  { %15290 = vrsqrt.f32 %v10198_v52  ;;  %vm10205_vm9 = vweird.f32 %v10198_v52 }
 0xc86   :  { %v15291_v36 = vpop.eup %15290 }
 0xc87   :  { %v10200_v43 = vmul.f32 %v15291_v36, %v10198_v52  ;;  %vm10206_vm4 = vweird.f32 %v15291_v36 }
 0xc88   :  { %vm10207_vm10 = vmor %vm10205_vm9, %vm10206_vm4 }
 0xc89   :  { %v10201_v12 = vmul.f32 %v15291_v36, %v10200_v43 }
 0xc8b   :  { %v10202_v40 = vmul.f32 0.5, %v10201_v12 }
 0xc8d   :  { %v10203_v9 = vsub.f32 1.5, %v10202_v40 }
 0xc8f   :  { %v10204_v2 = vmul.f32 %v15291_v36, %v10203_v9 }
 0xc91   :  { %v10208_v55 = vsel %vm10207_vm10, %v15291_v36, %v10204_v2 }
 0xc92   :  { %v10209_v15 = vmul.f32 %v10208_v55, %v10187_v25 }
 0xc94   :  { %10213 = vperm.xlu1 %15265, %v10209_v15  }
 0xc9c   :  { %10219 = vperm.xlu1 %15265, %v10188_v1  }
 0xca4   :  { %10306 = vperm.xlu1 %15265, %v10302_v21  }
 0xcac   :  { %10311 = vperm.xlu1 %15265, %v10303_v17  }
 0xd06   :  { %v10214_v35 = vpop.permute.xlu1 %10213 }
 0xd07   :  { %v10216_v29 = vmul.f32 %v10214_v35, %v10210_v28 }
 0xd0e   :  { %v10220_v6 = vpop.permute.xlu1 %10219 }
 0xd0f   :  { %v10222_v30 = vadd.f32 %v10220_v6, %v10216_v29 }
 0xd11   :  { %v10223_v44 = vmax.f32 %v10222_v30, 0.0 }
 0xd13   :  { %v10226_v14 = vperm.slane %v10223_v44, 0  ;;  %v10232_v5 = vperm.slane %v10223_v44, 1  ;;  %v10238_v38 = vperm.slane %v10223_v44, 2  ;;  %v10244_v54 = vperm.slane %v10223_v44, 3 }
 0xd14   :  { %v10250_v56 = vperm.slane %v10223_v44, 4  ;;  %v10256_v4 = vperm.slane %v10223_v44, 5  ;;  %v10262_v32 = vperm.slane %v10223_v44, 6  ;;  %v10268_v33 = vperm.slane %v10223_v44, 7 }
 0xd15   :  { %v10227_v3 = vmul.f32 %v10226_v14, %v10224_v0  ;;  %v10228_v11 = vmul.f32 %v10226_v14, %v10225_v16  ;;  %v10233_v53 = vmul.f32 %v10232_v5, %v10230_v8  ;;  %v10234_v13 = vmul.f32 %v10232_v5, %v10231_v46 }
 0xd16   :  { %v10239_v62 = vmul.f32 %v10238_v38, %v10236_v50  ;;  %v10240_v59 = vmul.f32 %v10238_v38, %v10237_v10  ;;  %v10245_v51 = vmul.f32 %v10244_v54, %v10242_v26  ;;  %v10246_v41 = vmul.f32 %v10244_v54, %v10243_v20  ;;  %v10307_v23 = vpop.permute.xlu1 %10306 }
 0xd17   :  { %v10251_v24 = vmul.f32 %v10250_v56, %v10248_v45  ;;  %v10252_v49 = vmul.f32 %v10250_v56, %v10249_v48  ;;  %v10257_v60 = vmul.f32 %v10256_v4, %v10254_v58  ;;  %v10258_v37 = vmul.f32 %v10256_v4, %v10255_v18 }
 0xd18   :  { %v10263_v47 = vmul.f32 %v10262_v32, %v10260_v42  ;;  %v10264_v52 = vmul.f32 %v10262_v32, %v10261_v7  ;;  %v10269_v36 = vmul.f32 %v10268_v33, %v10266_v22  ;;  %v10270_v43 = vmul.f32 %v10268_v33, %v10267_v57 }
 0xd19   :  { %v10271_v12 = vadd.f32 %v10233_v53, %v10227_v3  ;;  %v10272_v40 = vadd.f32 %v10234_v13, %v10228_v11  ;;  %v10273_v34 = vadd.f32 %v10245_v51, %v10239_v62  ;;  %v10274_v9 = vadd.f32 %v10246_v41, %v10240_v59 }
 0xd1a   :  { %v10275_v31 = vadd.f32 %v10257_v60, %v10251_v24  ;;  %v10276_v25 = vadd.f32 %v10258_v37, %v10252_v49  ;;  %v10277_v2 = vadd.f32 %v10269_v36, %v10263_v47  ;;  %v10278_v55 = vadd.f32 %v10270_v43, %v10264_v52 }
 0xd1b   :  { %v10279_v15 = vadd.f32 %v10273_v34, %v10271_v12  ;;  %v10280_v1 = vadd.f32 %v10274_v9, %v10272_v40 }
 0xd1c   :  { %v10281_v21 = vadd.f32 %v10277_v2, %v10275_v31  ;;  %v10282_v17 = vadd.f32 %v10278_v55, %v10276_v25 }
 0xd1e   :  { %v10283_v39 = vadd.f32 %v10281_v21, %v10279_v15  ;;  %v10284_v61 = vadd.f32 %v10282_v17, %v10280_v1  ;;  %v10312_v35 = vpop.permute.xlu1 %10311 }
 0xd20   :  { %v10285_v19 = vpack.c.bf16 %v10284_v61, %v10283_v39 }
 0xd22   :  { %10370 = vmatmul.bf16.vlgmr.msrb.gmra.mxu0 %v10285_v19 }
 0xd9f   :  { %v10371_v63 = vpop.f32.mrf.mxu0 }
 0xda0   :  { %v10372_v27 = vadd.f32 %v10371_v63, %v10307_v23 }
 0xda2   :  { %10376 = vst [vmem:[%s17190_s16] sm:$0xff] %v10372_v27 }
 0xda7   :  { %v10373_v28 = vpop.f32.mrf.mxu0 }
 0xda8   :  { %v10374_v29 = vadd.f32 %v10373_v28, %v10312_v35 }
 0xdaa   :  { %10377 = vst [vmem:[%s17190_s16 + $0x8] sm:$0xff] %v10374_v29 }
 0xdab   :  { %10382 = vsyncpa [#allocation3], 1 }
 0xdac   :  { %10383 = vsyncpa [#allocation5], 1 }
 0xdad   :  { %10384 = vsyncpa [#allocation8], 1 }
 0xdae   :  { %10385 = vsyncpa [#allocation11], 1 }
 0xdaf   :  { %10386 = vsyncpa [#allocation14], 1 }
 0xdb0   :  { %10387 = vsyncpa [#allocation17], 1 }
 0xdb1   :  { %10388 = vsyncpa [#allocation20], 1 }
 0xdb2   :  { %10389 = vsyncpa [#allocation23], 1 }

</bundles_post_ra>
